<compile_context>
chip_gen: v7x
topology: tpu7x:2x2x1
jax: 0.10.0
libtpu: 0.0.40
codegen_flags: <defaults>
</compile_context>

<pallas_src>
import jax
import jax.numpy as jnp
from jax.experimental import pallas as pl
from jax.experimental.pallas import tpu as pltpu

_BN_EPS = 1e-5
_VMEM = pltpu.MemorySpace.VMEM
_PARAMS = pltpu.CompilerParams(vmem_limit_bytes=32 * 1024 * 1024)


# ----------------------------- Pallas kernels ------------------------------

def _bn_relu(y, p):
    # Training-mode BatchNorm (batch statistics, biased variance) + ReLU on an
    # f32 block.  y: (M, C) pre-activation (bias already added).
    # p: (3, C) packed params: row0 = layer bias, row1 = gamma, row2 = beta.
    mean = jnp.mean(y, axis=0, keepdims=True)
    var = jnp.mean(y * y, axis=0, keepdims=True) - mean * mean   # one sweep
    inv = jax.lax.rsqrt(var + _BN_EPS)                           # EUP slot
    out = (y - mean) * (inv * p[1:2, :]) + p[2:3, :]
    return jnp.maximum(out, 0.0)


def _conv_fused_kernel(x_ref, w_ref, p_ref, o_ref):
    # o = relu(batchnorm(x @ w + bias)); x/w are bf16, accumulation/epilogue f32.
    p = p_ref[...]
    y = jnp.dot(x_ref[...], w_ref[...], preferred_element_type=jnp.float32)
    y = y + p[0:1, :]
    o_ref[...] = _bn_relu(y, p).astype(o_ref.dtype)


def _fc_stack_kernel(x_ref, w1_ref, p1_ref, w2_ref, p2_ref, w3_ref, b3_ref,
                     o_ref):
    # fc1 + bn3 + relu + fc2 + bn4 + relu + fc3, fully VMEM-resident.
    p1 = p1_ref[...]
    h = jnp.dot(x_ref[...], w1_ref[...],
                preferred_element_type=jnp.float32) + p1[0:1, :]
    h = _bn_relu(h, p1)

    p2 = p2_ref[...]
    h = jnp.dot(h.astype(jnp.bfloat16), w2_ref[...],
                preferred_element_type=jnp.float32) + p2[0:1, :]
    h = _bn_relu(h, p2)

    h = jnp.dot(h.astype(jnp.bfloat16), w3_ref[...],
                preferred_element_type=jnp.float32)
    o_ref[...] = (h + b3_ref[...]).astype(o_ref.dtype)


# ------------------------------ call wrappers -------------------------------

def fused_conv_bn_relu(patches, w, pgb):
    """patches: (M, K) bf16, w: (K, C) bf16, pgb: (3, C) f32 -> (M, C) bf16."""
    M, K = patches.shape
    K2, C = w.shape
    assert K == K2 and pgb.shape == (3, C)
    return pl.pallas_call(
        _conv_fused_kernel,
        out_shape=jax.ShapeDtypeStruct((M, C), jnp.bfloat16),
        in_specs=[pl.BlockSpec(memory_space=_VMEM)] * 3,
        out_specs=pl.BlockSpec(memory_space=_VMEM),
        compiler_params=_PARAMS,
    )(patches, w, pgb)


def fused_fc_stack(x, w1, p1, w2, p2, w3, b3):
    """x: (B, 400) bf16 -> logits (B, 10) f32 through fc1/bn3/fc2/bn4/fc3."""
    B = x.shape[0]
    return pl.pallas_call(
        _fc_stack_kernel,
        out_shape=jax.ShapeDtypeStruct((B, w3.shape[1]), jnp.float32),
        in_specs=[pl.BlockSpec(memory_space=_VMEM)] * 7,
        out_specs=pl.BlockSpec(memory_space=_VMEM),
        compiler_params=_PARAMS,
    )(x, w1, p1, w2, p2, w3, b3)


# ------------------------------ JAX glue ops -------------------------------

def im2col(x, kh, kw):
    # x: (B, H, W, C) -> (B, Ho, Wo, kh*kw*C); column order = (kh, kw, C).
    B, H, W, C = x.shape
    Ho, Wo = H - kh + 1, W - kw + 1
    cols = [x[:, i:i + Ho, j:j + Wo, :] for i in range(kh) for j in range(kw)]
    return jnp.concatenate(cols, axis=-1)


def maxpool2x2(x):
    # x: (B, H, W, C) -> (B, H//2, W//2, C), 2x2 window, stride 2.
    B, H, W, C = x.shape
    return x.reshape(B, H // 2, 2, W // 2, 2, C).max(axis=(2, 4))


# ------------------------------- parameters --------------------------------

def init_params(key):
    ks = jax.random.split(key, 10)

    def u(k, shape, fan_in):
        bound = 1.0 / float(fan_in) ** 0.5
        return jax.random.uniform(k, shape, jnp.float32, -bound, bound)

    def pack_pgb(bias):
        # row0 = layer bias, row1 = bn gamma (1.0), row2 = bn beta (0.0).
        c = bias.shape[0]
        return jnp.stack([bias, jnp.ones((c,), jnp.float32),
                          jnp.zeros((c,), jnp.float32)])

    p = {}
    # conv weights: PyTorch (OutC, InC, KH, KW) -> im2col-matmul form
    # (KH*KW*InC, OutC) with column order (kh, kw, C); stored bf16.
    w1 = u(ks[0], (6, 3, 5, 5), 75)
    p['w1'] = jnp.transpose(w1, (2, 3, 1, 0)).reshape(75, 6).astype(jnp.bfloat16)
    p['pgb1'] = pack_pgb(u(ks[1], (6,), 75))

    w2 = u(ks[2], (16, 6, 5, 5), 150)
    p['w2'] = jnp.transpose(w2, (2, 3, 1, 0)).reshape(150, 16).astype(jnp.bfloat16)
    p['pgb2'] = pack_pgb(u(ks[3], (16,), 150))

    # FC weights pre-transposed once to (in, out); stored bf16.
    p['w3'] = u(ks[4], (120, 400), 400).T.astype(jnp.bfloat16)   # fc1
    p['pgb3'] = pack_pgb(u(ks[5], (120,), 400))
    p['w4'] = u(ks[6], (84, 120), 120).T.astype(jnp.bfloat16)    # fc2
    p['pgb4'] = pack_pgb(u(ks[7], (84,), 120))
    p['w5'] = u(ks[8], (10, 84), 84).T.astype(jnp.bfloat16)      # fc3
    p['b5'] = u(ks[9], (10,), 84).reshape(1, 10)
    return p


# -------------------------------- forward ----------------------------------

def net_forward(params, x_nchw):
    x = jnp.transpose(x_nchw, (0, 2, 3, 1)).astype(jnp.bfloat16)   # NHWC bf16
    B = x.shape[0]

    # conv1 (3->6, 5x5) + bn1 + relu (one fused kernel), then 2x2 pool
    pat = im2col(x, 5, 5)                                          # (B,28,28,75)
    y = fused_conv_bn_relu(pat.reshape(B * 28 * 28, 75),
                           params['w1'], params['pgb1'])           # (B*784, 6) bf16
    y = maxpool2x2(y.reshape(B, 28, 28, 6))                        # (B,14,14,6)

    # conv2 (6->16, 5x5) + bn2 + relu (one fused kernel), then 2x2 pool
    pat = im2col(y, 5, 5)                                          # (B,10,10,150)
    y = fused_conv_bn_relu(pat.reshape(B * 100, 150),
                           params['w2'], params['pgb2'])           # (B*100, 16) bf16
    y = maxpool2x2(y.reshape(B, 10, 10, 16))                       # (B,5,5,16)

    # flatten exactly like PyTorch's x.view(-1, 400) on NCHW ((C,H,W) order)
    y = jnp.transpose(y, (0, 3, 1, 2)).reshape(B, 400)

    # fc1+bn3+relu -> fc2+bn4+relu -> fc3, all in one fused kernel
    return fused_fc_stack(y, params['w3'], params['pgb3'],
                          params['w4'], params['pgb4'],
                          params['w5'], params['b5'])              # (B, 10) f32


if __name__ == "__main__":
    key = jax.random.PRNGKey(0)
    pkey, xkey = jax.random.split(key)
    params = init_params(pkey)
    # Input spatial size is fixed at 32x32 by the 16*5*5 flatten in the module.
    x = jax.random.normal(xkey, (2, 3, 32, 32), jnp.float32)       # NCHW like PyTorch
    out = jax.jit(net_forward)(params, x)
    out = jax.block_until_ready(out)
    assert out.shape == (2, 10) and out.dtype == jnp.float32
    print("KERNEL_OK")
</pallas_src>

<mosaic_0001>
module attributes {stable_mosaic.version = 11 : i64} {
  func.func @_conv_fused_kernel(%arg0: memref<1568x75xbf16, #tpu.memory_space<vmem>>, %arg1: memref<75x6xbf16, #tpu.memory_space<vmem>>, %arg2: memref<3x6xf32, #tpu.memory_space<vmem>>, %arg3: memref<1568x6xbf16, #tpu.memory_space<vmem>>) attributes {dimension_semantics = [], scalar_prefetch = 0 : i64, scratch_operands = 0 : i64, tpu.core_type = #tpu.core_type<tc>} {
    %c0 = arith.constant 0 : index
    %c0_0 = arith.constant 0 : index
    %0 = vector.load %arg2[%c0, %c0_0] : memref<3x6xf32, #tpu.memory_space<vmem>>, vector<3x6xf32>
    %c0_1 = arith.constant 0 : index
    %c0_2 = arith.constant 0 : index
    %1 = vector.load %arg0[%c0_1, %c0_2] : memref<1568x75xbf16, #tpu.memory_space<vmem>>, vector<1568x75xbf16>
    %c0_3 = arith.constant 0 : index
    %c0_4 = arith.constant 0 : index
    %2 = vector.load %arg1[%c0_3, %c0_4] : memref<75x6xbf16, #tpu.memory_space<vmem>>, vector<75x6xbf16>
    %cst = arith.constant dense<0.000000e+00> : vector<1568x6xf32>
    %3 = tpu.matmul %1, %2, %cst {dimension_numbers = #tpu.dot_dimension_numbers<[1], [0], [0], [1], [0, 0, 1, 1], [], []>} : vector<1568x75xbf16>, vector<75x6xbf16>, vector<1568x6xf32> -> vector<1568x6xf32>
    %4 = vector.extract_strided_slice %0 {offsets = [0, 0], sizes = [1, 6], strides = [1, 1]} : vector<3x6xf32> to vector<1x6xf32>
    %5 = vector.broadcast %4 : vector<1x6xf32> to vector<1568x6xf32>
    %6 = arith.addf %3, %5 : vector<1568x6xf32>
    %cst_5 = arith.constant dense<0.000000e+00> : vector<6xf32>
    %7 = vector.multi_reduction <add>, %6, %cst_5 [0] : vector<1568x6xf32> to vector<6xf32>
    %8 = vector.shape_cast %7 : vector<6xf32> to vector<1x6xf32>
    %cst_6 = arith.constant 1.568000e+03 : f32
    %9 = vector.broadcast %cst_6 : f32 to vector<1x6xf32>
    %10 = arith.divf %8, %9 : vector<1x6xf32>
    %11 = arith.mulf %6, %6 : vector<1568x6xf32>
    %cst_7 = arith.constant dense<0.000000e+00> : vector<6xf32>
    %12 = vector.multi_reduction <add>, %11, %cst_7 [0] : vector<1568x6xf32> to vector<6xf32>
    %13 = vector.shape_cast %12 : vector<6xf32> to vector<1x6xf32>
    %cst_8 = arith.constant 1.568000e+03 : f32
    %14 = vector.broadcast %cst_8 : f32 to vector<1x6xf32>
    %15 = arith.divf %13, %14 : vector<1x6xf32>
    %16 = arith.mulf %10, %10 : vector<1x6xf32>
    %17 = arith.subf %15, %16 : vector<1x6xf32>
    %cst_9 = arith.constant 9.99999974E-6 : f32
    %18 = vector.broadcast %cst_9 : f32 to vector<1x6xf32>
    %19 = arith.addf %17, %18 : vector<1x6xf32>
    %20 = math.rsqrt %19 : vector<1x6xf32>
    %21 = vector.broadcast %10 : vector<1x6xf32> to vector<1568x6xf32>
    %22 = arith.subf %6, %21 : vector<1568x6xf32>
    %23 = vector.extract_strided_slice %0 {offsets = [1, 0], sizes = [1, 6], strides = [1, 1]} : vector<3x6xf32> to vector<1x6xf32>
    %24 = arith.mulf %20, %23 : vector<1x6xf32>
    %25 = vector.broadcast %24 : vector<1x6xf32> to vector<1568x6xf32>
    %26 = arith.mulf %22, %25 : vector<1568x6xf32>
    %27 = vector.extract_strided_slice %0 {offsets = [2, 0], sizes = [1, 6], strides = [1, 1]} : vector<3x6xf32> to vector<1x6xf32>
    %28 = vector.broadcast %27 : vector<1x6xf32> to vector<1568x6xf32>
    %29 = arith.addf %26, %28 : vector<1568x6xf32>
    %cst_10 = arith.constant 0.000000e+00 : f32
    %30 = vector.broadcast %cst_10 : f32 to vector<1568x6xf32>
    %31 = arith.maximumf %29, %30 : vector<1568x6xf32>
    %32 = arith.truncf %31 : vector<1568x6xf32> to vector<1568x6xbf16>
    %c0_11 = arith.constant 0 : index
    %c0_12 = arith.constant 0 : index
    %33 = vector.load %arg3[%c0_11, %c0_12] : memref<1568x6xbf16, #tpu.memory_space<vmem>>, vector<1568x6xbf16>
    tpu.vector_store %arg3[%c0_11, %c0_12], %32 {strides = array<i32>} : memref<1568x6xbf16, #tpu.memory_space<vmem>>, vector<1568x6xbf16>,
    return
  }
}

module attributes {stable_mosaic.version = 11 : i64} {
  func.func @_conv_fused_kernel(%arg0: memref<200x150xbf16, #tpu.memory_space<vmem>>, %arg1: memref<150x16xbf16, #tpu.memory_space<vmem>>, %arg2: memref<3x16xf32, #tpu.memory_space<vmem>>, %arg3: memref<200x16xbf16, #tpu.memory_space<vmem>>) attributes {dimension_semantics = [], scalar_prefetch = 0 : i64, scratch_operands = 0 : i64, tpu.core_type = #tpu.core_type<tc>} {
    %c0 = arith.constant 0 : index
    %c0_0 = arith.constant 0 : index
    %0 = vector.load %arg2[%c0, %c0_0] : memref<3x16xf32, #tpu.memory_space<vmem>>, vector<3x16xf32>
    %c0_1 = arith.constant 0 : index
    %c0_2 = arith.constant 0 : index
    %1 = vector.load %arg0[%c0_1, %c0_2] : memref<200x150xbf16, #tpu.memory_space<vmem>>, vector<200x150xbf16>
    %c0_3 = arith.constant 0 : index
    %c0_4 = arith.constant 0 : index
    %2 = vector.load %arg1[%c0_3, %c0_4] : memref<150x16xbf16, #tpu.memory_space<vmem>>, vector<150x16xbf16>
    %cst = arith.constant dense<0.000000e+00> : vector<200x16xf32>
    %3 = tpu.matmul %1, %2, %cst {dimension_numbers = #tpu.dot_dimension_numbers<[1], [0], [0], [1], [0, 0, 1, 1], [], []>} : vector<200x150xbf16>, vector<150x16xbf16>, vector<200x16xf32> -> vector<200x16xf32>
    %4 = vector.extract_strided_slice %0 {offsets = [0, 0], sizes = [1, 16], strides = [1, 1]} : vector<3x16xf32> to vector<1x16xf32>
    %5 = vector.broadcast %4 : vector<1x16xf32> to vector<200x16xf32>
    %6 = arith.addf %3, %5 : vector<200x16xf32>
    %cst_5 = arith.constant dense<0.000000e+00> : vector<16xf32>
    %7 = vector.multi_reduction <add>, %6, %cst_5 [0] : vector<200x16xf32> to vector<16xf32>
    %8 = vector.shape_cast %7 : vector<16xf32> to vector<1x16xf32>
    %cst_6 = arith.constant 2.000000e+02 : f32
    %9 = vector.broadcast %cst_6 : f32 to vector<1x16xf32>
    %10 = arith.divf %8, %9 : vector<1x16xf32>
    %11 = arith.mulf %6, %6 : vector<200x16xf32>
    %cst_7 = arith.constant dense<0.000000e+00> : vector<16xf32>
    %12 = vector.multi_reduction <add>, %11, %cst_7 [0] : vector<200x16xf32> to vector<16xf32>
    %13 = vector.shape_cast %12 : vector<16xf32> to vector<1x16xf32>
    %cst_8 = arith.constant 2.000000e+02 : f32
    %14 = vector.broadcast %cst_8 : f32 to vector<1x16xf32>
    %15 = arith.divf %13, %14 : vector<1x16xf32>
    %16 = arith.mulf %10, %10 : vector<1x16xf32>
    %17 = arith.subf %15, %16 : vector<1x16xf32>
    %cst_9 = arith.constant 9.99999974E-6 : f32
    %18 = vector.broadcast %cst_9 : f32 to vector<1x16xf32>
    %19 = arith.addf %17, %18 : vector<1x16xf32>
    %20 = math.rsqrt %19 : vector<1x16xf32>
    %21 = vector.broadcast %10 : vector<1x16xf32> to vector<200x16xf32>
    %22 = arith.subf %6, %21 : vector<200x16xf32>
    %23 = vector.extract_strided_slice %0 {offsets = [1, 0], sizes = [1, 16], strides = [1, 1]} : vector<3x16xf32> to vector<1x16xf32>
    %24 = arith.mulf %20, %23 : vector<1x16xf32>
    %25 = vector.broadcast %24 : vector<1x16xf32> to vector<200x16xf32>
    %26 = arith.mulf %22, %25 : vector<200x16xf32>
    %27 = vector.extract_strided_slice %0 {offsets = [2, 0], sizes = [1, 16], strides = [1, 1]} : vector<3x16xf32> to vector<1x16xf32>
    %28 = vector.broadcast %27 : vector<1x16xf32> to vector<200x16xf32>
    %29 = arith.addf %26, %28 : vector<200x16xf32>
    %cst_10 = arith.constant 0.000000e+00 : f32
    %30 = vector.broadcast %cst_10 : f32 to vector<200x16xf32>
    %31 = arith.maximumf %29, %30 : vector<200x16xf32>
    %32 = arith.truncf %31 : vector<200x16xf32> to vector<200x16xbf16>
    %c0_11 = arith.constant 0 : index
    %c0_12 = arith.constant 0 : index
    %33 = vector.load %arg3[%c0_11, %c0_12] : memref<200x16xbf16, #tpu.memory_space<vmem>>, vector<200x16xbf16>
    tpu.vector_store %arg3[%c0_11, %c0_12], %32 {strides = array<i32>} : memref<200x16xbf16, #tpu.memory_space<vmem>>, vector<200x16xbf16>,
    return
  }
}

module attributes {stable_mosaic.version = 11 : i64} {
  func.func @_fc_stack_kernel(%arg0: memref<2x400xbf16, #tpu.memory_space<vmem>>, %arg1: memref<400x120xbf16, #tpu.memory_space<vmem>>, %arg2: memref<3x120xf32, #tpu.memory_space<vmem>>, %arg3: memref<120x84xbf16, #tpu.memory_space<vmem>>, %arg4: memref<3x84xf32, #tpu.memory_space<vmem>>, %arg5: memref<84x10xbf16, #tpu.memory_space<vmem>>, %arg6: memref<1x10xf32, #tpu.memory_space<vmem>>, %arg7: memref<2x10xf32, #tpu.memory_space<vmem>>) attributes {dimension_semantics = [], scalar_prefetch = 0 : i64, scratch_operands = 0 : i64, tpu.core_type = #tpu.core_type<tc>} {
    %c0 = arith.constant 0 : index
    %c0_0 = arith.constant 0 : index
    %0 = vector.load %arg2[%c0, %c0_0] : memref<3x120xf32, #tpu.memory_space<vmem>>, vector<3x120xf32>
    %c0_1 = arith.constant 0 : index
    %c0_2 = arith.constant 0 : index
    %1 = vector.load %arg0[%c0_1, %c0_2] : memref<2x400xbf16, #tpu.memory_space<vmem>>, vector<2x400xbf16>
    %c0_3 = arith.constant 0 : index
    %c0_4 = arith.constant 0 : index
    %2 = vector.load %arg1[%c0_3, %c0_4] : memref<400x120xbf16, #tpu.memory_space<vmem>>, vector<400x120xbf16>
    %cst = arith.constant dense<0.000000e+00> : vector<2x120xf32>
    %3 = tpu.matmul %1, %2, %cst {dimension_numbers = #tpu.dot_dimension_numbers<[1], [0], [0], [1], [0, 0, 1, 1], [], []>} : vector<2x400xbf16>, vector<400x120xbf16>, vector<2x120xf32> -> vector<2x120xf32>
    %4 = vector.extract_strided_slice %0 {offsets = [0, 0], sizes = [1, 120], strides = [1, 1]} : vector<3x120xf32> to vector<1x120xf32>
    %5 = vector.broadcast %4 : vector<1x120xf32> to vector<2x120xf32>
    %6 = arith.addf %3, %5 : vector<2x120xf32>
    %cst_5 = arith.constant dense<0.000000e+00> : vector<120xf32>
    %7 = vector.multi_reduction <add>, %6, %cst_5 [0] : vector<2x120xf32> to vector<120xf32>
    %8 = vector.shape_cast %7 : vector<120xf32> to vector<1x120xf32>
    %cst_6 = arith.constant 2.000000e+00 : f32
    %9 = vector.broadcast %cst_6 : f32 to vector<1x120xf32>
    %10 = arith.divf %8, %9 : vector<1x120xf32>
    %11 = arith.mulf %6, %6 : vector<2x120xf32>
    %cst_7 = arith.constant dense<0.000000e+00> : vector<120xf32>
    %12 = vector.multi_reduction <add>, %11, %cst_7 [0] : vector<2x120xf32> to vector<120xf32>
    %13 = vector.shape_cast %12 : vector<120xf32> to vector<1x120xf32>
    %cst_8 = arith.constant 2.000000e+00 : f32
    %14 = vector.broadcast %cst_8 : f32 to vector<1x120xf32>
    %15 = arith.divf %13, %14 : vector<1x120xf32>
    %16 = arith.mulf %10, %10 : vector<1x120xf32>
    %17 = arith.subf %15, %16 : vector<1x120xf32>
    %cst_9 = arith.constant 9.99999974E-6 : f32
    %18 = vector.broadcast %cst_9 : f32 to vector<1x120xf32>
    %19 = arith.addf %17, %18 : vector<1x120xf32>
    %20 = math.rsqrt %19 : vector<1x120xf32>
    %21 = vector.broadcast %10 : vector<1x120xf32> to vector<2x120xf32>
    %22 = arith.subf %6, %21 : vector<2x120xf32>
    %23 = vector.extract_strided_slice %0 {offsets = [1, 0], sizes = [1, 120], strides = [1, 1]} : vector<3x120xf32> to vector<1x120xf32>
    %24 = arith.mulf %20, %23 : vector<1x120xf32>
    %25 = vector.broadcast %24 : vector<1x120xf32> to vector<2x120xf32>
    %26 = arith.mulf %22, %25 : vector<2x120xf32>
    %27 = vector.extract_strided_slice %0 {offsets = [2, 0], sizes = [1, 120], strides = [1, 1]} : vector<3x120xf32> to vector<1x120xf32>
    %28 = vector.broadcast %27 : vector<1x120xf32> to vector<2x120xf32>
    %29 = arith.addf %26, %28 : vector<2x120xf32>
    %cst_10 = arith.constant 0.000000e+00 : f32
    %30 = vector.broadcast %cst_10 : f32 to vector<2x120xf32>
    %31 = arith.maximumf %29, %30 : vector<2x120xf32>
    %c0_11 = arith.constant 0 : index
    %c0_12 = arith.constant 0 : index
    %32 = vector.load %arg4[%c0_11, %c0_12] : memref<3x84xf32, #tpu.memory_space<vmem>>, vector<3x84xf32>
    %33 = arith.truncf %31 : vector<2x120xf32> to vector<2x120xbf16>
    %c0_13 = arith.constant 0 : index
    %c0_14 = arith.constant 0 : index
    %34 = vector.load %arg3[%c0_13, %c0_14] : memref<120x84xbf16, #tpu.memory_space<vmem>>, vector<120x84xbf16>
    %cst_15 = arith.constant dense<0.000000e+00> : vector<2x84xf32>
    %35 = tpu.matmul %33, %34, %cst_15 {dimension_numbers = #tpu.dot_dimension_numbers<[1], [0], [0], [1], [0, 0, 1, 1], [], []>} : vector<2x120xbf16>, vector<120x84xbf16>, vector<2x84xf32> -> vector<2x84xf32>
    %36 = vector.extract_strided_slice %32 {offsets = [0, 0], sizes = [1, 84], strides = [1, 1]} : vector<3x84xf32> to vector<1x84xf32>
    %37 = vector.broadcast %36 : vector<1x84xf32> to vector<2x84xf32>
    %38 = arith.addf %35, %37 : vector<2x84xf32>
    %cst_16 = arith.constant dense<0.000000e+00> : vector<84xf32>
    %39 = vector.multi_reduction <add>, %38, %cst_16 [0] : vector<2x84xf32> to vector<84xf32>
    %40 = vector.shape_cast %39 : vector<84xf32> to vector<1x84xf32>
    %cst_17 = arith.constant 2.000000e+00 : f32
    %41 = vector.broadcast %cst_17 : f32 to vector<1x84xf32>
    %42 = arith.divf %40, %41 : vector<1x84xf32>
    %43 = arith.mulf %38, %38 : vector<2x84xf32>
    %cst_18 = arith.constant dense<0.000000e+00> : vector<84xf32>
    %44 = vector.multi_reduction <add>, %43, %cst_18 [0] : vector<2x84xf32> to vector<84xf32>
    %45 = vector.shape_cast %44 : vector<84xf32> to vector<1x84xf32>
    %cst_19 = arith.constant 2.000000e+00 : f32
    %46 = vector.broadcast %cst_19 : f32 to vector<1x84xf32>
    %47 = arith.divf %45, %46 : vector<1x84xf32>
    %48 = arith.mulf %42, %42 : vector<1x84xf32>
    %49 = arith.subf %47, %48 : vector<1x84xf32>
    %cst_20 = arith.constant 9.99999974E-6 : f32
    %50 = vector.broadcast %cst_20 : f32 to vector<1x84xf32>
    %51 = arith.addf %49, %50 : vector<1x84xf32>
    %52 = math.rsqrt %51 : vector<1x84xf32>
    %53 = vector.broadcast %42 : vector<1x84xf32> to vector<2x84xf32>
    %54 = arith.subf %38, %53 : vector<2x84xf32>
    %55 = vector.extract_strided_slice %32 {offsets = [1, 0], sizes = [1, 84], strides = [1, 1]} : vector<3x84xf32> to vector<1x84xf32>
    %56 = arith.mulf %52, %55 : vector<1x84xf32>
    %57 = vector.broadcast %56 : vector<1x84xf32> to vector<2x84xf32>
    %58 = arith.mulf %54, %57 : vector<2x84xf32>
    %59 = vector.extract_strided_slice %32 {offsets = [2, 0], sizes = [1, 84], strides = [1, 1]} : vector<3x84xf32> to vector<1x84xf32>
    %60 = vector.broadcast %59 : vector<1x84xf32> to vector<2x84xf32>
    %61 = arith.addf %58, %60 : vector<2x84xf32>
    %cst_21 = arith.constant 0.000000e+00 : f32
    %62 = vector.broadcast %cst_21 : f32 to vector<2x84xf32>
    %63 = arith.maximumf %61, %62 : vector<2x84xf32>
    %64 = arith.truncf %63 : vector<2x84xf32> to vector<2x84xbf16>
    %c0_22 = arith.constant 0 : index
    %c0_23 = arith.constant 0 : index
    %65 = vector.load %arg5[%c0_22, %c0_23] : memref<84x10xbf16, #tpu.memory_space<vmem>>, vector<84x10xbf16>
    %cst_24 = arith.constant dense<0.000000e+00> : vector<2x10xf32>
    %66 = tpu.matmul %64, %65, %cst_24 {dimension_numbers = #tpu.dot_dimension_numbers<[1], [0], [0], [1], [0, 0, 1, 1], [], []>} : vector<2x84xbf16>, vector<84x10xbf16>, vector<2x10xf32> -> vector<2x10xf32>
    %c0_25 = arith.constant 0 : index
    %c0_26 = arith.constant 0 : index
    %67 = vector.load %arg6[%c0_25, %c0_26] : memref<1x10xf32, #tpu.memory_space<vmem>>, vector<1x10xf32>
    %68 = vector.broadcast %67 : vector<1x10xf32> to vector<2x10xf32>
    %69 = arith.addf %66, %68 : vector<2x10xf32>
    %c0_27 = arith.constant 0 : index
    %c0_28 = arith.constant 0 : index
    %70 = vector.load %arg7[%c0_27, %c0_28] : memref<2x10xf32, #tpu.memory_space<vmem>>, vector<2x10xf32>
    tpu.vector_store %arg7[%c0_27, %c0_28], %69 {strides = array<i32>} : memref<2x10xf32, #tpu.memory_space<vmem>>, vector<2x10xf32>,
    return
  }
}

</mosaic_0001>

<bundles_post_ra>
// kernel: net_forward.3
= control target key start
LH: loop header
LB: loop body
LE: loop exit
PB: predicated region body
PF: predicated region fallthrough
CT: control target
= control target key end

     0   :  { %vm1040_vm0 = vcmask 1044480   ;;  %vm745_vm1 = vcmask 613376   ;;  %vm1041_vm2 = vcmask 1045504   ;;  %v5659_v4 = vmov 65535   ;;  %s12481_s1 = inlined_call_operand.vmem [shape: bf16[75,6], index: 1, kind: input, shape index: {}]   ;;  %s12482_s0 = inlined_call_operand.vmem [shape: bf16[1568,75], index: 0, kind: input, shape index: {}]   ;;  %s12483_s2 = inlined_call_operand.vmem [shape: f32[3,6], index: 2, kind: input, shape index: {}]   ;;  %s12484_s3 = inlined_call_operand.vmem [shape: bf16[1568,6], index: 3, kind: output, shape index: {}]  }
   0x1   :  { %v5553_v0 = vld [vmem:[%s12481_s1] sm:$0xff]   ;;  %v5554_v1 = vld [vmem:[%s12481_s1 + $0x8] sm:$0xff]   ;;  %v5555_v2 = vld [vmem:[%s12481_s1 + $0x10] sm:$0xff]   ;;  %v1042_v5 = vsel %vm1040_vm0, 4294967295, %v5659_v4  ;;  %vm1864_vm3 = vcmask 48128   ;;  %vm4439_vm4 = vcmask 44032  }
   0x2   :  { %5336 = vmatprep.subr.bf16.mxu0 %v5553_v0  ;;  %5542 = vmatprep.subr.bf16.mxu1 %v5553_v0  ;;  %v5558_v3 = vld [vmem:[%s12482_s0] sm:$0xff]   ;;  %v5556_v6 = vld [vmem:[%s12481_s1 + $0x18] sm:$0xff]   ;;  %v1043_v8 = vsel %vm1041_vm2, %v1042_v5, 0  ;;  %v5559_v10 = vld [vmem:[%s12482_s0 + $0x8] sm:$0xff]  }
   0x3   :  { %5337 = vmatpush3.bf16.msra.mxu0 %v5553_v0  ;;  %5547 = vmatpush3.bf16.msra.mxu1 %v5553_v0  ;;  %v5557_v7 = vld [vmem:[%s12481_s1 + $0x20] sm:$0x3f]   ;;  %v5560_v11 = vld [vmem:[%s12482_s0 + $0x10] sm:$0xff]   ;;  %v5561_v12 = vld [vmem:[%s12482_s0 + $0x18] sm:$0xff]  }
   0x4   :  { %5338 = vmatprep.subr.bf16.mxu0 %v5554_v1  ;;  %5543 = vmatprep.subr.bf16.mxu1 %v5554_v1  ;;  %v1045_v9 = vand.u32 %v5557_v7, %v1043_v8  ;;  %v5562_v13 = vld [vmem:[%s12482_s0 + $0x20] sm:$0xff]   ;;  %v5563_v14 = vld [vmem:[%s12482_s0 + $0x28] sm:$0xff]   ;;  %v5564_v15 = vld [vmem:[%s12482_s0 + $0x30] sm:$0xff]  }
   0x5   :  { %5346 = vmatprep.mubr.msk.bf16.mxu0 %vm745_vm1, %v5558_v3  ;;  %v5565_v16 = vld [vmem:[%s12482_s0 + $0x38] sm:$0xff]   ;;  %v5566_v17 = vld [vmem:[%s12482_s0 + $0x40] sm:$0xff]   ;;  %v5567_v18 = vld [vmem:[%s12482_s0 + $0x48] sm:$0xff]  }
   0x6   :  { %v5568_v19 = vld [vmem:[%s12482_s0 + $0x50] sm:$0xff]   ;;  %v5569_v20 = vld [vmem:[%s12482_s0 + $0x58] sm:$0xff]   ;;  %v5570_v21 = vld [vmem:[%s12482_s0 + $0x60] sm:$0xff]  }
   0x7   :  { %5339 = vmatpush3.bf16.msra.mxu0 %v5554_v1  ;;  %5548 = vmatpush3.bf16.msra.mxu1 %v5554_v1  ;;  %v5571_v22 = vld [vmem:[%s12482_s0 + $0x68] sm:$0xff]   ;;  %v5572_v23 = vld [vmem:[%s12482_s0 + $0x70] sm:$0xff]   ;;  %v5573_v24 = vld [vmem:[%s12482_s0 + $0x78] sm:$0xff]  }
   0x8   :  { %5340 = vmatprep.subr.bf16.mxu0 %v5555_v2  ;;  %5544 = vmatprep.subr.bf16.mxu1 %v5555_v2  ;;  %v5574_v25 = vld [vmem:[%s12482_s0 + $0x80] sm:$0xff]   ;;  %v5575_v26 = vld [vmem:[%s12482_s0 + $0x88] sm:$0xff]   ;;  %v5576_v27 = vld [vmem:[%s12482_s0 + $0x90] sm:$0xff]  }
   0x9   :  { %v5608_v28 = vld [vmem:[%s12482_s0 + $0x190] sm:$0xff]   ;;  %v5609_v29 = vld [vmem:[%s12482_s0 + $0x198] sm:$0xff]   ;;  %v5610_v30 = vld [vmem:[%s12482_s0 + $0x1a0] sm:$0xff]  }
   0xa   :  { %5446 = vmatprep.mubr.msk.bf16.mxu1 %vm745_vm1, %v5608_v28  ;;  %v5577_v31 = vld [vmem:[%s12482_s0 + $0x98] sm:$0xff]   ;;  %v5578_v32 = vld [vmem:[%s12482_s0 + $0xa0] sm:$0xff]   ;;  %v5611_v33 = vld [vmem:[%s12482_s0 + $0x1a8] sm:$0xff]  }
   0xb   :  { %5341 = vmatpush3.bf16.msra.mxu0 %v5555_v2  ;;  %5549 = vmatpush3.bf16.msra.mxu1 %v5555_v2  ;;  %v5579_v34 = vld [vmem:[%s12482_s0 + $0xa8] sm:$0xff]   ;;  %v5580_v35 = vld [vmem:[%s12482_s0 + $0xb0] sm:$0xff]   ;;  %v5613_v37 = vld [vmem:[%s12482_s0 + $0x1b8] sm:$0xff]  }
   0xc   :  { %5342 = vmatprep.subr.bf16.mxu0 %v5556_v6  ;;  %5545 = vmatprep.subr.bf16.mxu1 %v5556_v6  ;;  %v5612_v36 = vld [vmem:[%s12482_s0 + $0x1b0] sm:$0xff]   ;;  %v5581_v38 = vld [vmem:[%s12482_s0 + $0xb8] sm:$0xff]   ;;  %v5582_v39 = vld [vmem:[%s12482_s0 + $0xc0] sm:$0xff]  }
   0xd   :  { %v5614_v40 = vld [vmem:[%s12482_s0 + $0x1c0] sm:$0xff]   ;;  %v5583_v41 = vld [vmem:[%s12482_s0 + $0xc8] sm:$0xff]   ;;  %v5584_v43 = vld [vmem:[%s12482_s0 + $0xd0] sm:$0xff]  }
   0xe   :  { %v5615_v42 = vld [vmem:[%s12482_s0 + $0x1c8] sm:$0xff]   ;;  %v5616_v44 = vld [vmem:[%s12482_s0 + $0x1d0] sm:$0xff]   ;;  %v5585_v45 = vld [vmem:[%s12482_s0 + $0xd8] sm:$0xff]  }
   0xf   :  { %5343 = vmatpush3.bf16.msra.mxu0 %v5556_v6  ;;  %5550 = vmatpush3.bf16.msra.mxu1 %v5556_v6  ;;  %v5617_v46 = vld [vmem:[%s12482_s0 + $0x1d8] sm:$0xff]   ;;  %v5586_v47 = vld [vmem:[%s12482_s0 + $0xe0] sm:$0xff]   ;;  %v5587_v49 = vld [vmem:[%s12482_s0 + $0xe8] sm:$0xff]  }
  0x10   :  { %5344 = vmatprep.subr.bf16.mxu0 %v1045_v9  ;;  %5546 = vmatprep.subr.bf16.mxu1 %v1045_v9  ;;  %v5618_v48 = vld [vmem:[%s12482_s0 + $0x1e0] sm:$0xff]   ;;  %v5619_v50 = vld [vmem:[%s12482_s0 + $0x1e8] sm:$0xff]   ;;  %v5588_v51 = vld [vmem:[%s12482_s0 + $0xf0] sm:$0xff]  }
  0x11   :  { %v5620_v52 = vld [vmem:[%s12482_s0 + $0x1f0] sm:$0xff]   ;;  %v5589_v53 = vld [vmem:[%s12482_s0 + $0xf8] sm:$0xff]   ;;  %v5590_v55 = vld [vmem:[%s12482_s0 + $0x100] sm:$0xff]  }
  0x12   :  { %v5621_v54 = vld [vmem:[%s12482_s0 + $0x1f8] sm:$0xff]   ;;  %v5622_v56 = vld [vmem:[%s12482_s0 + $0x200] sm:$0xff]   ;;  %v5591_v57 = vld [vmem:[%s12482_s0 + $0x108] sm:$0xff]  }
  0x13   :  { %5345 = vmatpush3.bf16.msra.mxu0 %v1045_v9  ;;  %5551 = vmatpush3.bf16.msra.mxu1 %v1045_v9  ;;  %v5623_v58 = vld [vmem:[%s12482_s0 + $0x208] sm:$0xff]   ;;  %v5592_v59 = vld [vmem:[%s12482_s0 + $0x110] sm:$0xff]   ;;  %v5593_v61 = vld [vmem:[%s12482_s0 + $0x118] sm:$0xff]  }
  0x14   :  { %v5624_v60 = vld [vmem:[%s12482_s0 + $0x210] sm:$0xff]   ;;  %v5625_v62 = vld [vmem:[%s12482_s0 + $0x218] sm:$0xff]   ;;  %v5594_v63 = vld [vmem:[%s12482_s0 + $0x120] sm:$0xff]  }
  0x15   :  { %v5626_v0 = vld [vmem:[%s12482_s0 + $0x220] sm:$0xff]   ;;  %v5595_v1 = vld [vmem:[%s12482_s0 + $0x128] sm:$0xff]   ;;  %v5596_v3 = vld [vmem:[%s12482_s0 + $0x130] sm:$0xff]  }
  0x16   :  { %5347 = vmatmul.mubr.msk.bf16.vlgmr.msra.gmra.mrb[0].mxu0 %vm745_vm1, %v5559_v10  ;;  %5447 = vmatmul.mubr.msk.bf16.vlgmr.msra.gmra.mrb[0].mxu1 %vm745_vm1, %v5609_v29  ;;  %v5627_v2 = vld [vmem:[%s12482_s0 + $0x228] sm:$0xff]   ;;  %v5628_v4 = vld [vmem:[%s12482_s0 + $0x230] sm:$0xff]   ;;  %v5597_v5 = vld [vmem:[%s12482_s0 + $0x138] sm:$0xff]   ;;  %v222_v29 = vlaneseq }
  0x17   :  { %5350 = vmatprep.mubr.msk.bf16.mxu0 %vm745_vm1, %v5560_v11  ;;  %5450 = vmatprep.mubr.msk.bf16.mxu1 %vm745_vm1, %v5610_v30  ;;  %v5629_v6 = vld [vmem:[%s12482_s0 + $0x238] sm:$0xff]   ;;  %v5598_v7 = vld [vmem:[%s12482_s0 + $0x140] sm:$0xff]   ;;  %v5599_v9 = vld [vmem:[%s12482_s0 + $0x148] sm:$0xff]  }
  0x18   :  { %v5630_v8 = vld [vmem:[%s12482_s0 + $0x240] sm:$0xff]   ;;  %v5631_v10 = vld [vmem:[%s12482_s0 + $0x248] sm:$0xff]   ;;  %v5600_v11 = vld [vmem:[%s12482_s0 + $0x150] sm:$0xff]   ;;  %v6031_v30 = vshrl.u32 %v222_v29, 7 }
  0x19   :  { %v5641_v28 = vld [vmem:[%s12482_s0 + $0x298] sm:$0xff]  }
  0x1a   :  { %12994 = vst [vmem:[#allocation2_spill] sm:$0xff] %v6031_v30 }
  0x1e   :  { %5351 = vmatmul.mubr.msk.bf16.gmra.mrb[4].mxu0 %vm745_vm1, %v5561_v12  ;;  %5451 = vmatmul.mubr.msk.bf16.gmra.mrb[4].mxu1 %vm745_vm1, %v5611_v33  ;;  %v5632_v12 = vld [vmem:[%s12482_s0 + $0x250] sm:$0xff]   ;;  %v224_v33 = vsub.s32 0, %v6031_v30 }
  0x1f   :  { %5354 = vmatprep.mubr.msk.bf16.mxu0 %vm745_vm1, %v5562_v13  ;;  %5454 = vmatprep.mubr.msk.bf16.mxu1 %vm745_vm1, %v5612_v36  ;;  %v5601_v13 = vld [vmem:[%s12482_s0 + $0x158] sm:$0xff]  }
  0x26   :  { %5355 = vmatmul.mubr.msk.bf16.gmra.mrb[8].mxu0 %vm745_vm1, %v5563_v14  ;;  %5455 = vmatmul.mubr.msk.bf16.gmra.mrb[8].mxu1 %vm745_vm1, %v5613_v37  ;;  %v5633_v14 = vld [vmem:[%s12482_s0 + $0x258] sm:$0xff]   ;;  %v5644_v37 = vld [vmem:[%s12482_s0 + $0x2b0] sm:$0xff]  }
  0x27   :  { %5358 = vmatprep.mubr.msk.bf16.mxu0 %vm745_vm1, %v5564_v15  ;;  %5458 = vmatprep.mubr.msk.bf16.mxu1 %vm745_vm1, %v5614_v40  ;;  %v5602_v15 = vld [vmem:[%s12482_s0 + $0x160] sm:$0xff]  }
  0x2e   :  { %5359 = vmatmul.mubr.msk.bf16.gmra.mrb[12].mxu0 %vm745_vm1, %v5565_v16  ;;  %5459 = vmatmul.mubr.msk.bf16.gmra.mrb[12].mxu1 %vm745_vm1, %v5615_v42  ;;  %v5634_v16 = vld [vmem:[%s12482_s0 + $0x260] sm:$0xff]  }
  0x2f   :  { %5362 = vmatprep.mubr.msk.bf16.mxu0 %vm745_vm1, %v5566_v17  ;;  %5462 = vmatprep.mubr.msk.bf16.mxu1 %vm745_vm1, %v5616_v44  ;;  %v5603_v17 = vld [vmem:[%s12482_s0 + $0x168] sm:$0xff]  }
  0x36   :  { %5363 = vmatmul.mubr.msk.bf16.gmra.mrb[16].mxu0 %vm745_vm1, %v5567_v18  ;;  %5463 = vmatmul.mubr.msk.bf16.gmra.mrb[16].mxu1 %vm745_vm1, %v5617_v46  ;;  %v5635_v18 = vld [vmem:[%s12482_s0 + $0x268] sm:$0xff]  }
  0x37   :  { %5366 = vmatprep.mubr.msk.bf16.mxu0 %vm745_vm1, %v5568_v19  ;;  %5466 = vmatprep.mubr.msk.bf16.mxu1 %vm745_vm1, %v5618_v48  ;;  %v5604_v19 = vld [vmem:[%s12482_s0 + $0x170] sm:$0xff]  }
  0x3e   :  { %5367 = vmatmul.mubr.msk.bf16.gmra.mrb[20].mxu0 %vm745_vm1, %v5569_v20  ;;  %5467 = vmatmul.mubr.msk.bf16.gmra.mrb[20].mxu1 %vm745_vm1, %v5619_v50  ;;  %v5636_v20 = vld [vmem:[%s12482_s0 + $0x270] sm:$0xff]  }
  0x3f   :  { %5370 = vmatprep.mubr.msk.bf16.mxu0 %vm745_vm1, %v5570_v21  ;;  %5470 = vmatprep.mubr.msk.bf16.mxu1 %vm745_vm1, %v5620_v52  ;;  %v5605_v21 = vld [vmem:[%s12482_s0 + $0x178] sm:$0xff]  }
  0x46   :  { %5371 = vmatmul.mubr.msk.bf16.gmra.mrb[24].mxu0 %vm745_vm1, %v5571_v22  ;;  %5471 = vmatmul.mubr.msk.bf16.gmra.mrb[24].mxu1 %vm745_vm1, %v5621_v54  ;;  %v5637_v22 = vld [vmem:[%s12482_s0 + $0x278] sm:$0xff]  }
  0x47   :  { %5374 = vmatprep.mubr.msk.bf16.mxu0 %vm745_vm1, %v5572_v23  ;;  %5474 = vmatprep.mubr.msk.bf16.mxu1 %vm745_vm1, %v5622_v56  ;;  %v5606_v23 = vld [vmem:[%s12482_s0 + $0x180] sm:$0xff]  }
  0x4e   :  { %5375 = vmatmul.mubr.msk.bf16.gmra.mrb[28].mxu0 %vm745_vm1, %v5573_v24  ;;  %5475 = vmatmul.mubr.msk.bf16.gmra.mrb[28].mxu1 %vm745_vm1, %v5623_v58  ;;  %v5638_v24 = vld [vmem:[%s12482_s0 + $0x280] sm:$0xff]  }
  0x4f   :  { %5378 = vmatprep.mubr.msk.bf16.mxu0 %vm745_vm1, %v5574_v25  ;;  %5478 = vmatprep.mubr.msk.bf16.mxu1 %vm745_vm1, %v5624_v60  ;;  %v5607_v25 = vld [vmem:[%s12482_s0 + $0x188] sm:$0xff]  }
  0x56   :  { %5379 = vmatmul.mubr.msk.bf16.gmra.mrb[32].mxu0 %vm745_vm1, %v5575_v26  ;;  %5479 = vmatmul.mubr.msk.bf16.gmra.mrb[32].mxu1 %vm745_vm1, %v5625_v62  ;;  %v5639_v26 = vld [vmem:[%s12482_s0 + $0x288] sm:$0xff]  }
  0x57   :  { %5382 = vmatprep.mubr.msk.bf16.mxu0 %vm745_vm1, %v5576_v27  ;;  %5482 = vmatprep.mubr.msk.bf16.mxu1 %vm745_vm1, %v5626_v0  ;;  %v5640_v27 = vld [vmem:[%s12482_s0 + $0x290] sm:$0xff]  }
  0x5e   :  { %5383 = vmatmul.mubr.msk.bf16.gmra.mrb[36].mxu0 %vm745_vm1, %v5577_v31  ;;  %5483 = vmatmul.mubr.msk.bf16.gmra.mrb[36].mxu1 %vm745_vm1, %v5627_v2  ;;  %v5642_v31 = vld [vmem:[%s12482_s0 + $0x2a0] sm:$0xff]  }
  0x5f   :  { %5386 = vmatprep.mubr.msk.bf16.mxu0 %vm745_vm1, %v5578_v32  ;;  %5486 = vmatprep.mubr.msk.bf16.mxu1 %vm745_vm1, %v5628_v4  ;;  %v5643_v32 = vld [vmem:[%s12482_s0 + $0x2a8] sm:$0xff]  }
  0x66   :  { %5387 = vmatmul.mubr.msk.bf16.gmra.mrb[40].mxu0 %vm745_vm1, %v5579_v34  ;;  %5487 = vmatmul.mubr.msk.bf16.gmra.mrb[40].mxu1 %vm745_vm1, %v5629_v6  ;;  %v15_v34 = vld [vmem:[%s12483_s2] sm:$0x7] }
  0x67   :  { %5390 = vmatprep.mubr.msk.bf16.mxu0 %vm745_vm1, %v5580_v35  ;;  %5490 = vmatprep.mubr.msk.bf16.mxu1 %vm745_vm1, %v5630_v8  ;;  %v6045_v35 = vrot.slane %v15_v34, %v224_v33 }
  0x6e   :  { %5391 = vmatmul.mubr.msk.bf16.gmra.mrb[44].mxu0 %vm745_vm1, %v5581_v38  ;;  %5491 = vmatmul.mubr.msk.bf16.gmra.mrb[44].mxu1 %vm745_vm1, %v5631_v10 }
  0x6f   :  { %5394 = vmatprep.mubr.msk.bf16.mxu0 %vm745_vm1, %v5582_v39  ;;  %5494 = vmatprep.mubr.msk.bf16.mxu1 %vm745_vm1, %v5632_v12  ;;  %v5645_v39 = vld [vmem:[%s12482_s0 + $0x2b8] sm:$0xff]  }
  0x76   :  { %5395 = vmatmul.mubr.msk.bf16.gmra.mrb[48].mxu0 %vm745_vm1, %v5583_v41  ;;  %5495 = vmatmul.mubr.msk.bf16.gmra.mrb[48].mxu1 %vm745_vm1, %v5633_v14 }
  0x77   :  { %5398 = vmatprep.mubr.msk.bf16.mxu0 %vm745_vm1, %v5584_v43  ;;  %5498 = vmatprep.mubr.msk.bf16.mxu1 %vm745_vm1, %v5634_v16 }
  0x7e   :  { %5399 = vmatmul.mubr.msk.bf16.gmra.mrb[52].mxu0 %vm745_vm1, %v5585_v45  ;;  %5499 = vmatmul.mubr.msk.bf16.gmra.mrb[52].mxu1 %vm745_vm1, %v5635_v18 }
  0x7f   :  { %5402 = vmatprep.mubr.msk.bf16.mxu0 %vm745_vm1, %v5586_v47  ;;  %5502 = vmatprep.mubr.msk.bf16.mxu1 %vm745_vm1, %v5636_v20 }
  0x86   :  { %5403 = vmatmul.mubr.msk.bf16.gmra.mrb[56].mxu0 %vm745_vm1, %v5587_v49  ;;  %5503 = vmatmul.mubr.msk.bf16.gmra.mrb[56].mxu1 %vm745_vm1, %v5637_v22 }
  0x87   :  { %5406 = vmatprep.mubr.msk.bf16.mxu0 %vm745_vm1, %v5588_v51  ;;  %5506 = vmatprep.mubr.msk.bf16.mxu1 %vm745_vm1, %v5638_v24 }
  0x8e   :  { %5407 = vmatmul.mubr.msk.bf16.gmra.mrb[60].mxu0 %vm745_vm1, %v5589_v53  ;;  %5507 = vmatmul.mubr.msk.bf16.gmra.mrb[60].mxu1 %vm745_vm1, %v5639_v26  ;;  %v5649_v26 = vld [vmem:[%s12482_s0 + $0x2d8] sm:$0xff]  }
  0x8f   :  { %5410 = vmatprep.mubr.msk.bf16.mxu0 %vm745_vm1, %v5590_v55  ;;  %5510 = vmatprep.mubr.msk.bf16.mxu1 %vm745_vm1, %v5640_v27 }
  0x96   :  { %5411 = vmatmul.mubr.msk.bf16.gmra.mrb[64].mxu0 %vm745_vm1, %v5591_v57  ;;  %5511 = vmatmul.mubr.msk.bf16.gmra.mrb[64].mxu1 %vm745_vm1, %v5641_v28  ;;  %v5646_v57 = vld [vmem:[%s12482_s0 + $0x2c0] sm:$0xff]  }
  0x97   :  { %5414 = vmatprep.mubr.msk.bf16.mxu0 %vm745_vm1, %v5592_v59  ;;  %5514 = vmatprep.mubr.msk.bf16.mxu1 %vm745_vm1, %v5642_v31 }
  0x9e   :  { %5415 = vmatmul.mubr.msk.bf16.gmra.mrb[68].mxu0 %vm745_vm1, %v5593_v61  ;;  %5515 = vmatmul.mubr.msk.bf16.gmra.mrb[68].mxu1 %vm745_vm1, %v5643_v32  ;;  %v5647_v61 = vld [vmem:[%s12482_s0 + $0x2c8] sm:$0xff]  }
  0x9f   :  { %5418 = vmatprep.mubr.msk.bf16.mxu0 %vm745_vm1, %v5594_v63  ;;  %5518 = vmatprep.mubr.msk.bf16.mxu1 %vm745_vm1, %v5644_v37 }
  0xa6   :  { %5419 = vmatmul.mubr.msk.bf16.gmra.mrb[72].mxu0 %vm745_vm1, %v5595_v1  ;;  %5519 = vmatmul.mubr.msk.bf16.gmra.mrb[72].mxu1 %vm745_vm1, %v5645_v39 }
  0xa7   :  { %5422 = vmatprep.mubr.msk.bf16.mxu0 %vm745_vm1, %v5596_v3  ;;  %5522 = vmatprep.mubr.msk.bf16.mxu1 %vm745_vm1, %v5646_v57 }
  0xae   :  { %5423 = vmatmul.mubr.msk.bf16.gmra.mrb[76].mxu0 %vm745_vm1, %v5597_v5  ;;  %5523 = vmatmul.mubr.msk.bf16.gmra.mrb[76].mxu1 %vm745_vm1, %v5647_v61 }
  0xaf   :  { %5426 = vmatprep.mubr.msk.bf16.mxu0 %vm745_vm1, %v5598_v7 }
  0xb6   :  { %5427 = vmatmul.mubr.msk.bf16.gmra.mrb[80].mxu0 %vm745_vm1, %v5599_v9 }
  0xb7   :  { %5430 = vmatprep.mubr.msk.bf16.mxu0 %vm745_vm1, %v5600_v11 }
  0xbe   :  { %5431 = vmatmul.mubr.msk.bf16.gmra.mrb[84].mxu0 %vm745_vm1, %v5601_v13 }
  0xbf   :  { %5434 = vmatprep.mubr.msk.bf16.mxu0 %vm745_vm1, %v5602_v15 }
  0xc6   :  { %5435 = vmatmul.mubr.msk.bf16.gmra.mrb[88].mxu0 %vm745_vm1, %v5603_v17 }
  0xc7   :  { %5438 = vmatprep.mubr.msk.bf16.mxu0 %vm745_vm1, %v5604_v19 }
  0xce   :  { %5439 = vmatmul.mubr.msk.bf16.gmra.mrb[92].mxu0 %vm745_vm1, %v5605_v21  ;;  %v5648_v21 = vld [vmem:[%s12482_s0 + $0x2d0] sm:$0xff]  }
  0xcf   :  { %5442 = vmatprep.mubr.msk.bf16.mxu0 %vm745_vm1, %v5606_v23  ;;  %5526 = vmatprep.mubr.msk.bf16.mxu1 %vm745_vm1, %v5648_v21 }
  0xd0   :  { %5527 = vmatmul.mubr.msk.bf16.gmra.mrb[80].mxu1 %vm745_vm1, %v5649_v26 }
  0xd6   :  { %5443 = vmatmul.mubr.msk.bf16.gmra.mrb[96].mxu0 %vm745_vm1, %v5607_v25 }
  0xe9   :  { %v5348_v36 = vpop.f32.mrb[0].mxu0 }
  0xea   :  { %v1081_v38 = vpop.f32.mrb[1].mxu0  ;;  %v6054_v40 = vadd.f32 %v5348_v36, %v6045_v35 }
  0xeb   :  { %v6057_v41 = vadd.f32 %v1081_v38, %v6045_v35  ;;  %v5349_v42 = vpop.f32.mrb[2].mxu0 }
  0xec   :  { %12995 = vst [vmem:[#allocation3_spill] sm:$0xff] %v6054_v40  ;;  %v1084_v43 = vpop.f32.mrb[3].mxu0  ;;  %v6064_v45 = vadd.f32 %v5349_v42, %v6045_v35  ;;  %v2266_v47 = vmul.f32 %v6054_v40, %v6054_v40  ;;  %v1868_v52 = vsel %vm1864_vm3, %v6054_v40, 0.0 }
  0xed   :  { %12996 = vst [vmem:[#allocation4_spill] sm:$0xff] %v6057_v41  ;;  %v2264_v44 = vmul.f32 %v6057_v41, %v6057_v41  ;;  %v6067_v46 = vadd.f32 %v1084_v43, %v6045_v35  ;;  %v1865_v48 = vsel %vm1864_vm3, %v6057_v41, 0.0 }
  0xee   :  { %12997 = vst [vmem:[#allocation5_spill] sm:$0xff] %v6064_v45  ;;  %v2267_v54 = vmul.f32 %v6064_v45, %v6064_v45  ;;  %v2463_v62 = vsel %vm1864_vm3, %v2266_v47, 0.0  ;;  %v1870_v63 = vsel %vm1864_vm3, %v6064_v45, 0.0 }
  0xef   :  { %12998 = vst [vmem:[#allocation6_spill] sm:$0xff] %v6067_v46  ;;  %v1866_v49 = vsel %vm1864_vm3, %v6067_v46, 0.0  ;;  %v2265_v50 = vmul.f32 %v6067_v46, %v6067_v46  ;;  %v2460_v53 = vsel %vm1864_vm3, %v2264_v44, 0.0 }
  0xf0   :  { %v1867_v51 = vadd.f32 %v1866_v49, %v1865_v48  ;;  %v2465_v6 = vsel %vm1864_vm3, %v2267_v54, 0.0 }
  0xf1   :  { %v2461_v55 = vsel %vm1864_vm3, %v2265_v50, 0.0  ;;  %v5352_v56 = vpop.f32.mrb[4].mxu0 }
  0xf2   :  { %v1869_v58 = vadd.f32 %v1868_v52, %v1867_v51  ;;  %v2462_v59 = vadd.f32 %v2461_v55, %v2460_v53  ;;  %v1097_v60 = vpop.f32.mrb[5].mxu0  ;;  %v6097_v4 = vadd.f32 %v5352_v56, %v6045_v35 }
  0xf3   :  { %v6093_v0 = vadd.f32 %v1097_v60, %v6045_v35  ;;  %v5353_v1 = vpop.f32.mrb[6].mxu0 }
  0xf4   :  { %v1871_v2 = vadd.f32 %v1870_v63, %v1869_v58  ;;  %v2464_v3 = vadd.f32 %v2463_v62, %v2462_v59  ;;  %13000 = vst [vmem:[#allocation8_spill] sm:$0xff] %v6097_v4  ;;  %v1100_v5 = vpop.f32.mrb[7].mxu0  ;;  %v6109_v12 = vadd.f32 %v5353_v1, %v6045_v35  ;;  %v2270_v15 = vmul.f32 %v6097_v4, %v6097_v4  ;;  %v5650_v58 = vld [vmem:[%s12482_s0 + $0x2e0] sm:$0xff]   ;;  %v5651_v62 = vld [vmem:[%s12482_s0 + $0x2e8] sm:$0xff]  }
  0xf5   :  { %12999 = vst [vmem:[#allocation7_spill] sm:$0xff] %v6093_v0  ;;  %v1872_v7 = vsel %vm1864_vm3, %v6093_v0, 0.0  ;;  %v2268_v8 = vmul.f32 %v6093_v0, %v6093_v0  ;;  %v6106_v9 = vadd.f32 %v1100_v5, %v6045_v35  ;;  %v1876_v19 = vsel %vm1864_vm3, %v6097_v4, 0.0  ;;  %5530 = vmatprep.mubr.msk.bf16.mxu1 %vm745_vm1, %v5650_v58 }
  0xf6   :  { %v2466_v10 = vadd.f32 %v2465_v6, %v2464_v3  ;;  %v1873_v11 = vadd.f32 %v1872_v7, %v1871_v2  ;;  %13002 = vst [vmem:[#allocation10_spill] sm:$0xff] %v6109_v12  ;;  %v2271_v22 = vmul.f32 %v6109_v12, %v6109_v12  ;;  %v1878_v27 = vsel %vm1864_vm3, %v6109_v12, 0.0  ;;  %5531 = vmatmul.mubr.msk.bf16.gmra.mrb[84].mxu1 %vm745_vm1, %v5651_v62 }
  0xf7   :  { %13001 = vst [vmem:[#allocation9_spill] sm:$0xff] %v6106_v9  ;;  %v2467_v13 = vsel %vm1864_vm3, %v2268_v8, 0.0  ;;  %v1874_v14 = vsel %vm1864_vm3, %v6106_v9, 0.0  ;;  %v2269_v18 = vmul.f32 %v6106_v9, %v6106_v9  ;;  %v2471_v32 = vsel %vm1864_vm3, %v2270_v15, 0.0 }
  0xf8   :  { %v2468_v16 = vadd.f32 %v2467_v13, %v2466_v10  ;;  %v1875_v17 = vadd.f32 %v1874_v14, %v1873_v11  ;;  %v2473_v43 = vsel %vm1864_vm3, %v2271_v22, 0.0 }
  0xf9   :  { %v5356_v20 = vpop.f32.mrb[8].mxu0  ;;  %v2469_v24 = vsel %vm1864_vm3, %v2269_v18, 0.0 }
  0xfa   :  { %v1877_v23 = vadd.f32 %v1876_v19, %v1875_v17  ;;  %v1113_v25 = vpop.f32.mrb[9].mxu0  ;;  %v2470_v28 = vadd.f32 %v2469_v24, %v2468_v16  ;;  %v6137_v34 = vadd.f32 %v5356_v20, %v6045_v35 }
  0xfb   :  { %v6132_v29 = vadd.f32 %v1113_v25, %v6045_v35  ;;  %v5357_v31 = vpop.f32.mrb[10].mxu0 }
  0xfc   :  { %v1879_v33 = vadd.f32 %v1878_v27, %v1877_v23  ;;  %13004 = vst [vmem:[#allocation12_spill] sm:$0xff] %v6137_v34  ;;  %v1116_v36 = vpop.f32.mrb[11].mxu0  ;;  %v2472_v37 = vadd.f32 %v2471_v32, %v2470_v28  ;;  %v6149_v47 = vadd.f32 %v5357_v31, %v6045_v35  ;;  %v2274_v52 = vmul.f32 %v6137_v34, %v6137_v34  ;;  %v5652_v28 = vld [vmem:[%s12482_s0 + $0x2f0] sm:$0xff]  }
  0xfd   :  { %13003 = vst [vmem:[#allocation11_spill] sm:$0xff] %v6132_v29  ;;  %v1880_v38 = vsel %vm1864_vm3, %v6132_v29, 0.0  ;;  %v2272_v39 = vmul.f32 %v6132_v29, %v6132_v29  ;;  %v6145_v42 = vadd.f32 %v1116_v36, %v6045_v35  ;;  %v1884_v54 = vsel %vm1864_vm3, %v6137_v34, 0.0  ;;  %v5653_v36 = vld [vmem:[%s12482_s0 + $0x2f8] sm:$0xff]   ;;  %5534 = vmatprep.mubr.msk.bf16.mxu1 %vm745_vm1, %v5652_v28 }
  0xfe   :  { %v1881_v44 = vadd.f32 %v1880_v38, %v1879_v33  ;;  %13006 = vst [vmem:[#allocation14_spill] sm:$0xff] %v6149_v47  ;;  %v2474_v48 = vadd.f32 %v2473_v43, %v2472_v37  ;;  %v2275_v59 = vmul.f32 %v6149_v47, %v6149_v47  ;;  %v1886_v63 = vsel %vm1864_vm3, %v6149_v47, 0.0  ;;  %5535 = vmatmul.mubr.msk.bf16.gmra.mrb[88].mxu1 %vm745_vm1, %v5653_v36 }
  0xff   :  { %13005 = vst [vmem:[#allocation13_spill] sm:$0xff] %v6145_v42  ;;  %v2475_v49 = vsel %vm1864_vm3, %v2272_v39, 0.0  ;;  %v1882_v50 = vsel %vm1864_vm3, %v6145_v42, 0.0  ;;  %v2273_v51 = vmul.f32 %v6145_v42, %v6145_v42  ;;  %v2479_v5 = vsel %vm1864_vm3, %v2274_v52, 0.0 }
 0x100   :  { %v1883_v53 = vadd.f32 %v1882_v50, %v1881_v44  ;;  %v2476_v55 = vadd.f32 %v2475_v49, %v2474_v48  ;;  %v2481_v15 = vsel %vm1864_vm3, %v2275_v59, 0.0 }
 0x101   :  { %v2477_v56 = vsel %vm1864_vm3, %v2273_v51, 0.0  ;;  %v5360_v57 = vpop.f32.mrb[12].mxu0 }
 0x102   :  { %v1885_v60 = vadd.f32 %v1884_v54, %v1883_v53  ;;  %v1129_v61 = vpop.f32.mrb[13].mxu0  ;;  %v2478_v1 = vadd.f32 %v2477_v56, %v2476_v55  ;;  %v6177_v7 = vadd.f32 %v5360_v57, %v6045_v35 }
 0x103   :  { %v6172_v2 = vadd.f32 %v1129_v61, %v6045_v35  ;;  %v5361_v3 = vpop.f32.mrb[14].mxu0 }
 0x104   :  { %v1887_v6 = vadd.f32 %v1886_v63, %v1885_v60  ;;  %13008 = vst [vmem:[#allocation16_spill] sm:$0xff] %v6177_v7  ;;  %v1132_v8 = vpop.f32.mrb[15].mxu0  ;;  %v2480_v10 = vadd.f32 %v2479_v5, %v2478_v1  ;;  %v6189_v17 = vadd.f32 %v5361_v3, %v6045_v35  ;;  %v2278_v22 = vmul.f32 %v6177_v7, %v6177_v7 }
 0x105   :  { %13007 = vst [vmem:[#allocation15_spill] sm:$0xff] %v6172_v2  ;;  %v1888_v11 = vsel %vm1864_vm3, %v6172_v2, 0.0  ;;  %v2276_v13 = vmul.f32 %v6172_v2, %v6172_v2  ;;  %v6185_v14 = vadd.f32 %v1132_v8, %v6045_v35  ;;  %v1892_v24 = vsel %vm1864_vm3, %v6177_v7, 0.0  ;;  %v5654_v8 = vld [vmem:[%s12482_s0 + $0x300] sm:$0xff]  }
 0x106   :  { %v1889_v16 = vadd.f32 %v1888_v11, %v1887_v6  ;;  %13010 = vst [vmem:[#allocation18_spill] sm:$0xff] %v6189_v17  ;;  %v2482_v18 = vadd.f32 %v2481_v15, %v2480_v10  ;;  %v2279_v31 = vmul.f32 %v6189_v17, %v6189_v17  ;;  %v1894_v37 = vsel %vm1864_vm3, %v6189_v17, 0.0  ;;  %v5655_v15 = vld [vmem:[%s12482_s0 + $0x308] sm:$0xff]   ;;  %5538 = vmatprep.mubr.msk.bf16.mxu1 %vm745_vm1, %v5654_v8 }
 0x107   :  { %13009 = vst [vmem:[#allocation17_spill] sm:$0xff] %v6185_v14  ;;  %v2483_v19 = vsel %vm1864_vm3, %v2276_v13, 0.0  ;;  %v1890_v20 = vsel %vm1864_vm3, %v6185_v14, 0.0  ;;  %v2277_v21 = vmul.f32 %v6185_v14, %v6185_v14  ;;  %v2487_v44 = vsel %vm1864_vm3, %v2278_v22, 0.0  ;;  %5539 = vmatmul.mubr.msk.bf16.gmra.mrb[92].mxu1 %vm745_vm1, %v5655_v15 }
 0x108   :  { %v1891_v23 = vadd.f32 %v1890_v20, %v1889_v16  ;;  %v2484_v25 = vadd.f32 %v2483_v19, %v2482_v18  ;;  %v2489_v55 = vsel %vm1864_vm3, %v2279_v31, 0.0 }
 0x109   :  { %v2485_v26 = vsel %vm1864_vm3, %v2277_v21, 0.0  ;;  %v5364_v27 = vpop.f32.mrb[16].mxu0 }
 0x10a   :  { %v1893_v32 = vadd.f32 %v1892_v24, %v1891_v23  ;;  %v1145_v33 = vpop.f32.mrb[17].mxu0  ;;  %v2486_v38 = vadd.f32 %v2485_v26, %v2484_v25  ;;  %v6217_v49 = vadd.f32 %v5364_v27, %v6045_v35 }
 0x10b   :  { %v6212_v39 = vadd.f32 %v1145_v33, %v6045_v35  ;;  %v5365_v43 = vpop.f32.mrb[18].mxu0 }
 0x10c   :  { %v1895_v48 = vadd.f32 %v1894_v37, %v1893_v32  ;;  %13012 = vst [vmem:[#allocation20_spill] sm:$0xff] %v6217_v49  ;;  %v1148_v50 = vpop.f32.mrb[19].mxu0  ;;  %v2488_v51 = vadd.f32 %v2487_v44, %v2486_v38  ;;  %v6229_v57 = vadd.f32 %v5365_v43, %v6045_v35  ;;  %v2282_v62 = vmul.f32 %v6217_v49, %v6217_v49 }
 0x10d   :  { %13011 = vst [vmem:[#allocation19_spill] sm:$0xff] %v6212_v39  ;;  %v1896_v52 = vsel %vm1864_vm3, %v6212_v39, 0.0  ;;  %v2280_v53 = vmul.f32 %v6212_v39, %v6212_v39  ;;  %v6225_v54 = vadd.f32 %v1148_v50, %v6045_v35  ;;  %v1900_v1 = vsel %vm1864_vm3, %v6217_v49, 0.0 }
 0x10e   :  { %v1897_v56 = vadd.f32 %v1896_v52, %v1895_v48  ;;  %13014 = vst [vmem:[#allocation22_spill] sm:$0xff] %v6229_v57  ;;  %v2490_v58 = vadd.f32 %v2489_v55, %v2488_v51  ;;  %v2283_v10 = vmul.f32 %v6229_v57, %v6229_v57  ;;  %v1902_v16 = vsel %vm1864_vm3, %v6229_v57, 0.0 }
 0x10f   :  { %13013 = vst [vmem:[#allocation21_spill] sm:$0xff] %v6225_v54  ;;  %v2491_v59 = vsel %vm1864_vm3, %v2280_v53, 0.0  ;;  %v1898_v60 = vsel %vm1864_vm3, %v6225_v54, 0.0  ;;  %v2281_v61 = vmul.f32 %v6225_v54, %v6225_v54  ;;  %v2495_v21 = vsel %vm1864_vm3, %v2282_v62, 0.0 }
 0x110   :  { %v1899_v63 = vadd.f32 %v1898_v60, %v1897_v56  ;;  %v2492_v3 = vadd.f32 %v2491_v59, %v2490_v58  ;;  %v2497_v31 = vsel %vm1864_vm3, %v2283_v10, 0.0 }
 0x111   :  { %v2493_v5 = vsel %vm1864_vm3, %v2281_v61, 0.0  ;;  %v5368_v6 = vpop.f32.mrb[20].mxu0 }
 0x112   :  { %v1901_v11 = vadd.f32 %v1900_v1, %v1899_v63  ;;  %v1161_v13 = vpop.f32.mrb[21].mxu0  ;;  %v2494_v18 = vadd.f32 %v2493_v5, %v2492_v3  ;;  %v6257_v23 = vadd.f32 %v5368_v6, %v6045_v35 }
 0x113   :  { %v6252_v19 = vadd.f32 %v1161_v13, %v6045_v35  ;;  %v5369_v20 = vpop.f32.mrb[22].mxu0 }
 0x114   :  { %v1903_v22 = vadd.f32 %v1902_v16, %v1901_v11  ;;  %13016 = vst [vmem:[#allocation24_spill] sm:$0xff] %v6257_v23  ;;  %v1164_v24 = vpop.f32.mrb[23].mxu0  ;;  %v2496_v25 = vadd.f32 %v2495_v21, %v2494_v18  ;;  %v6269_v33 = vadd.f32 %v5369_v20, %v6045_v35  ;;  %v2286_v44 = vmul.f32 %v6257_v23, %v6257_v23 }
 0x115   :  { %13015 = vst [vmem:[#allocation23_spill] sm:$0xff] %v6252_v19  ;;  %v1904_v26 = vsel %vm1864_vm3, %v6252_v19, 0.0  ;;  %v2284_v27 = vmul.f32 %v6252_v19, %v6252_v19  ;;  %v6265_v28 = vadd.f32 %v1164_v24, %v6045_v35  ;;  %v1908_v50 = vsel %vm1864_vm3, %v6257_v23, 0.0 }
 0x116   :  { %v1905_v32 = vadd.f32 %v1904_v26, %v1903_v22  ;;  %13018 = vst [vmem:[#allocation26_spill] sm:$0xff] %v6269_v33  ;;  %v2498_v36 = vadd.f32 %v2497_v31, %v2496_v25  ;;  %v2287_v55 = vmul.f32 %v6269_v33, %v6269_v33  ;;  %v1910_v59 = vsel %vm1864_vm3, %v6269_v33, 0.0 }
 0x117   :  { %13017 = vst [vmem:[#allocation25_spill] sm:$0xff] %v6265_v28  ;;  %v2499_v37 = vsel %vm1864_vm3, %v2284_v27, 0.0  ;;  %v1906_v38 = vsel %vm1864_vm3, %v6265_v28, 0.0  ;;  %v2285_v43 = vmul.f32 %v6265_v28, %v6265_v28  ;;  %v2503_v63 = vsel %vm1864_vm3, %v2286_v44, 0.0 }
 0x118   :  { %v1907_v48 = vadd.f32 %v1906_v38, %v1905_v32  ;;  %v2500_v51 = vadd.f32 %v2499_v37, %v2498_v36  ;;  %v2505_v13 = vsel %vm1864_vm3, %v2287_v55, 0.0 }
 0x119   :  { %v2501_v52 = vsel %vm1864_vm3, %v2285_v43, 0.0  ;;  %v5372_v53 = vpop.f32.mrb[24].mxu0 }
 0x11a   :  { %v1909_v56 = vadd.f32 %v1908_v50, %v1907_v48  ;;  %v1177_v58 = vpop.f32.mrb[25].mxu0  ;;  %v2502_v60 = vadd.f32 %v2501_v52, %v2500_v51  ;;  %v6290_v3 = vadd.f32 %v5372_v53, %v6045_v35 }
 0x11b   :  { %v6286_v61 = vadd.f32 %v1177_v58, %v6045_v35  ;;  %v5373_v62 = vpop.f32.mrb[26].mxu0 }
 0x11c   :  { %v1911_v1 = vadd.f32 %v1910_v59, %v1909_v56  ;;  %13020 = vst [vmem:[#allocation28_spill] sm:$0xff] %v6290_v3  ;;  %v1180_v5 = vpop.f32.mrb[27].mxu0  ;;  %v2504_v6 = vadd.f32 %v2503_v63, %v2502_v60  ;;  %v6301_v16 = vadd.f32 %v5373_v62, %v6045_v35  ;;  %v2290_v24 = vmul.f32 %v6290_v3, %v6290_v3 }
 0x11d   :  { %13019 = vst [vmem:[#allocation27_spill] sm:$0xff] %v6286_v61  ;;  %v1912_v8 = vsel %vm1864_vm3, %v6286_v61, 0.0  ;;  %v2288_v10 = vmul.f32 %v6286_v61, %v6286_v61  ;;  %v6297_v11 = vadd.f32 %v1180_v5, %v6045_v35  ;;  %v1916_v26 = vsel %vm1864_vm3, %v6290_v3, 0.0 }
 0x11e   :  { %v1913_v15 = vadd.f32 %v1912_v8, %v1911_v1  ;;  %13022 = vst [vmem:[#allocation30_spill] sm:$0xff] %v6301_v16  ;;  %v2506_v18 = vadd.f32 %v2505_v13, %v2504_v6  ;;  %v2291_v36 = vmul.f32 %v6301_v16, %v6301_v16  ;;  %v1918_v43 = vsel %vm1864_vm3, %v6301_v16, 0.0 }
 0x11f   :  { %13021 = vst [vmem:[#allocation29_spill] sm:$0xff] %v6297_v11  ;;  %v2507_v20 = vsel %vm1864_vm3, %v2288_v10, 0.0  ;;  %v1914_v21 = vsel %vm1864_vm3, %v6297_v11, 0.0  ;;  %v2289_v22 = vmul.f32 %v6297_v11, %v6297_v11  ;;  %v2511_v51 = vsel %vm1864_vm3, %v2290_v24, 0.0 }
 0x120   :  { %v1915_v25 = vadd.f32 %v1914_v21, %v1913_v15  ;;  %v2508_v27 = vadd.f32 %v2507_v20, %v2506_v18  ;;  %v2513_v62 = vsel %vm1864_vm3, %v2291_v36, 0.0 }
 0x121   :  { %v2509_v31 = vsel %vm1864_vm3, %v2289_v22, 0.0  ;;  %v5376_v32 = vpop.f32.mrb[28].mxu0 }
 0x122   :  { %v1917_v37 = vadd.f32 %v1916_v26, %v1915_v25  ;;  %v1193_v38 = vpop.f32.mrb[29].mxu0  ;;  %v2510_v44 = vadd.f32 %v2509_v31, %v2508_v27  ;;  %v6322_v53 = vadd.f32 %v5376_v32, %v6045_v35 }
 0x123   :  { %v6318_v48 = vadd.f32 %v1193_v38, %v6045_v35  ;;  %v5377_v50 = vpop.f32.mrb[30].mxu0 }
 0x124   :  { %v1919_v52 = vadd.f32 %v1918_v43, %v1917_v37  ;;  %13024 = vst [vmem:[#allocation32_spill] sm:$0xff] %v6322_v53  ;;  %v1196_v55 = vpop.f32.mrb[31].mxu0  ;;  %v2512_v56 = vadd.f32 %v2511_v51, %v2510_v44  ;;  %v6333_v1 = vadd.f32 %v5377_v50, %v6045_v35  ;;  %v2294_v13 = vmul.f32 %v6322_v53, %v6322_v53 }
 0x125   :  { %13023 = vst [vmem:[#allocation31_spill] sm:$0xff] %v6318_v48  ;;  %v1920_v58 = vsel %vm1864_vm3, %v6318_v48, 0.0  ;;  %v2292_v59 = vmul.f32 %v6318_v48, %v6318_v48  ;;  %v6329_v60 = vadd.f32 %v1196_v55, %v6045_v35  ;;  %v1924_v18 = vsel %vm1864_vm3, %v6322_v53, 0.0 }
 0x126   :  { %v1921_v63 = vadd.f32 %v1920_v58, %v1919_v52  ;;  %13026 = vst [vmem:[#allocation34_spill] sm:$0xff] %v6333_v1  ;;  %v2514_v5 = vadd.f32 %v2513_v62, %v2512_v56  ;;  %v2295_v24 = vmul.f32 %v6333_v1, %v6333_v1  ;;  %v1926_v27 = vsel %vm1864_vm3, %v6333_v1, 0.0 }
 0x127   :  { %13025 = vst [vmem:[#allocation33_spill] sm:$0xff] %v6329_v60  ;;  %v2515_v6 = vsel %vm1864_vm3, %v2292_v59, 0.0  ;;  %v1922_v8 = vsel %vm1864_vm3, %v6329_v60, 0.0  ;;  %v2293_v10 = vmul.f32 %v6329_v60, %v6329_v60  ;;  %v2519_v37 = vsel %vm1864_vm3, %v2294_v13, 0.0 }
 0x128   :  { %v1923_v15 = vadd.f32 %v1922_v8, %v1921_v63  ;;  %v2516_v20 = vadd.f32 %v2515_v6, %v2514_v5  ;;  %v2521_v56 = vsel %vm1864_vm3, %v2295_v24, 0.0  ;;  %v6372_v8 = vpop.f32.mrb[0].mxu1 }
 0x129   :  { %v2517_v21 = vsel %vm1864_vm3, %v2293_v10, 0.0  ;;  %v5380_v22 = vpop.f32.mrb[32].mxu0 }
 0x12a   :  { %v1925_v25 = vadd.f32 %v1924_v18, %v1923_v15  ;;  %v1209_v26 = vpop.f32.mrb[33].mxu0  ;;  %v2518_v31 = vadd.f32 %v2517_v21, %v2516_v20  ;;  %v6354_v43 = vadd.f32 %v5380_v22, %v6045_v35  ;;  %v6376_v15 = vpop.f32.mrb[1].mxu1 }
 0x12b   :  { %v6350_v32 = vadd.f32 %v1209_v26, %v6045_v35  ;;  %v5381_v36 = vpop.f32.mrb[34].mxu0  ;;  %v6381_v24 = vpop.f32.mrb[2].mxu1 }
 0x12c   :  { %v1927_v38 = vadd.f32 %v1926_v27, %v1925_v25  ;;  %13028 = vst [vmem:[#allocation36_spill] sm:$0xff] %v6354_v43  ;;  %v1212_v44 = vpop.f32.mrb[35].mxu0  ;;  %v2520_v50 = vadd.f32 %v2519_v37, %v2518_v31  ;;  %v6365_v59 = vadd.f32 %v5381_v36, %v6045_v35  ;;  %v2298_v10 = vmul.f32 %v6354_v43, %v6354_v43  ;;  %v6385_v31 = vpop.f32.mrb[3].mxu1 }
 0x12d   :  { %13027 = vst [vmem:[#allocation35_spill] sm:$0xff] %v6350_v32  ;;  %v1928_v51 = vsel %vm1864_vm3, %v6350_v32, 0.0  ;;  %v2296_v52 = vmul.f32 %v6350_v32, %v6350_v32  ;;  %v6361_v55 = vadd.f32 %v1212_v44, %v6045_v35  ;;  %v1932_v18 = vsel %vm1864_vm3, %v6354_v43, 0.0 }
 0x12e   :  { %v1929_v58 = vadd.f32 %v1928_v51, %v1927_v38  ;;  %13030 = vst [vmem:[#allocation38_spill] sm:$0xff] %v6365_v59  ;;  %v2522_v62 = vadd.f32 %v2521_v56, %v2520_v50  ;;  %v2299_v25 = vmul.f32 %v6365_v59, %v6365_v59  ;;  %v1934_v36 = vsel %vm1864_vm3, %v6365_v59, 0.0 }
 0x12f   :  { %13029 = vst [vmem:[#allocation37_spill] sm:$0xff] %v6361_v55  ;;  %v2523_v63 = vsel %vm1864_vm3, %v2296_v52, 0.0  ;;  %v1930_v5 = vsel %vm1864_vm3, %v6361_v55, 0.0  ;;  %v2297_v6 = vmul.f32 %v6361_v55, %v6361_v55  ;;  %v2527_v50 = vsel %vm1864_vm3, %v2298_v10, 0.0 }
 0x130   :  { %v1931_v13 = vadd.f32 %v1930_v5, %v1929_v58  ;;  %v2524_v20 = vadd.f32 %v2523_v63, %v2522_v62 }
 0x131   :  { %v2525_v21 = vsel %vm1864_vm3, %v2297_v6, 0.0  ;;  %v5384_v22 = vpop.f32.mrb[36].mxu0  ;;  %v2529_v6 = vsel %vm1864_vm3, %v2299_v25, 0.0 }
 0x132   :  { %v1933_v26 = vadd.f32 %v1932_v18, %v1931_v13  ;;  %v1225_v27 = vpop.f32.mrb[37].mxu0  ;;  %v2526_v37 = vadd.f32 %v2525_v21, %v2524_v20  ;;  %v6394_v52 = vadd.f32 %v5384_v22, %v6045_v35 }
 0x133   :  { %v6390_v38 = vadd.f32 %v1225_v27, %v6045_v35  ;;  %v5385_v44 = vpop.f32.mrb[38].mxu0 }
 0x134   :  { %v1935_v51 = vadd.f32 %v1934_v36, %v1933_v26  ;;  %13032 = vst [vmem:[#allocation40_spill] sm:$0xff] %v6394_v52  ;;  %v1228_v56 = vpop.f32.mrb[39].mxu0  ;;  %v2528_v58 = vadd.f32 %v2527_v50, %v2526_v37  ;;  %v6405_v10 = vadd.f32 %v5385_v44, %v6045_v35  ;;  %v6412_v26 = vpop.f32.mrb[4].mxu1  ;;  %v2302_v27 = vmul.f32 %v6394_v52, %v6394_v52 }
 0x135   :  { %13031 = vst [vmem:[#allocation39_spill] sm:$0xff] %v6390_v38  ;;  %v1936_v62 = vsel %vm1864_vm3, %v6390_v38, 0.0  ;;  %v2300_v63 = vmul.f32 %v6390_v38, %v6390_v38  ;;  %v6401_v5 = vadd.f32 %v1228_v56, %v6045_v35  ;;  %v6416_v25 = vpop.f32.mrb[5].mxu1  ;;  %v1940_v37 = vsel %vm1864_vm3, %v6394_v52, 0.0 }
 0x136   :  { %v1937_v13 = vadd.f32 %v1936_v62, %v1935_v51  ;;  %13034 = vst [vmem:[#allocation42_spill] sm:$0xff] %v6405_v10  ;;  %v2530_v18 = vadd.f32 %v2529_v6, %v2528_v58  ;;  %v6421_v56 = vpop.f32.mrb[6].mxu1  ;;  %v2303_v58 = vmul.f32 %v6405_v10, %v6405_v10 }
 0x137   :  { %13033 = vst [vmem:[#allocation41_spill] sm:$0xff] %v6401_v5  ;;  %v2531_v20 = vsel %vm1864_vm3, %v2300_v63, 0.0  ;;  %v1938_v21 = vsel %vm1864_vm3, %v6401_v5, 0.0  ;;  %v2301_v22 = vmul.f32 %v6401_v5, %v6401_v5  ;;  %v6425_v6 = vpop.f32.mrb[7].mxu1 }
 0x138   :  { %v1939_v36 = vadd.f32 %v1938_v21, %v1937_v13  ;;  %v2532_v44 = vadd.f32 %v2531_v20, %v2530_v18  ;;  %v1942_v13 = vsel %vm1864_vm3, %v6405_v10, 0.0  ;;  %v2535_v20 = vsel %vm1864_vm3, %v2302_v27, 0.0 }
 0x139   :  { %v2533_v50 = vsel %vm1864_vm3, %v2301_v22, 0.0  ;;  %v5388_v51 = vpop.f32.mrb[40].mxu0 }
 0x13a   :  { %v1941_v62 = vadd.f32 %v1940_v37, %v1939_v36  ;;  %v1241_v63 = vpop.f32.mrb[41].mxu0  ;;  %v2534_v21 = vadd.f32 %v2533_v50, %v2532_v44  ;;  %v6434_v52 = vadd.f32 %v5388_v51, %v6045_v35  ;;  %v2537_v50 = vsel %vm1864_vm3, %v2303_v58, 0.0 }
 0x13b   :  { %v6430_v5 = vadd.f32 %v1241_v63, %v6045_v35  ;;  %v5389_v18 = vpop.f32.mrb[42].mxu0 }
 0x13c   :  { %v1943_v22 = vadd.f32 %v1942_v13, %v1941_v62  ;;  %13036 = vst [vmem:[#allocation44_spill] sm:$0xff] %v6434_v52  ;;  %v1244_v38 = vpop.f32.mrb[43].mxu0  ;;  %v2536_v59 = vadd.f32 %v2535_v20, %v2534_v21  ;;  %v6445_v27 = vadd.f32 %v5389_v18, %v6045_v35  ;;  %v6452_v20 = vpop.f32.mrb[8].mxu1  ;;  %v1948_v18 = vsel %vm1864_vm3, %v6434_v52, 0.0 }
 0x13d   :  { %13035 = vst [vmem:[#allocation43_spill] sm:$0xff] %v6430_v5  ;;  %v1944_v36 = vsel %vm1864_vm3, %v6430_v5, 0.0  ;;  %v2304_v37 = vmul.f32 %v6430_v5, %v6430_v5  ;;  %v6441_v44 = vadd.f32 %v1244_v38, %v6045_v35  ;;  %v2306_v38 = vmul.f32 %v6434_v52, %v6434_v52  ;;  %v6456_v58 = vpop.f32.mrb[9].mxu1 }
 0x13e   :  { %v1945_v63 = vadd.f32 %v1944_v36, %v1943_v22  ;;  %13038 = vst [vmem:[#allocation46_spill] sm:$0xff] %v6445_v27  ;;  %v2538_v62 = vadd.f32 %v2537_v50, %v2536_v59  ;;  %v2307_v50 = vmul.f32 %v6445_v27, %v6445_v27 }
 0x13f   :  { %13037 = vst [vmem:[#allocation45_spill] sm:$0xff] %v6441_v44  ;;  %v2539_v51 = vsel %vm1864_vm3, %v2304_v37, 0.0  ;;  %v1946_v13 = vsel %vm1864_vm3, %v6441_v44, 0.0  ;;  %v2305_v21 = vmul.f32 %v6441_v44, %v6441_v44  ;;  %v6461_v37 = vpop.f32.mrb[10].mxu1 }
 0x140   :  { %v1947_v5 = vadd.f32 %v1946_v13, %v1945_v63  ;;  %v2540_v59 = vadd.f32 %v2539_v51, %v2538_v62  ;;  %v6465_v43 = vpop.f32.mrb[11].mxu1  ;;  %v1950_v63 = vsel %vm1864_vm3, %v6445_v27, 0.0  ;;  %v2543_v51 = vsel %vm1864_vm3, %v2306_v38, 0.0 }
 0x141   :  { %v2541_v22 = vsel %vm1864_vm3, %v2305_v21, 0.0  ;;  %v5392_v36 = vpop.f32.mrb[44].mxu0 }
 0x142   :  { %v1949_v44 = vadd.f32 %v1948_v18, %v1947_v5  ;;  %v1257_v10 = vpop.f32.mrb[45].mxu0  ;;  %v2542_v13 = vadd.f32 %v2541_v22, %v2540_v59  ;;  %v6474_v52 = vadd.f32 %v5392_v36, %v6045_v35 }
 0x143   :  { %v6470_v55 = vadd.f32 %v1257_v10, %v6045_v35  ;;  %v5393_v62 = vpop.f32.mrb[46].mxu0  ;;  %v2545_v10 = vsel %vm1864_vm3, %v2307_v50, 0.0 }
 0x144   :  { %v1951_v21 = vadd.f32 %v1950_v63, %v1949_v44  ;;  %13040 = vst [vmem:[#allocation48_spill] sm:$0xff] %v6474_v52  ;;  %v1260_v32 = vpop.f32.mrb[47].mxu0  ;;  %v2544_v1 = vadd.f32 %v2543_v51, %v2542_v13  ;;  %v6485_v38 = vadd.f32 %v5393_v62, %v6045_v35  ;;  %v6492_v51 = vpop.f32.mrb[12].mxu1  ;;  %v1956_v62 = vsel %vm1864_vm3, %v6474_v52, 0.0 }
 0x145   :  { %13039 = vst [vmem:[#allocation47_spill] sm:$0xff] %v6470_v55  ;;  %v1952_v5 = vsel %vm1864_vm3, %v6470_v55, 0.0  ;;  %v2308_v18 = vmul.f32 %v6470_v55, %v6470_v55  ;;  %v6481_v59 = vadd.f32 %v1260_v32, %v6045_v35  ;;  %v2310_v32 = vmul.f32 %v6474_v52, %v6474_v52  ;;  %v6496_v50 = vpop.f32.mrb[13].mxu1 }
 0x146   :  { %v1953_v22 = vadd.f32 %v1952_v5, %v1951_v21  ;;  %13042 = vst [vmem:[#allocation50_spill] sm:$0xff] %v6485_v38  ;;  %v2546_v44 = vadd.f32 %v2545_v10, %v2544_v1  ;;  %v2311_v10 = vmul.f32 %v6485_v38, %v6485_v38 }
 0x147   :  { %13041 = vst [vmem:[#allocation49_spill] sm:$0xff] %v6481_v59  ;;  %v2547_v36 = vsel %vm1864_vm3, %v2308_v18, 0.0  ;;  %v1954_v63 = vsel %vm1864_vm3, %v6481_v59, 0.0  ;;  %v2309_v13 = vmul.f32 %v6481_v59, %v6481_v59  ;;  %v6501_v18 = vpop.f32.mrb[14].mxu1 }
 0x148   :  { %v1955_v55 = vadd.f32 %v1954_v63, %v1953_v22  ;;  %v2548_v1 = vadd.f32 %v2547_v36, %v2546_v44  ;;  %v6505_v53 = vpop.f32.mrb[15].mxu1  ;;  %v1958_v22 = vsel %vm1864_vm3, %v6485_v38, 0.0  ;;  %v2551_v36 = vsel %vm1864_vm3, %v2310_v32, 0.0 }
 0x149   :  { %v2549_v21 = vsel %vm1864_vm3, %v2309_v13, 0.0  ;;  %v5396_v5 = vpop.f32.mrb[48].mxu0 }
 0x14a   :  { %v1957_v59 = vadd.f32 %v1956_v62, %v1955_v55  ;;  %v1273_v27 = vpop.f32.mrb[49].mxu0  ;;  %v2550_v63 = vadd.f32 %v2549_v21, %v2548_v1  ;;  %v6514_v52 = vadd.f32 %v5396_v5, %v6045_v35 }
 0x14b   :  { %v6510_v60 = vadd.f32 %v1273_v27, %v6045_v35  ;;  %v5397_v44 = vpop.f32.mrb[50].mxu0  ;;  %v2553_v27 = vsel %vm1864_vm3, %v2311_v10, 0.0 }
 0x14c   :  { %v1959_v13 = vadd.f32 %v1958_v22, %v1957_v59  ;;  %13044 = vst [vmem:[#allocation52_spill] sm:$0xff] %v6514_v52  ;;  %v1276_v48 = vpop.f32.mrb[51].mxu0  ;;  %v2552_v16 = vadd.f32 %v2551_v36, %v2550_v63  ;;  %v6525_v32 = vadd.f32 %v5397_v44, %v6045_v35  ;;  %v6532_v36 = vpop.f32.mrb[16].mxu1  ;;  %v1964_v44 = vsel %vm1864_vm3, %v6514_v52, 0.0 }
 0x14d   :  { %13043 = vst [vmem:[#allocation51_spill] sm:$0xff] %v6510_v60  ;;  %v1960_v55 = vsel %vm1864_vm3, %v6510_v60, 0.0  ;;  %v2312_v62 = vmul.f32 %v6510_v60, %v6510_v60  ;;  %v6521_v1 = vadd.f32 %v1276_v48, %v6045_v35  ;;  %v2314_v48 = vmul.f32 %v6514_v52, %v6514_v52  ;;  %v6536_v10 = vpop.f32.mrb[17].mxu1 }
 0x14e   :  { %v1961_v21 = vadd.f32 %v1960_v55, %v1959_v13  ;;  %13046 = vst [vmem:[#allocation54_spill] sm:$0xff] %v6525_v32  ;;  %v2554_v59 = vadd.f32 %v2553_v27, %v2552_v16  ;;  %v2315_v27 = vmul.f32 %v6525_v32, %v6525_v32 }
 0x14f   :  { %13045 = vst [vmem:[#allocation53_spill] sm:$0xff] %v6521_v1  ;;  %v2555_v5 = vsel %vm1864_vm3, %v2312_v62, 0.0  ;;  %v1962_v22 = vsel %vm1864_vm3, %v6521_v1, 0.0  ;;  %v2313_v63 = vmul.f32 %v6521_v1, %v6521_v1  ;;  %v6541_v62 = vpop.f32.mrb[18].mxu1 }
 0x150   :  { %v1963_v60 = vadd.f32 %v1962_v22, %v1961_v21  ;;  %v2556_v16 = vadd.f32 %v2555_v5, %v2554_v59  ;;  %v6545_v3 = vpop.f32.mrb[19].mxu1  ;;  %v1966_v21 = vsel %vm1864_vm3, %v6525_v32, 0.0  ;;  %v2559_v5 = vsel %vm1864_vm3, %v2314_v48, 0.0 }
 0x151   :  { %v2557_v13 = vsel %vm1864_vm3, %v2313_v63, 0.0  ;;  %v5400_v55 = vpop.f32.mrb[52].mxu0 }
 0x152   :  { %v1965_v1 = vadd.f32 %v1964_v44, %v1963_v60  ;;  %v1289_v38 = vpop.f32.mrb[53].mxu0  ;;  %v2558_v22 = vadd.f32 %v2557_v13, %v2556_v16  ;;  %v6554_v52 = vadd.f32 %v5400_v55, %v6045_v35 }
 0x153   :  { %v6550_v11 = vadd.f32 %v1289_v38, %v6045_v35  ;;  %v5401_v59 = vpop.f32.mrb[54].mxu0  ;;  %v2561_v38 = vsel %vm1864_vm3, %v2315_v27, 0.0 }
 0x154   :  { %v1967_v63 = vadd.f32 %v1966_v21, %v1965_v1  ;;  %13048 = vst [vmem:[#allocation56_spill] sm:$0xff] %v6554_v52  ;;  %v1292_v61 = vpop.f32.mrb[55].mxu0  ;;  %v2560_v33 = vadd.f32 %v2559_v5, %v2558_v22  ;;  %v6565_v48 = vadd.f32 %v5401_v59, %v6045_v35  ;;  %v6572_v5 = vpop.f32.mrb[20].mxu1  ;;  %v1972_v59 = vsel %vm1864_vm3, %v6554_v52, 0.0 }
 0x155   :  { %13047 = vst [vmem:[#allocation55_spill] sm:$0xff] %v6550_v11  ;;  %v1968_v60 = vsel %vm1864_vm3, %v6550_v11, 0.0  ;;  %v2316_v44 = vmul.f32 %v6550_v11, %v6550_v11  ;;  %v6561_v16 = vadd.f32 %v1292_v61, %v6045_v35  ;;  %v2318_v61 = vmul.f32 %v6554_v52, %v6554_v52  ;;  %v6576_v27 = vpop.f32.mrb[21].mxu1 }
 0x156   :  { %v1969_v13 = vadd.f32 %v1968_v60, %v1967_v63  ;;  %13050 = vst [vmem:[#allocation58_spill] sm:$0xff] %v6565_v48  ;;  %v2562_v1 = vadd.f32 %v2561_v38, %v2560_v33  ;;  %v2319_v38 = vmul.f32 %v6565_v48, %v6565_v48 }
 0x157   :  { %13049 = vst [vmem:[#allocation57_spill] sm:$0xff] %v6561_v16  ;;  %v2563_v55 = vsel %vm1864_vm3, %v2316_v44, 0.0  ;;  %v1970_v21 = vsel %vm1864_vm3, %v6561_v16, 0.0  ;;  %v2317_v22 = vmul.f32 %v6561_v16, %v6561_v16  ;;  %v6581_v44 = vpop.f32.mrb[22].mxu1 }
 0x158   :  { %v1971_v11 = vadd.f32 %v1970_v21, %v1969_v13  ;;  %v2564_v33 = vadd.f32 %v2563_v55, %v2562_v1  ;;  %v6585_v23 = vpop.f32.mrb[23].mxu1  ;;  %v1974_v13 = vsel %vm1864_vm3, %v6565_v48, 0.0  ;;  %v2567_v55 = vsel %vm1864_vm3, %v2318_v61, 0.0 }
 0x159   :  { %v2565_v63 = vsel %vm1864_vm3, %v2317_v22, 0.0  ;;  %v5404_v60 = vpop.f32.mrb[56].mxu0 }
 0x15a   :  { %v1973_v16 = vadd.f32 %v1972_v59, %v1971_v11  ;;  %v1305_v32 = vpop.f32.mrb[57].mxu0  ;;  %v2566_v21 = vadd.f32 %v2565_v63, %v2564_v33  ;;  %v6594_v52 = vadd.f32 %v5404_v60, %v6045_v35 }
 0x15b   :  { %v6590_v28 = vadd.f32 %v1305_v32, %v6045_v35  ;;  %v5405_v1 = vpop.f32.mrb[58].mxu0  ;;  %v2569_v32 = vsel %vm1864_vm3, %v2319_v38, 0.0 }
 0x15c   :  { %v1975_v22 = vadd.f32 %v1974_v13, %v1973_v16  ;;  %13052 = vst [vmem:[#allocation60_spill] sm:$0xff] %v6594_v52  ;;  %v1308_v19 = vpop.f32.mrb[59].mxu0  ;;  %v2568_v57 = vadd.f32 %v2567_v55, %v2566_v21  ;;  %v6605_v61 = vadd.f32 %v5405_v1, %v6045_v35  ;;  %v6612_v55 = vpop.f32.mrb[24].mxu1  ;;  %v1980_v1 = vsel %vm1864_vm3, %v6594_v52, 0.0 }
 0x15d   :  { %13051 = vst [vmem:[#allocation59_spill] sm:$0xff] %v6590_v28  ;;  %v1976_v11 = vsel %vm1864_vm3, %v6590_v28, 0.0  ;;  %v2320_v59 = vmul.f32 %v6590_v28, %v6590_v28  ;;  %v6601_v33 = vadd.f32 %v1308_v19, %v6045_v35  ;;  %v2322_v19 = vmul.f32 %v6594_v52, %v6594_v52  ;;  %v6616_v38 = vpop.f32.mrb[25].mxu1 }
 0x15e   :  { %v1977_v63 = vadd.f32 %v1976_v11, %v1975_v22  ;;  %13054 = vst [vmem:[#allocation62_spill] sm:$0xff] %v6605_v61  ;;  %v2570_v16 = vadd.f32 %v2569_v32, %v2568_v57  ;;  %v2323_v32 = vmul.f32 %v6605_v61, %v6605_v61 }
 0x15f   :  { %13053 = vst [vmem:[#allocation61_spill] sm:$0xff] %v6601_v33  ;;  %v2571_v60 = vsel %vm1864_vm3, %v2320_v59, 0.0  ;;  %v1978_v13 = vsel %vm1864_vm3, %v6601_v33, 0.0  ;;  %v2321_v21 = vmul.f32 %v6601_v33, %v6601_v33  ;;  %v6621_v59 = vpop.f32.mrb[26].mxu1 }
 0x160   :  { %v1979_v28 = vadd.f32 %v1978_v13, %v1977_v63  ;;  %v2572_v57 = vadd.f32 %v2571_v60, %v2570_v16  ;;  %v6625_v49 = vpop.f32.mrb[27].mxu1  ;;  %v1982_v63 = vsel %vm1864_vm3, %v6605_v61, 0.0  ;;  %v2575_v60 = vsel %vm1864_vm3, %v2322_v19, 0.0 }
 0x161   :  { %v2573_v22 = vsel %vm1864_vm3, %v2321_v21, 0.0  ;;  %v5408_v11 = vpop.f32.mrb[60].mxu0 }
 0x162   :  { %v1981_v33 = vadd.f32 %v1980_v1, %v1979_v28  ;;  %v1321_v48 = vpop.f32.mrb[61].mxu0  ;;  %v2574_v13 = vadd.f32 %v2573_v22, %v2572_v57  ;;  %v6634_v52 = vadd.f32 %v5408_v11, %v6045_v35 }
 0x163   :  { %v6630_v54 = vadd.f32 %v1321_v48, %v6045_v35  ;;  %v5409_v16 = vpop.f32.mrb[62].mxu0  ;;  %v2577_v48 = vsel %vm1864_vm3, %v2323_v32, 0.0 }
 0x164   :  { %v1983_v21 = vadd.f32 %v1982_v63, %v1981_v33  ;;  %13056 = vst [vmem:[#allocation64_spill] sm:$0xff] %v6634_v52  ;;  %v1324_v39 = vpop.f32.mrb[63].mxu0  ;;  %v2576_v17 = vadd.f32 %v2575_v60, %v2574_v13  ;;  %v6645_v19 = vadd.f32 %v5409_v16, %v6045_v35  ;;  %v6652_v60 = vpop.f32.mrb[28].mxu1  ;;  %v1988_v16 = vsel %vm1864_vm3, %v6634_v52, 0.0 }
 0x165   :  { %13055 = vst [vmem:[#allocation63_spill] sm:$0xff] %v6630_v54  ;;  %v1984_v28 = vsel %vm1864_vm3, %v6630_v54, 0.0  ;;  %v2324_v1 = vmul.f32 %v6630_v54, %v6630_v54  ;;  %v6641_v57 = vadd.f32 %v1324_v39, %v6045_v35  ;;  %v2326_v39 = vmul.f32 %v6634_v52, %v6634_v52  ;;  %v6656_v32 = vpop.f32.mrb[29].mxu1 }
 0x166   :  { %v1985_v22 = vadd.f32 %v1984_v28, %v1983_v21  ;;  %13058 = vst [vmem:[#allocation66_spill] sm:$0xff] %v6645_v19  ;;  %v2578_v33 = vadd.f32 %v2577_v48, %v2576_v17  ;;  %v2327_v48 = vmul.f32 %v6645_v19, %v6645_v19 }
 0x167   :  { %13057 = vst [vmem:[#allocation65_spill] sm:$0xff] %v6641_v57  ;;  %v2579_v11 = vsel %vm1864_vm3, %v2324_v1, 0.0  ;;  %v1986_v63 = vsel %vm1864_vm3, %v6641_v57, 0.0  ;;  %v2325_v13 = vmul.f32 %v6641_v57, %v6641_v57  ;;  %v6661_v1 = vpop.f32.mrb[30].mxu1 }
 0x168   :  { %v1987_v54 = vadd.f32 %v1986_v63, %v1985_v22  ;;  %v2580_v17 = vadd.f32 %v2579_v11, %v2578_v33  ;;  %v6665_v7 = vpop.f32.mrb[31].mxu1  ;;  %v1990_v22 = vsel %vm1864_vm3, %v6645_v19, 0.0  ;;  %v2583_v11 = vsel %vm1864_vm3, %v2326_v39, 0.0 }
 0x169   :  { %v2581_v21 = vsel %vm1864_vm3, %v2325_v13, 0.0  ;;  %v5412_v28 = vpop.f32.mrb[64].mxu0 }
 0x16a   :  { %v1989_v57 = vadd.f32 %v1988_v16, %v1987_v54  ;;  %v1337_v61 = vpop.f32.mrb[65].mxu0  ;;  %v2582_v63 = vadd.f32 %v2581_v21, %v2580_v17  ;;  %v6674_v52 = vadd.f32 %v5412_v28, %v6045_v35 }
 0x16b   :  { %v6670_v14 = vadd.f32 %v1337_v61, %v6045_v35  ;;  %v5413_v33 = vpop.f32.mrb[66].mxu0  ;;  %v2585_v61 = vsel %vm1864_vm3, %v2327_v48, 0.0 }
 0x16c   :  { %v1991_v13 = vadd.f32 %v1990_v22, %v1989_v57  ;;  %13060 = vst [vmem:[#allocation68_spill] sm:$0xff] %v6674_v52  ;;  %v1340_v2 = vpop.f32.mrb[67].mxu0  ;;  %v2584_v47 = vadd.f32 %v2583_v11, %v2582_v63  ;;  %v6685_v39 = vadd.f32 %v5413_v33, %v6045_v35  ;;  %v6692_v11 = vpop.f32.mrb[32].mxu1  ;;  %v1996_v33 = vsel %vm1864_vm3, %v6674_v52, 0.0 }
 0x16d   :  { %13059 = vst [vmem:[#allocation67_spill] sm:$0xff] %v6670_v14  ;;  %v1992_v54 = vsel %vm1864_vm3, %v6670_v14, 0.0  ;;  %v2328_v16 = vmul.f32 %v6670_v14, %v6670_v14  ;;  %v6681_v17 = vadd.f32 %v1340_v2, %v6045_v35  ;;  %v2330_v2 = vmul.f32 %v6674_v52, %v6674_v52  ;;  %v6696_v48 = vpop.f32.mrb[33].mxu1 }
 0x16e   :  { %v1993_v21 = vadd.f32 %v1992_v54, %v1991_v13  ;;  %13062 = vst [vmem:[#allocation70_spill] sm:$0xff] %v6685_v39  ;;  %v2586_v57 = vadd.f32 %v2585_v61, %v2584_v47  ;;  %v2331_v61 = vmul.f32 %v6685_v39, %v6685_v39 }
 0x16f   :  { %13061 = vst [vmem:[#allocation69_spill] sm:$0xff] %v6681_v17  ;;  %v2587_v28 = vsel %vm1864_vm3, %v2328_v16, 0.0  ;;  %v1994_v22 = vsel %vm1864_vm3, %v6681_v17, 0.0  ;;  %v2329_v63 = vmul.f32 %v6681_v17, %v6681_v17  ;;  %v6701_v16 = vpop.f32.mrb[34].mxu1 }
 0x170   :  { %v1995_v14 = vadd.f32 %v1994_v22, %v1993_v21  ;;  %v2588_v47 = vadd.f32 %v2587_v28, %v2586_v57  ;;  %v6705_v34 = vpop.f32.mrb[35].mxu1  ;;  %v1998_v21 = vsel %vm1864_vm3, %v6685_v39, 0.0  ;;  %v2591_v28 = vsel %vm1864_vm3, %v2330_v2, 0.0 }
 0x171   :  { %v2589_v13 = vsel %vm1864_vm3, %v2329_v63, 0.0  ;;  %v5416_v54 = vpop.f32.mrb[68].mxu0 }
 0x172   :  { %v1997_v17 = vadd.f32 %v1996_v33, %v1995_v14  ;;  %v1353_v19 = vpop.f32.mrb[69].mxu0  ;;  %v2590_v22 = vadd.f32 %v2589_v13, %v2588_v47  ;;  %v6714_v52 = vadd.f32 %v5416_v54, %v6045_v35 }
 0x173   :  { %v6710_v42 = vadd.f32 %v1353_v19, %v6045_v35  ;;  %v5417_v57 = vpop.f32.mrb[70].mxu0  ;;  %v2593_v19 = vsel %vm1864_vm3, %v2331_v61, 0.0 }
 0x174   :  { %v1999_v63 = vadd.f32 %v1998_v21, %v1997_v17  ;;  %13064 = vst [vmem:[#allocation72_spill] sm:$0xff] %v6714_v52  ;;  %v1356_v29 = vpop.f32.mrb[71].mxu0  ;;  %v2592_v12 = vadd.f32 %v2591_v28, %v2590_v22  ;;  %v6725_v2 = vadd.f32 %v5417_v57, %v6045_v35  ;;  %v6732_v28 = vpop.f32.mrb[36].mxu1  ;;  %v2004_v57 = vsel %vm1864_vm3, %v6714_v52, 0.0 }
 0x175   :  { %13063 = vst [vmem:[#allocation71_spill] sm:$0xff] %v6710_v42  ;;  %v2000_v14 = vsel %vm1864_vm3, %v6710_v42, 0.0  ;;  %v2332_v33 = vmul.f32 %v6710_v42, %v6710_v42  ;;  %v6721_v47 = vadd.f32 %v1356_v29, %v6045_v35  ;;  %v2334_v29 = vmul.f32 %v6714_v52, %v6714_v52  ;;  %v6736_v61 = vpop.f32.mrb[37].mxu1 }
 0x176   :  { %v2001_v13 = vadd.f32 %v2000_v14, %v1999_v63  ;;  %13066 = vst [vmem:[#allocation74_spill] sm:$0xff] %v6725_v2  ;;  %v2594_v17 = vadd.f32 %v2593_v19, %v2592_v12  ;;  %v2335_v19 = vmul.f32 %v6725_v2, %v6725_v2 }
 0x177   :  { %13065 = vst [vmem:[#allocation73_spill] sm:$0xff] %v6721_v47  ;;  %v2595_v54 = vsel %vm1864_vm3, %v2332_v33, 0.0  ;;  %v2002_v21 = vsel %vm1864_vm3, %v6721_v47, 0.0  ;;  %v2333_v22 = vmul.f32 %v6721_v47, %v6721_v47  ;;  %v6741_v33 = vpop.f32.mrb[38].mxu1 }
 0x178   :  { %v2003_v42 = vadd.f32 %v2002_v21, %v2001_v13  ;;  %v2596_v12 = vadd.f32 %v2595_v54, %v2594_v17  ;;  %v6745_v4 = vpop.f32.mrb[39].mxu1  ;;  %v2006_v13 = vsel %vm1864_vm3, %v6725_v2, 0.0  ;;  %v2599_v54 = vsel %vm1864_vm3, %v2334_v29, 0.0 }
 0x179   :  { %v2597_v63 = vsel %vm1864_vm3, %v2333_v22, 0.0  ;;  %v5420_v14 = vpop.f32.mrb[72].mxu0 }
 0x17a   :  { %v2005_v47 = vadd.f32 %v2004_v57, %v2003_v42  ;;  %v1369_v39 = vpop.f32.mrb[73].mxu0  ;;  %v2598_v21 = vadd.f32 %v2597_v63, %v2596_v12  ;;  %v6754_v52 = vadd.f32 %v5420_v14, %v6045_v35 }
 0x17b   :  { %v6750_v9 = vadd.f32 %v1369_v39, %v6045_v35  ;;  %v5421_v17 = vpop.f32.mrb[74].mxu0  ;;  %v2601_v39 = vsel %vm1864_vm3, %v2335_v19, 0.0 }
 0x17c   :  { %v2007_v22 = vadd.f32 %v2006_v13, %v2005_v47  ;;  %13068 = vst [vmem:[#allocation76_spill] sm:$0xff] %v6754_v52  ;;  %v1372_v0 = vpop.f32.mrb[75].mxu0  ;;  %v2600_v45 = vadd.f32 %v2599_v54, %v2598_v21  ;;  %v6765_v29 = vadd.f32 %v5421_v17, %v6045_v35  ;;  %v6772_v54 = vpop.f32.mrb[40].mxu1  ;;  %v2012_v17 = vsel %vm1864_vm3, %v6754_v52, 0.0 }
 0x17d   :  { %13067 = vst [vmem:[#allocation75_spill] sm:$0xff] %v6750_v9  ;;  %v2008_v42 = vsel %vm1864_vm3, %v6750_v9, 0.0  ;;  %v2336_v57 = vmul.f32 %v6750_v9, %v6750_v9  ;;  %v6761_v12 = vadd.f32 %v1372_v0, %v6045_v35  ;;  %v2338_v0 = vmul.f32 %v6754_v52, %v6754_v52  ;;  %v6776_v19 = vpop.f32.mrb[41].mxu1 }
 0x17e   :  { %v2009_v63 = vadd.f32 %v2008_v42, %v2007_v22  ;;  %13070 = vst [vmem:[#allocation78_spill] sm:$0xff] %v6765_v29  ;;  %v2602_v47 = vadd.f32 %v2601_v39, %v2600_v45  ;;  %v2339_v39 = vmul.f32 %v6765_v29, %v6765_v29 }
 0x17f   :  { %13069 = vst [vmem:[#allocation77_spill] sm:$0xff] %v6761_v12  ;;  %v2603_v14 = vsel %vm1864_vm3, %v2336_v57, 0.0  ;;  %v2010_v13 = vsel %vm1864_vm3, %v6761_v12, 0.0  ;;  %v2337_v21 = vmul.f32 %v6761_v12, %v6761_v12  ;;  %v6781_v57 = vpop.f32.mrb[42].mxu1 }
 0x180   :  { %v2011_v9 = vadd.f32 %v2010_v13, %v2009_v63  ;;  %v2604_v45 = vadd.f32 %v2603_v14, %v2602_v47  ;;  %13071 = vst [vmem:[#allocation79_spill] sm:$0xff] %v6781_v57  ;;  %v6785_v40 = vpop.f32.mrb[43].mxu1  ;;  %v2014_v63 = vsel %vm1864_vm3, %v6765_v29, 0.0  ;;  %v2607_v14 = vsel %vm1864_vm3, %v2338_v0, 0.0 }
 0x181   :  { %v2605_v22 = vsel %vm1864_vm3, %v2337_v21, 0.0  ;;  %v5424_v42 = vpop.f32.mrb[76].mxu0 }
 0x182   :  { %v2013_v12 = vadd.f32 %v2012_v17, %v2011_v9  ;;  %v1385_v2 = vpop.f32.mrb[77].mxu0  ;;  %v2606_v13 = vadd.f32 %v2605_v22, %v2604_v45  ;;  %v6794_v52 = vadd.f32 %v5424_v42, %v6045_v35 }
 0x183   :  { %v6790_v46 = vadd.f32 %v1385_v2, %v6045_v35  ;;  %v5425_v47 = vpop.f32.mrb[78].mxu0  ;;  %v2609_v2 = vsel %vm1864_vm3, %v2339_v39, 0.0 }
 0x184   :  { %v2015_v21 = vadd.f32 %v2014_v63, %v2013_v12  ;;  %13073 = vst [vmem:[#allocation81_spill] sm:$0xff] %v6794_v52  ;;  %v1388_v41 = vpop.f32.mrb[79].mxu0  ;;  %v2608_v30 = vadd.f32 %v2607_v14, %v2606_v13  ;;  %v6805_v0 = vadd.f32 %v5425_v47, %v6045_v35  ;;  %v6812_v14 = vpop.f32.mrb[44].mxu1  ;;  %v2020_v47 = vsel %vm1864_vm3, %v6794_v52, 0.0 }
 0x185   :  { %13072 = vst [vmem:[#allocation80_spill] sm:$0xff] %v6790_v46  ;;  %v2016_v9 = vsel %vm1864_vm3, %v6790_v46, 0.0  ;;  %v2340_v17 = vmul.f32 %v6790_v46, %v6790_v46  ;;  %v6801_v45 = vadd.f32 %v1388_v41, %v6045_v35  ;;  %13076 = vst [vmem:[#allocation84_spill] sm:$0xff] %v6812_v14  ;;  %v2342_v41 = vmul.f32 %v6794_v52, %v6794_v52  ;;  %v6816_v39 = vpop.f32.mrb[45].mxu1 }
 0x186   :  { %v2017_v22 = vadd.f32 %v2016_v9, %v2015_v21  ;;  %13075 = vst [vmem:[#allocation83_spill] sm:$0xff] %v6805_v0  ;;  %v2610_v12 = vadd.f32 %v2609_v2, %v2608_v30  ;;  %13077 = vst [vmem:[#allocation85_spill] sm:$0xff] %v6816_v39  ;;  %v2343_v2 = vmul.f32 %v6805_v0, %v6805_v0 }
 0x187   :  { %13074 = vst [vmem:[#allocation82_spill] sm:$0xff] %v6801_v45  ;;  %v2611_v42 = vsel %vm1864_vm3, %v2340_v17, 0.0  ;;  %v2018_v63 = vsel %vm1864_vm3, %v6801_v45, 0.0  ;;  %v2341_v13 = vmul.f32 %v6801_v45, %v6801_v45  ;;  %v6821_v17 = vpop.f32.mrb[46].mxu1 }
 0x188   :  { %v2019_v46 = vadd.f32 %v2018_v63, %v2017_v22  ;;  %v2612_v30 = vadd.f32 %v2611_v42, %v2610_v12  ;;  %13078 = vst [vmem:[#allocation86_spill] sm:$0xff] %v6821_v17  ;;  %v6825_v14 = vpop.f32.mrb[47].mxu1  ;;  %v2022_v22 = vsel %vm1864_vm3, %v6805_v0, 0.0  ;;  %v2615_v42 = vsel %vm1864_vm3, %v2342_v41, 0.0 }
 0x189   :  { %v2613_v21 = vsel %vm1864_vm3, %v2341_v13, 0.0  ;;  %v5428_v9 = vpop.f32.mrb[80].mxu0  ;;  %13079 = vst [vmem:[#allocation87_spill] sm:$0xff] %v6825_v14 }
 0x18a   :  { %v2021_v45 = vadd.f32 %v2020_v47, %v2019_v46  ;;  %v1401_v29 = vpop.f32.mrb[81].mxu0  ;;  %v2614_v63 = vadd.f32 %v2613_v21, %v2612_v30  ;;  %v6834_v52 = vadd.f32 %v5428_v9, %v6045_v35 }
 0x18b   :  { %v6830_v39 = vadd.f32 %v1401_v29, %v6045_v35  ;;  %v5429_v12 = vpop.f32.mrb[82].mxu0  ;;  %v2617_v29 = vsel %vm1864_vm3, %v2343_v2, 0.0 }
 0x18c   :  { %v2023_v13 = vadd.f32 %v2022_v22, %v2021_v45  ;;  %13081 = vst [vmem:[#allocation89_spill] sm:$0xff] %v6834_v52  ;;  %v1404_v17 = vpop.f32.mrb[83].mxu0  ;;  %v2616_v57 = vadd.f32 %v2615_v42, %v2614_v63  ;;  %v6845_v41 = vadd.f32 %v5429_v12, %v6045_v35  ;;  %v6852_v42 = vpop.f32.mrb[48].mxu1  ;;  %v2028_v12 = vsel %vm1864_vm3, %v6834_v52, 0.0 }
 0x18d   :  { %13080 = vst [vmem:[#allocation88_spill] sm:$0xff] %v6830_v39  ;;  %v2024_v46 = vsel %vm1864_vm3, %v6830_v39, 0.0  ;;  %v2344_v47 = vmul.f32 %v6830_v39, %v6830_v39  ;;  %v6841_v30 = vadd.f32 %v1404_v17, %v6045_v35  ;;  %13084 = vst [vmem:[#allocation92_spill] sm:$0xff] %v6852_v42  ;;  %v2346_v17 = vmul.f32 %v6834_v52, %v6834_v52  ;;  %v6856_v2 = vpop.f32.mrb[49].mxu1 }
 0x18e   :  { %v2025_v21 = vadd.f32 %v2024_v46, %v2023_v13  ;;  %13083 = vst [vmem:[#allocation91_spill] sm:$0xff] %v6845_v41  ;;  %v2618_v45 = vadd.f32 %v2617_v29, %v2616_v57  ;;  %13085 = vst [vmem:[#allocation93_spill] sm:$0xff] %v6856_v2  ;;  %v2347_v29 = vmul.f32 %v6845_v41, %v6845_v41 }
 0x18f   :  { %13082 = vst [vmem:[#allocation90_spill] sm:$0xff] %v6841_v30  ;;  %v2619_v9 = vsel %vm1864_vm3, %v2344_v47, 0.0  ;;  %v2026_v22 = vsel %vm1864_vm3, %v6841_v30, 0.0  ;;  %v2345_v63 = vmul.f32 %v6841_v30, %v6841_v30  ;;  %v6861_v47 = vpop.f32.mrb[50].mxu1 }
 0x190   :  { %v2027_v39 = vadd.f32 %v2026_v22, %v2025_v21  ;;  %v2620_v57 = vadd.f32 %v2619_v9, %v2618_v45  ;;  %13086 = vst [vmem:[#allocation94_spill] sm:$0xff] %v6861_v47  ;;  %v6865_v42 = vpop.f32.mrb[51].mxu1  ;;  %v2030_v21 = vsel %vm1864_vm3, %v6845_v41, 0.0  ;;  %v2623_v9 = vsel %vm1864_vm3, %v2346_v17, 0.0 }
 0x191   :  { %v2621_v13 = vsel %vm1864_vm3, %v2345_v63, 0.0  ;;  %v5432_v46 = vpop.f32.mrb[84].mxu0  ;;  %13087 = vst [vmem:[#allocation95_spill] sm:$0xff] %v6865_v42 }
 0x192   :  { %v2029_v30 = vadd.f32 %v2028_v12, %v2027_v39  ;;  %v1417_v0 = vpop.f32.mrb[85].mxu0  ;;  %v2622_v22 = vadd.f32 %v2621_v13, %v2620_v57  ;;  %v6874_v52 = vadd.f32 %v5432_v46, %v6045_v35 }
 0x193   :  { %v6870_v2 = vadd.f32 %v1417_v0, %v6045_v35  ;;  %v5433_v45 = vpop.f32.mrb[86].mxu0  ;;  %v2625_v0 = vsel %vm1864_vm3, %v2347_v29, 0.0 }
 0x194   :  { %v2031_v63 = vadd.f32 %v2030_v21, %v2029_v30  ;;  %13089 = vst [vmem:[#allocation97_spill] sm:$0xff] %v6874_v52  ;;  %v1420_v47 = vpop.f32.mrb[87].mxu0  ;;  %v2624_v14 = vadd.f32 %v2623_v9, %v2622_v22  ;;  %v6885_v17 = vadd.f32 %v5433_v45, %v6045_v35  ;;  %v6892_v9 = vpop.f32.mrb[52].mxu1  ;;  %v2036_v45 = vsel %vm1864_vm3, %v6874_v52, 0.0 }
 0x195   :  { %13088 = vst [vmem:[#allocation96_spill] sm:$0xff] %v6870_v2  ;;  %v2032_v39 = vsel %vm1864_vm3, %v6870_v2, 0.0  ;;  %v2348_v12 = vmul.f32 %v6870_v2, %v6870_v2  ;;  %v6881_v57 = vadd.f32 %v1420_v47, %v6045_v35  ;;  %13092 = vst [vmem:[#allocation100_spill] sm:$0xff] %v6892_v9  ;;  %v2350_v47 = vmul.f32 %v6874_v52, %v6874_v52  ;;  %v6896_v29 = vpop.f32.mrb[53].mxu1 }
 0x196   :  { %v2033_v13 = vadd.f32 %v2032_v39, %v2031_v63  ;;  %13091 = vst [vmem:[#allocation99_spill] sm:$0xff] %v6885_v17  ;;  %v2626_v30 = vadd.f32 %v2625_v0, %v2624_v14  ;;  %13093 = vst [vmem:[#allocation101_spill] sm:$0xff] %v6896_v29  ;;  %v2351_v0 = vmul.f32 %v6885_v17, %v6885_v17 }
 0x197   :  { %13090 = vst [vmem:[#allocation98_spill] sm:$0xff] %v6881_v57  ;;  %v2627_v46 = vsel %vm1864_vm3, %v2348_v12, 0.0  ;;  %v2034_v21 = vsel %vm1864_vm3, %v6881_v57, 0.0  ;;  %v2349_v22 = vmul.f32 %v6881_v57, %v6881_v57  ;;  %v6901_v12 = vpop.f32.mrb[54].mxu1 }
 0x198   :  { %v2035_v2 = vadd.f32 %v2034_v21, %v2033_v13  ;;  %v2628_v14 = vadd.f32 %v2627_v46, %v2626_v30  ;;  %13094 = vst [vmem:[#allocation102_spill] sm:$0xff] %v6901_v12  ;;  %v6905_v9 = vpop.f32.mrb[55].mxu1  ;;  %v2038_v13 = vsel %vm1864_vm3, %v6885_v17, 0.0  ;;  %v2631_v46 = vsel %vm1864_vm3, %v2350_v47, 0.0 }
 0x199   :  { %v2629_v63 = vsel %vm1864_vm3, %v2349_v22, 0.0  ;;  %v5436_v39 = vpop.f32.mrb[88].mxu0  ;;  %13095 = vst [vmem:[#allocation103_spill] sm:$0xff] %v6905_v9 }
 0x19a   :  { %v2037_v57 = vadd.f32 %v2036_v45, %v2035_v2  ;;  %v1433_v41 = vpop.f32.mrb[89].mxu0  ;;  %v2630_v21 = vadd.f32 %v2629_v63, %v2628_v14  ;;  %v6914_v52 = vadd.f32 %v5436_v39, %v6045_v35 }
 0x19b   :  { %v6910_v29 = vadd.f32 %v1433_v41, %v6045_v35  ;;  %v5437_v30 = vpop.f32.mrb[90].mxu0  ;;  %v2633_v41 = vsel %vm1864_vm3, %v2351_v0, 0.0 }
 0x19c   :  { %v2039_v22 = vadd.f32 %v2038_v13, %v2037_v57  ;;  %13097 = vst [vmem:[#allocation105_spill] sm:$0xff] %v6914_v52  ;;  %v1436_v12 = vpop.f32.mrb[91].mxu0  ;;  %v2632_v42 = vadd.f32 %v2631_v46, %v2630_v21  ;;  %v6925_v47 = vadd.f32 %v5437_v30, %v6045_v35  ;;  %v6932_v46 = vpop.f32.mrb[56].mxu1  ;;  %v2044_v30 = vsel %vm1864_vm3, %v6914_v52, 0.0 }
 0x19d   :  { %13096 = vst [vmem:[#allocation104_spill] sm:$0xff] %v6910_v29  ;;  %v2040_v2 = vsel %vm1864_vm3, %v6910_v29, 0.0  ;;  %v2352_v45 = vmul.f32 %v6910_v29, %v6910_v29  ;;  %v6921_v14 = vadd.f32 %v1436_v12, %v6045_v35  ;;  %13100 = vst [vmem:[#allocation108_spill] sm:$0xff] %v6932_v46  ;;  %v2354_v12 = vmul.f32 %v6914_v52, %v6914_v52  ;;  %v6936_v0 = vpop.f32.mrb[57].mxu1 }
 0x19e   :  { %v2041_v63 = vadd.f32 %v2040_v2, %v2039_v22  ;;  %13099 = vst [vmem:[#allocation107_spill] sm:$0xff] %v6925_v47  ;;  %v2634_v57 = vadd.f32 %v2633_v41, %v2632_v42  ;;  %13101 = vst [vmem:[#allocation109_spill] sm:$0xff] %v6936_v0  ;;  %v2355_v41 = vmul.f32 %v6925_v47, %v6925_v47 }
 0x19f   :  { %13098 = vst [vmem:[#allocation106_spill] sm:$0xff] %v6921_v14  ;;  %v2635_v39 = vsel %vm1864_vm3, %v2352_v45, 0.0  ;;  %v2042_v13 = vsel %vm1864_vm3, %v6921_v14, 0.0  ;;  %v2353_v21 = vmul.f32 %v6921_v14, %v6921_v14  ;;  %v6941_v45 = vpop.f32.mrb[58].mxu1 }
 0x1a0   :  { %v2043_v29 = vadd.f32 %v2042_v13, %v2041_v63  ;;  %v2636_v42 = vadd.f32 %v2635_v39, %v2634_v57  ;;  %13102 = vst [vmem:[#allocation110_spill] sm:$0xff] %v6941_v45  ;;  %v6945_v46 = vpop.f32.mrb[59].mxu1  ;;  %v2046_v63 = vsel %vm1864_vm3, %v6925_v47, 0.0  ;;  %v2639_v39 = vsel %vm1864_vm3, %v2354_v12, 0.0 }
 0x1a1   :  { %v2637_v22 = vsel %vm1864_vm3, %v2353_v21, 0.0  ;;  %v5440_v2 = vpop.f32.mrb[92].mxu0 }
 0x1a2   :  { %v2045_v14 = vadd.f32 %v2044_v30, %v2043_v29  ;;  %v1449_v17 = vpop.f32.mrb[93].mxu0  ;;  %v2638_v13 = vadd.f32 %v2637_v22, %v2636_v42  ;;  %v6954_v52 = vadd.f32 %v5440_v2, %v6045_v35 }
 0x1a3   :  { %v6950_v0 = vadd.f32 %v1449_v17, %v6045_v35  ;;  %v5441_v57 = vpop.f32.mrb[94].mxu0  ;;  %v2641_v17 = vsel %vm1864_vm3, %v2355_v41, 0.0 }
 0x1a4   :  { %v2047_v21 = vadd.f32 %v2046_v63, %v2045_v14  ;;  %13104 = vst [vmem:[#allocation112_spill] sm:$0xff] %v6954_v52  ;;  %v1452_v45 = vpop.f32.mrb[95].mxu0  ;;  %v2640_v9 = vadd.f32 %v2639_v39, %v2638_v13  ;;  %v6965_v12 = vadd.f32 %v5441_v57, %v6045_v35  ;;  %v6972_v39 = vpop.f32.mrb[60].mxu1  ;;  %v2052_v57 = vsel %vm1864_vm3, %v6954_v52, 0.0 }
 0x1a5   :  { %13103 = vst [vmem:[#allocation111_spill] sm:$0xff] %v6950_v0  ;;  %v2048_v29 = vsel %vm1864_vm3, %v6950_v0, 0.0  ;;  %v2356_v30 = vmul.f32 %v6950_v0, %v6950_v0  ;;  %v6961_v42 = vadd.f32 %v1452_v45, %v6045_v35  ;;  %13107 = vst [vmem:[#allocation115_spill] sm:$0xff] %v6972_v39  ;;  %v2358_v45 = vmul.f32 %v6954_v52, %v6954_v52  ;;  %v6976_v41 = vpop.f32.mrb[61].mxu1 }
 0x1a6   :  { %v2049_v22 = vadd.f32 %v2048_v29, %v2047_v21  ;;  %13106 = vst [vmem:[#allocation114_spill] sm:$0xff] %v6965_v12  ;;  %v2642_v14 = vadd.f32 %v2641_v17, %v2640_v9  ;;  %13108 = vst [vmem:[#allocation116_spill] sm:$0xff] %v6976_v41  ;;  %v2359_v17 = vmul.f32 %v6965_v12, %v6965_v12 }
 0x1a7   :  { %13105 = vst [vmem:[#allocation113_spill] sm:$0xff] %v6961_v42  ;;  %v2643_v2 = vsel %vm1864_vm3, %v2356_v30, 0.0  ;;  %v2050_v63 = vsel %vm1864_vm3, %v6961_v42, 0.0  ;;  %v2357_v13 = vmul.f32 %v6961_v42, %v6961_v42  ;;  %v6981_v30 = vpop.f32.mrb[62].mxu1 }
 0x1a8   :  { %v2051_v0 = vadd.f32 %v2050_v63, %v2049_v22  ;;  %v2644_v9 = vadd.f32 %v2643_v2, %v2642_v14  ;;  %13109 = vst [vmem:[#allocation117_spill] sm:$0xff] %v6981_v30  ;;  %v6985_v39 = vpop.f32.mrb[63].mxu1  ;;  %v2054_v22 = vsel %vm1864_vm3, %v6965_v12, 0.0  ;;  %v2647_v2 = vsel %vm1864_vm3, %v2358_v45, 0.0 }
 0x1a9   :  { %v2645_v21 = vsel %vm1864_vm3, %v2357_v13, 0.0  ;;  %v5444_v29 = vpop.f32.mrb[96].mxu0 }
 0x1aa   :  { %v2053_v42 = vadd.f32 %v2052_v57, %v2051_v0  ;;  %v1465_v47 = vpop.f32.mrb[97].mxu0  ;;  %v2646_v63 = vadd.f32 %v2645_v21, %v2644_v9  ;;  %v6994_v52 = vadd.f32 %v5444_v29, %v6045_v35  ;;  %v6998_v0 = vadd.f32 %v6376_v15, %v6045_v35 }
 0x1ab   :  { %v6990_v41 = vadd.f32 %v1465_v47, %v6045_v35  ;;  %v5445_v14 = vpop.f32.mrb[98].mxu0 }
 0x1ac   :  { %v2055_v13 = vadd.f32 %v2054_v22, %v2053_v42  ;;  %13111 = vst [vmem:[#allocation119_spill] sm:$0xff] %v6994_v52  ;;  %v1468_v30 = vpop.f32.mrb[99].mxu0  ;;  %13112 = vst [vmem:[#allocation120_spill] sm:$0xff] %v6998_v0  ;;  %v2648_v57 = vadd.f32 %v2647_v2, %v2646_v63  ;;  %v2649_v42 = vsel %vm1864_vm3, %v2359_v17, 0.0  ;;  %v7009_v21 = vadd.f32 %v5445_v14, %v6045_v35  ;;  %v7016_v2 = vpop.f32.mrb[64].mxu1 }
 0x1ad   :  { %13110 = vst [vmem:[#allocation118_spill] sm:$0xff] %v6990_v41  ;;  %v2056_v12 = vsel %vm1864_vm3, %v6990_v41, 0.0  ;;  %v2360_v47 = vmul.f32 %v6990_v41, %v6990_v41  ;;  %v7005_v9 = vadd.f32 %v1468_v30, %v6045_v35  ;;  %13115 = vst [vmem:[#allocation123_spill] sm:$0xff] %v7016_v2  ;;  %v2362_v30 = vmul.f32 %v6994_v52, %v6994_v52  ;;  %v7020_v17 = vpop.f32.mrb[65].mxu1 }
 0x1ae   :  { %v2057_v45 = vadd.f32 %v2056_v12, %v2055_v13  ;;  %13114 = vst [vmem:[#allocation122_spill] sm:$0xff] %v7009_v21  ;;  %v2650_v29 = vadd.f32 %v2649_v42, %v2648_v57  ;;  %v2060_v12 = vsel %vm1864_vm3, %v6994_v52, 0.0  ;;  %v2364_v57 = vmul.f32 %v6998_v0, %v6998_v0 }
 0x1af   :  { %13113 = vst [vmem:[#allocation121_spill] sm:$0xff] %v7005_v9  ;;  %v2651_v15 = vsel %vm1864_vm3, %v2360_v47, 0.0  ;;  %v2058_v22 = vsel %vm1864_vm3, %v7005_v9, 0.0  ;;  %v2361_v63 = vmul.f32 %v7005_v9, %v7005_v9  ;;  %v7027_v47 = vpop.f32.mrb[66].mxu1  ;;  %v2363_v42 = vmul.f32 %v7009_v21, %v7009_v21 }
 0x1b0   :  { %v2059_v41 = vadd.f32 %v2058_v22, %v2057_v45  ;;  %v2652_v14 = vadd.f32 %v2651_v15, %v2650_v29  ;;  %13116 = vst [vmem:[#allocation124_spill] sm:$0xff] %v7027_v47  ;;  %v7033_v45 = vadd.f32 %v6385_v31, %v6045_v35  ;;  %v7035_v22 = vpop.f32.mrb[67].mxu1  ;;  %v2062_v29 = vsel %vm1864_vm3, %v7009_v21, 0.0 }
 0x1b1   :  { %v2653_v13 = vsel %vm1864_vm3, %v2361_v63, 0.0  ;;  %v2064_v63 = vsel %vm1864_vm3, %v6998_v0, 0.0  ;;  %v2655_v52 = vsel %vm1864_vm3, %v2362_v30, 0.0  ;;  %v7044_v2 = vadd.f32 %v6372_v8, %v6045_v35 }
 0x1b2   :  { %v2061_v9 = vadd.f32 %v2060_v12, %v2059_v41  ;;  %13117 = vst [vmem:[#allocation125_spill] sm:$0xff] %v7033_v45  ;;  %v2654_v15 = vadd.f32 %v2653_v13, %v2652_v14  ;;  %v2659_v31 = vsel %vm1864_vm3, %v2364_v57, 0.0  ;;  %v7049_v12 = vadd.f32 %v6381_v24, %v6045_v35 }
 0x1b3   :  { %13118 = vst [vmem:[#allocation126_spill] sm:$0xff] %v7044_v2  ;;  %v2657_v21 = vsel %vm1864_vm3, %v2363_v42, 0.0  ;;  %v2365_v13 = vmul.f32 %v7033_v45, %v7033_v45  ;;  %v2066_v8 = vsel %vm1864_vm3, %v7033_v45, 0.0  ;;  %v2366_v24 = vmul.f32 %v7044_v2, %v7044_v2 }
 0x1b4   :  { %v2063_v47 = vadd.f32 %v2062_v29, %v2061_v9  ;;  %v2656_v41 = vadd.f32 %v2655_v52, %v2654_v15  ;;  %13119 = vst [vmem:[#allocation127_spill] sm:$0xff] %v7049_v12  ;;  %v7056_v9 = vadd.f32 %v6416_v25, %v6045_v35  ;;  %v7060_v52 = vpop.f32.mrb[68].mxu1  ;;  %v2367_v25 = vmul.f32 %v7049_v12, %v7049_v12 }
 0x1b5   :  { %v7064_v29 = vpop.f32.mrb[69].mxu1  ;;  %v7093_v0 = vadd.f32 %v6421_v56, %v6045_v35 }
 0x1b6   :  { %v2065_v14 = vadd.f32 %v2064_v63, %v2063_v47  ;;  %13120 = vst [vmem:[#allocation128_spill] sm:$0xff] %v7056_v9  ;;  %v2658_v30 = vadd.f32 %v2657_v21, %v2656_v41  ;;  %v2068_v47 = vsel %vm1864_vm3, %v7044_v2, 0.0  ;;  %v7070_v15 = vpop.f32.mrb[70].mxu1  ;;  %v2661_v63 = vsel %vm1864_vm3, %v2365_v13, 0.0 }
 0x1b7   :  { %13121 = vst [vmem:[#allocation129_spill] sm:$0xff] %v7070_v15  ;;  %v2368_v41 = vmul.f32 %v7056_v9, %v7056_v9  ;;  %v2072_v2 = vsel %vm1864_vm3, %v7056_v9, 0.0  ;;  %v7088_v13 = vadd.f32 %v6412_v26, %v6045_v35  ;;  %v2665_v45 = vsel %vm1864_vm3, %v2367_v25, 0.0  ;;  %13124 = vst [vmem:[#allocation132_spill] sm:$0xff] %v7093_v0 }
 0x1b8   :  { %v2067_v57 = vadd.f32 %v2066_v8, %v2065_v14  ;;  %v2660_v42 = vadd.f32 %v2659_v31, %v2658_v30  ;;  %v7077_v14 = vadd.f32 %v6425_v6, %v6045_v35  ;;  %v7079_v8 = vpop.f32.mrb[71].mxu1  ;;  %v2070_v31 = vsel %vm1864_vm3, %v7049_v12, 0.0 }
 0x1b9   :  { %13123 = vst [vmem:[#allocation131_spill] sm:$0xff] %v7088_v13  ;;  %v7104_v25 = vpop.f32.mrb[72].mxu1  ;;  %v2370_v56 = vmul.f32 %v7088_v13, %v7088_v13  ;;  %v7137_v9 = vadd.f32 %v6461_v37, %v6045_v35 }
 0x1ba   :  { %v2069_v21 = vadd.f32 %v2068_v47, %v2067_v57  ;;  %13122 = vst [vmem:[#allocation130_spill] sm:$0xff] %v7077_v14  ;;  %v2662_v30 = vadd.f32 %v2661_v63, %v2660_v42  ;;  %v2663_v57 = vsel %vm1864_vm3, %v2366_v24, 0.0  ;;  %v2667_v42 = vsel %vm1864_vm3, %v2368_v41, 0.0 }
 0x1bb   :  { %v2369_v63 = vmul.f32 %v7077_v14, %v7077_v14  ;;  %v7100_v24 = vadd.f32 %v6456_v58, %v6045_v35  ;;  %v2074_v26 = vsel %vm1864_vm3, %v7077_v14, 0.0  ;;  %v2076_v41 = vsel %vm1864_vm3, %v7088_v13, 0.0  ;;  %13128 = vst [vmem:[#allocation136_spill] sm:$0xff] %v7137_v9 }
 0x1bc   :  { %v2071_v47 = vadd.f32 %v2070_v31, %v2069_v21  ;;  %v2664_v6 = vadd.f32 %v2663_v57, %v2662_v30  ;;  %v2371_v58 = vmul.f32 %v7093_v0, %v7093_v0 }
 0x1bd   :  { %13125 = vst [vmem:[#allocation133_spill] sm:$0xff] %v7100_v24  ;;  %v2080_v13 = vsel %vm1864_vm3, %v7100_v24, 0.0 }
 0x1be   :  { %v2073_v15 = vadd.f32 %v2072_v2, %v2071_v47  ;;  %v2666_v21 = vadd.f32 %v2665_v45, %v2664_v6  ;;  %v7108_v2 = vpop.f32.mrb[73].mxu1  ;;  %v2669_v47 = vsel %vm1864_vm3, %v2369_v63, 0.0  ;;  %v2372_v6 = vmul.f32 %v7100_v24, %v7100_v24 }
 0x1bf   :  { %v7114_v57 = vpop.f32.mrb[74].mxu1  ;;  %v7132_v63 = vadd.f32 %v6452_v20, %v6045_v35  ;;  %v2673_v14 = vsel %vm1864_vm3, %v2371_v58, 0.0  ;;  %v7181_v24 = vadd.f32 %v6501_v18, %v6045_v35 }
 0x1c0   :  { %v2075_v31 = vadd.f32 %v2074_v26, %v2073_v15  ;;  %v2668_v30 = vadd.f32 %v2667_v42, %v2666_v21  ;;  %v7121_v15 = vadd.f32 %v6465_v43, %v6045_v35  ;;  %v7123_v26 = vpop.f32.mrb[75].mxu1  ;;  %v2078_v42 = vsel %vm1864_vm3, %v7093_v0, 0.0 }
 0x1c1   :  { %13127 = vst [vmem:[#allocation135_spill] sm:$0xff] %v7132_v63  ;;  %v7148_v58 = vpop.f32.mrb[76].mxu1  ;;  %v2374_v37 = vmul.f32 %v7132_v63, %v7132_v63  ;;  %13132 = vst [vmem:[#allocation140_spill] sm:$0xff] %v7181_v24 }
 0x1c2   :  { %v2077_v45 = vadd.f32 %v2076_v41, %v2075_v31  ;;  %13126 = vst [vmem:[#allocation134_spill] sm:$0xff] %v7121_v15  ;;  %v2670_v21 = vadd.f32 %v2669_v47, %v2668_v30  ;;  %v2671_v31 = vsel %vm1864_vm3, %v2370_v56, 0.0  ;;  %v2675_v30 = vsel %vm1864_vm3, %v2372_v6, 0.0 }
 0x1c3   :  { %v2373_v47 = vmul.f32 %v7121_v15, %v7121_v15  ;;  %v7144_v56 = vadd.f32 %v6496_v50, %v6045_v35  ;;  %v2082_v20 = vsel %vm1864_vm3, %v7121_v15, 0.0  ;;  %v2084_v6 = vsel %vm1864_vm3, %v7132_v63, 0.0 }
 0x1c4   :  { %v2079_v41 = vadd.f32 %v2078_v42, %v2077_v45  ;;  %v2672_v43 = vadd.f32 %v2671_v31, %v2670_v21  ;;  %v2375_v50 = vmul.f32 %v7137_v9, %v7137_v9 }
 0x1c5   :  { %13129 = vst [vmem:[#allocation137_spill] sm:$0xff] %v7144_v56  ;;  %v2088_v63 = vsel %vm1864_vm3, %v7144_v56, 0.0 }
 0x1c6   :  { %v2081_v12 = vadd.f32 %v2080_v13, %v2079_v41  ;;  %v2674_v45 = vadd.f32 %v2673_v14, %v2672_v43  ;;  %v7152_v13 = vpop.f32.mrb[77].mxu1  ;;  %v2677_v41 = vsel %vm1864_vm3, %v2373_v47, 0.0  ;;  %v2376_v43 = vmul.f32 %v7144_v56, %v7144_v56 }
 0x1c7   :  { %v7158_v31 = vpop.f32.mrb[78].mxu1  ;;  %v7176_v47 = vadd.f32 %v6492_v51, %v6045_v35  ;;  %v2681_v15 = vsel %vm1864_vm3, %v2375_v50, 0.0  ;;  %v7225_v56 = vadd.f32 %v6541_v62, %v6045_v35 }
 0x1c8   :  { %v2083_v42 = vadd.f32 %v2082_v20, %v2081_v12  ;;  %v2676_v21 = vadd.f32 %v2675_v30, %v2674_v45  ;;  %v7165_v12 = vadd.f32 %v6505_v53, %v6045_v35  ;;  %v7167_v20 = vpop.f32.mrb[79].mxu1  ;;  %v2086_v30 = vsel %vm1864_vm3, %v7137_v9, 0.0 }
 0x1c9   :  { %13131 = vst [vmem:[#allocation139_spill] sm:$0xff] %v7176_v47  ;;  %v7192_v50 = vpop.f32.mrb[80].mxu1  ;;  %v2378_v18 = vmul.f32 %v7176_v47, %v7176_v47  ;;  %13136 = vst [vmem:[#allocation144_spill] sm:$0xff] %v7225_v56 }
 0x1ca   :  { %v2085_v14 = vadd.f32 %v2084_v6, %v2083_v42  ;;  %13130 = vst [vmem:[#allocation138_spill] sm:$0xff] %v7165_v12  ;;  %v2678_v45 = vadd.f32 %v2677_v41, %v2676_v21  ;;  %v2679_v42 = vsel %vm1864_vm3, %v2374_v37, 0.0  ;;  %v2683_v21 = vsel %vm1864_vm3, %v2376_v43, 0.0 }
 0x1cb   :  { %v2377_v41 = vmul.f32 %v7165_v12, %v7165_v12  ;;  %v7188_v37 = vadd.f32 %v6536_v10, %v6045_v35  ;;  %v2090_v51 = vsel %vm1864_vm3, %v7165_v12, 0.0  ;;  %v2092_v43 = vsel %vm1864_vm3, %v7176_v47, 0.0 }
 0x1cc   :  { %v2087_v6 = vadd.f32 %v2086_v30, %v2085_v14  ;;  %v2680_v53 = vadd.f32 %v2679_v42, %v2678_v45  ;;  %v2379_v10 = vmul.f32 %v7181_v24, %v7181_v24 }
 0x1cd   :  { %13133 = vst [vmem:[#allocation141_spill] sm:$0xff] %v7188_v37  ;;  %v2096_v47 = vsel %vm1864_vm3, %v7188_v37, 0.0 }
 0x1ce   :  { %v2089_v0 = vadd.f32 %v2088_v63, %v2087_v6  ;;  %v2682_v14 = vadd.f32 %v2681_v15, %v2680_v53  ;;  %v7196_v63 = vpop.f32.mrb[81].mxu1  ;;  %v2685_v6 = vsel %vm1864_vm3, %v2377_v41, 0.0  ;;  %v2380_v53 = vmul.f32 %v7188_v37, %v7188_v37 }
 0x1cf   :  { %v7202_v42 = vpop.f32.mrb[82].mxu1  ;;  %v7220_v41 = vadd.f32 %v6532_v36, %v6045_v35  ;;  %v2689_v12 = vsel %vm1864_vm3, %v2379_v10, 0.0  ;;  %v7269_v37 = vadd.f32 %v6581_v44, %v6045_v35 }
 0x1d0   :  { %v2091_v30 = vadd.f32 %v2090_v51, %v2089_v0  ;;  %v2684_v45 = vadd.f32 %v2683_v21, %v2682_v14  ;;  %v7209_v0 = vadd.f32 %v6545_v3, %v6045_v35  ;;  %v7211_v51 = vpop.f32.mrb[83].mxu1  ;;  %v2094_v21 = vsel %vm1864_vm3, %v7181_v24, 0.0 }
 0x1d1   :  { %13135 = vst [vmem:[#allocation143_spill] sm:$0xff] %v7220_v41  ;;  %v7236_v10 = vpop.f32.mrb[84].mxu1  ;;  %v2382_v62 = vmul.f32 %v7220_v41, %v7220_v41  ;;  %13140 = vst [vmem:[#allocation148_spill] sm:$0xff] %v7269_v37 }
 0x1d2   :  { %v2093_v15 = vadd.f32 %v2092_v43, %v2091_v30  ;;  %13134 = vst [vmem:[#allocation142_spill] sm:$0xff] %v7209_v0  ;;  %v2686_v14 = vadd.f32 %v2685_v6, %v2684_v45  ;;  %v2687_v30 = vsel %vm1864_vm3, %v2378_v18, 0.0  ;;  %v2691_v45 = vsel %vm1864_vm3, %v2380_v53, 0.0 }
 0x1d3   :  { %v2381_v6 = vmul.f32 %v7209_v0, %v7209_v0  ;;  %v7232_v18 = vadd.f32 %v6576_v27, %v6045_v35  ;;  %v2098_v36 = vsel %vm1864_vm3, %v7209_v0, 0.0  ;;  %v2100_v53 = vsel %vm1864_vm3, %v7220_v41, 0.0 }
 0x1d4   :  { %v2095_v43 = vadd.f32 %v2094_v21, %v2093_v15  ;;  %v2688_v3 = vadd.f32 %v2687_v30, %v2686_v14  ;;  %v2383_v27 = vmul.f32 %v7225_v56, %v7225_v56 }
 0x1d5   :  { %13137 = vst [vmem:[#allocation145_spill] sm:$0xff] %v7232_v18  ;;  %v2104_v41 = vsel %vm1864_vm3, %v7232_v18, 0.0 }
 0x1d6   :  { %v2097_v9 = vadd.f32 %v2096_v47, %v2095_v43  ;;  %v2690_v15 = vadd.f32 %v2689_v12, %v2688_v3  ;;  %v7240_v47 = vpop.f32.mrb[85].mxu1  ;;  %v2693_v43 = vsel %vm1864_vm3, %v2381_v6, 0.0  ;;  %v2384_v3 = vmul.f32 %v7232_v18, %v7232_v18 }
 0x1d7   :  { %v7246_v30 = vpop.f32.mrb[86].mxu1  ;;  %v7264_v6 = vadd.f32 %v6572_v5, %v6045_v35  ;;  %v2697_v0 = vsel %vm1864_vm3, %v2383_v27, 0.0  ;;  %v7313_v18 = vadd.f32 %v6621_v59, %v6045_v35 }
 0x1d8   :  { %v2099_v21 = vadd.f32 %v2098_v36, %v2097_v9  ;;  %v2692_v14 = vadd.f32 %v2691_v45, %v2690_v15  ;;  %v7253_v9 = vadd.f32 %v6585_v23, %v6045_v35  ;;  %v7255_v36 = vpop.f32.mrb[87].mxu1  ;;  %v2102_v45 = vsel %vm1864_vm3, %v7225_v56, 0.0 }
 0x1d9   :  { %13139 = vst [vmem:[#allocation147_spill] sm:$0xff] %v7264_v6  ;;  %v7280_v27 = vpop.f32.mrb[88].mxu1  ;;  %v2386_v44 = vmul.f32 %v7264_v6, %v7264_v6 }
 0x1da   :  { %v2101_v12 = vadd.f32 %v2100_v53, %v2099_v21  ;;  %13138 = vst [vmem:[#allocation146_spill] sm:$0xff] %v7253_v9  ;;  %v2694_v15 = vadd.f32 %v2693_v43, %v2692_v14  ;;  %v2695_v21 = vsel %vm1864_vm3, %v2382_v62, 0.0  ;;  %v2699_v14 = vsel %vm1864_vm3, %v2384_v3, 0.0 }
 0x1db   :  { %v2385_v43 = vmul.f32 %v7253_v9, %v7253_v9  ;;  %v7276_v62 = vadd.f32 %v6616_v38, %v6045_v35  ;;  %v2106_v5 = vsel %vm1864_vm3, %v7253_v9, 0.0  ;;  %v2108_v3 = vsel %vm1864_vm3, %v7264_v6, 0.0 }
 0x1dc   :  { %v2103_v53 = vadd.f32 %v2102_v45, %v2101_v12  ;;  %v2696_v23 = vadd.f32 %v2695_v21, %v2694_v15  ;;  %v2387_v38 = vmul.f32 %v7269_v37, %v7269_v37 }
 0x1dd   :  { %13141 = vst [vmem:[#allocation149_spill] sm:$0xff] %v7276_v62  ;;  %v2112_v6 = vsel %vm1864_vm3, %v7276_v62, 0.0 }
 0x1de   :  { %v2105_v24 = vadd.f32 %v2104_v41, %v2103_v53  ;;  %v2698_v12 = vadd.f32 %v2697_v0, %v2696_v23  ;;  %v7284_v41 = vpop.f32.mrb[89].mxu1  ;;  %v2701_v53 = vsel %vm1864_vm3, %v2385_v43, 0.0  ;;  %v2388_v23 = vmul.f32 %v7276_v62, %v7276_v62 }
 0x1df   :  { %v7290_v21 = vpop.f32.mrb[90].mxu1  ;;  %v7308_v43 = vadd.f32 %v6612_v55, %v6045_v35  ;;  %v2705_v9 = vsel %vm1864_vm3, %v2387_v38, 0.0  ;;  %v7357_v62 = vadd.f32 %v6661_v1, %v6045_v35 }
 0x1e0   :  { %v2107_v45 = vadd.f32 %v2106_v5, %v2105_v24  ;;  %v2700_v15 = vadd.f32 %v2699_v14, %v2698_v12  ;;  %v7297_v24 = vadd.f32 %v6625_v49, %v6045_v35  ;;  %v7299_v5 = vpop.f32.mrb[91].mxu1  ;;  %v2110_v14 = vsel %vm1864_vm3, %v7269_v37, 0.0 }
 0x1e1   :  { %13143 = vst [vmem:[#allocation151_spill] sm:$0xff] %v7308_v43  ;;  %v7324_v38 = vpop.f32.mrb[92].mxu1  ;;  %v2390_v59 = vmul.f32 %v7308_v43, %v7308_v43  ;;  %13144 = vst [vmem:[#allocation152_spill] sm:$0xff] %v7357_v62 }
 0x1e2   :  { %v2109_v0 = vadd.f32 %v2108_v3, %v2107_v45  ;;  %13142 = vst [vmem:[#allocation150_spill] sm:$0xff] %v7297_v24  ;;  %v2702_v12 = vadd.f32 %v2701_v53, %v2700_v15  ;;  %v2703_v45 = vsel %vm1864_vm3, %v2386_v44, 0.0  ;;  %v2707_v15 = vsel %vm1864_vm3, %v2388_v23, 0.0 }
 0x1e3   :  { %v2389_v53 = vmul.f32 %v7297_v24, %v7297_v24  ;;  %v7320_v44 = vadd.f32 %v6656_v32, %v6045_v35  ;;  %v2114_v55 = vsel %vm1864_vm3, %v7297_v24, 0.0  ;;  %v2116_v23 = vsel %vm1864_vm3, %v7308_v43, 0.0 }
 0x1e4   :  { %v2111_v3 = vadd.f32 %v2110_v14, %v2109_v0  ;;  %v2704_v49 = vadd.f32 %v2703_v45, %v2702_v12  ;;  %v2391_v32 = vmul.f32 %v7313_v18, %v7313_v18 }
 0x1e5   :  { %v2120_v43 = vsel %vm1864_vm3, %v7320_v44, 0.0 }
 0x1e6   :  { %v2113_v56 = vadd.f32 %v2112_v6, %v2111_v3  ;;  %v2706_v0 = vadd.f32 %v2705_v9, %v2704_v49  ;;  %v7328_v6 = vpop.f32.mrb[93].mxu1  ;;  %v2709_v3 = vsel %vm1864_vm3, %v2389_v53, 0.0  ;;  %v2392_v49 = vmul.f32 %v7320_v44, %v7320_v44 }
 0x1e7   :  { %v7334_v45 = vpop.f32.mrb[94].mxu1  ;;  %v7352_v53 = vadd.f32 %v6652_v60, %v6045_v35  ;;  %v2713_v24 = vsel %vm1864_vm3, %v2391_v32, 0.0 }
 0x1e8   :  { %v2115_v14 = vadd.f32 %v2114_v55, %v2113_v56  ;;  %v2708_v12 = vadd.f32 %v2707_v15, %v2706_v0  ;;  %v7341_v56 = vadd.f32 %v6665_v7, %v6045_v35  ;;  %v7343_v55 = vpop.f32.mrb[95].mxu1  ;;  %v2118_v15 = vsel %vm1864_vm3, %v7313_v18, 0.0 }
 0x1e9   :  { %v2394_v32 = vmul.f32 %v7352_v53, %v7352_v53  ;;  %v2124_v1 = vsel %vm1864_vm3, %v7352_v53, 0.0 }
 0x1ea   :  { %v2117_v9 = vadd.f32 %v2116_v23, %v2115_v14  ;;  %v2710_v0 = vadd.f32 %v2709_v3, %v2708_v12  ;;  %v2711_v14 = vsel %vm1864_vm3, %v2390_v59, 0.0  ;;  %v2715_v12 = vsel %vm1864_vm3, %v2392_v49, 0.0 }
 0x1eb   :  { %v2393_v3 = vmul.f32 %v7341_v56, %v7341_v56  ;;  %v7364_v59 = vadd.f32 %v6696_v48, %v6045_v35  ;;  %v2122_v60 = vsel %vm1864_vm3, %v7341_v56, 0.0  ;;  %v2395_v49 = vmul.f32 %v7357_v62, %v7357_v62 }
 0x1ec   :  { %v2119_v23 = vadd.f32 %v2118_v15, %v2117_v9  ;;  %v2712_v7 = vadd.f32 %v2711_v14, %v2710_v0 }
 0x1ed   :  { %13145 = vst [vmem:[#allocation153_spill] sm:$0xff] %v7364_v59  ;;  %v2717_v14 = vsel %vm1864_vm3, %v2393_v3, 0.0  ;;  %v2396_v48 = vmul.f32 %v7364_v59, %v7364_v59  ;;  %v7388_v3 = vadd.f32 %v6692_v11, %v6045_v35 }
 0x1ee   :  { %v2121_v37 = vadd.f32 %v2120_v43, %v2119_v23  ;;  %v2714_v9 = vadd.f32 %v2713_v24, %v2712_v7  ;;  %v7379_v24 = vadd.f32 %v6705_v34, %v6045_v35  ;;  %v2128_v7 = vsel %vm1864_vm3, %v7364_v59, 0.0 }
 0x1ef   :  { %13147 = vst [vmem:[#allocation155_spill] sm:$0xff] %v7388_v3  ;;  %v7393_v34 = vadd.f32 %v6701_v16, %v6045_v35  ;;  %v2132_v16 = vsel %vm1864_vm3, %v7388_v3, 0.0 }
 0x1f0   :  { %v2123_v15 = vadd.f32 %v2122_v60, %v2121_v37  ;;  %v2716_v43 = vadd.f32 %v2715_v12, %v2714_v9  ;;  %13146 = vst [vmem:[#allocation154_spill] sm:$0xff] %v7379_v24  ;;  %v2126_v37 = vsel %vm1864_vm3, %v7357_v62, 0.0  ;;  %v2719_v12 = vsel %vm1864_vm3, %v2394_v32, 0.0 }
 0x1f1   :  { %v2721_v60 = vsel %vm1864_vm3, %v2395_v49, 0.0  ;;  %13148 = vst [vmem:[#allocation156_spill] sm:$0xff] %v7393_v34  ;;  %v7400_v32 = vadd.f32 %v6736_v61, %v6045_v35  ;;  %v2130_v11 = vsel %vm1864_vm3, %v7379_v24, 0.0  ;;  %v2398_v49 = vmul.f32 %v7388_v3, %v7388_v3 }
 0x1f2   :  { %v2125_v0 = vadd.f32 %v2124_v1, %v2123_v15  ;;  %v2718_v23 = vadd.f32 %v2717_v14, %v2716_v43  ;;  %v2723_v43 = vsel %vm1864_vm3, %v2396_v48, 0.0  ;;  %v2397_v14 = vmul.f32 %v7379_v24, %v7379_v24 }
 0x1f3   :  { %13149 = vst [vmem:[#allocation157_spill] sm:$0xff] %v7400_v32  ;;  %v2399_v48 = vmul.f32 %v7393_v34, %v7393_v34  ;;  %v2400_v61 = vmul.f32 %v7400_v32, %v7400_v32 }
 0x1f4   :  { %v2127_v9 = vadd.f32 %v2126_v37, %v2125_v0  ;;  %v2720_v15 = vadd.f32 %v2719_v12, %v2718_v23  ;;  %v2725_v12 = vsel %vm1864_vm3, %v2397_v14, 0.0 }
 0x1f6   :  { %v2129_v1 = vadd.f32 %v2128_v7, %v2127_v9  ;;  %v2722_v0 = vadd.f32 %v2721_v60, %v2720_v15  ;;  %v7415_v9 = vadd.f32 %v6745_v4, %v6045_v35  ;;  %v2134_v60 = vsel %vm1864_vm3, %v7393_v34, 0.0 }
 0x1f7   :  { %v7429_v4 = vadd.f32 %v6741_v33, %v6045_v35 }
 0x1f8   :  { %v2131_v37 = vadd.f32 %v2130_v11, %v2129_v1  ;;  %v2724_v23 = vadd.f32 %v2723_v43, %v2722_v0  ;;  %13150 = vst [vmem:[#allocation158_spill] sm:$0xff] %v7415_v9  ;;  %v2136_v1 = vsel %vm1864_vm3, %v7400_v32, 0.0  ;;  %v2727_v43 = vsel %vm1864_vm3, %v2398_v49, 0.0 }
 0x1f9   :  { %v7424_v0 = vadd.f32 %v6732_v28, %v6045_v35  ;;  %v2729_v11 = vsel %vm1864_vm3, %v2399_v48, 0.0  ;;  %13152 = vst [vmem:[#allocation160_spill] sm:$0xff] %v7429_v4  ;;  %v7436_v49 = vadd.f32 %v6776_v19, %v6045_v35 }
 0x1fa   :  { %v2133_v7 = vadd.f32 %v2132_v16, %v2131_v37  ;;  %v2726_v15 = vadd.f32 %v2725_v12, %v2724_v23  ;;  %v2731_v23 = vsel %vm1864_vm3, %v2400_v61, 0.0  ;;  %v2401_v12 = vmul.f32 %v7415_v9, %v7415_v9 }
 0x1fb   :  { %13151 = vst [vmem:[#allocation159_spill] sm:$0xff] %v7424_v0  ;;  %13153 = vst [vmem:[#allocation161_spill] sm:$0xff] %v7436_v49  ;;  %v2402_v48 = vmul.f32 %v7424_v0, %v7424_v0  ;;  %v2140_v33 = vsel %vm1864_vm3, %v7424_v0, 0.0  ;;  %v2403_v61 = vmul.f32 %v7429_v4, %v7429_v4  ;;  %v2404_v19 = vmul.f32 %v7436_v49, %v7436_v49 }
 0x1fc   :  { %v2135_v14 = vadd.f32 %v2134_v60, %v2133_v7  ;;  %v2728_v37 = vadd.f32 %v2727_v43, %v2726_v15  ;;  %v2138_v7 = vsel %vm1864_vm3, %v7415_v9, 0.0  ;;  %v2733_v43 = vsel %vm1864_vm3, %v2401_v12, 0.0 }
 0x1fe   :  { %v2137_v16 = vadd.f32 %v2136_v1, %v2135_v14  ;;  %v2730_v28 = vadd.f32 %v2729_v11, %v2728_v37  ;;  %v7451_v14 = vadd.f32 %v6785_v40, %v6045_v35  ;;  %v2142_v11 = vsel %vm1864_vm3, %v7429_v4, 0.0  ;;  %v13156_v40 = vld [vmem:[#allocation79_spill] sm:$0xff] }
 0x200   :  { %v2139_v60 = vadd.f32 %v2138_v7, %v2137_v16  ;;  %v2732_v15 = vadd.f32 %v2731_v23, %v2730_v28  ;;  %13154 = vst [vmem:[#allocation162_spill] sm:$0xff] %v7451_v14  ;;  %v2144_v16 = vsel %vm1864_vm3, %v7436_v49, 0.0  ;;  %v2735_v23 = vsel %vm1864_vm3, %v2402_v48, 0.0  ;;  %v13158_v48 = vld [vmem:[#allocation85_spill] sm:$0xff] }
 0x201   :  { %v7460_v28 = vadd.f32 %v6772_v54, %v6045_v35  ;;  %v2737_v7 = vsel %vm1864_vm3, %v2403_v61, 0.0  ;;  %v7472_v49 = vadd.f32 %v13158_v48, %v6045_v35 }
 0x202   :  { %v2141_v1 = vadd.f32 %v2140_v33, %v2139_v60  ;;  %v2734_v37 = vadd.f32 %v2733_v43, %v2732_v15  ;;  %v7465_v33 = vadd.f32 %v13156_v40, %v6045_v35  ;;  %v2739_v15 = vsel %vm1864_vm3, %v2404_v19, 0.0 }
 0x203   :  { %13155 = vst [vmem:[#allocation163_spill] sm:$0xff] %v7460_v28  ;;  %v2405_v43 = vmul.f32 %v7451_v14, %v7451_v14  ;;  %13159 = vst [vmem:[#allocation85_spill] sm:$0xff] %v7472_v49  ;;  %v2406_v61 = vmul.f32 %v7460_v28, %v7460_v28 }
 0x204   :  { %v2143_v12 = vadd.f32 %v2142_v11, %v2141_v1  ;;  %v2736_v60 = vadd.f32 %v2735_v23, %v2734_v37  ;;  %13157 = vst [vmem:[#allocation79_spill] sm:$0xff] %v7465_v33  ;;  %v2146_v1 = vsel %vm1864_vm3, %v7451_v14, 0.0  ;;  %v2148_v37 = vsel %vm1864_vm3, %v7460_v28, 0.0 }
 0x205   :  { %v2407_v19 = vmul.f32 %v7465_v33, %v7465_v33 }
 0x206   :  { %v2145_v0 = vadd.f32 %v2144_v16, %v2143_v12  ;;  %v2738_v54 = vadd.f32 %v2737_v7, %v2736_v60  ;;  %v2741_v12 = vsel %vm1864_vm3, %v2405_v43, 0.0  ;;  %v2408_v7 = vmul.f32 %v7472_v49, %v7472_v49  ;;  %v13160_v60 = vld [vmem:[#allocation87_spill] sm:$0xff] }
 0x207   :  { %v7487_v40 = vadd.f32 %v13160_v60, %v6045_v35  ;;  %v13164_v60 = vld [vmem:[#allocation86_spill] sm:$0xff] }
 0x208   :  { %v2147_v11 = vadd.f32 %v2146_v1, %v2145_v0  ;;  %v2740_v16 = vadd.f32 %v2739_v15, %v2738_v54  ;;  %v2150_v0 = vsel %vm1864_vm3, %v7465_v33, 0.0  ;;  %v2152_v15 = vsel %vm1864_vm3, %v7472_v49, 0.0  ;;  %v13162_v1 = vld [vmem:[#allocation84_spill] sm:$0xff] }
 0x209   :  { %13161 = vst [vmem:[#allocation87_spill] sm:$0xff] %v7487_v40  ;;  %v2743_v54 = vsel %vm1864_vm3, %v2406_v61, 0.0  ;;  %v7501_v14 = vadd.f32 %v13164_v60, %v6045_v35  ;;  %v13166_v61 = vld [vmem:[#allocation93_spill] sm:$0xff] }
 0x20a   :  { %v2149_v23 = vadd.f32 %v2148_v37, %v2147_v11  ;;  %v2742_v48 = vadd.f32 %v2741_v12, %v2740_v16  ;;  %v7496_v11 = vadd.f32 %v13162_v1, %v6045_v35  ;;  %v2745_v37 = vsel %vm1864_vm3, %v2407_v19, 0.0 }
 0x20b   :  { %13165 = vst [vmem:[#allocation86_spill] sm:$0xff] %v7501_v14  ;;  %v2747_v16 = vsel %vm1864_vm3, %v2408_v7, 0.0  ;;  %v2409_v12 = vmul.f32 %v7487_v40, %v7487_v40  ;;  %v7508_v49 = vadd.f32 %v13166_v61, %v6045_v35  ;;  %v2411_v7 = vmul.f32 %v7501_v14, %v7501_v14 }
 0x20c   :  { %13163 = vst [vmem:[#allocation84_spill] sm:$0xff] %v7496_v11  ;;  %v2151_v43 = vadd.f32 %v2150_v0, %v2149_v23  ;;  %v2744_v28 = vadd.f32 %v2743_v54, %v2742_v48  ;;  %v2154_v23 = vsel %vm1864_vm3, %v7487_v40, 0.0  ;;  %v2410_v19 = vmul.f32 %v7496_v11, %v7496_v11 }
 0x20d   :  { %13167 = vst [vmem:[#allocation93_spill] sm:$0xff] %v7508_v49  ;;  %v2156_v48 = vsel %vm1864_vm3, %v7496_v11, 0.0 }
 0x20e   :  { %v2153_v4 = vadd.f32 %v2152_v15, %v2151_v43  ;;  %v2746_v1 = vadd.f32 %v2745_v37, %v2744_v28  ;;  %v2749_v43 = vsel %vm1864_vm3, %v2409_v12, 0.0  ;;  %v2412_v28 = vmul.f32 %v7508_v49, %v7508_v49  ;;  %v13168_v37 = vld [vmem:[#allocation95_spill] sm:$0xff] }
 0x20f   :  { %v7523_v60 = vadd.f32 %v13168_v37, %v6045_v35  ;;  %v13172_v37 = vld [vmem:[#allocation94_spill] sm:$0xff] }
 0x210   :  { %v2155_v0 = vadd.f32 %v2154_v23, %v2153_v4  ;;  %v2748_v15 = vadd.f32 %v2747_v16, %v2746_v1  ;;  %v2158_v4 = vsel %vm1864_vm3, %v7501_v14, 0.0  ;;  %v2160_v16 = vsel %vm1864_vm3, %v7508_v49, 0.0  ;;  %v13170_v23 = vld [vmem:[#allocation92_spill] sm:$0xff] }
 0x211   :  { %13169 = vst [vmem:[#allocation95_spill] sm:$0xff] %v7523_v60  ;;  %v2751_v1 = vsel %vm1864_vm3, %v2410_v19, 0.0  ;;  %v7537_v40 = vadd.f32 %v13172_v37, %v6045_v35  ;;  %v13174_v19 = vld [vmem:[#allocation101_spill] sm:$0xff] }
 0x212   :  { %v2157_v54 = vadd.f32 %v2156_v48, %v2155_v0  ;;  %v2750_v61 = vadd.f32 %v2749_v43, %v2748_v15  ;;  %v7532_v0 = vadd.f32 %v13170_v23, %v6045_v35  ;;  %v2753_v48 = vsel %vm1864_vm3, %v2411_v7, 0.0 }
 0x213   :  { %13173 = vst [vmem:[#allocation94_spill] sm:$0xff] %v7537_v40  ;;  %v2755_v15 = vsel %vm1864_vm3, %v2412_v28, 0.0  ;;  %v2413_v43 = vmul.f32 %v7523_v60, %v7523_v60  ;;  %v7544_v49 = vadd.f32 %v13174_v19, %v6045_v35  ;;  %v2415_v28 = vmul.f32 %v7537_v40, %v7537_v40 }
 0x214   :  { %13171 = vst [vmem:[#allocation92_spill] sm:$0xff] %v7532_v0  ;;  %v2159_v12 = vadd.f32 %v2158_v4, %v2157_v54  ;;  %v2752_v11 = vadd.f32 %v2751_v1, %v2750_v61  ;;  %v2162_v54 = vsel %vm1864_vm3, %v7523_v60, 0.0  ;;  %v2414_v7 = vmul.f32 %v7532_v0, %v7532_v0  ;;  %v13351_v3 = vld [vmem:[#allocation93_spill] sm:$0xff] }
 0x215   :  { %13175 = vst [vmem:[#allocation101_spill] sm:$0xff] %v7544_v49  ;;  %v2164_v61 = vsel %vm1864_vm3, %v7532_v0, 0.0 }
 0x216   :  { %v2161_v33 = vadd.f32 %v2160_v16, %v2159_v12  ;;  %v2754_v23 = vadd.f32 %v2753_v48, %v2752_v11  ;;  %v2757_v12 = vsel %vm1864_vm3, %v2413_v43, 0.0  ;;  %v2416_v11 = vmul.f32 %v7544_v49, %v7544_v49  ;;  %v13176_v48 = vld [vmem:[#allocation103_spill] sm:$0xff] }
 0x217   :  { %v7559_v37 = vadd.f32 %v13176_v48, %v6045_v35  ;;  %v13180_v48 = vld [vmem:[#allocation102_spill] sm:$0xff] }
 0x218   :  { %v2163_v4 = vadd.f32 %v2162_v54, %v2161_v33  ;;  %v2756_v16 = vadd.f32 %v2755_v15, %v2754_v23  ;;  %v2166_v33 = vsel %vm1864_vm3, %v7537_v40, 0.0  ;;  %v2168_v15 = vsel %vm1864_vm3, %v7544_v49, 0.0  ;;  %v13178_v54 = vld [vmem:[#allocation100_spill] sm:$0xff] }
 0x219   :  { %13177 = vst [vmem:[#allocation103_spill] sm:$0xff] %v7559_v37  ;;  %v2759_v23 = vsel %vm1864_vm3, %v2414_v7, 0.0  ;;  %v7573_v60 = vadd.f32 %v13180_v48, %v6045_v35  ;;  %v13182_v7 = vld [vmem:[#allocation109_spill] sm:$0xff] }
 0x21a   :  { %v2165_v1 = vadd.f32 %v2164_v61, %v2163_v4  ;;  %v2758_v19 = vadd.f32 %v2757_v12, %v2756_v16  ;;  %v7568_v4 = vadd.f32 %v13178_v54, %v6045_v35  ;;  %v2761_v61 = vsel %vm1864_vm3, %v2415_v28, 0.0 }
 0x21b   :  { %13181 = vst [vmem:[#allocation102_spill] sm:$0xff] %v7573_v60  ;;  %v2763_v16 = vsel %vm1864_vm3, %v2416_v11, 0.0  ;;  %v2417_v12 = vmul.f32 %v7559_v37, %v7559_v37  ;;  %v7580_v49 = vadd.f32 %v13182_v7, %v6045_v35  ;;  %v2419_v11 = vmul.f32 %v7573_v60, %v7573_v60 }
 0x21c   :  { %13179 = vst [vmem:[#allocation100_spill] sm:$0xff] %v7568_v4  ;;  %v2167_v43 = vadd.f32 %v2166_v33, %v2165_v1  ;;  %v2760_v0 = vadd.f32 %v2759_v23, %v2758_v19  ;;  %v2170_v1 = vsel %vm1864_vm3, %v7559_v37, 0.0  ;;  %v2418_v28 = vmul.f32 %v7568_v4, %v7568_v4 }
 0x21d   :  { %13183 = vst [vmem:[#allocation109_spill] sm:$0xff] %v7580_v49  ;;  %v2172_v19 = vsel %vm1864_vm3, %v7568_v4, 0.0 }
 0x21e   :  { %v2169_v14 = vadd.f32 %v2168_v15, %v2167_v43  ;;  %v2762_v54 = vadd.f32 %v2761_v61, %v2760_v0  ;;  %v2765_v43 = vsel %vm1864_vm3, %v2417_v12, 0.0  ;;  %v2420_v0 = vmul.f32 %v7580_v49, %v7580_v49 }
 0x21f   :  { %v7595_v61 = vadd.f32 %v6945_v46, %v6045_v35  ;;  %v2767_v7 = vsel %vm1864_vm3, %v2418_v28, 0.0  ;;  %v13187_v46 = vld [vmem:[#allocation110_spill] sm:$0xff]  ;;  %v13189_v28 = vld [vmem:[#allocation116_spill] sm:$0xff] }
 0x220   :  { %v2171_v33 = vadd.f32 %v2170_v1, %v2169_v14  ;;  %v2764_v15 = vadd.f32 %v2763_v16, %v2762_v54  ;;  %v2174_v14 = vsel %vm1864_vm3, %v7573_v60, 0.0  ;;  %v2176_v16 = vsel %vm1864_vm3, %v7580_v49, 0.0  ;;  %v13185_v54 = vld [vmem:[#allocation108_spill] sm:$0xff] }
 0x221   :  { %13184 = vst [vmem:[#allocation164_spill] sm:$0xff] %v7595_v61  ;;  %v7604_v1 = vadd.f32 %v13185_v54, %v6045_v35  ;;  %v7609_v4 = vadd.f32 %v13187_v46, %v6045_v35  ;;  %v7616_v49 = vadd.f32 %v13189_v28, %v6045_v35 }
 0x222   :  { %v2173_v23 = vadd.f32 %v2172_v19, %v2171_v33  ;;  %v2766_v48 = vadd.f32 %v2765_v43, %v2764_v15  ;;  %v2769_v33 = vsel %vm1864_vm3, %v2419_v11, 0.0  ;;  %v2771_v15 = vsel %vm1864_vm3, %v2420_v0, 0.0 }
 0x223   :  { %13186 = vst [vmem:[#allocation108_spill] sm:$0xff] %v7604_v1  ;;  %13188 = vst [vmem:[#allocation110_spill] sm:$0xff] %v7609_v4  ;;  %v2421_v43 = vmul.f32 %v7595_v61, %v7595_v61  ;;  %v2422_v11 = vmul.f32 %v7604_v1, %v7604_v1  ;;  %v2423_v0 = vmul.f32 %v7609_v4, %v7609_v4 }
 0x224   :  { %v2175_v12 = vadd.f32 %v2174_v14, %v2173_v23  ;;  %v2768_v19 = vadd.f32 %v2767_v7, %v2766_v48  ;;  %v2178_v23 = vsel %vm1864_vm3, %v7595_v61, 0.0  ;;  %v2180_v48 = vsel %vm1864_vm3, %v7604_v1, 0.0 }
 0x225   :  { %v2775_v28 = vsel %vm1864_vm3, %v2422_v11, 0.0  ;;  %v7652_v11 = vadd.f32 %v7020_v17, %v6045_v35 }
 0x226   :  { %v2177_v37 = vadd.f32 %v2176_v16, %v2175_v12  ;;  %v2770_v54 = vadd.f32 %v2769_v33, %v2768_v19  ;;  %v2773_v12 = vsel %vm1864_vm3, %v2421_v43, 0.0  ;;  %v2424_v33 = vmul.f32 %v7616_v49, %v7616_v49 }
 0x227   :  { %v7631_v19 = vadd.f32 %v6985_v39, %v6045_v35  ;;  %v13193_v39 = vld [vmem:[#allocation117_spill] sm:$0xff]  ;;  %v2428_v17 = vmul.f32 %v7652_v11, %v7652_v11 }
 0x228   :  { %v2179_v14 = vadd.f32 %v2178_v23, %v2177_v37  ;;  %v2772_v16 = vadd.f32 %v2771_v15, %v2770_v54  ;;  %v2182_v37 = vsel %vm1864_vm3, %v7609_v4, 0.0  ;;  %v2184_v15 = vsel %vm1864_vm3, %v7616_v49, 0.0  ;;  %v13191_v54 = vld [vmem:[#allocation115_spill] sm:$0xff] }
 0x229   :  { %13190 = vst [vmem:[#allocation116_spill] sm:$0xff] %v7631_v19  ;;  %v7640_v23 = vadd.f32 %v13191_v54, %v6045_v35  ;;  %v7645_v1 = vadd.f32 %v13193_v39, %v6045_v35  ;;  %v2192_v39 = vsel %vm1864_vm3, %v7652_v11, 0.0 }
 0x22a   :  { %v2181_v7 = vadd.f32 %v2180_v48, %v2179_v14  ;;  %v2774_v46 = vadd.f32 %v2773_v12, %v2772_v16  ;;  %v2777_v14 = vsel %vm1864_vm3, %v2423_v0, 0.0  ;;  %v2779_v16 = vsel %vm1864_vm3, %v2424_v33, 0.0  ;;  %v13359_v9 = vld [vmem:[#allocation108_spill] sm:$0xff] }
 0x22b   :  { %13192 = vst [vmem:[#allocation115_spill] sm:$0xff] %v7640_v23  ;;  %v2425_v12 = vmul.f32 %v7631_v19, %v7631_v19  ;;  %v2426_v0 = vmul.f32 %v7640_v23, %v7640_v23  ;;  %v2427_v33 = vmul.f32 %v7645_v1, %v7645_v1 }
 0x22c   :  { %v2183_v43 = vadd.f32 %v2182_v37, %v2181_v7  ;;  %v2776_v48 = vadd.f32 %v2775_v28, %v2774_v46  ;;  %v2186_v7 = vsel %vm1864_vm3, %v7631_v19, 0.0  ;;  %v2188_v46 = vsel %vm1864_vm3, %v7640_v23, 0.0 }
 0x22e   :  { %v2185_v61 = vadd.f32 %v2184_v15, %v2183_v43  ;;  %v2778_v54 = vadd.f32 %v2777_v14, %v2776_v48  ;;  %v2781_v43 = vsel %vm1864_vm3, %v2425_v12, 0.0  ;;  %v7667_v14 = vadd.f32 %v7035_v22, %v6045_v35  ;;  %v13196_v22 = vld [vmem:[#allocation124_spill] sm:$0xff] }
 0x22f   :  { %v7681_v23 = vadd.f32 %v13196_v22, %v6045_v35 }
 0x230   :  { %v2187_v37 = vadd.f32 %v2186_v7, %v2185_v61  ;;  %v2780_v15 = vadd.f32 %v2779_v16, %v2778_v54  ;;  %v2190_v61 = vsel %vm1864_vm3, %v7645_v1, 0.0  ;;  %v2783_v16 = vsel %vm1864_vm3, %v2426_v0, 0.0  ;;  %v13194_v54 = vld [vmem:[#allocation123_spill] sm:$0xff]  ;;  %v13360_v24 = vld [vmem:[#allocation116_spill] sm:$0xff] }
 0x231   :  { %v7676_v7 = vadd.f32 %v13194_v54, %v6045_v35  ;;  %v7688_v0 = vadd.f32 %v7064_v29, %v6045_v35 }
 0x232   :  { %v2189_v28 = vadd.f32 %v2188_v46, %v2187_v37  ;;  %v2782_v48 = vadd.f32 %v2781_v43, %v2780_v15  ;;  %v2785_v37 = vsel %vm1864_vm3, %v2427_v33, 0.0  ;;  %v2787_v15 = vsel %vm1864_vm3, %v2428_v17, 0.0 }
 0x233   :  { %13195 = vst [vmem:[#allocation117_spill] sm:$0xff] %v7676_v7  ;;  %v2429_v43 = vmul.f32 %v7667_v14, %v7667_v14  ;;  %v2430_v33 = vmul.f32 %v7676_v7, %v7676_v7  ;;  %v2431_v17 = vmul.f32 %v7681_v23, %v7681_v23  ;;  %v2432_v29 = vmul.f32 %v7688_v0, %v7688_v0 }
 0x234   :  { %v2191_v12 = vadd.f32 %v2190_v61, %v2189_v28  ;;  %v2784_v46 = vadd.f32 %v2783_v16, %v2782_v48  ;;  %v2194_v28 = vsel %vm1864_vm3, %v7667_v14, 0.0  ;;  %v2196_v48 = vsel %vm1864_vm3, %v7676_v7, 0.0 }
 0x235   :  { %v2200_v22 = vsel %vm1864_vm3, %v7688_v0, 0.0 }
 0x236   :  { %v2193_v19 = vadd.f32 %v2192_v39, %v2191_v12  ;;  %v2786_v54 = vadd.f32 %v2785_v37, %v2784_v46  ;;  %v2789_v12 = vsel %vm1864_vm3, %v2429_v43, 0.0  ;;  %v7703_v37 = vadd.f32 %v7079_v8, %v6045_v35  ;;  %v13197_v8 = vld [vmem:[#allocation129_spill] sm:$0xff] }
 0x238   :  { %v2195_v61 = vadd.f32 %v2194_v28, %v2193_v19  ;;  %v2788_v39 = vadd.f32 %v2787_v15, %v2786_v54  ;;  %v2198_v19 = vsel %vm1864_vm3, %v7681_v23, 0.0  ;;  %v2791_v15 = vsel %vm1864_vm3, %v2430_v33, 0.0 }
 0x239   :  { %v7712_v54 = vadd.f32 %v7060_v52, %v6045_v35  ;;  %v2793_v28 = vsel %vm1864_vm3, %v2431_v17, 0.0  ;;  %v7724_v33 = vadd.f32 %v7108_v2, %v6045_v35 }
 0x23a   :  { %v2197_v16 = vadd.f32 %v2196_v48, %v2195_v61  ;;  %v2790_v46 = vadd.f32 %v2789_v12, %v2788_v39  ;;  %v7717_v48 = vadd.f32 %v13197_v8, %v6045_v35  ;;  %v2795_v39 = vsel %vm1864_vm3, %v2432_v29, 0.0  ;;  %v13362_v62 = vld [vmem:[#allocation117_spill] sm:$0xff] }
 0x23b   :  { %v2433_v12 = vmul.f32 %v7703_v37, %v7703_v37  ;;  %v2434_v17 = vmul.f32 %v7712_v54, %v7712_v54  ;;  %v2436_v2 = vmul.f32 %v7724_v33, %v7724_v33  ;;  %v2208_v8 = vsel %vm1864_vm3, %v7724_v33, 0.0 }
 0x23c   :  { %v2199_v43 = vadd.f32 %v2198_v19, %v2197_v16  ;;  %v2792_v61 = vadd.f32 %v2791_v15, %v2790_v46  ;;  %v2202_v16 = vsel %vm1864_vm3, %v7703_v37, 0.0  ;;  %v2204_v46 = vsel %vm1864_vm3, %v7712_v54, 0.0 }
 0x23d   :  { %v2435_v29 = vmul.f32 %v7717_v48, %v7717_v48 }
 0x23e   :  { %v2201_v7 = vadd.f32 %v2200_v22, %v2199_v43  ;;  %v2794_v52 = vadd.f32 %v2793_v28, %v2792_v61  ;;  %v2797_v43 = vsel %vm1864_vm3, %v2433_v12, 0.0  ;;  %v7739_v28 = vadd.f32 %v7123_v26, %v6045_v35 }
 0x23f   :  { %v7753_v26 = vadd.f32 %v7114_v57, %v6045_v35 }
 0x240   :  { %v2203_v19 = vadd.f32 %v2202_v16, %v2201_v7  ;;  %v2796_v22 = vadd.f32 %v2795_v39, %v2794_v52  ;;  %v2206_v7 = vsel %vm1864_vm3, %v7717_v48, 0.0  ;;  %v2799_v39 = vsel %vm1864_vm3, %v2434_v17, 0.0 }
 0x241   :  { %v7748_v52 = vadd.f32 %v7104_v25, %v6045_v35  ;;  %v2801_v16 = vsel %vm1864_vm3, %v2435_v29, 0.0  ;;  %13199 = vst [vmem:[#allocation124_spill] sm:$0xff] %v7753_v26  ;;  %v7760_v17 = vadd.f32 %v7152_v13, %v6045_v35 }
 0x242   :  { %v2205_v15 = vadd.f32 %v2204_v46, %v2203_v19  ;;  %v2798_v61 = vadd.f32 %v2797_v43, %v2796_v22  ;;  %v2803_v22 = vsel %vm1864_vm3, %v2436_v2, 0.0  ;;  %v2437_v43 = vmul.f32 %v7739_v28, %v7739_v28 }
 0x243   :  { %13198 = vst [vmem:[#allocation123_spill] sm:$0xff] %v7748_v52  ;;  %13200 = vst [vmem:[#allocation129_spill] sm:$0xff] %v7760_v17  ;;  %v2438_v29 = vmul.f32 %v7748_v52, %v7748_v52  ;;  %v2212_v57 = vsel %vm1864_vm3, %v7748_v52, 0.0  ;;  %v2439_v2 = vmul.f32 %v7753_v26, %v7753_v26  ;;  %v2440_v13 = vmul.f32 %v7760_v17, %v7760_v17 }
 0x244   :  { %v2207_v12 = vadd.f32 %v2206_v7, %v2205_v15  ;;  %v2800_v19 = vadd.f32 %v2799_v39, %v2798_v61  ;;  %v2210_v15 = vsel %vm1864_vm3, %v7739_v28, 0.0  ;;  %v2805_v39 = vsel %vm1864_vm3, %v2437_v43, 0.0 }
 0x246   :  { %v2209_v46 = vadd.f32 %v2208_v8, %v2207_v12  ;;  %v2802_v25 = vadd.f32 %v2801_v16, %v2800_v19  ;;  %v7775_v12 = vadd.f32 %v7167_v20, %v6045_v35  ;;  %v2214_v16 = vsel %vm1864_vm3, %v7753_v26, 0.0 }
 0x247   :  { %v7789_v20 = vadd.f32 %v7158_v31, %v6045_v35 }
 0x248   :  { %v2211_v7 = vadd.f32 %v2210_v15, %v2209_v46  ;;  %v2804_v61 = vadd.f32 %v2803_v22, %v2802_v25  ;;  %13201 = vst [vmem:[#allocation165_spill] sm:$0xff] %v7775_v12  ;;  %v2216_v46 = vsel %vm1864_vm3, %v7760_v17, 0.0  ;;  %v2807_v22 = vsel %vm1864_vm3, %v2438_v29, 0.0  ;;  %v13364_v34 = vld [vmem:[#allocation124_spill] sm:$0xff] }
 0x249   :  { %v7784_v25 = vadd.f32 %v7148_v58, %v6045_v35  ;;  %v2809_v15 = vsel %vm1864_vm3, %v2439_v2, 0.0  ;;  %13203 = vst [vmem:[#allocation167_spill] sm:$0xff] %v7789_v20  ;;  %v7796_v29 = vadd.f32 %v7196_v63, %v6045_v35 }
 0x24a   :  { %v2213_v8 = vadd.f32 %v2212_v57, %v2211_v7  ;;  %v2806_v19 = vadd.f32 %v2805_v39, %v2804_v61  ;;  %v2811_v61 = vsel %vm1864_vm3, %v2440_v13, 0.0  ;;  %v2441_v39 = vmul.f32 %v7775_v12, %v7775_v12  ;;  %v13363_v60 = vld [vmem:[#allocation123_spill] sm:$0xff] }
 0x24b   :  { %13202 = vst [vmem:[#allocation166_spill] sm:$0xff] %v7784_v25  ;;  %13204 = vst [vmem:[#allocation168_spill] sm:$0xff] %v7796_v29  ;;  %v2442_v2 = vmul.f32 %v7784_v25, %v7784_v25  ;;  %v2220_v31 = vsel %vm1864_vm3, %v7784_v25, 0.0  ;;  %v2443_v13 = vmul.f32 %v7789_v20, %v7789_v20  ;;  %v2444_v63 = vmul.f32 %v7796_v29, %v7796_v29 }
 0x24c   :  { %v2215_v43 = vadd.f32 %v2214_v16, %v2213_v8  ;;  %v2808_v7 = vadd.f32 %v2807_v22, %v2806_v19  ;;  %v2218_v8 = vsel %vm1864_vm3, %v7775_v12, 0.0  ;;  %v2813_v22 = vsel %vm1864_vm3, %v2441_v39, 0.0 }
 0x24e   :  { %v2217_v57 = vadd.f32 %v2216_v46, %v2215_v43  ;;  %v2810_v58 = vadd.f32 %v2809_v15, %v2808_v7  ;;  %v7811_v43 = vadd.f32 %v7211_v51, %v6045_v35  ;;  %v2222_v15 = vsel %vm1864_vm3, %v7789_v20, 0.0 }
 0x24f   :  { %v7825_v51 = vadd.f32 %v7202_v42, %v6045_v35  ;;  %v13367_v4 = vld [vmem:[#allocation165_spill] sm:$0xff] }
 0x250   :  { %v2219_v16 = vadd.f32 %v2218_v8, %v2217_v57  ;;  %v2812_v19 = vadd.f32 %v2811_v61, %v2810_v58  ;;  %v2224_v57 = vsel %vm1864_vm3, %v7796_v29, 0.0  ;;  %v2815_v61 = vsel %vm1864_vm3, %v2442_v2, 0.0 }
 0x251   :  { %v7820_v58 = vadd.f32 %v7192_v50, %v6045_v35  ;;  %v2817_v8 = vsel %vm1864_vm3, %v2443_v13, 0.0  ;;  %v7832_v2 = vadd.f32 %v7240_v47, %v6045_v35  ;;  %v7934_v29 = vadd.f32 %v7334_v45, %v6045_v35 }
 0x252   :  { %v2221_v46 = vadd.f32 %v2220_v31, %v2219_v16  ;;  %v2814_v7 = vadd.f32 %v2813_v22, %v2812_v19  ;;  %v2819_v19 = vsel %vm1864_vm3, %v2444_v63, 0.0  ;;  %v2445_v22 = vmul.f32 %v7811_v43, %v7811_v43  ;;  %v13368_v59 = vld [vmem:[#allocation166_spill] sm:$0xff] }
 0x253   :  { %v2446_v13 = vmul.f32 %v7820_v58, %v7820_v58  ;;  %v2228_v42 = vsel %vm1864_vm3, %v7820_v58, 0.0  ;;  %v2447_v63 = vmul.f32 %v7825_v51, %v7825_v51  ;;  %v2448_v47 = vmul.f32 %v7832_v2, %v7832_v2  ;;  %13211 = vst [vmem:[#allocation175_spill] sm:$0xff] %v7934_v29 }
 0x254   :  { %v2223_v39 = vadd.f32 %v2222_v15, %v2221_v46  ;;  %v2816_v16 = vadd.f32 %v2815_v61, %v2814_v7  ;;  %v2226_v46 = vsel %vm1864_vm3, %v7811_v43, 0.0  ;;  %v2821_v61 = vsel %vm1864_vm3, %v2445_v22, 0.0 }
 0x256   :  { %v2225_v31 = vadd.f32 %v2224_v57, %v2223_v39  ;;  %v2818_v50 = vadd.f32 %v2817_v8, %v2816_v16  ;;  %v7847_v39 = vadd.f32 %v7255_v36, %v6045_v35  ;;  %v2230_v8 = vsel %vm1864_vm3, %v7825_v51, 0.0 }
 0x257   :  { %v7861_v36 = vadd.f32 %v7246_v30, %v6045_v35 }
 0x258   :  { %v2227_v15 = vadd.f32 %v2226_v46, %v2225_v31  ;;  %v2820_v7 = vadd.f32 %v2819_v19, %v2818_v50  ;;  %v2232_v31 = vsel %vm1864_vm3, %v7832_v2, 0.0  ;;  %v2823_v19 = vsel %vm1864_vm3, %v2446_v13, 0.0 }
 0x259   :  { %v7856_v50 = vadd.f32 %v7236_v10, %v6045_v35  ;;  %v2825_v46 = vsel %vm1864_vm3, %v2447_v63, 0.0  ;;  %v7868_v13 = vadd.f32 %v7284_v41, %v6045_v35 }
 0x25a   :  { %v2229_v57 = vadd.f32 %v2228_v42, %v2227_v15  ;;  %v2822_v16 = vadd.f32 %v2821_v61, %v2820_v7  ;;  %v2827_v7 = vsel %vm1864_vm3, %v2448_v47, 0.0  ;;  %v2449_v61 = vmul.f32 %v7847_v39, %v7847_v39 }
 0x25b   :  { %v2450_v63 = vmul.f32 %v7856_v50, %v7856_v50  ;;  %v2236_v30 = vsel %vm1864_vm3, %v7856_v50, 0.0  ;;  %v2451_v47 = vmul.f32 %v7861_v36, %v7861_v36  ;;  %v2452_v41 = vmul.f32 %v7868_v13, %v7868_v13 }
 0x25c   :  { %v2231_v22 = vadd.f32 %v2230_v8, %v2229_v57  ;;  %v2824_v15 = vadd.f32 %v2823_v19, %v2822_v16  ;;  %v2234_v57 = vsel %vm1864_vm3, %v7847_v39, 0.0  ;;  %v2829_v19 = vsel %vm1864_vm3, %v2449_v61, 0.0 }
 0x25e   :  { %v2233_v42 = vadd.f32 %v2232_v31, %v2231_v22  ;;  %v2826_v10 = vadd.f32 %v2825_v46, %v2824_v15  ;;  %v7883_v22 = vadd.f32 %v7299_v5, %v6045_v35  ;;  %v2238_v46 = vsel %vm1864_vm3, %v7861_v36, 0.0 }
 0x25f   :  { %v7897_v5 = vadd.f32 %v7290_v21, %v6045_v35 }
 0x260   :  { %v2235_v8 = vadd.f32 %v2234_v57, %v2233_v42  ;;  %v2828_v16 = vadd.f32 %v2827_v7, %v2826_v10  ;;  %13205 = vst [vmem:[#allocation169_spill] sm:$0xff] %v7883_v22  ;;  %v2240_v42 = vsel %vm1864_vm3, %v7868_v13, 0.0  ;;  %v2831_v7 = vsel %vm1864_vm3, %v2450_v63, 0.0 }
 0x261   :  { %v7892_v10 = vadd.f32 %v7280_v27, %v6045_v35  ;;  %v2833_v57 = vsel %vm1864_vm3, %v2451_v47, 0.0  ;;  %13207 = vst [vmem:[#allocation171_spill] sm:$0xff] %v7897_v5  ;;  %v7904_v63 = vadd.f32 %v7328_v6, %v6045_v35 }
 0x262   :  { %v2237_v31 = vadd.f32 %v2236_v30, %v2235_v8  ;;  %v2830_v15 = vadd.f32 %v2829_v19, %v2828_v16  ;;  %v2835_v16 = vsel %vm1864_vm3, %v2452_v41, 0.0  ;;  %v2453_v19 = vmul.f32 %v7883_v22, %v7883_v22 }
 0x263   :  { %13206 = vst [vmem:[#allocation170_spill] sm:$0xff] %v7892_v10  ;;  %13208 = vst [vmem:[#allocation172_spill] sm:$0xff] %v7904_v63  ;;  %v2454_v47 = vmul.f32 %v7892_v10, %v7892_v10  ;;  %v2244_v21 = vsel %vm1864_vm3, %v7892_v10, 0.0  ;;  %v2455_v41 = vmul.f32 %v7897_v5, %v7897_v5  ;;  %v2456_v6 = vmul.f32 %v7904_v63, %v7904_v63 }
 0x264   :  { %v2239_v61 = vadd.f32 %v2238_v46, %v2237_v31  ;;  %v2832_v8 = vadd.f32 %v2831_v7, %v2830_v15  ;;  %v2242_v31 = vsel %vm1864_vm3, %v7883_v22, 0.0  ;;  %v2837_v7 = vsel %vm1864_vm3, %v2453_v19, 0.0 }
 0x266   :  { %v2241_v30 = vadd.f32 %v2240_v42, %v2239_v61  ;;  %v2834_v27 = vadd.f32 %v2833_v57, %v2832_v8  ;;  %v7919_v61 = vadd.f32 %v7343_v55, %v6045_v35  ;;  %v2246_v57 = vsel %vm1864_vm3, %v7897_v5, 0.0 }
 0x267   :  { %v2843_v55 = vsel %vm1864_vm3, %v2456_v6, 0.0  ;;  %v2459_v6 = vmul.f32 %v7934_v29, %v7934_v29 }
 0x268   :  { %v2243_v46 = vadd.f32 %v2242_v31, %v2241_v30  ;;  %v2836_v15 = vadd.f32 %v2835_v16, %v2834_v27  ;;  %13209 = vst [vmem:[#allocation173_spill] sm:$0xff] %v7919_v61  ;;  %v2248_v30 = vsel %vm1864_vm3, %v7904_v63, 0.0  ;;  %v2839_v16 = vsel %vm1864_vm3, %v2454_v47, 0.0 }
 0x269   :  { %v7928_v27 = vadd.f32 %v7324_v38, %v6045_v35  ;;  %v2841_v31 = vsel %vm1864_vm3, %v2455_v41, 0.0  ;;  %v2250_v47 = vsel %vm1864_vm3, %v7919_v61, 0.0 }
 0x26a   :  { %v2245_v42 = vadd.f32 %v2244_v21, %v2243_v46  ;;  %v2838_v8 = vadd.f32 %v2837_v7, %v2836_v15  ;;  %v2457_v15 = vmul.f32 %v7919_v61, %v7919_v61 }
 0x26b   :  { %13210 = vst [vmem:[#allocation174_spill] sm:$0xff] %v7928_v27  ;;  %v2458_v38 = vmul.f32 %v7928_v27, %v7928_v27  ;;  %v2252_v41 = vsel %vm1864_vm3, %v7928_v27, 0.0  ;;  %v13370_v27 = vld [vmem:[#allocation168_spill] sm:$0xff] }
 0x26c   :  { %v2247_v19 = vadd.f32 %v2246_v57, %v2245_v42  ;;  %v2840_v46 = vadd.f32 %v2839_v16, %v2838_v8  ;;  %v2845_v45 = vsel %vm1864_vm3, %v2457_v15, 0.0  ;;  %v2254_v8 = vsel %vm1864_vm3, %v7934_v29, 0.0 }
 0x26d   :  { %v2847_v16 = vsel %vm1864_vm3, %v2458_v38, 0.0 }
 0x26e   :  { %v2249_v21 = vadd.f32 %v2248_v30, %v2247_v19  ;;  %v2842_v7 = vadd.f32 %v2841_v31, %v2840_v46  ;;  %v2849_v46 = vsel %vm1864_vm3, %v2459_v6, 0.0 }
 0x270   :  { %v2251_v42 = vadd.f32 %v2250_v47, %v2249_v21  ;;  %v2844_v57 = vadd.f32 %v2843_v55, %v2842_v7 }
 0x272   :  { %v2253_v35 = vadd.f32 %v2252_v41, %v2251_v42  ;;  %v2846_v30 = vadd.f32 %v2845_v45, %v2844_v57  ;;  %v13212_v57 = vld [vmem:[#allocation2_spill] sm:$0xff] }
 0x273   :  { %v3261_v38 = vsub.s32 2, %v13212_v57  ;;  %v13366_v40 = vsub.s32 1, %v13212_v57 }
 0x274   :  { %v2255_v19 = vadd.f32 %v2254_v8, %v2253_v35  ;;  %v2848_v31 = vadd.f32 %v2847_v16, %v2846_v30  ;;  %v7959_v8 = vld [vmem:[%s12483_s2] sm:$0x7]  ;;  %v13340_v16 = vld [vmem:[#allocation151_spill] sm:$0xff] }
 0x275   :  { %v13335_v30 = vld [vmem:[#allocation146_spill] sm:$0xff] }
 0x276   :  { %v2256_v21 = vrot.slane %v2255_v19, 4  ;;  %v2850_v47 = vadd.f32 %v2849_v46, %v2848_v31  ;;  %v13217_v46 = vld [vmem:[#allocation5_spill] sm:$0xff]  ;;  %v13361_v31 = vld [vmem:[#allocation115_spill] sm:$0xff] }
 0x278   :  { %v2257_v20 = vadd.f32 %v2256_v21, %v2255_v19  ;;  %v2851_v55 = vrot.slane %v2850_v47, 4  ;;  %v13216_v19 = vld [vmem:[#allocation3_spill] sm:$0xff]  ;;  %v13357_v21 = vld [vmem:[#allocation109_spill] sm:$0xff] }
 0x27a   :  { %v2258_v7 = vrot.slane %v2257_v20, 2  ;;  %v2852_v25 = vadd.f32 %v2851_v55, %v2850_v47  ;;  %v13218_v47 = vld [vmem:[#allocation7_spill] sm:$0xff]  ;;  %v13358_v55 = vld [vmem:[#allocation164_spill] sm:$0xff] }
 0x27c   :  { %v2259_v12 = vadd.f32 %v2258_v7, %v2257_v20  ;;  %v2853_v42 = vrot.slane %v2852_v25, 2  ;;  %v7962_v20 = vrot.slane %v7959_v8, %v3261_v38  ;;  %v13221_v38 = vld [vmem:[#allocation10_spill] sm:$0xff]  ;;  %v13338_v7 = vld [vmem:[#allocation149_spill] sm:$0xff] }
 0x27e   :  { %v2260_v41 = vrot.slane %v2259_v12, 1  ;;  %v2854_v15 = vadd.f32 %v2853_v42, %v2852_v25  ;;  %13213 = vst [vmem:[#allocation2_spill] sm:$0xff] %v7962_v20  ;;  %v13337_v20 = vld [vmem:[#allocation148_spill] sm:$0xff]  ;;  %v13347_v42 = vld [vmem:[#allocation85_spill] sm:$0xff] }
 0x280   :  { %v2261_v17 = vadd.f32 %v2260_v41, %v2259_v12  ;;  %v2855_v26 = vrot.slane %v2854_v15, 1  ;;  %v13336_v12 = vld [vmem:[#allocation147_spill] sm:$0xff] }
 0x281   :  { %v13355_v41 = vld [vmem:[#allocation103_spill] sm:$0xff] }
 0x282   :  { %v7951_v52 = vmul.f32 0.0006377551, %v2261_v17  ;;  %v2856_v35 = vadd.f32 %v2855_v26, %v2854_v15  ;;  %v13214_v17 = vld [vmem:[#allocation4_spill] sm:$0xff]  ;;  %v13215_v26 = vld [vmem:[#allocation6_spill] sm:$0xff]  ;;  %v13354_v15 = vld [vmem:[#allocation101_spill] sm:$0xff] }
 0x284   :  { %v2858_v6 = vmul.f32 %v7951_v52, %v7951_v52  ;;  %v2857_v45 = vmul.f32 0.0006377551, %v2856_v35  ;;  %v13339_v35 = vld [vmem:[#allocation150_spill] sm:$0xff]  ;;  %v13371_v29 = vsub.f32 %v13214_v17, %v7951_v52  ;;  %v13373_v57 = vsub.f32 %v13216_v19, %v7951_v52 }
 0x285   :  { %v13374_v22 = vsub.f32 %v13217_v46, %v7951_v52 }
 0x286   :  { %v2859_v25 = vsub.f32 %v2857_v45, %v2858_v6 }
 0x288   :  { %v2860_v6 = vadd.f32 1e-05, %v2859_v25  ;;  %v13369_v25 = vld [vmem:[#allocation167_spill] sm:$0xff] }
 0x28a   :  { %5656 = vrsqrt.f32 %v2860_v6  ;;  %v13334_v6 = vld [vmem:[#allocation145_spill] sm:$0xff] }
 0x294   :  { %v8089_v45 = vpop.eup %5656 }
 0x295   :  { %v3058_v32 = vmul.f32 %v7959_v8, %v8089_v45  ;;  %v13365_v8 = vld [vmem:[#allocation129_spill] sm:$0xff] }
 0x297   :  { %v8355_v61 = vrot.slane %v3058_v32, %v13366_v40  ;;  %v13372_v32 = vsub.f32 %v13215_v26, %v7951_v52 }
 0x299   :  { %v8369_v45 = vmul.f32 %v8355_v61, %v13371_v29  ;;  %v8375_v40 = vmul.f32 %v8355_v61, %v13372_v32  ;;  %v8381_v10 = vmul.f32 %v8355_v61, %v13373_v57  ;;  %v8387_v17 = vmul.f32 %v8355_v61, %v13374_v22  ;;  %v13377_v32 = vld [vmem:[#allocation9_spill] sm:$0xff]  ;;  %v13380_v57 = vld [vmem:[#allocation8_spill] sm:$0xff] }
 0x29a   :  { %v13375_v29 = vsub.f32 %v13218_v47, %v7951_v52  ;;  %v13378_v5 = vsub.f32 %v13377_v32, %v7951_v52  ;;  %v13381_v63 = vsub.f32 %v13380_v57, %v7951_v52  ;;  %v13383_v22 = vsub.f32 %v13221_v38, %v7951_v52 }
 0x29c   :  { %v8393_v26 = vmul.f32 %v8355_v61, %v13375_v29  ;;  %v8399_v19 = vmul.f32 %v8355_v61, %v13378_v5  ;;  %v8405_v46 = vmul.f32 %v8355_v61, %v13381_v63  ;;  %v8411_v47 = vmul.f32 %v8355_v61, %v13383_v22  ;;  %v13385_v29 = vld [vmem:[#allocation11_spill] sm:$0xff]  ;;  %v13388_v5 = vld [vmem:[#allocation13_spill] sm:$0xff]  ;;  %v13391_v63 = vld [vmem:[#allocation12_spill] sm:$0xff] }
 0x29d   :  { %v13394_v22 = vld [vmem:[#allocation14_spill] sm:$0xff] }
 0x29e   :  { %13376 = vst [vmem:[#allocation4_spill] sm:$0xff] %v8393_v26  ;;  %13379 = vst [vmem:[#allocation6_spill] sm:$0xff] %v8399_v19  ;;  %v13386_v26 = vsub.f32 %v13385_v29, %v7951_v52  ;;  %v13389_v19 = vsub.f32 %v13388_v5, %v7951_v52 }
 0x29f   :  { %13382 = vst [vmem:[#allocation3_spill] sm:$0xff] %v8405_v46  ;;  %13384 = vst [vmem:[#allocation5_spill] sm:$0xff] %v8411_v47  ;;  %v13392_v46 = vsub.f32 %v13391_v63, %v7951_v52  ;;  %v13395_v47 = vsub.f32 %v13394_v22, %v7951_v52 }
 0x2a0   :  { %v8417_v32 = vmul.f32 %v8355_v61, %v13386_v26  ;;  %v8423_v57 = vmul.f32 %v8355_v61, %v13389_v19  ;;  %v13397_v26 = vld [vmem:[#allocation15_spill] sm:$0xff]  ;;  %v13400_v19 = vld [vmem:[#allocation17_spill] sm:$0xff] }
 0x2a1   :  { %v8429_v38 = vmul.f32 %v8355_v61, %v13392_v46  ;;  %v8435_v29 = vmul.f32 %v8355_v61, %v13395_v47  ;;  %v13403_v46 = vld [vmem:[#allocation16_spill] sm:$0xff]  ;;  %v13406_v47 = vld [vmem:[#allocation18_spill] sm:$0xff] }
 0x2a2   :  { %13387 = vst [vmem:[#allocation7_spill] sm:$0xff] %v8417_v32  ;;  %13390 = vst [vmem:[#allocation10_spill] sm:$0xff] %v8423_v57  ;;  %v13398_v32 = vsub.f32 %v13397_v26, %v7951_v52  ;;  %v13401_v57 = vsub.f32 %v13400_v19, %v7951_v52 }
 0x2a3   :  { %13393 = vst [vmem:[#allocation145_spill] sm:$0xff] %v8429_v38  ;;  %13396 = vst [vmem:[#allocation146_spill] sm:$0xff] %v8435_v29  ;;  %v13404_v38 = vsub.f32 %v13403_v46, %v7951_v52  ;;  %v13407_v29 = vsub.f32 %v13406_v47, %v7951_v52 }
 0x2a4   :  { %v8441_v5 = vmul.f32 %v8355_v61, %v13398_v32  ;;  %v8447_v63 = vmul.f32 %v8355_v61, %v13401_v57  ;;  %v13409_v32 = vld [vmem:[#allocation19_spill] sm:$0xff]  ;;  %v13412_v57 = vld [vmem:[#allocation21_spill] sm:$0xff] }
 0x2a5   :  { %v8453_v22 = vmul.f32 %v8355_v61, %v13404_v38  ;;  %v8459_v26 = vmul.f32 %v8355_v61, %v13407_v29  ;;  %v13415_v38 = vld [vmem:[#allocation20_spill] sm:$0xff]  ;;  %v13418_v29 = vld [vmem:[#allocation22_spill] sm:$0xff] }
 0x2a6   :  { %13399 = vst [vmem:[#allocation147_spill] sm:$0xff] %v8441_v5  ;;  %13402 = vst [vmem:[#allocation148_spill] sm:$0xff] %v8447_v63  ;;  %v13410_v5 = vsub.f32 %v13409_v32, %v7951_v52  ;;  %v13413_v63 = vsub.f32 %v13412_v57, %v7951_v52 }
 0x2a7   :  { %13405 = vst [vmem:[#allocation149_spill] sm:$0xff] %v8453_v22  ;;  %13408 = vst [vmem:[#allocation150_spill] sm:$0xff] %v8459_v26  ;;  %v13416_v22 = vsub.f32 %v13415_v38, %v7951_v52  ;;  %v13419_v26 = vsub.f32 %v13418_v29, %v7951_v52 }
 0x2a8   :  { %v8465_v19 = vmul.f32 %v8355_v61, %v13410_v5  ;;  %v8471_v46 = vmul.f32 %v8355_v61, %v13413_v63  ;;  %v13421_v5 = vld [vmem:[#allocation23_spill] sm:$0xff]  ;;  %v13424_v63 = vld [vmem:[#allocation25_spill] sm:$0xff] }
 0x2a9   :  { %v8477_v47 = vmul.f32 %v8355_v61, %v13416_v22  ;;  %v8483_v32 = vmul.f32 %v8355_v61, %v13419_v26  ;;  %v13427_v22 = vld [vmem:[#allocation24_spill] sm:$0xff]  ;;  %v13430_v26 = vld [vmem:[#allocation26_spill] sm:$0xff] }
 0x2aa   :  { %13411 = vst [vmem:[#allocation151_spill] sm:$0xff] %v8465_v19  ;;  %13414 = vst [vmem:[#allocation85_spill] sm:$0xff] %v8471_v46  ;;  %v13422_v19 = vsub.f32 %v13421_v5, %v7951_v52  ;;  %v13425_v46 = vsub.f32 %v13424_v63, %v7951_v52 }
 0x2ab   :  { %13417 = vst [vmem:[#allocation93_spill] sm:$0xff] %v8477_v47  ;;  %13420 = vst [vmem:[#allocation101_spill] sm:$0xff] %v8483_v32  ;;  %v13428_v47 = vsub.f32 %v13427_v22, %v7951_v52  ;;  %v13431_v32 = vsub.f32 %v13430_v26, %v7951_v52 }
 0x2ac   :  { %v8489_v57 = vmul.f32 %v8355_v61, %v13422_v19  ;;  %v8495_v38 = vmul.f32 %v8355_v61, %v13425_v46  ;;  %v13433_v19 = vld [vmem:[#allocation27_spill] sm:$0xff]  ;;  %v13436_v46 = vld [vmem:[#allocation29_spill] sm:$0xff] }
 0x2ad   :  { %v8501_v29 = vmul.f32 %v8355_v61, %v13428_v47  ;;  %v8507_v5 = vmul.f32 %v8355_v61, %v13431_v32  ;;  %v13439_v47 = vld [vmem:[#allocation28_spill] sm:$0xff]  ;;  %v13442_v32 = vld [vmem:[#allocation30_spill] sm:$0xff] }
 0x2ae   :  { %13423 = vst [vmem:[#allocation103_spill] sm:$0xff] %v8489_v57  ;;  %13426 = vst [vmem:[#allocation109_spill] sm:$0xff] %v8495_v38  ;;  %v13434_v57 = vsub.f32 %v13433_v19, %v7951_v52  ;;  %v13437_v38 = vsub.f32 %v13436_v46, %v7951_v52 }
 0x2af   :  { %13429 = vst [vmem:[#allocation164_spill] sm:$0xff] %v8501_v29  ;;  %13432 = vst [vmem:[#allocation108_spill] sm:$0xff] %v8507_v5  ;;  %v13440_v29 = vsub.f32 %v13439_v47, %v7951_v52  ;;  %v13443_v5 = vsub.f32 %v13442_v32, %v7951_v52 }
 0x2b0   :  { %v8513_v63 = vmul.f32 %v8355_v61, %v13434_v57  ;;  %v8519_v22 = vmul.f32 %v8355_v61, %v13437_v38  ;;  %v13445_v57 = vld [vmem:[#allocation31_spill] sm:$0xff]  ;;  %v13448_v38 = vld [vmem:[#allocation33_spill] sm:$0xff] }
 0x2b1   :  { %v8525_v26 = vmul.f32 %v8355_v61, %v13440_v29  ;;  %v8531_v19 = vmul.f32 %v8355_v61, %v13443_v5  ;;  %v13451_v29 = vld [vmem:[#allocation32_spill] sm:$0xff]  ;;  %v13454_v5 = vld [vmem:[#allocation34_spill] sm:$0xff] }
 0x2b2   :  { %13435 = vst [vmem:[#allocation116_spill] sm:$0xff] %v8513_v63  ;;  %13438 = vst [vmem:[#allocation115_spill] sm:$0xff] %v8519_v22  ;;  %v13446_v63 = vsub.f32 %v13445_v57, %v7951_v52  ;;  %v13449_v22 = vsub.f32 %v13448_v38, %v7951_v52 }
 0x2b3   :  { %13441 = vst [vmem:[#allocation117_spill] sm:$0xff] %v8525_v26  ;;  %13444 = vst [vmem:[#allocation123_spill] sm:$0xff] %v8531_v19  ;;  %v13452_v26 = vsub.f32 %v13451_v29, %v7951_v52  ;;  %v13455_v19 = vsub.f32 %v13454_v5, %v7951_v52 }
 0x2b4   :  { %v8537_v46 = vmul.f32 %v8355_v61, %v13446_v63  ;;  %v8543_v47 = vmul.f32 %v8355_v61, %v13449_v22  ;;  %v13457_v63 = vld [vmem:[#allocation35_spill] sm:$0xff]  ;;  %v13460_v22 = vld [vmem:[#allocation37_spill] sm:$0xff] }
 0x2b5   :  { %v8549_v32 = vmul.f32 %v8355_v61, %v13452_v26  ;;  %v8555_v57 = vmul.f32 %v8355_v61, %v13455_v19  ;;  %v13463_v26 = vld [vmem:[#allocation36_spill] sm:$0xff]  ;;  %v13466_v19 = vld [vmem:[#allocation38_spill] sm:$0xff] }
 0x2b6   :  { %13447 = vst [vmem:[#allocation124_spill] sm:$0xff] %v8537_v46  ;;  %13450 = vst [vmem:[#allocation129_spill] sm:$0xff] %v8543_v47  ;;  %v13458_v46 = vsub.f32 %v13457_v63, %v7951_v52  ;;  %v13461_v47 = vsub.f32 %v13460_v22, %v7951_v52 }
 0x2b7   :  { %13453 = vst [vmem:[#allocation165_spill] sm:$0xff] %v8549_v32  ;;  %13456 = vst [vmem:[#allocation166_spill] sm:$0xff] %v8555_v57  ;;  %v13464_v32 = vsub.f32 %v13463_v26, %v7951_v52  ;;  %v13467_v57 = vsub.f32 %v13466_v19, %v7951_v52 }
 0x2b8   :  { %v8561_v38 = vmul.f32 %v8355_v61, %v13458_v46  ;;  %v8567_v29 = vmul.f32 %v8355_v61, %v13461_v47  ;;  %v13469_v46 = vld [vmem:[#allocation39_spill] sm:$0xff]  ;;  %v13472_v47 = vld [vmem:[#allocation41_spill] sm:$0xff] }
 0x2b9   :  { %v8573_v5 = vmul.f32 %v8355_v61, %v13464_v32  ;;  %v8579_v63 = vmul.f32 %v8355_v61, %v13467_v57  ;;  %v13475_v32 = vld [vmem:[#allocation40_spill] sm:$0xff]  ;;  %v13478_v57 = vld [vmem:[#allocation42_spill] sm:$0xff] }
 0x2ba   :  { %13459 = vst [vmem:[#allocation167_spill] sm:$0xff] %v8561_v38  ;;  %13462 = vst [vmem:[#allocation168_spill] sm:$0xff] %v8567_v29  ;;  %v13470_v38 = vsub.f32 %v13469_v46, %v7951_v52  ;;  %v13473_v29 = vsub.f32 %v13472_v47, %v7951_v52 }
 0x2bb   :  { %13465 = vst [vmem:[#allocation9_spill] sm:$0xff] %v8573_v5  ;;  %13468 = vst [vmem:[#allocation8_spill] sm:$0xff] %v8579_v63  ;;  %v13476_v5 = vsub.f32 %v13475_v32, %v7951_v52  ;;  %v13479_v63 = vsub.f32 %v13478_v57, %v7951_v52 }
 0x2bc   :  { %v8585_v22 = vmul.f32 %v8355_v61, %v13470_v38  ;;  %v8591_v26 = vmul.f32 %v8355_v61, %v13473_v29  ;;  %v13481_v38 = vld [vmem:[#allocation43_spill] sm:$0xff]  ;;  %v13484_v29 = vld [vmem:[#allocation45_spill] sm:$0xff] }
 0x2bd   :  { %v8597_v19 = vmul.f32 %v8355_v61, %v13476_v5  ;;  %v8603_v46 = vmul.f32 %v8355_v61, %v13479_v63  ;;  %v13487_v5 = vld [vmem:[#allocation44_spill] sm:$0xff]  ;;  %v13490_v63 = vld [vmem:[#allocation46_spill] sm:$0xff] }
 0x2be   :  { %13471 = vst [vmem:[#allocation11_spill] sm:$0xff] %v8585_v22  ;;  %13474 = vst [vmem:[#allocation13_spill] sm:$0xff] %v8591_v26  ;;  %v13482_v22 = vsub.f32 %v13481_v38, %v7951_v52  ;;  %v13485_v26 = vsub.f32 %v13484_v29, %v7951_v52 }
 0x2bf   :  { %13477 = vst [vmem:[#allocation12_spill] sm:$0xff] %v8597_v19  ;;  %13480 = vst [vmem:[#allocation14_spill] sm:$0xff] %v8603_v46  ;;  %v13488_v19 = vsub.f32 %v13487_v5, %v7951_v52  ;;  %v13491_v46 = vsub.f32 %v13490_v63, %v7951_v52 }
 0x2c0   :  { %v8609_v47 = vmul.f32 %v8355_v61, %v13482_v22  ;;  %v8615_v32 = vmul.f32 %v8355_v61, %v13485_v26  ;;  %v13493_v22 = vld [vmem:[#allocation47_spill] sm:$0xff]  ;;  %v13496_v26 = vld [vmem:[#allocation49_spill] sm:$0xff] }
 0x2c1   :  { %v8621_v57 = vmul.f32 %v8355_v61, %v13488_v19  ;;  %v8627_v38 = vmul.f32 %v8355_v61, %v13491_v46  ;;  %v13499_v19 = vld [vmem:[#allocation48_spill] sm:$0xff]  ;;  %v13502_v46 = vld [vmem:[#allocation50_spill] sm:$0xff] }
 0x2c2   :  { %13483 = vst [vmem:[#allocation15_spill] sm:$0xff] %v8609_v47  ;;  %13486 = vst [vmem:[#allocation17_spill] sm:$0xff] %v8615_v32  ;;  %v13494_v47 = vsub.f32 %v13493_v22, %v7951_v52  ;;  %v13497_v32 = vsub.f32 %v13496_v26, %v7951_v52 }
 0x2c3   :  { %13489 = vst [vmem:[#allocation16_spill] sm:$0xff] %v8621_v57  ;;  %13492 = vst [vmem:[#allocation18_spill] sm:$0xff] %v8627_v38  ;;  %v13500_v57 = vsub.f32 %v13499_v19, %v7951_v52  ;;  %v13503_v38 = vsub.f32 %v13502_v46, %v7951_v52 }
 0x2c4   :  { %v8633_v29 = vmul.f32 %v8355_v61, %v13494_v47  ;;  %v8639_v5 = vmul.f32 %v8355_v61, %v13497_v32  ;;  %v13505_v47 = vld [vmem:[#allocation51_spill] sm:$0xff]  ;;  %v13508_v32 = vld [vmem:[#allocation53_spill] sm:$0xff] }
 0x2c5   :  { %v8645_v63 = vmul.f32 %v8355_v61, %v13500_v57  ;;  %v8651_v22 = vmul.f32 %v8355_v61, %v13503_v38  ;;  %v13511_v57 = vld [vmem:[#allocation52_spill] sm:$0xff]  ;;  %v13514_v38 = vld [vmem:[#allocation54_spill] sm:$0xff] }
 0x2c6   :  { %13495 = vst [vmem:[#allocation19_spill] sm:$0xff] %v8633_v29  ;;  %13498 = vst [vmem:[#allocation21_spill] sm:$0xff] %v8639_v5  ;;  %v13506_v29 = vsub.f32 %v13505_v47, %v7951_v52  ;;  %v13509_v5 = vsub.f32 %v13508_v32, %v7951_v52 }
 0x2c7   :  { %13501 = vst [vmem:[#allocation20_spill] sm:$0xff] %v8645_v63  ;;  %13504 = vst [vmem:[#allocation22_spill] sm:$0xff] %v8651_v22  ;;  %v13512_v63 = vsub.f32 %v13511_v57, %v7951_v52  ;;  %v13515_v22 = vsub.f32 %v13514_v38, %v7951_v52 }
 0x2c8   :  { %v8657_v26 = vmul.f32 %v8355_v61, %v13506_v29  ;;  %v8663_v19 = vmul.f32 %v8355_v61, %v13509_v5  ;;  %v13517_v29 = vld [vmem:[#allocation55_spill] sm:$0xff]  ;;  %v13520_v5 = vld [vmem:[#allocation57_spill] sm:$0xff] }
 0x2c9   :  { %v8669_v46 = vmul.f32 %v8355_v61, %v13512_v63  ;;  %v8675_v47 = vmul.f32 %v8355_v61, %v13515_v22  ;;  %v13523_v63 = vld [vmem:[#allocation56_spill] sm:$0xff]  ;;  %v13526_v22 = vld [vmem:[#allocation58_spill] sm:$0xff] }
 0x2ca   :  { %13507 = vst [vmem:[#allocation23_spill] sm:$0xff] %v8657_v26  ;;  %13510 = vst [vmem:[#allocation25_spill] sm:$0xff] %v8663_v19  ;;  %v13518_v26 = vsub.f32 %v13517_v29, %v7951_v52  ;;  %v13521_v19 = vsub.f32 %v13520_v5, %v7951_v52 }
 0x2cb   :  { %13513 = vst [vmem:[#allocation24_spill] sm:$0xff] %v8669_v46  ;;  %13516 = vst [vmem:[#allocation26_spill] sm:$0xff] %v8675_v47  ;;  %v13524_v46 = vsub.f32 %v13523_v63, %v7951_v52  ;;  %v13527_v47 = vsub.f32 %v13526_v22, %v7951_v52 }
 0x2cc   :  { %v8681_v32 = vmul.f32 %v8355_v61, %v13518_v26  ;;  %v8687_v57 = vmul.f32 %v8355_v61, %v13521_v19  ;;  %v13529_v26 = vld [vmem:[#allocation59_spill] sm:$0xff]  ;;  %v13532_v19 = vld [vmem:[#allocation61_spill] sm:$0xff] }
 0x2cd   :  { %v8693_v38 = vmul.f32 %v8355_v61, %v13524_v46  ;;  %v8699_v29 = vmul.f32 %v8355_v61, %v13527_v47  ;;  %v13535_v46 = vld [vmem:[#allocation60_spill] sm:$0xff]  ;;  %v13538_v47 = vld [vmem:[#allocation62_spill] sm:$0xff] }
 0x2ce   :  { %13519 = vst [vmem:[#allocation27_spill] sm:$0xff] %v8681_v32  ;;  %13522 = vst [vmem:[#allocation29_spill] sm:$0xff] %v8687_v57  ;;  %v13530_v32 = vsub.f32 %v13529_v26, %v7951_v52  ;;  %v13533_v57 = vsub.f32 %v13532_v19, %v7951_v52 }
 0x2cf   :  { %13525 = vst [vmem:[#allocation28_spill] sm:$0xff] %v8693_v38  ;;  %13528 = vst [vmem:[#allocation30_spill] sm:$0xff] %v8699_v29  ;;  %v13536_v38 = vsub.f32 %v13535_v46, %v7951_v52  ;;  %v13539_v29 = vsub.f32 %v13538_v47, %v7951_v52 }
 0x2d0   :  { %v8705_v5 = vmul.f32 %v8355_v61, %v13530_v32  ;;  %v8711_v63 = vmul.f32 %v8355_v61, %v13533_v57  ;;  %v13541_v32 = vld [vmem:[#allocation63_spill] sm:$0xff]  ;;  %v13544_v57 = vld [vmem:[#allocation65_spill] sm:$0xff] }
 0x2d1   :  { %v8717_v22 = vmul.f32 %v8355_v61, %v13536_v38  ;;  %v8723_v26 = vmul.f32 %v8355_v61, %v13539_v29  ;;  %v13547_v38 = vld [vmem:[#allocation64_spill] sm:$0xff]  ;;  %v13550_v29 = vld [vmem:[#allocation66_spill] sm:$0xff] }
 0x2d2   :  { %13531 = vst [vmem:[#allocation31_spill] sm:$0xff] %v8705_v5  ;;  %13534 = vst [vmem:[#allocation33_spill] sm:$0xff] %v8711_v63  ;;  %v13542_v5 = vsub.f32 %v13541_v32, %v7951_v52  ;;  %v13545_v63 = vsub.f32 %v13544_v57, %v7951_v52 }
 0x2d3   :  { %13537 = vst [vmem:[#allocation32_spill] sm:$0xff] %v8717_v22  ;;  %13540 = vst [vmem:[#allocation34_spill] sm:$0xff] %v8723_v26  ;;  %v13548_v22 = vsub.f32 %v13547_v38, %v7951_v52  ;;  %v13551_v26 = vsub.f32 %v13550_v29, %v7951_v52 }
 0x2d4   :  { %v8729_v19 = vmul.f32 %v8355_v61, %v13542_v5  ;;  %v8735_v46 = vmul.f32 %v8355_v61, %v13545_v63  ;;  %v13553_v5 = vld [vmem:[#allocation67_spill] sm:$0xff]  ;;  %v13556_v63 = vld [vmem:[#allocation69_spill] sm:$0xff] }
 0x2d5   :  { %v8741_v47 = vmul.f32 %v8355_v61, %v13548_v22  ;;  %v8747_v32 = vmul.f32 %v8355_v61, %v13551_v26  ;;  %v13559_v22 = vld [vmem:[#allocation68_spill] sm:$0xff]  ;;  %v13562_v26 = vld [vmem:[#allocation70_spill] sm:$0xff] }
 0x2d6   :  { %13543 = vst [vmem:[#allocation35_spill] sm:$0xff] %v8729_v19  ;;  %13546 = vst [vmem:[#allocation37_spill] sm:$0xff] %v8735_v46  ;;  %v13554_v19 = vsub.f32 %v13553_v5, %v7951_v52  ;;  %v13557_v46 = vsub.f32 %v13556_v63, %v7951_v52 }
 0x2d7   :  { %13549 = vst [vmem:[#allocation36_spill] sm:$0xff] %v8741_v47  ;;  %13552 = vst [vmem:[#allocation38_spill] sm:$0xff] %v8747_v32  ;;  %v13560_v47 = vsub.f32 %v13559_v22, %v7951_v52  ;;  %v13563_v32 = vsub.f32 %v13562_v26, %v7951_v52 }
 0x2d8   :  { %v8753_v57 = vmul.f32 %v8355_v61, %v13554_v19  ;;  %v8759_v38 = vmul.f32 %v8355_v61, %v13557_v46  ;;  %v13565_v19 = vld [vmem:[#allocation71_spill] sm:$0xff]  ;;  %v13568_v46 = vld [vmem:[#allocation73_spill] sm:$0xff] }
 0x2d9   :  { %v8765_v29 = vmul.f32 %v8355_v61, %v13560_v47  ;;  %v8771_v5 = vmul.f32 %v8355_v61, %v13563_v32  ;;  %v13571_v47 = vld [vmem:[#allocation72_spill] sm:$0xff]  ;;  %v13574_v32 = vld [vmem:[#allocation74_spill] sm:$0xff] }
 0x2da   :  { %13555 = vst [vmem:[#allocation39_spill] sm:$0xff] %v8753_v57  ;;  %13558 = vst [vmem:[#allocation41_spill] sm:$0xff] %v8759_v38  ;;  %v13566_v57 = vsub.f32 %v13565_v19, %v7951_v52  ;;  %v13569_v38 = vsub.f32 %v13568_v46, %v7951_v52 }
 0x2db   :  { %13561 = vst [vmem:[#allocation40_spill] sm:$0xff] %v8765_v29  ;;  %13564 = vst [vmem:[#allocation42_spill] sm:$0xff] %v8771_v5  ;;  %v13572_v29 = vsub.f32 %v13571_v47, %v7951_v52  ;;  %v13575_v5 = vsub.f32 %v13574_v32, %v7951_v52 }
 0x2dc   :  { %v8777_v63 = vmul.f32 %v8355_v61, %v13566_v57  ;;  %v8783_v22 = vmul.f32 %v8355_v61, %v13569_v38  ;;  %v13577_v57 = vld [vmem:[#allocation75_spill] sm:$0xff]  ;;  %v13580_v38 = vld [vmem:[#allocation77_spill] sm:$0xff] }
 0x2dd   :  { %v8789_v26 = vmul.f32 %v8355_v61, %v13572_v29  ;;  %v8795_v19 = vmul.f32 %v8355_v61, %v13575_v5  ;;  %v13583_v29 = vld [vmem:[#allocation76_spill] sm:$0xff]  ;;  %v13586_v5 = vld [vmem:[#allocation78_spill] sm:$0xff] }
 0x2de   :  { %13567 = vst [vmem:[#allocation43_spill] sm:$0xff] %v8777_v63  ;;  %13570 = vst [vmem:[#allocation45_spill] sm:$0xff] %v8783_v22  ;;  %v13578_v63 = vsub.f32 %v13577_v57, %v7951_v52  ;;  %v13581_v22 = vsub.f32 %v13580_v38, %v7951_v52 }
 0x2df   :  { %13573 = vst [vmem:[#allocation44_spill] sm:$0xff] %v8789_v26  ;;  %13576 = vst [vmem:[#allocation46_spill] sm:$0xff] %v8795_v19  ;;  %v13584_v26 = vsub.f32 %v13583_v29, %v7951_v52  ;;  %v13587_v19 = vsub.f32 %v13586_v5, %v7951_v52 }
 0x2e0   :  { %v8801_v46 = vmul.f32 %v8355_v61, %v13578_v63  ;;  %v8807_v47 = vmul.f32 %v8355_v61, %v13581_v22  ;;  %v13589_v63 = vld [vmem:[#allocation80_spill] sm:$0xff]  ;;  %v13592_v22 = vld [vmem:[#allocation82_spill] sm:$0xff] }
 0x2e1   :  { %v8813_v32 = vmul.f32 %v8355_v61, %v13584_v26  ;;  %v8819_v57 = vmul.f32 %v8355_v61, %v13587_v19  ;;  %v13595_v26 = vld [vmem:[#allocation81_spill] sm:$0xff]  ;;  %v13598_v19 = vld [vmem:[#allocation83_spill] sm:$0xff] }
 0x2e2   :  { %13579 = vst [vmem:[#allocation47_spill] sm:$0xff] %v8801_v46  ;;  %13582 = vst [vmem:[#allocation49_spill] sm:$0xff] %v8807_v47  ;;  %v13590_v46 = vsub.f32 %v13589_v63, %v7951_v52  ;;  %v13593_v47 = vsub.f32 %v13592_v22, %v7951_v52 }
 0x2e3   :  { %13585 = vst [vmem:[#allocation48_spill] sm:$0xff] %v8813_v32  ;;  %13588 = vst [vmem:[#allocation50_spill] sm:$0xff] %v8819_v57  ;;  %v13596_v32 = vsub.f32 %v13595_v26, %v7951_v52  ;;  %v13599_v57 = vsub.f32 %v13598_v19, %v7951_v52 }
 0x2e4   :  { %v8825_v38 = vmul.f32 %v8355_v61, %v13590_v46  ;;  %v8831_v29 = vmul.f32 %v8355_v61, %v13593_v47  ;;  %v13601_v46 = vld [vmem:[#allocation88_spill] sm:$0xff]  ;;  %v13604_v47 = vld [vmem:[#allocation90_spill] sm:$0xff] }
 0x2e5   :  { %v8837_v5 = vmul.f32 %v8355_v61, %v13596_v32  ;;  %v8843_v63 = vmul.f32 %v8355_v61, %v13599_v57  ;;  %v13607_v32 = vld [vmem:[#allocation89_spill] sm:$0xff]  ;;  %v13610_v57 = vld [vmem:[#allocation91_spill] sm:$0xff] }
 0x2e6   :  { %13591 = vst [vmem:[#allocation51_spill] sm:$0xff] %v8825_v38  ;;  %13594 = vst [vmem:[#allocation53_spill] sm:$0xff] %v8831_v29  ;;  %v13602_v38 = vsub.f32 %v13601_v46, %v7951_v52  ;;  %v13605_v29 = vsub.f32 %v13604_v47, %v7951_v52 }
 0x2e7   :  { %13597 = vst [vmem:[#allocation52_spill] sm:$0xff] %v8837_v5  ;;  %13600 = vst [vmem:[#allocation54_spill] sm:$0xff] %v8843_v63  ;;  %v13608_v5 = vsub.f32 %v13607_v32, %v7951_v52  ;;  %v13611_v63 = vsub.f32 %v13610_v57, %v7951_v52 }
 0x2e8   :  { %v8849_v22 = vmul.f32 %v8355_v61, %v13602_v38  ;;  %v8855_v26 = vmul.f32 %v8355_v61, %v13605_v29  ;;  %v13613_v38 = vld [vmem:[#allocation96_spill] sm:$0xff]  ;;  %v13616_v29 = vld [vmem:[#allocation98_spill] sm:$0xff] }
 0x2e9   :  { %v8861_v19 = vmul.f32 %v8355_v61, %v13608_v5  ;;  %v8867_v46 = vmul.f32 %v8355_v61, %v13611_v63  ;;  %v13619_v5 = vld [vmem:[#allocation97_spill] sm:$0xff]  ;;  %v13622_v63 = vld [vmem:[#allocation99_spill] sm:$0xff] }
 0x2ea   :  { %13603 = vst [vmem:[#allocation55_spill] sm:$0xff] %v8849_v22  ;;  %13606 = vst [vmem:[#allocation57_spill] sm:$0xff] %v8855_v26  ;;  %v13614_v22 = vsub.f32 %v13613_v38, %v7951_v52  ;;  %v13617_v26 = vsub.f32 %v13616_v29, %v7951_v52 }
 0x2eb   :  { %13609 = vst [vmem:[#allocation56_spill] sm:$0xff] %v8861_v19  ;;  %13612 = vst [vmem:[#allocation58_spill] sm:$0xff] %v8867_v46  ;;  %v13620_v19 = vsub.f32 %v13619_v5, %v7951_v52  ;;  %v13623_v46 = vsub.f32 %v13622_v63, %v7951_v52 }
 0x2ec   :  { %v8873_v47 = vmul.f32 %v8355_v61, %v13614_v22  ;;  %v8879_v32 = vmul.f32 %v8355_v61, %v13617_v26  ;;  %v13625_v22 = vld [vmem:[#allocation104_spill] sm:$0xff]  ;;  %v13628_v26 = vld [vmem:[#allocation106_spill] sm:$0xff] }
 0x2ed   :  { %v8885_v57 = vmul.f32 %v8355_v61, %v13620_v19  ;;  %v8891_v38 = vmul.f32 %v8355_v61, %v13623_v46  ;;  %v13631_v19 = vld [vmem:[#allocation105_spill] sm:$0xff]  ;;  %v13634_v46 = vld [vmem:[#allocation107_spill] sm:$0xff] }
 0x2ee   :  { %13615 = vst [vmem:[#allocation59_spill] sm:$0xff] %v8873_v47  ;;  %13618 = vst [vmem:[#allocation61_spill] sm:$0xff] %v8879_v32  ;;  %v13626_v47 = vsub.f32 %v13625_v22, %v7951_v52  ;;  %v13629_v32 = vsub.f32 %v13628_v26, %v7951_v52 }
 0x2ef   :  { %13621 = vst [vmem:[#allocation60_spill] sm:$0xff] %v8885_v57  ;;  %13624 = vst [vmem:[#allocation62_spill] sm:$0xff] %v8891_v38  ;;  %v13632_v57 = vsub.f32 %v13631_v19, %v7951_v52  ;;  %v13635_v38 = vsub.f32 %v13634_v46, %v7951_v52 }
 0x2f0   :  { %v8897_v29 = vmul.f32 %v8355_v61, %v13626_v47  ;;  %v8903_v5 = vmul.f32 %v8355_v61, %v13629_v32  ;;  %v13637_v47 = vld [vmem:[#allocation111_spill] sm:$0xff]  ;;  %v13640_v32 = vld [vmem:[#allocation113_spill] sm:$0xff] }
 0x2f1   :  { %v8909_v63 = vmul.f32 %v8355_v61, %v13632_v57  ;;  %v8915_v22 = vmul.f32 %v8355_v61, %v13635_v38  ;;  %v13643_v57 = vld [vmem:[#allocation112_spill] sm:$0xff]  ;;  %v13646_v38 = vld [vmem:[#allocation114_spill] sm:$0xff] }
 0x2f2   :  { %13627 = vst [vmem:[#allocation63_spill] sm:$0xff] %v8897_v29  ;;  %13630 = vst [vmem:[#allocation65_spill] sm:$0xff] %v8903_v5  ;;  %v13638_v29 = vsub.f32 %v13637_v47, %v7951_v52  ;;  %v13641_v5 = vsub.f32 %v13640_v32, %v7951_v52 }
 0x2f3   :  { %13633 = vst [vmem:[#allocation64_spill] sm:$0xff] %v8909_v63  ;;  %13636 = vst [vmem:[#allocation66_spill] sm:$0xff] %v8915_v22  ;;  %v13644_v63 = vsub.f32 %v13643_v57, %v7951_v52  ;;  %v13647_v22 = vsub.f32 %v13646_v38, %v7951_v52 }
 0x2f4   :  { %v8921_v26 = vmul.f32 %v8355_v61, %v13638_v29  ;;  %v8927_v19 = vmul.f32 %v8355_v61, %v13641_v5  ;;  %v13649_v29 = vld [vmem:[#allocation118_spill] sm:$0xff]  ;;  %v13652_v5 = vld [vmem:[#allocation121_spill] sm:$0xff] }
 0x2f5   :  { %v8933_v46 = vmul.f32 %v8355_v61, %v13644_v63  ;;  %v8939_v47 = vmul.f32 %v8355_v61, %v13647_v22  ;;  %v13655_v63 = vld [vmem:[#allocation119_spill] sm:$0xff]  ;;  %v13658_v22 = vld [vmem:[#allocation122_spill] sm:$0xff] }
 0x2f6   :  { %13639 = vst [vmem:[#allocation67_spill] sm:$0xff] %v8921_v26  ;;  %13642 = vst [vmem:[#allocation69_spill] sm:$0xff] %v8927_v19  ;;  %v13650_v26 = vsub.f32 %v13649_v29, %v7951_v52  ;;  %v13653_v19 = vsub.f32 %v13652_v5, %v7951_v52 }
 0x2f7   :  { %13645 = vst [vmem:[#allocation68_spill] sm:$0xff] %v8933_v46  ;;  %13648 = vst [vmem:[#allocation70_spill] sm:$0xff] %v8939_v47  ;;  %v13656_v46 = vsub.f32 %v13655_v63, %v7951_v52  ;;  %v13659_v47 = vsub.f32 %v13658_v22, %v7951_v52 }
 0x2f8   :  { %v8945_v32 = vmul.f32 %v8355_v61, %v13650_v26  ;;  %v8951_v57 = vmul.f32 %v8355_v61, %v13653_v19  ;;  %v13661_v26 = vld [vmem:[#allocation120_spill] sm:$0xff]  ;;  %v13664_v19 = vld [vmem:[#allocation125_spill] sm:$0xff] }
 0x2f9   :  { %v8957_v38 = vmul.f32 %v8355_v61, %v13656_v46  ;;  %v8963_v29 = vmul.f32 %v8355_v61, %v13659_v47  ;;  %v13667_v46 = vld [vmem:[#allocation126_spill] sm:$0xff]  ;;  %v13670_v47 = vld [vmem:[#allocation127_spill] sm:$0xff] }
 0x2fa   :  { %13651 = vst [vmem:[#allocation71_spill] sm:$0xff] %v8945_v32  ;;  %13654 = vst [vmem:[#allocation73_spill] sm:$0xff] %v8951_v57  ;;  %v13662_v32 = vsub.f32 %v13661_v26, %v7951_v52  ;;  %v13665_v57 = vsub.f32 %v13664_v19, %v7951_v52 }
 0x2fb   :  { %13657 = vst [vmem:[#allocation72_spill] sm:$0xff] %v8957_v38  ;;  %13660 = vst [vmem:[#allocation74_spill] sm:$0xff] %v8963_v29  ;;  %v13668_v38 = vsub.f32 %v13667_v46, %v7951_v52  ;;  %v13671_v29 = vsub.f32 %v13670_v47, %v7951_v52 }
 0x2fc   :  { %v8969_v5 = vmul.f32 %v8355_v61, %v13662_v32  ;;  %v8975_v63 = vmul.f32 %v8355_v61, %v13665_v57  ;;  %v13673_v32 = vld [vmem:[#allocation128_spill] sm:$0xff]  ;;  %v13676_v57 = vld [vmem:[#allocation130_spill] sm:$0xff] }
 0x2fd   :  { %v8981_v22 = vmul.f32 %v8355_v61, %v13668_v38  ;;  %v8987_v26 = vmul.f32 %v8355_v61, %v13671_v29  ;;  %v13679_v38 = vld [vmem:[#allocation131_spill] sm:$0xff]  ;;  %v13682_v29 = vld [vmem:[#allocation132_spill] sm:$0xff] }
 0x2fe   :  { %13663 = vst [vmem:[#allocation75_spill] sm:$0xff] %v8969_v5  ;;  %13666 = vst [vmem:[#allocation77_spill] sm:$0xff] %v8975_v63  ;;  %v13674_v5 = vsub.f32 %v13673_v32, %v7951_v52  ;;  %v13677_v63 = vsub.f32 %v13676_v57, %v7951_v52 }
 0x2ff   :  { %13669 = vst [vmem:[#allocation76_spill] sm:$0xff] %v8981_v22  ;;  %13672 = vst [vmem:[#allocation78_spill] sm:$0xff] %v8987_v26  ;;  %v13680_v22 = vsub.f32 %v13679_v38, %v7951_v52  ;;  %v13683_v26 = vsub.f32 %v13682_v29, %v7951_v52 }
 0x300   :  { %v8993_v19 = vmul.f32 %v8355_v61, %v13674_v5  ;;  %v8999_v46 = vmul.f32 %v8355_v61, %v13677_v63  ;;  %v13685_v5 = vld [vmem:[#allocation133_spill] sm:$0xff]  ;;  %v13688_v63 = vld [vmem:[#allocation134_spill] sm:$0xff] }
 0x301   :  { %v9005_v47 = vmul.f32 %v8355_v61, %v13680_v22  ;;  %v9011_v32 = vmul.f32 %v8355_v61, %v13683_v26  ;;  %v13691_v22 = vld [vmem:[#allocation135_spill] sm:$0xff]  ;;  %v13694_v26 = vld [vmem:[#allocation136_spill] sm:$0xff] }
 0x302   :  { %13675 = vst [vmem:[#allocation80_spill] sm:$0xff] %v8993_v19  ;;  %13678 = vst [vmem:[#allocation82_spill] sm:$0xff] %v8999_v46  ;;  %v13686_v19 = vsub.f32 %v13685_v5, %v7951_v52  ;;  %v13689_v46 = vsub.f32 %v13688_v63, %v7951_v52 }
 0x303   :  { %13681 = vst [vmem:[#allocation81_spill] sm:$0xff] %v9005_v47  ;;  %13684 = vst [vmem:[#allocation83_spill] sm:$0xff] %v9011_v32  ;;  %v13692_v47 = vsub.f32 %v13691_v22, %v7951_v52  ;;  %v13695_v32 = vsub.f32 %v13694_v26, %v7951_v52 }
 0x304   :  { %v9017_v57 = vmul.f32 %v8355_v61, %v13686_v19  ;;  %v9023_v38 = vmul.f32 %v8355_v61, %v13689_v46  ;;  %v13697_v19 = vld [vmem:[#allocation137_spill] sm:$0xff]  ;;  %v13700_v46 = vld [vmem:[#allocation138_spill] sm:$0xff] }
 0x305   :  { %v9029_v29 = vmul.f32 %v8355_v61, %v13692_v47  ;;  %v9035_v5 = vmul.f32 %v8355_v61, %v13695_v32  ;;  %v13703_v47 = vld [vmem:[#allocation139_spill] sm:$0xff]  ;;  %v13706_v32 = vld [vmem:[#allocation140_spill] sm:$0xff] }
 0x306   :  { %13687 = vst [vmem:[#allocation88_spill] sm:$0xff] %v9017_v57  ;;  %13690 = vst [vmem:[#allocation90_spill] sm:$0xff] %v9023_v38  ;;  %v13698_v57 = vsub.f32 %v13697_v19, %v7951_v52  ;;  %v13701_v38 = vsub.f32 %v13700_v46, %v7951_v52 }
 0x307   :  { %13693 = vst [vmem:[#allocation89_spill] sm:$0xff] %v9029_v29  ;;  %13696 = vst [vmem:[#allocation91_spill] sm:$0xff] %v9035_v5  ;;  %v13704_v29 = vsub.f32 %v13703_v47, %v7951_v52  ;;  %v13707_v5 = vsub.f32 %v13706_v32, %v7951_v52 }
 0x308   :  { %v9041_v63 = vmul.f32 %v8355_v61, %v13698_v57  ;;  %v9047_v22 = vmul.f32 %v8355_v61, %v13701_v38  ;;  %v13709_v57 = vld [vmem:[#allocation141_spill] sm:$0xff]  ;;  %v13711_v38 = vld [vmem:[#allocation142_spill] sm:$0xff] }
 0x309   :  { %v9053_v26 = vmul.f32 %v8355_v61, %v13704_v29  ;;  %v9059_v19 = vmul.f32 %v8355_v61, %v13707_v5  ;;  %v13713_v29 = vld [vmem:[#allocation143_spill] sm:$0xff]  ;;  %v13715_v5 = vld [vmem:[#allocation144_spill] sm:$0xff] }
 0x30a   :  { %13699 = vst [vmem:[#allocation96_spill] sm:$0xff] %v9041_v63  ;;  %13702 = vst [vmem:[#allocation98_spill] sm:$0xff] %v9047_v22  ;;  %v13710_v63 = vsub.f32 %v13709_v57, %v7951_v52  ;;  %v13712_v22 = vsub.f32 %v13711_v38, %v7951_v52 }
 0x30b   :  { %13705 = vst [vmem:[#allocation97_spill] sm:$0xff] %v9053_v26  ;;  %13708 = vst [vmem:[#allocation99_spill] sm:$0xff] %v9059_v19  ;;  %v13714_v26 = vsub.f32 %v13713_v29, %v7951_v52  ;;  %v13716_v19 = vsub.f32 %v13715_v5, %v7951_v52 }
 0x30c   :  { %v9065_v46 = vmul.f32 %v8355_v61, %v13710_v63  ;;  %v9071_v47 = vmul.f32 %v8355_v61, %v13712_v22  ;;  %v13717_v63 = vsub.f32 %v13334_v6, %v7951_v52  ;;  %v13718_v22 = vsub.f32 %v13335_v30, %v7951_v52 }
 0x30d   :  { %v9077_v32 = vmul.f32 %v8355_v61, %v13714_v26  ;;  %v9083_v57 = vmul.f32 %v8355_v61, %v13716_v19  ;;  %v13719_v26 = vsub.f32 %v13336_v12, %v7951_v52  ;;  %v13720_v19 = vsub.f32 %v13337_v20, %v7951_v52 }
 0x30e   :  { %v9089_v38 = vmul.f32 %v8355_v61, %v13717_v63  ;;  %v9095_v29 = vmul.f32 %v8355_v61, %v13718_v22  ;;  %v13721_v63 = vsub.f32 %v13338_v7, %v7951_v52  ;;  %v13722_v22 = vsub.f32 %v13339_v35, %v7951_v52 }
 0x30f   :  { %v9101_v5 = vmul.f32 %v8355_v61, %v13719_v26  ;;  %v9107_v6 = vmul.f32 %v8355_v61, %v13720_v19  ;;  %v13723_v26 = vsub.f32 %v13340_v16, %v7951_v52  ;;  %v13724_v19 = vsub.f32 %v7313_v18, %v7951_v52 }
 0x310   :  { %v9113_v30 = vmul.f32 %v8355_v61, %v13721_v63  ;;  %v9119_v12 = vmul.f32 %v8355_v61, %v13722_v22  ;;  %v13726_v63 = vsub.f32 %v7320_v44, %v7951_v52  ;;  %v13728_v22 = vsub.f32 %v7341_v56, %v7951_v52 }
 0x311   :  { %v9125_v20 = vmul.f32 %v8355_v61, %v13723_v26  ;;  %v9131_v7 = vmul.f32 %v8355_v61, %v13724_v19  ;;  %v13730_v26 = vsub.f32 %v7352_v53, %v7951_v52  ;;  %v13732_v19 = vld [vmem:[#allocation152_spill] sm:$0xff] }
 0x312   :  { %v9137_v35 = vmul.f32 %v8355_v61, %v13726_v63  ;;  %v9143_v16 = vmul.f32 %v8355_v61, %v13728_v22  ;;  %v13735_v63 = vld [vmem:[#allocation153_spill] sm:$0xff]  ;;  %v13738_v22 = vld [vmem:[#allocation154_spill] sm:$0xff] }
 0x313   :  { %13725 = vst [vmem:[#allocation104_spill] sm:$0xff] %v9131_v7  ;;  %v9149_v18 = vmul.f32 %v8355_v61, %v13730_v26  ;;  %v13733_v7 = vsub.f32 %v13732_v19, %v7951_v52  ;;  %v13741_v26 = vld [vmem:[#allocation155_spill] sm:$0xff] }
 0x314   :  { %13727 = vst [vmem:[#allocation106_spill] sm:$0xff] %v9137_v35  ;;  %13729 = vst [vmem:[#allocation105_spill] sm:$0xff] %v9143_v16  ;;  %v13736_v35 = vsub.f32 %v13735_v63, %v7951_v52  ;;  %v13739_v16 = vsub.f32 %v13738_v22, %v7951_v52 }
 0x315   :  { %13731 = vst [vmem:[#allocation107_spill] sm:$0xff] %v9149_v18  ;;  %v9155_v44 = vmul.f32 %v8355_v61, %v13733_v7  ;;  %v13742_v18 = vsub.f32 %v13741_v26, %v7951_v52  ;;  %v13744_v7 = vld [vmem:[#allocation156_spill] sm:$0xff] }
 0x316   :  { %v9161_v56 = vmul.f32 %v8355_v61, %v13736_v35  ;;  %v9167_v53 = vmul.f32 %v8355_v61, %v13739_v16  ;;  %v13747_v35 = vld [vmem:[#allocation157_spill] sm:$0xff]  ;;  %v13750_v16 = vld [vmem:[#allocation158_spill] sm:$0xff] }
 0x317   :  { %13734 = vst [vmem:[#allocation111_spill] sm:$0xff] %v9155_v44  ;;  %v9173_v19 = vmul.f32 %v8355_v61, %v13742_v18  ;;  %v13745_v44 = vsub.f32 %v13744_v7, %v7951_v52  ;;  %v13753_v18 = vld [vmem:[#allocation159_spill] sm:$0xff] }
 0x318   :  { %13737 = vst [vmem:[#allocation113_spill] sm:$0xff] %v9161_v56  ;;  %13740 = vst [vmem:[#allocation112_spill] sm:$0xff] %v9167_v53  ;;  %v13748_v56 = vsub.f32 %v13747_v35, %v7951_v52  ;;  %v13751_v53 = vsub.f32 %v13750_v16, %v7951_v52 }
 0x319   :  { %13743 = vst [vmem:[#allocation114_spill] sm:$0xff] %v9173_v19  ;;  %v9179_v63 = vmul.f32 %v8355_v61, %v13745_v44  ;;  %v13754_v19 = vsub.f32 %v13753_v18, %v7951_v52  ;;  %v13756_v44 = vld [vmem:[#allocation160_spill] sm:$0xff] }
 0x31a   :  { %v9185_v22 = vmul.f32 %v8355_v61, %v13748_v56  ;;  %v9191_v26 = vmul.f32 %v8355_v61, %v13751_v53  ;;  %v13759_v56 = vld [vmem:[#allocation161_spill] sm:$0xff]  ;;  %v13761_v53 = vld [vmem:[#allocation162_spill] sm:$0xff] }
 0x31b   :  { %13746 = vst [vmem:[#allocation118_spill] sm:$0xff] %v9179_v63  ;;  %v9197_v7 = vmul.f32 %v8355_v61, %v13754_v19  ;;  %v13757_v63 = vsub.f32 %v13756_v44, %v7951_v52  ;;  %v13764_v19 = vld [vmem:[#allocation163_spill] sm:$0xff] }
 0x31c   :  { %13749 = vst [vmem:[#allocation121_spill] sm:$0xff] %v9185_v22  ;;  %13752 = vst [vmem:[#allocation119_spill] sm:$0xff] %v9191_v26  ;;  %v13760_v22 = vsub.f32 %v13759_v56, %v7951_v52  ;;  %v13762_v26 = vsub.f32 %v13761_v53, %v7951_v52 }
 0x31d   :  { %13755 = vst [vmem:[#allocation122_spill] sm:$0xff] %v9197_v7  ;;  %v9203_v35 = vmul.f32 %v8355_v61, %v13757_v63  ;;  %v13765_v7 = vsub.f32 %v13764_v19, %v7951_v52  ;;  %v13767_v63 = vld [vmem:[#allocation79_spill] sm:$0xff] }
 0x31e   :  { %v9209_v16 = vmul.f32 %v8355_v61, %v13760_v22  ;;  %v9215_v18 = vmul.f32 %v8355_v61, %v13762_v26  ;;  %v13770_v22 = vsub.f32 %v13347_v42, %v7951_v52  ;;  %v13771_v26 = vld [vmem:[#allocation87_spill] sm:$0xff] }
 0x31f   :  { %13758 = vst [vmem:[#allocation120_spill] sm:$0xff] %v9203_v35  ;;  %v9221_v44 = vmul.f32 %v8355_v61, %v13765_v7  ;;  %v13768_v35 = vsub.f32 %v13767_v63, %v7951_v52  ;;  %v13774_v7 = vld [vmem:[#allocation84_spill] sm:$0xff] }
 0x320   :  { %13763 = vst [vmem:[#allocation125_spill] sm:$0xff] %v9215_v18  ;;  %v9233_v53 = vmul.f32 %v8355_v61, %v13770_v22  ;;  %v13772_v18 = vsub.f32 %v13771_v26, %v7951_v52  ;;  %v13780_v22 = vsub.f32 %v13351_v3, %v7951_v52 }
 0x321   :  { %13766 = vst [vmem:[#allocation126_spill] sm:$0xff] %v9221_v44  ;;  %v9227_v56 = vmul.f32 %v8355_v61, %v13768_v35  ;;  %v13775_v44 = vsub.f32 %v13774_v7, %v7951_v52  ;;  %v13777_v35 = vld [vmem:[#allocation86_spill] sm:$0xff] }
 0x322   :  { %v9239_v19 = vmul.f32 %v8355_v61, %v13772_v18  ;;  %v9257_v26 = vmul.f32 %v8355_v61, %v13780_v22  ;;  %v13781_v18 = vld [vmem:[#allocation95_spill] sm:$0xff]  ;;  %v13789_v22 = vsub.f32 %v13354_v15, %v7951_v52 }
 0x323   :  { %13769 = vst [vmem:[#allocation127_spill] sm:$0xff] %v9227_v56  ;;  %v9245_v63 = vmul.f32 %v8355_v61, %v13775_v44  ;;  %v13778_v56 = vsub.f32 %v13777_v35, %v7951_v52  ;;  %v13783_v44 = vld [vmem:[#allocation92_spill] sm:$0xff] }
 0x324   :  { %13773 = vst [vmem:[#allocation128_spill] sm:$0xff] %v9239_v19  ;;  %v13782_v19 = vsub.f32 %v13781_v18, %v7951_v52  ;;  %v9281_v18 = vmul.f32 %v8355_v61, %v13789_v22  ;;  %v13796_v22 = vsub.f32 %v13357_v21, %v7951_v52 }
 0x325   :  { %13776 = vst [vmem:[#allocation130_spill] sm:$0xff] %v9245_v63  ;;  %v9251_v42 = vmul.f32 %v8355_v61, %v13778_v56  ;;  %v13784_v63 = vsub.f32 %v13783_v44, %v7951_v52  ;;  %v13786_v56 = vld [vmem:[#allocation94_spill] sm:$0xff] }
 0x326   :  { %v9263_v7 = vmul.f32 %v8355_v61, %v13782_v19  ;;  %v13790_v19 = vsub.f32 %v13355_v41, %v7951_v52  ;;  %v9305_v41 = vmul.f32 %v8355_v61, %v13796_v22  ;;  %v13801_v22 = vsub.f32 %v7616_v49, %v7951_v52 }
 0x327   :  { %13779 = vst [vmem:[#allocation131_spill] sm:$0xff] %v9251_v42  ;;  %v9269_v35 = vmul.f32 %v8355_v61, %v13784_v63  ;;  %v13787_v42 = vsub.f32 %v13786_v56, %v7951_v52  ;;  %v13791_v63 = vld [vmem:[#allocation100_spill] sm:$0xff] }
 0x328   :  { %v9287_v44 = vmul.f32 %v8355_v61, %v13790_v19  ;;  %v13797_v19 = vsub.f32 %v13358_v55, %v7951_v52  ;;  %v9329_v55 = vmul.f32 %v8355_v61, %v13801_v22  ;;  %v13805_v22 = vsub.f32 %v7652_v11, %v7951_v52 }
 0x329   :  { %13785 = vst [vmem:[#allocation132_spill] sm:$0xff] %v9269_v35  ;;  %v9275_v3 = vmul.f32 %v8355_v61, %v13787_v42  ;;  %v13792_v35 = vsub.f32 %v13791_v63, %v7951_v52  ;;  %v13793_v42 = vld [vmem:[#allocation102_spill] sm:$0xff] }
 0x32a   :  { %v9311_v63 = vmul.f32 %v8355_v61, %v13797_v19  ;;  %v13802_v19 = vsub.f32 %v13360_v24, %v7951_v52  ;;  %v9353_v24 = vmul.f32 %v8355_v61, %v13805_v22  ;;  %v13809_v22 = vsub.f32 %v7688_v0, %v7951_v52 }
 0x32b   :  { %13788 = vst [vmem:[#allocation133_spill] sm:$0xff] %v9275_v3  ;;  %v9293_v56 = vmul.f32 %v8355_v61, %v13792_v35  ;;  %v13794_v3 = vsub.f32 %v13793_v42, %v7951_v52  ;;  %v13798_v35 = vsub.f32 %v13359_v9, %v7951_v52 }
 0x32c   :  { %v9335_v9 = vmul.f32 %v8355_v61, %v13802_v19  ;;  %v13806_v19 = vsub.f32 %v7667_v14, %v7951_v52  ;;  %v9377_v14 = vmul.f32 %v8355_v61, %v13809_v22  ;;  %v13813_v22 = vsub.f32 %v7724_v33, %v7951_v52 }
 0x32d   :  { %v9299_v15 = vmul.f32 %v8355_v61, %v13794_v3  ;;  %v9317_v42 = vmul.f32 %v8355_v61, %v13798_v35  ;;  %v13799_v3 = vld [vmem:[#allocation110_spill] sm:$0xff]  ;;  %v13803_v35 = vsub.f32 %v13361_v31, %v7951_v52 }
 0x32e   :  { %v9359_v31 = vmul.f32 %v8355_v61, %v13806_v19  ;;  %v13810_v19 = vsub.f32 %v7703_v37, %v7951_v52  ;;  %v9401_v37 = vmul.f32 %v8355_v61, %v13813_v22  ;;  %v13817_v22 = vsub.f32 %v13365_v8, %v7951_v52 }
 0x32f   :  { %13795 = vst [vmem:[#allocation134_spill] sm:$0xff] %v9299_v15  ;;  %v13800_v15 = vsub.f32 %v13799_v3, %v7951_v52  ;;  %v9341_v3 = vmul.f32 %v8355_v61, %v13803_v35  ;;  %v13807_v35 = vsub.f32 %v13362_v62, %v7951_v52 }
 0x330   :  { %v9383_v62 = vmul.f32 %v8355_v61, %v13810_v19  ;;  %v13814_v19 = vsub.f32 %v7739_v28, %v7951_v52  ;;  %v9425_v28 = vmul.f32 %v8355_v61, %v13817_v22  ;;  %v13821_v22 = vsub.f32 %v13370_v27, %v7951_v52 }
 0x331   :  { %v9323_v21 = vmul.f32 %v8355_v61, %v13800_v15  ;;  %v13804_v15 = vsub.f32 %v7645_v1, %v7951_v52  ;;  %v9365_v1 = vmul.f32 %v8355_v61, %v13807_v35  ;;  %v13811_v35 = vsub.f32 %v7712_v54, %v7951_v52 }
 0x332   :  { %v9407_v54 = vmul.f32 %v8355_v61, %v13814_v19  ;;  %v13818_v19 = vsub.f32 %v13367_v4, %v7951_v52  ;;  %v9449_v4 = vmul.f32 %v8355_v61, %v13821_v22  ;;  %v13825_v22 = vsub.f32 %v7832_v2, %v7951_v52 }
 0x333   :  { %v9347_v49 = vmul.f32 %v8355_v61, %v13804_v15  ;;  %v13808_v15 = vsub.f32 %v7681_v23, %v7951_v52  ;;  %v9389_v23 = vmul.f32 %v8355_v61, %v13811_v35  ;;  %v13815_v35 = vsub.f32 %v13363_v60, %v7951_v52 }
 0x334   :  { %v9431_v60 = vmul.f32 %v8355_v61, %v13818_v19  ;;  %v13822_v19 = vsub.f32 %v7811_v43, %v7951_v52  ;;  %v9473_v43 = vmul.f32 %v8355_v61, %v13825_v22  ;;  %v13832_v22 = vsub.f32 %v7868_v13, %v7951_v52 }
 0x335   :  { %v9371_v11 = vmul.f32 %v8355_v61, %v13808_v15  ;;  %v13812_v15 = vsub.f32 %v7717_v48, %v7951_v52  ;;  %v9413_v48 = vmul.f32 %v8355_v61, %v13815_v35  ;;  %v13819_v35 = vsub.f32 %v13368_v59, %v7951_v52 }
 0x336   :  { %v9455_v59 = vmul.f32 %v8355_v61, %v13822_v19  ;;  %v13826_v19 = vsub.f32 %v7847_v39, %v7951_v52  ;;  %v9497_v39 = vmul.f32 %v8355_v61, %v13832_v22  ;;  %v13843_v22 = vld [vmem:[#allocation172_spill] sm:$0xff] }
 0x337   :  { %v9395_v0 = vmul.f32 %v8355_v61, %v13812_v15  ;;  %v13816_v15 = vsub.f32 %v13364_v34, %v7951_v52  ;;  %v9437_v34 = vmul.f32 %v8355_v61, %v13819_v35  ;;  %v13823_v35 = vsub.f32 %v7820_v58, %v7951_v52 }
 0x338   :  { %v9479_v58 = vmul.f32 %v8355_v61, %v13826_v19  ;;  %13833 = vst [vmem:[#allocation138_spill] sm:$0xff] %v9497_v39  ;;  %v13834_v19 = vld [vmem:[#allocation169_spill] sm:$0xff]  ;;  %v13844_v39 = vsub.f32 %v13843_v22, %v7951_v52 }
 0x339   :  { %v9419_v33 = vmul.f32 %v8355_v61, %v13816_v15  ;;  %v13820_v15 = vsub.f32 %v13369_v25, %v7951_v52  ;;  %v9461_v25 = vmul.f32 %v8355_v61, %v13823_v35  ;;  %v13828_v35 = vsub.f32 %v7856_v50, %v7951_v52 }
 0x33a   :  { %13827 = vst [vmem:[#allocation135_spill] sm:$0xff] %v9479_v58  ;;  %v13835_v58 = vsub.f32 %v13834_v19, %v7951_v52  ;;  %v9521_v19 = vmul.f32 %v8355_v61, %v13844_v39  ;;  %v13852_v39 = vld [vmem:[#allocation2_spill] sm:$0xff] }
 0x33b   :  { %v9443_v8 = vmul.f32 %v8355_v61, %v13820_v15  ;;  %v13824_v15 = vsub.f32 %v7825_v51, %v7951_v52  ;;  %v9485_v51 = vmul.f32 %v8355_v61, %v13828_v35  ;;  %v13837_v35 = vld [vmem:[#allocation170_spill] sm:$0xff] }
 0x33c   :  { %v9503_v50 = vmul.f32 %v8355_v61, %v13835_v58  ;;  %13845 = vst [vmem:[#allocation142_spill] sm:$0xff] %v9521_v19  ;;  %v13846_v58 = vld [vmem:[#allocation173_spill] sm:$0xff]  ;;  %v9543_v19 = vadd.f32 %v13852_v39, %v8369_v45 }
 0x33d   :  { %v9467_v27 = vmul.f32 %v8355_v61, %v13824_v15  ;;  %13829 = vst [vmem:[#allocation136_spill] sm:$0xff] %v9485_v51  ;;  %v13830_v15 = vsub.f32 %v7861_v36, %v7951_v52  ;;  %v13838_v51 = vsub.f32 %v13837_v35, %v7951_v52 }
 0x33e   :  { %13836 = vst [vmem:[#allocation139_spill] sm:$0xff] %v9503_v50  ;;  %v13847_v50 = vsub.f32 %v13846_v58, %v7951_v52  ;;  %13853 = vst [vmem:[#allocation143_spill] sm:$0xff] %v9543_v19  ;;  %v9551_v58 = vadd.f32 %v13852_v39, %v8381_v10 }
 0x33f   :  { %v9491_v2 = vmul.f32 %v8355_v61, %v13830_v15  ;;  %v9509_v36 = vmul.f32 %v8355_v61, %v13838_v51  ;;  %v13840_v15 = vld [vmem:[#allocation171_spill] sm:$0xff]  ;;  %v13848_v51 = vld [vmem:[#allocation174_spill] sm:$0xff] }
 0x340   :  { %v9527_v35 = vmul.f32 %v8355_v61, %v13847_v50  ;;  %v9547_v50 = vadd.f32 %v13852_v39, %v8375_v40  ;;  %13855 = vst [vmem:[#allocation152_spill] sm:$0xff] %v9551_v58  ;;  %v13865_v58 = vld [vmem:[#allocation7_spill] sm:$0xff] }
 0x341   :  { %13831 = vst [vmem:[#allocation137_spill] sm:$0xff] %v9491_v2  ;;  %13839 = vst [vmem:[#allocation140_spill] sm:$0xff] %v9509_v36  ;;  %v13841_v2 = vsub.f32 %v13840_v15, %v7951_v52  ;;  %v13849_v36 = vsub.f32 %v13848_v51, %v7951_v52  ;;  %v13861_v51 = vld [vmem:[#allocation3_spill] sm:$0xff] }
 0x342   :  { %13854 = vst [vmem:[#allocation144_spill] sm:$0xff] %v9547_v50  ;;  %v9567_v40 = vadd.f32 %v13852_v39, %v13861_v51 }
 0x343   :  { %v9515_v13 = vmul.f32 %v8355_v61, %v13841_v2  ;;  %v9533_v15 = vmul.f32 %v8355_v61, %v13849_v36  ;;  %v13850_v2 = vld [vmem:[#allocation175_spill] sm:$0xff]  ;;  %v9555_v36 = vadd.f32 %v13852_v39, %v8387_v17  ;;  %v9575_v17 = vadd.f32 %v13852_v39, %v13865_v58 }
 0x344   :  { %13862 = vst [vmem:[#allocation156_spill] sm:$0xff] %v9567_v40  ;;  %v13873_v40 = vld [vmem:[#allocation147_spill] sm:$0xff] }
 0x345   :  { %13842 = vst [vmem:[#allocation141_spill] sm:$0xff] %v9515_v13  ;;  %v13851_v13 = vsub.f32 %v13850_v2, %v7951_v52  ;;  %13856 = vst [vmem:[#allocation153_spill] sm:$0xff] %v9555_v36  ;;  %v13857_v52 = vld [vmem:[#allocation4_spill] sm:$0xff]  ;;  %v13863_v2 = vld [vmem:[#allocation5_spill] sm:$0xff] }
 0x346   :  { %v9571_v10 = vadd.f32 %v13852_v39, %v13863_v2  ;;  %13866 = vst [vmem:[#allocation158_spill] sm:$0xff] %v9575_v17  ;;  %v13867_v36 = vld [vmem:[#allocation10_spill] sm:$0xff]  ;;  %v9591_v2 = vadd.f32 %v13852_v39, %v13873_v40  ;;  %v13877_v17 = vld [vmem:[#allocation149_spill] sm:$0xff] }
 0x347   :  { %v9539_v22 = vmul.f32 %v8355_v61, %v13851_v13  ;;  %v9559_v61 = vadd.f32 %v13852_v39, %v13857_v52  ;;  %v13859_v13 = vld [vmem:[#allocation6_spill] sm:$0xff]  ;;  %v9579_v52 = vadd.f32 %v13852_v39, %v13867_v36  ;;  %v9599_v36 = vadd.f32 %v13852_v39, %v13877_v17 }
 0x348   :  { %v9563_v45 = vadd.f32 %v13852_v39, %v13859_v13  ;;  %13864 = vst [vmem:[#allocation157_spill] sm:$0xff] %v9571_v10  ;;  %13874 = vst [vmem:[#allocation162_spill] sm:$0xff] %v9591_v2  ;;  %v13875_v10 = vld [vmem:[#allocation148_spill] sm:$0xff]  ;;  %v13885_v2 = vld [vmem:[#allocation93_spill] sm:$0xff] }
 0x349   :  { %13858 = vst [vmem:[#allocation154_spill] sm:$0xff] %v9559_v61  ;;  %13868 = vst [vmem:[#allocation159_spill] sm:$0xff] %v9579_v52  ;;  %v13869_v61 = vld [vmem:[#allocation145_spill] sm:$0xff]  ;;  %v9595_v58 = vadd.f32 %v13852_v39, %v13875_v10  ;;  %v13879_v52 = vld [vmem:[#allocation150_spill] sm:$0xff]  ;;  %v9615_v10 = vadd.f32 %v13852_v39, %v13885_v2 }
 0x34a   :  { %13860 = vst [vmem:[#allocation155_spill] sm:$0xff] %v9563_v45  ;;  %v9583_v13 = vadd.f32 %v13852_v39, %v13869_v61  ;;  %v13871_v45 = vld [vmem:[#allocation146_spill] sm:$0xff]  ;;  %13878 = vst [vmem:[#allocation79_spill] sm:$0xff] %v9599_v36  ;;  %v9603_v61 = vadd.f32 %v13852_v39, %v13879_v52  ;;  %v13889_v36 = vld [vmem:[#allocation103_spill] sm:$0xff] }
 0x34b   :  { %v9587_v51 = vadd.f32 %v13852_v39, %v13871_v45  ;;  %13876 = vst [vmem:[#allocation163_spill] sm:$0xff] %v9595_v58  ;;  %13886 = vst [vmem:[#allocation95_spill] sm:$0xff] %v9615_v10  ;;  %v13887_v58 = vld [vmem:[#allocation101_spill] sm:$0xff]  ;;  %v9623_v52 = vadd.f32 %v13852_v39, %v13889_v36  ;;  %v13897_v10 = vld [vmem:[#allocation116_spill] sm:$0xff] }
 0x34c   :  { %13870 = vst [vmem:[#allocation160_spill] sm:$0xff] %v9583_v13  ;;  %13880 = vst [vmem:[#allocation87_spill] sm:$0xff] %v9603_v61  ;;  %v13881_v13 = vld [vmem:[#allocation151_spill] sm:$0xff]  ;;  %v9619_v17 = vadd.f32 %v13852_v39, %v13887_v58  ;;  %v13891_v61 = vld [vmem:[#allocation109_spill] sm:$0xff]  ;;  %v9639_v58 = vadd.f32 %v13852_v39, %v13897_v10 }
 0x34d   :  { %13872 = vst [vmem:[#allocation161_spill] sm:$0xff] %v9587_v51  ;;  %v9607_v45 = vadd.f32 %v13852_v39, %v13881_v13  ;;  %v13883_v51 = vld [vmem:[#allocation85_spill] sm:$0xff]  ;;  %13890 = vst [vmem:[#allocation94_spill] sm:$0xff] %v9623_v52  ;;  %v9627_v13 = vadd.f32 %v13852_v39, %v13891_v61 }
 0x34e   :  { %v9611_v40 = vadd.f32 %v13852_v39, %v13883_v51  ;;  %13888 = vst [vmem:[#allocation92_spill] sm:$0xff] %v9619_v17  ;;  %13898 = vst [vmem:[#allocation169_spill] sm:$0xff] %v9639_v58  ;;  %v13899_v17 = vld [vmem:[#allocation115_spill] sm:$0xff]  ;;  %v13901_v52 = vld [vmem:[#allocation117_spill] sm:$0xff] }
 0x34f   :  { %13882 = vst [vmem:[#allocation84_spill] sm:$0xff] %v9607_v45  ;;  %13892 = vst [vmem:[#allocation100_spill] sm:$0xff] %v9627_v13  ;;  %v13893_v45 = vld [vmem:[#allocation164_spill] sm:$0xff]  ;;  %v9643_v36 = vadd.f32 %v13852_v39, %v13899_v17  ;;  %v9647_v61 = vadd.f32 %v13852_v39, %v13901_v52  ;;  %v13903_v13 = vld [vmem:[#allocation123_spill] sm:$0xff] }
 0x350   :  { %13884 = vst [vmem:[#allocation86_spill] sm:$0xff] %v9611_v40  ;;  %v9631_v51 = vadd.f32 %v13852_v39, %v13893_v45  ;;  %v13895_v40 = vld [vmem:[#allocation108_spill] sm:$0xff]  ;;  %v9651_v45 = vadd.f32 %v13852_v39, %v13903_v13  ;;  %v13909_v58 = vld [vmem:[#allocation165_spill] sm:$0xff] }
 0x351   :  { %v9635_v2 = vadd.f32 %v13852_v39, %v13895_v40  ;;  %13900 = vst [vmem:[#allocation170_spill] sm:$0xff] %v9643_v36  ;;  %13902 = vst [vmem:[#allocation171_spill] sm:$0xff] %v9647_v61  ;;  %v9663_v17 = vadd.f32 %v13852_v39, %v13909_v58  ;;  %v13911_v36 = vld [vmem:[#allocation166_spill] sm:$0xff]  ;;  %v13913_v61 = vld [vmem:[#allocation167_spill] sm:$0xff] }
 0x352   :  { %13894 = vst [vmem:[#allocation102_spill] sm:$0xff] %v9631_v51  ;;  %13904 = vst [vmem:[#allocation172_spill] sm:$0xff] %v9651_v45  ;;  %v13905_v51 = vld [vmem:[#allocation124_spill] sm:$0xff]  ;;  %v9667_v52 = vadd.f32 %v13852_v39, %v13911_v36  ;;  %v9671_v13 = vadd.f32 %v13852_v39, %v13913_v61 }
 0x353   :  { %13896 = vst [vmem:[#allocation110_spill] sm:$0xff] %v9635_v2  ;;  %v9655_v40 = vadd.f32 %v13852_v39, %v13905_v51  ;;  %v13907_v2 = vld [vmem:[#allocation129_spill] sm:$0xff]  ;;  %13910 = vst [vmem:[#allocation175_spill] sm:$0xff] %v9663_v17  ;;  %v13915_v45 = vld [vmem:[#allocation168_spill] sm:$0xff] }
 0x354   :  { %v9659_v10 = vadd.f32 %v13852_v39, %v13907_v2  ;;  %13912 = vst [vmem:[#allocation2_spill] sm:$0xff] %v9667_v52  ;;  %13914 = vst [vmem:[#allocation4_spill] sm:$0xff] %v9671_v13  ;;  %v9675_v51 = vadd.f32 %v13852_v39, %v13915_v45  ;;  %v13921_v17 = vld [vmem:[#allocation11_spill] sm:$0xff]  ;;  %v13923_v52 = vld [vmem:[#allocation13_spill] sm:$0xff] }
 0x355   :  { %13906 = vst [vmem:[#allocation173_spill] sm:$0xff] %v9655_v40  ;;  %v13917_v40 = vld [vmem:[#allocation9_spill] sm:$0xff]  ;;  %v9687_v36 = vadd.f32 %v13852_v39, %v13921_v17  ;;  %v9691_v61 = vadd.f32 %v13852_v39, %v13923_v52  ;;  %v13925_v13 = vld [vmem:[#allocation12_spill] sm:$0xff] }
 0x356   :  { %13908 = vst [vmem:[#allocation174_spill] sm:$0xff] %v9659_v10  ;;  %13916 = vst [vmem:[#allocation6_spill] sm:$0xff] %v9675_v51  ;;  %v9679_v2 = vadd.f32 %v13852_v39, %v13917_v40  ;;  %v13919_v10 = vld [vmem:[#allocation8_spill] sm:$0xff]  ;;  %v9695_v45 = vadd.f32 %v13852_v39, %v13925_v13  ;;  %v13927_v51 = vld [vmem:[#allocation14_spill] sm:$0xff] }
 0x357   :  { %v9683_v58 = vadd.f32 %v13852_v39, %v13919_v10  ;;  %13922 = vst [vmem:[#allocation7_spill] sm:$0xff] %v9687_v36  ;;  %13924 = vst [vmem:[#allocation10_spill] sm:$0xff] %v9691_v61  ;;  %v9699_v40 = vadd.f32 %v13852_v39, %v13927_v51  ;;  %v13933_v36 = vld [vmem:[#allocation16_spill] sm:$0xff]  ;;  %v13935_v61 = vld [vmem:[#allocation18_spill] sm:$0xff] }
 0x358   :  { %13918 = vst [vmem:[#allocation3_spill] sm:$0xff] %v9679_v2  ;;  %13926 = vst [vmem:[#allocation145_spill] sm:$0xff] %v9695_v45  ;;  %v13929_v2 = vld [vmem:[#allocation15_spill] sm:$0xff]  ;;  %v9711_v52 = vadd.f32 %v13852_v39, %v13933_v36  ;;  %v9715_v13 = vadd.f32 %v13852_v39, %v13935_v61 }
 0x359   :  { %13920 = vst [vmem:[#allocation5_spill] sm:$0xff] %v9683_v58  ;;  %13928 = vst [vmem:[#allocation146_spill] sm:$0xff] %v9699_v40  ;;  %v9703_v10 = vadd.f32 %v13852_v39, %v13929_v2  ;;  %v13931_v58 = vld [vmem:[#allocation17_spill] sm:$0xff]  ;;  %v13937_v45 = vld [vmem:[#allocation19_spill] sm:$0xff] }
 0x35a   :  { %v9707_v17 = vadd.f32 %v13852_v39, %v13931_v58  ;;  %13934 = vst [vmem:[#allocation149_spill] sm:$0xff] %v9711_v52  ;;  %13936 = vst [vmem:[#allocation150_spill] sm:$0xff] %v9715_v13  ;;  %v9719_v51 = vadd.f32 %v13852_v39, %v13937_v45  ;;  %v13939_v40 = vld [vmem:[#allocation21_spill] sm:$0xff]  ;;  %v13945_v52 = vld [vmem:[#allocation23_spill] sm:$0xff] }
 0x35b   :  { %13930 = vst [vmem:[#allocation147_spill] sm:$0xff] %v9703_v10  ;;  %v9723_v2 = vadd.f32 %v13852_v39, %v13939_v40  ;;  %v13941_v10 = vld [vmem:[#allocation20_spill] sm:$0xff]  ;;  %v9735_v61 = vadd.f32 %v13852_v39, %v13945_v52  ;;  %v13947_v13 = vld [vmem:[#allocation25_spill] sm:$0xff] }
 0x35c   :  { %13932 = vst [vmem:[#allocation148_spill] sm:$0xff] %v9707_v17  ;;  %13938 = vst [vmem:[#allocation151_spill] sm:$0xff] %v9719_v51  ;;  %v9727_v58 = vadd.f32 %v13852_v39, %v13941_v10  ;;  %v13943_v17 = vld [vmem:[#allocation22_spill] sm:$0xff]  ;;  %v9739_v45 = vadd.f32 %v13852_v39, %v13947_v13  ;;  %v13949_v51 = vld [vmem:[#allocation24_spill] sm:$0xff] }
 0x35d   :  { %13940 = vst [vmem:[#allocation85_spill] sm:$0xff] %v9723_v2  ;;  %v9731_v36 = vadd.f32 %v13852_v39, %v13943_v17  ;;  %13946 = vst [vmem:[#allocation103_spill] sm:$0xff] %v9735_v61  ;;  %v9743_v40 = vadd.f32 %v13852_v39, %v13949_v51  ;;  %v13951_v2 = vld [vmem:[#allocation26_spill] sm:$0xff]  ;;  %v13957_v61 = vld [vmem:[#allocation28_spill] sm:$0xff] }
 0x35e   :  { %13942 = vst [vmem:[#allocation93_spill] sm:$0xff] %v9727_v58  ;;  %13948 = vst [vmem:[#allocation109_spill] sm:$0xff] %v9739_v45  ;;  %v9747_v10 = vadd.f32 %v13852_v39, %v13951_v2  ;;  %v13953_v58 = vld [vmem:[#allocation27_spill] sm:$0xff]  ;;  %v9759_v13 = vadd.f32 %v13852_v39, %v13957_v61  ;;  %v13959_v45 = vld [vmem:[#allocation30_spill] sm:$0xff] }
 0x35f   :  { %13944 = vst [vmem:[#allocation101_spill] sm:$0xff] %v9731_v36  ;;  %13950 = vst [vmem:[#allocation164_spill] sm:$0xff] %v9743_v40  ;;  %v9751_v17 = vadd.f32 %v13852_v39, %v13953_v58  ;;  %v13955_v36 = vld [vmem:[#allocation29_spill] sm:$0xff]  ;;  %v9763_v51 = vadd.f32 %v13852_v39, %v13959_v45  ;;  %v13961_v40 = vld [vmem:[#allocation31_spill] sm:$0xff] }
 0x360   :  { %13952 = vst [vmem:[#allocation108_spill] sm:$0xff] %v9747_v10  ;;  %v9755_v52 = vadd.f32 %v13852_v39, %v13955_v36  ;;  %13958 = vst [vmem:[#allocation117_spill] sm:$0xff] %v9759_v13  ;;  %v9767_v2 = vadd.f32 %v13852_v39, %v13961_v40  ;;  %v13963_v10 = vld [vmem:[#allocation33_spill] sm:$0xff]  ;;  %v13969_v13 = vld [vmem:[#allocation35_spill] sm:$0xff] }
 0x361   :  { %13954 = vst [vmem:[#allocation116_spill] sm:$0xff] %v9751_v17  ;;  %13960 = vst [vmem:[#allocation123_spill] sm:$0xff] %v9763_v51  ;;  %v9771_v58 = vadd.f32 %v13852_v39, %v13963_v10  ;;  %v13965_v17 = vld [vmem:[#allocation32_spill] sm:$0xff]  ;;  %v9783_v45 = vadd.f32 %v13852_v39, %v13969_v13  ;;  %v13971_v51 = vld [vmem:[#allocation37_spill] sm:$0xff] }
 0x362   :  { %13956 = vst [vmem:[#allocation115_spill] sm:$0xff] %v9755_v52  ;;  %13962 = vst [vmem:[#allocation124_spill] sm:$0xff] %v9767_v2  ;;  %v9775_v36 = vadd.f32 %v13852_v39, %v13965_v17  ;;  %v13967_v52 = vld [vmem:[#allocation34_spill] sm:$0xff]  ;;  %v9787_v40 = vadd.f32 %v13852_v39, %v13971_v51  ;;  %v13973_v2 = vld [vmem:[#allocation36_spill] sm:$0xff] }
 0x363   :  { %13964 = vst [vmem:[#allocation129_spill] sm:$0xff] %v9771_v58  ;;  %v9779_v61 = vadd.f32 %v13852_v39, %v13967_v52  ;;  %13970 = vst [vmem:[#allocation167_spill] sm:$0xff] %v9783_v45  ;;  %v9791_v10 = vadd.f32 %v13852_v39, %v13973_v2  ;;  %v13975_v58 = vld [vmem:[#allocation38_spill] sm:$0xff]  ;;  %v13981_v45 = vld [vmem:[#allocation40_spill] sm:$0xff] }
 0x364   :  { %13966 = vst [vmem:[#allocation165_spill] sm:$0xff] %v9775_v36  ;;  %13972 = vst [vmem:[#allocation168_spill] sm:$0xff] %v9787_v40  ;;  %v9795_v17 = vadd.f32 %v13852_v39, %v13975_v58  ;;  %v13977_v36 = vld [vmem:[#allocation39_spill] sm:$0xff]  ;;  %v9807_v51 = vadd.f32 %v13852_v39, %v13981_v45  ;;  %v13983_v40 = vld [vmem:[#allocation42_spill] sm:$0xff] }
 0x365   :  { %13968 = vst [vmem:[#allocation166_spill] sm:$0xff] %v9779_v61  ;;  %13974 = vst [vmem:[#allocation9_spill] sm:$0xff] %v9791_v10  ;;  %v9799_v52 = vadd.f32 %v13852_v39, %v13977_v36  ;;  %v13979_v61 = vld [vmem:[#allocation41_spill] sm:$0xff]  ;;  %v9811_v2 = vadd.f32 %v13852_v39, %v13983_v40  ;;  %v13985_v10 = vld [vmem:[#allocation43_spill] sm:$0xff] }
 0x366   :  { %13976 = vst [vmem:[#allocation8_spill] sm:$0xff] %v9795_v17  ;;  %v9803_v13 = vadd.f32 %v13852_v39, %v13979_v61  ;;  %13982 = vst [vmem:[#allocation12_spill] sm:$0xff] %v9807_v51  ;;  %v9815_v58 = vadd.f32 %v13852_v39, %v13985_v10  ;;  %v13987_v17 = vld [vmem:[#allocation45_spill] sm:$0xff]  ;;  %v13993_v51 = vld [vmem:[#allocation47_spill] sm:$0xff] }
 0x367   :  { %13978 = vst [vmem:[#allocation11_spill] sm:$0xff] %v9799_v52  ;;  %13984 = vst [vmem:[#allocation14_spill] sm:$0xff] %v9811_v2  ;;  %v9819_v36 = vadd.f32 %v13852_v39, %v13987_v17  ;;  %v13989_v52 = vld [vmem:[#allocation44_spill] sm:$0xff]  ;;  %v9831_v40 = vadd.f32 %v13852_v39, %v13993_v51  ;;  %v13995_v2 = vld [vmem:[#allocation49_spill] sm:$0xff] }
 0x368   :  { %13980 = vst [vmem:[#allocation13_spill] sm:$0xff] %v9803_v13  ;;  %13986 = vst [vmem:[#allocation15_spill] sm:$0xff] %v9815_v58  ;;  %v9823_v61 = vadd.f32 %v13852_v39, %v13989_v52  ;;  %v13991_v13 = vld [vmem:[#allocation46_spill] sm:$0xff]  ;;  %v9835_v10 = vadd.f32 %v13852_v39, %v13995_v2  ;;  %v13997_v58 = vld [vmem:[#allocation48_spill] sm:$0xff] }
 0x369   :  { %13988 = vst [vmem:[#allocation17_spill] sm:$0xff] %v9819_v36  ;;  %v9827_v45 = vadd.f32 %v13852_v39, %v13991_v13  ;;  %13994 = vst [vmem:[#allocation19_spill] sm:$0xff] %v9831_v40  ;;  %v9839_v17 = vadd.f32 %v13852_v39, %v13997_v58  ;;  %v13999_v36 = vld [vmem:[#allocation50_spill] sm:$0xff]  ;;  %v14005_v40 = vld [vmem:[#allocation52_spill] sm:$0xff] }
 0x36a   :  { %13990 = vst [vmem:[#allocation16_spill] sm:$0xff] %v9823_v61  ;;  %13996 = vst [vmem:[#allocation21_spill] sm:$0xff] %v9835_v10  ;;  %v9843_v52 = vadd.f32 %v13852_v39, %v13999_v36  ;;  %v14001_v61 = vld [vmem:[#allocation51_spill] sm:$0xff]  ;;  %v9855_v2 = vadd.f32 %v13852_v39, %v14005_v40  ;;  %v14007_v10 = vld [vmem:[#allocation54_spill] sm:$0xff] }
 0x36b   :  { %13992 = vst [vmem:[#allocation18_spill] sm:$0xff] %v9827_v45  ;;  %13998 = vst [vmem:[#allocation20_spill] sm:$0xff] %v9839_v17  ;;  %v9847_v13 = vadd.f32 %v13852_v39, %v14001_v61  ;;  %v14003_v45 = vld [vmem:[#allocation53_spill] sm:$0xff]  ;;  %v9859_v58 = vadd.f32 %v13852_v39, %v14007_v10  ;;  %v14009_v17 = vld [vmem:[#allocation55_spill] sm:$0xff] }
 0x36c   :  { %14000 = vst [vmem:[#allocation22_spill] sm:$0xff] %v9843_v52  ;;  %v9851_v51 = vadd.f32 %v13852_v39, %v14003_v45  ;;  %14006 = vst [vmem:[#allocation24_spill] sm:$0xff] %v9855_v2  ;;  %v9863_v36 = vadd.f32 %v13852_v39, %v14009_v17  ;;  %v14011_v52 = vld [vmem:[#allocation57_spill] sm:$0xff]  ;;  %v14017_v2 = vld [vmem:[#allocation59_spill] sm:$0xff] }
 0x36d   :  { %14002 = vst [vmem:[#allocation23_spill] sm:$0xff] %v9847_v13  ;;  %14008 = vst [vmem:[#allocation26_spill] sm:$0xff] %v9859_v58  ;;  %v9867_v61 = vadd.f32 %v13852_v39, %v14011_v52  ;;  %v14013_v13 = vld [vmem:[#allocation56_spill] sm:$0xff]  ;;  %v9879_v10 = vadd.f32 %v13852_v39, %v14017_v2  ;;  %v14019_v58 = vld [vmem:[#allocation61_spill] sm:$0xff] }
 0x36e   :  { %14004 = vst [vmem:[#allocation25_spill] sm:$0xff] %v9851_v51  ;;  %14010 = vst [vmem:[#allocation27_spill] sm:$0xff] %v9863_v36  ;;  %v9871_v45 = vadd.f32 %v13852_v39, %v14013_v13  ;;  %v14015_v51 = vld [vmem:[#allocation58_spill] sm:$0xff]  ;;  %v9883_v17 = vadd.f32 %v13852_v39, %v14019_v58  ;;  %v14021_v36 = vld [vmem:[#allocation60_spill] sm:$0xff] }
 0x36f   :  { %14012 = vst [vmem:[#allocation29_spill] sm:$0xff] %v9867_v61  ;;  %v9875_v40 = vadd.f32 %v13852_v39, %v14015_v51  ;;  %14018 = vst [vmem:[#allocation31_spill] sm:$0xff] %v9879_v10  ;;  %v9887_v52 = vadd.f32 %v13852_v39, %v14021_v36  ;;  %v14023_v61 = vld [vmem:[#allocation62_spill] sm:$0xff]  ;;  %v14029_v10 = vld [vmem:[#allocation64_spill] sm:$0xff] }
 0x370   :  { %14014 = vst [vmem:[#allocation28_spill] sm:$0xff] %v9871_v45  ;;  %14020 = vst [vmem:[#allocation33_spill] sm:$0xff] %v9883_v17  ;;  %v9891_v13 = vadd.f32 %v13852_v39, %v14023_v61  ;;  %v14025_v45 = vld [vmem:[#allocation63_spill] sm:$0xff]  ;;  %v9903_v58 = vadd.f32 %v13852_v39, %v14029_v10  ;;  %v14031_v17 = vld [vmem:[#allocation66_spill] sm:$0xff] }
 0x371   :  { %14016 = vst [vmem:[#allocation30_spill] sm:$0xff] %v9875_v40  ;;  %14022 = vst [vmem:[#allocation32_spill] sm:$0xff] %v9887_v52  ;;  %v9895_v51 = vadd.f32 %v13852_v39, %v14025_v45  ;;  %v14027_v40 = vld [vmem:[#allocation65_spill] sm:$0xff]  ;;  %v9907_v36 = vadd.f32 %v13852_v39, %v14031_v17  ;;  %v14033_v52 = vld [vmem:[#allocation67_spill] sm:$0xff] }
 0x372   :  { %14024 = vst [vmem:[#allocation34_spill] sm:$0xff] %v9891_v13  ;;  %v9899_v2 = vadd.f32 %v13852_v39, %v14027_v40  ;;  %14030 = vst [vmem:[#allocation36_spill] sm:$0xff] %v9903_v58  ;;  %v9911_v61 = vadd.f32 %v13852_v39, %v14033_v52  ;;  %v14035_v13 = vld [vmem:[#allocation69_spill] sm:$0xff]  ;;  %v14041_v58 = vld [vmem:[#allocation71_spill] sm:$0xff] }
 0x373   :  { %14026 = vst [vmem:[#allocation35_spill] sm:$0xff] %v9895_v51  ;;  %14032 = vst [vmem:[#allocation38_spill] sm:$0xff] %v9907_v36  ;;  %v9915_v45 = vadd.f32 %v13852_v39, %v14035_v13  ;;  %v14037_v51 = vld [vmem:[#allocation68_spill] sm:$0xff]  ;;  %v9927_v17 = vadd.f32 %v13852_v39, %v14041_v58  ;;  %v14043_v36 = vld [vmem:[#allocation73_spill] sm:$0xff] }
 0x374   :  { %14028 = vst [vmem:[#allocation37_spill] sm:$0xff] %v9899_v2  ;;  %14034 = vst [vmem:[#allocation39_spill] sm:$0xff] %v9911_v61  ;;  %v9919_v40 = vadd.f32 %v13852_v39, %v14037_v51  ;;  %v14039_v2 = vld [vmem:[#allocation70_spill] sm:$0xff]  ;;  %v9931_v52 = vadd.f32 %v13852_v39, %v14043_v36  ;;  %v14045_v61 = vld [vmem:[#allocation72_spill] sm:$0xff] }
 0x375   :  { %14036 = vst [vmem:[#allocation41_spill] sm:$0xff] %v9915_v45  ;;  %v9923_v10 = vadd.f32 %v13852_v39, %v14039_v2  ;;  %14042 = vst [vmem:[#allocation43_spill] sm:$0xff] %v9927_v17  ;;  %v9935_v13 = vadd.f32 %v13852_v39, %v14045_v61  ;;  %v14047_v45 = vld [vmem:[#allocation74_spill] sm:$0xff]  ;;  %v14053_v17 = vld [vmem:[#allocation76_spill] sm:$0xff] }
 0x376   :  { %14038 = vst [vmem:[#allocation40_spill] sm:$0xff] %v9919_v40  ;;  %14044 = vst [vmem:[#allocation45_spill] sm:$0xff] %v9931_v52  ;;  %v9939_v51 = vadd.f32 %v13852_v39, %v14047_v45  ;;  %v14049_v40 = vld [vmem:[#allocation75_spill] sm:$0xff]  ;;  %v9951_v36 = vadd.f32 %v13852_v39, %v14053_v17  ;;  %v14055_v52 = vld [vmem:[#allocation78_spill] sm:$0xff] }
 0x377   :  { %14040 = vst [vmem:[#allocation42_spill] sm:$0xff] %v9923_v10  ;;  %14046 = vst [vmem:[#allocation44_spill] sm:$0xff] %v9935_v13  ;;  %v9943_v2 = vadd.f32 %v13852_v39, %v14049_v40  ;;  %v14051_v10 = vld [vmem:[#allocation77_spill] sm:$0xff]  ;;  %v9955_v61 = vadd.f32 %v13852_v39, %v14055_v52  ;;  %v14057_v13 = vld [vmem:[#allocation80_spill] sm:$0xff] }
 0x378   :  { %14048 = vst [vmem:[#allocation46_spill] sm:$0xff] %v9939_v51  ;;  %v9947_v58 = vadd.f32 %v13852_v39, %v14051_v10  ;;  %14054 = vst [vmem:[#allocation48_spill] sm:$0xff] %v9951_v36  ;;  %v9959_v45 = vadd.f32 %v13852_v39, %v14057_v13  ;;  %v14059_v51 = vld [vmem:[#allocation82_spill] sm:$0xff]  ;;  %v14065_v36 = vld [vmem:[#allocation88_spill] sm:$0xff] }
 0x379   :  { %14050 = vst [vmem:[#allocation47_spill] sm:$0xff] %v9943_v2  ;;  %14056 = vst [vmem:[#allocation50_spill] sm:$0xff] %v9955_v61  ;;  %v9963_v40 = vadd.f32 %v13852_v39, %v14059_v51  ;;  %v14061_v2 = vld [vmem:[#allocation81_spill] sm:$0xff]  ;;  %v9975_v52 = vadd.f32 %v13852_v39, %v14065_v36  ;;  %v14067_v61 = vld [vmem:[#allocation90_spill] sm:$0xff] }
 0x37a   :  { %14052 = vst [vmem:[#allocation49_spill] sm:$0xff] %v9947_v58  ;;  %14058 = vst [vmem:[#allocation51_spill] sm:$0xff] %v9959_v45  ;;  %v9967_v10 = vadd.f32 %v13852_v39, %v14061_v2  ;;  %v14063_v58 = vld [vmem:[#allocation83_spill] sm:$0xff]  ;;  %v9979_v13 = vadd.f32 %v13852_v39, %v14067_v61  ;;  %v14069_v45 = vld [vmem:[#allocation89_spill] sm:$0xff] }
 0x37b   :  { %14060 = vst [vmem:[#allocation53_spill] sm:$0xff] %v9963_v40  ;;  %v9971_v17 = vadd.f32 %v13852_v39, %v14063_v58  ;;  %14066 = vst [vmem:[#allocation55_spill] sm:$0xff] %v9975_v52  ;;  %v9983_v51 = vadd.f32 %v13852_v39, %v14069_v45  ;;  %v14071_v40 = vld [vmem:[#allocation91_spill] sm:$0xff]  ;;  %v14077_v52 = vld [vmem:[#allocation97_spill] sm:$0xff] }
 0x37c   :  { %14062 = vst [vmem:[#allocation52_spill] sm:$0xff] %v9967_v10  ;;  %14068 = vst [vmem:[#allocation57_spill] sm:$0xff] %v9979_v13  ;;  %v9987_v2 = vadd.f32 %v13852_v39, %v14071_v40  ;;  %v14073_v10 = vld [vmem:[#allocation96_spill] sm:$0xff]  ;;  %v9999_v61 = vadd.f32 %v13852_v39, %v14077_v52  ;;  %v14079_v13 = vld [vmem:[#allocation99_spill] sm:$0xff]  ;;  %v10007_v40 = vadd.f32 %v13852_v39, %v9065_v46 }
 0x37d   :  { %14064 = vst [vmem:[#allocation54_spill] sm:$0xff] %v9971_v17  ;;  %14070 = vst [vmem:[#allocation56_spill] sm:$0xff] %v9983_v51  ;;  %v9991_v58 = vadd.f32 %v13852_v39, %v14073_v10  ;;  %v14075_v17 = vld [vmem:[#allocation98_spill] sm:$0xff]  ;;  %v10003_v45 = vadd.f32 %v13852_v39, %v14079_v13  ;;  %v10011_v10 = vadd.f32 %v13852_v39, %v9071_v47 }
 0x37e   :  { %14072 = vst [vmem:[#allocation58_spill] sm:$0xff] %v9987_v2  ;;  %v9995_v36 = vadd.f32 %v13852_v39, %v14075_v17  ;;  %14078 = vst [vmem:[#allocation60_spill] sm:$0xff] %v9999_v61  ;;  %v10015_v17 = vadd.f32 %v13852_v39, %v9077_v32  ;;  %v10019_v52 = vadd.f32 %v13852_v39, %v9083_v57 }
 0x37f   :  { %14074 = vst [vmem:[#allocation59_spill] sm:$0xff] %v9991_v58  ;;  %14080 = vst [vmem:[#allocation62_spill] sm:$0xff] %v10003_v45  ;;  %v10023_v13 = vadd.f32 %v13852_v39, %v9089_v38  ;;  %v10027_v46 = vadd.f32 %v13852_v39, %v9095_v29  ;;  %v10031_v47 = vadd.f32 %v13852_v39, %v9101_v5  ;;  %v14269_v19 = vld [vmem:[#allocation46_spill] sm:$0xff] }
 0x380   :  { %14076 = vst [vmem:[#allocation61_spill] sm:$0xff] %v9995_v36  ;;  %14081 = vst [vmem:[#allocation63_spill] sm:$0xff] %v10007_v40  ;;  %v10035_v32 = vadd.f32 %v13852_v39, %v9107_v6  ;;  %v10039_v57 = vadd.f32 %v13852_v39, %v9113_v30  ;;  %v10043_v38 = vadd.f32 %v13852_v39, %v9119_v12  ;;  %v14270_v50 = vld [vmem:[#allocation47_spill] sm:$0xff] }
 0x381   :  { %14082 = vst [vmem:[#allocation65_spill] sm:$0xff] %v10011_v10  ;;  %14083 = vst [vmem:[#allocation64_spill] sm:$0xff] %v10015_v17  ;;  %v10047_v29 = vadd.f32 %v13852_v39, %v9125_v20 }
 0x382   :  { %14084 = vst [vmem:[#allocation66_spill] sm:$0xff] %v10019_v52  ;;  %14085 = vst [vmem:[#allocation67_spill] sm:$0xff] %v10023_v13 }
 0x383   :  { %14086 = vst [vmem:[#allocation69_spill] sm:$0xff] %v10027_v46  ;;  %14087 = vst [vmem:[#allocation68_spill] sm:$0xff] %v10031_v47  ;;  %v14092_v46 = vld [vmem:[#allocation104_spill] sm:$0xff]  ;;  %v14094_v47 = vld [vmem:[#allocation106_spill] sm:$0xff] }
 0x384   :  { %14088 = vst [vmem:[#allocation70_spill] sm:$0xff] %v10035_v32  ;;  %14089 = vst [vmem:[#allocation71_spill] sm:$0xff] %v10039_v57  ;;  %v10051_v5 = vadd.f32 %v13852_v39, %v14092_v46  ;;  %v10055_v6 = vadd.f32 %v13852_v39, %v14094_v47  ;;  %v14096_v32 = vld [vmem:[#allocation105_spill] sm:$0xff]  ;;  %v14098_v57 = vld [vmem:[#allocation107_spill] sm:$0xff] }
 0x385   :  { %14090 = vst [vmem:[#allocation73_spill] sm:$0xff] %v10043_v38  ;;  %14091 = vst [vmem:[#allocation72_spill] sm:$0xff] %v10047_v29  ;;  %v10059_v30 = vadd.f32 %v13852_v39, %v14096_v32  ;;  %v10063_v12 = vadd.f32 %v13852_v39, %v14098_v57  ;;  %v14100_v38 = vld [vmem:[#allocation111_spill] sm:$0xff]  ;;  %v14102_v29 = vld [vmem:[#allocation113_spill] sm:$0xff] }
 0x386   :  { %14093 = vst [vmem:[#allocation74_spill] sm:$0xff] %v10051_v5  ;;  %14095 = vst [vmem:[#allocation75_spill] sm:$0xff] %v10055_v6  ;;  %v10067_v20 = vadd.f32 %v13852_v39, %v14100_v38  ;;  %v10071_v46 = vadd.f32 %v13852_v39, %v14102_v29  ;;  %v14104_v5 = vld [vmem:[#allocation112_spill] sm:$0xff]  ;;  %v14106_v6 = vld [vmem:[#allocation114_spill] sm:$0xff] }
 0x387   :  { %14097 = vst [vmem:[#allocation77_spill] sm:$0xff] %v10059_v30  ;;  %14099 = vst [vmem:[#allocation76_spill] sm:$0xff] %v10063_v12  ;;  %v10075_v47 = vadd.f32 %v13852_v39, %v14104_v5  ;;  %v10079_v32 = vadd.f32 %v13852_v39, %v14106_v6  ;;  %v14108_v30 = vld [vmem:[#allocation118_spill] sm:$0xff]  ;;  %v14110_v12 = vld [vmem:[#allocation121_spill] sm:$0xff] }
 0x388   :  { %14101 = vst [vmem:[#allocation78_spill] sm:$0xff] %v10067_v20  ;;  %14103 = vst [vmem:[#allocation80_spill] sm:$0xff] %v10071_v46  ;;  %v10083_v57 = vadd.f32 %v13852_v39, %v14108_v30  ;;  %v10087_v38 = vadd.f32 %v13852_v39, %v14110_v12  ;;  %v14112_v20 = vld [vmem:[#allocation119_spill] sm:$0xff]  ;;  %v14114_v46 = vld [vmem:[#allocation122_spill] sm:$0xff]  ;;  %v10103_v30 = vadd.f32 %v13852_v39, %v9209_v16 }
 0x389   :  { %14105 = vst [vmem:[#allocation82_spill] sm:$0xff] %v10075_v47  ;;  %14107 = vst [vmem:[#allocation81_spill] sm:$0xff] %v10079_v32  ;;  %v10091_v29 = vadd.f32 %v13852_v39, %v14112_v20  ;;  %v10095_v5 = vadd.f32 %v13852_v39, %v14114_v46  ;;  %v14116_v47 = vld [vmem:[#allocation120_spill] sm:$0xff] }
 0x38a   :  { %14109 = vst [vmem:[#allocation83_spill] sm:$0xff] %v10083_v57  ;;  %14111 = vst [vmem:[#allocation88_spill] sm:$0xff] %v10087_v38  ;;  %v10099_v6 = vadd.f32 %v13852_v39, %v14116_v47  ;;  %v14119_v57 = vld [vmem:[#allocation125_spill] sm:$0xff]  ;;  %v14121_v38 = vld [vmem:[#allocation126_spill] sm:$0xff]  ;;  %v10119_v47 = vadd.f32 %v13852_v39, %v9233_v53  ;;  %v10139_v53 = vadd.f32 %v13852_v39, %v9263_v7 }
 0x38b   :  { %14113 = vst [vmem:[#allocation90_spill] sm:$0xff] %v10091_v29  ;;  %14115 = vst [vmem:[#allocation89_spill] sm:$0xff] %v10095_v5  ;;  %v10107_v12 = vadd.f32 %v13852_v39, %v14119_v57  ;;  %v10111_v20 = vadd.f32 %v13852_v39, %v14121_v38  ;;  %v14122_v29 = vld [vmem:[#allocation127_spill] sm:$0xff]  ;;  %v10159_v7 = vadd.f32 %v13852_v39, %v9293_v56  ;;  %v14282_v58 = vld [vmem:[#allocation70_spill] sm:$0xff] }
 0x38c   :  { %14117 = vst [vmem:[#allocation91_spill] sm:$0xff] %v10099_v6  ;;  %14118 = vst [vmem:[#allocation96_spill] sm:$0xff] %v10103_v30  ;;  %v10115_v46 = vadd.f32 %v13852_v39, %v14122_v29  ;;  %v14124_v6 = vld [vmem:[#allocation128_spill] sm:$0xff]  ;;  %v14126_v30 = vld [vmem:[#allocation130_spill] sm:$0xff]  ;;  %v10135_v29 = vadd.f32 %v13852_v39, %v9257_v26  ;;  %v10155_v26 = vadd.f32 %v13852_v39, %v9287_v44 }
 0x38d   :  { %14120 = vst [vmem:[#allocation98_spill] sm:$0xff] %v10107_v12  ;;  %14123 = vst [vmem:[#allocation97_spill] sm:$0xff] %v10119_v47  ;;  %v10123_v16 = vadd.f32 %v13852_v39, %v14124_v6  ;;  %v10127_v57 = vadd.f32 %v13852_v39, %v14126_v30  ;;  %v14127_v12 = vld [vmem:[#allocation131_spill] sm:$0xff]  ;;  %v14129_v47 = vld [vmem:[#allocation132_spill] sm:$0xff]  ;;  %v10175_v44 = vadd.f32 %v13852_v39, %v9317_v42 }
 0x38e   :  { %v10131_v38 = vadd.f32 %v13852_v39, %v14127_v12  ;;  %14128 = vst [vmem:[#allocation104_spill] sm:$0xff] %v10139_v53  ;;  %v10143_v6 = vadd.f32 %v13852_v39, %v14129_v47  ;;  %v10151_v12 = vadd.f32 %v13852_v39, %v9281_v18  ;;  %v14131_v53 = vld [vmem:[#allocation134_spill] sm:$0xff]  ;;  %v10171_v18 = vadd.f32 %v13852_v39, %v9311_v63 }
 0x38f   :  { %14125 = vst [vmem:[#allocation99_spill] sm:$0xff] %v10123_v16  ;;  %v14130_v16 = vld [vmem:[#allocation133_spill] sm:$0xff]  ;;  %v10163_v47 = vadd.f32 %v13852_v39, %v14131_v53  ;;  %v10179_v56 = vadd.f32 %v13852_v39, %v9323_v21  ;;  %v10183_v53 = vadd.f32 %v13852_v39, %v9329_v55  ;;  %v10191_v63 = vadd.f32 %v13852_v39, %v9341_v3  ;;  %v14286_v40 = vld [vmem:[#allocation74_spill] sm:$0xff]  ;;  %v14291_v51 = vld [vmem:[#allocation80_spill] sm:$0xff] }
 0x390   :  { %v10147_v30 = vadd.f32 %v13852_v39, %v14130_v16  ;;  %v10167_v16 = vadd.f32 %v13852_v39, %v9305_v41  ;;  %v10187_v41 = vadd.f32 %v13852_v39, %v9335_v9  ;;  %v10195_v42 = vadd.f32 %v13852_v39, %v9347_v49  ;;  %v14290_v13 = vld [vmem:[#allocation78_spill] sm:$0xff] }
 0x391   :  { %v10199_v21 = vadd.f32 %v13852_v39, %v9353_v24  ;;  %v10203_v55 = vadd.f32 %v13852_v39, %v9359_v31  ;;  %v10207_v9 = vadd.f32 %v13852_v39, %v9365_v1  ;;  %v10211_v3 = vadd.f32 %v13852_v39, %v9371_v11  ;;  %v14293_v36 = vld [vmem:[#allocation83_spill] sm:$0xff]  ;;  %v14294_v61 = vld [vmem:[#allocation88_spill] sm:$0xff] }
 0x392   :  { %v10215_v49 = vadd.f32 %v13852_v39, %v9377_v14  ;;  %v10219_v24 = vadd.f32 %v13852_v39, %v9383_v62  ;;  %v10223_v31 = vadd.f32 %v13852_v39, %v9389_v23  ;;  %v10227_v1 = vadd.f32 %v13852_v39, %v9395_v0  ;;  %v14295_v45 = vld [vmem:[#allocation90_spill] sm:$0xff] }
 0x393   :  { %14132 = vst [vmem:[#allocation106_spill] sm:$0xff] %v10199_v21  ;;  %14133 = vst [vmem:[#allocation105_spill] sm:$0xff] %v10203_v55  ;;  %v10231_v11 = vadd.f32 %v13852_v39, %v9401_v37  ;;  %v10235_v14 = vadd.f32 %v13852_v39, %v9407_v54  ;;  %v10239_v62 = vadd.f32 %v13852_v39, %v9413_v48  ;;  %v14296_v10 = vld [vmem:[#allocation91_spill] sm:$0xff]  ;;  %v14297_v17 = vld [vmem:[#allocation96_spill] sm:$0xff] }
 0x394   :  { %14134 = vst [vmem:[#allocation107_spill] sm:$0xff] %v10207_v9  ;;  %14135 = vst [vmem:[#allocation111_spill] sm:$0xff] %v10211_v3  ;;  %v10243_v23 = vadd.f32 %v13852_v39, %v9419_v33  ;;  %v10247_v0 = vadd.f32 %v13852_v39, %v9425_v28  ;;  %v10251_v37 = vadd.f32 %v13852_v39, %v9431_v60  ;;  %v14298_v52 = vld [vmem:[#allocation98_spill] sm:$0xff]  ;;  %v14299_v2 = vld [vmem:[#allocation97_spill] sm:$0xff] }
 0x395   :  { %14136 = vst [vmem:[#allocation113_spill] sm:$0xff] %v10215_v49  ;;  %14137 = vst [vmem:[#allocation112_spill] sm:$0xff] %v10219_v24  ;;  %v10255_v54 = vadd.f32 %v13852_v39, %v9437_v34  ;;  %v10259_v48 = vadd.f32 %v13852_v39, %v9443_v8  ;;  %v10263_v33 = vadd.f32 %v13852_v39, %v9449_v4  ;;  %v14301_v5 = vld [vmem:[#allocation104_spill] sm:$0xff] }
 0x396   :  { %14138 = vst [vmem:[#allocation114_spill] sm:$0xff] %v10223_v31  ;;  %14139 = vst [vmem:[#allocation118_spill] sm:$0xff] %v10227_v1  ;;  %v10267_v28 = vadd.f32 %v13852_v39, %v9455_v59  ;;  %v10271_v60 = vadd.f32 %v13852_v39, %v9461_v25  ;;  %v10275_v34 = vadd.f32 %v13852_v39, %v9467_v27  ;;  %v14300_v32 = vld [vmem:[#allocation99_spill] sm:$0xff] }
 0x397   :  { %14140 = vst [vmem:[#allocation121_spill] sm:$0xff] %v10231_v11  ;;  %14141 = vst [vmem:[#allocation119_spill] sm:$0xff] %v10235_v14  ;;  %v10279_v8 = vadd.f32 %v13852_v39, %v9473_v43 }
 0x398   :  { %14142 = vst [vmem:[#allocation122_spill] sm:$0xff] %v10239_v62  ;;  %14143 = vst [vmem:[#allocation120_spill] sm:$0xff] %v10243_v23  ;;  %v14323_v62 = vld [vmem:[#allocation143_spill] sm:$0xff]  ;;  %v14326_v23 = vld [vmem:[#allocation144_spill] sm:$0xff] }
 0x399   :  { %14144 = vst [vmem:[#allocation125_spill] sm:$0xff] %v10247_v0  ;;  %14145 = vst [vmem:[#allocation126_spill] sm:$0xff] %v10251_v37  ;;  %v14277_v0 = vld [vmem:[#allocation54_spill] sm:$0xff]  ;;  %v14324_v37 = vmax.f32 %v14323_v62, 0.0  ;;  %v14327_v9 = vmax.f32 %v14326_v23, 0.0 }
 0x39a   :  { %14146 = vst [vmem:[#allocation127_spill] sm:$0xff] %v10255_v54  ;;  %14147 = vst [vmem:[#allocation128_spill] sm:$0xff] %v10259_v48  ;;  %v14153_v48 = vld [vmem:[#allocation135_spill] sm:$0xff]  ;;  %v14275_v54 = vld [vmem:[#allocation53_spill] sm:$0xff] }
 0x39b   :  { %14148 = vst [vmem:[#allocation130_spill] sm:$0xff] %v10263_v33  ;;  %14149 = vst [vmem:[#allocation131_spill] sm:$0xff] %v10267_v28  ;;  %v10283_v4 = vadd.f32 %v13852_v39, %v14153_v48  ;;  %v14155_v33 = vld [vmem:[#allocation136_spill] sm:$0xff]  ;;  %v14157_v28 = vld [vmem:[#allocation137_spill] sm:$0xff] }
 0x39c   :  { %14150 = vst [vmem:[#allocation132_spill] sm:$0xff] %v10271_v60  ;;  %14151 = vst [vmem:[#allocation133_spill] sm:$0xff] %v10275_v34  ;;  %v10287_v59 = vadd.f32 %v13852_v39, %v14155_v33  ;;  %v10291_v25 = vadd.f32 %v13852_v39, %v14157_v28  ;;  %v14159_v60 = vld [vmem:[#allocation138_spill] sm:$0xff]  ;;  %v14161_v34 = vld [vmem:[#allocation139_spill] sm:$0xff] }
 0x39d   :  { %14152 = vst [vmem:[#allocation134_spill] sm:$0xff] %v10279_v8  ;;  %14154 = vst [vmem:[#allocation135_spill] sm:$0xff] %v10283_v4  ;;  %v10295_v27 = vadd.f32 %v13852_v39, %v14159_v60  ;;  %v10299_v43 = vadd.f32 %v13852_v39, %v14161_v34  ;;  %v14163_v8 = vld [vmem:[#allocation140_spill] sm:$0xff]  ;;  %v14165_v4 = vld [vmem:[#allocation141_spill] sm:$0xff]  ;;  %v10315_v60 = vadd.f32 %v13852_v39, %v9527_v35 }
 0x39e   :  { %14156 = vst [vmem:[#allocation136_spill] sm:$0xff] %v10287_v59  ;;  %14158 = vst [vmem:[#allocation137_spill] sm:$0xff] %v10291_v25  ;;  %v10303_v48 = vadd.f32 %v13852_v39, %v14163_v8  ;;  %v10307_v33 = vadd.f32 %v13852_v39, %v14165_v4  ;;  %v14167_v59 = vld [vmem:[#allocation142_spill] sm:$0xff]  ;;  %v10319_v34 = vadd.f32 %v13852_v39, %v9533_v15  ;;  %v14274_v35 = vld [vmem:[#allocation51_spill] sm:$0xff]  ;;  %v14314_v55 = vmov %v10291_v25 }
 0x39f   :  { %14160 = vst [vmem:[#allocation138_spill] sm:$0xff] %v10295_v27  ;;  %14162 = vst [vmem:[#allocation139_spill] sm:$0xff] %v10299_v43  ;;  %v10311_v28 = vadd.f32 %v13852_v39, %v14167_v59  ;;  %v10323_v8 = vadd.f32 %v13852_v39, %v9539_v22  ;;  %v14272_v59 = vld [vmem:[#allocation48_spill] sm:$0xff]  ;;  %v14273_v27 = vld [vmem:[#allocation50_spill] sm:$0xff]  ;;  %v14316_v3 = vmov %v10299_v43  ;;  %v10529_v39 = vpack.c.bf16 %v14327_v9, %v14327_v9 }
 0x3a0   :  { %14164 = vst [vmem:[#allocation140_spill] sm:$0xff] %v10303_v48  ;;  %14166 = vst [vmem:[#allocation141_spill] sm:$0xff] %v10307_v33  ;;  %v14271_v33 = vld [vmem:[#allocation49_spill] sm:$0xff]  ;;  %v14276_v15 = vld [vmem:[#allocation52_spill] sm:$0xff]  ;;  %v14317_v49 = vmov %v10303_v48  ;;  %v14321_v11 = vmov %v10319_v34 }
 0x3a1   :  { %14168 = vst [vmem:[#allocation142_spill] sm:$0xff] %v10311_v28  ;;  %14169 = vst [vmem:[#allocation176_spill] sm:$0xff] %v10315_v60  ;;  %v14278_v22 = vld [vmem:[#allocation55_spill] sm:$0xff]  ;;  %v14319_v31 = vmov %v10311_v28  ;;  %v14329_v48 = vld [vmem:[#allocation152_spill] sm:$0xff] }
 0x3a2   :  { %14170 = vst [vmem:[#allocation177_spill] sm:$0xff] %v10319_v34  ;;  %14171 = vst [vmem:[#allocation178_spill] sm:$0xff] %v10323_v8  ;;  %v14279_v8 = vld [vmem:[#allocation57_spill] sm:$0xff]  ;;  %v10524_v34 = vpack.c.bf16 %v14324_v37, %v14324_v37  ;;  %v14330_v4 = vmax.f32 %v14329_v48, 0.0  ;;  %v14335_v60 = vld [vmem:[#allocation154_spill] sm:$0xff] }
 0x3a3   :  { %14328 = vst [vmem:[#allocation47_spill] sm:$0xff] %v10529_v39  ;;  %v14332_v28 = vld [vmem:[#allocation153_spill] sm:$0xff]  ;;  %v14336_v62 = vmax.f32 %v14335_v60, 0.0  ;;  %v14341_v39 = vld [vmem:[#allocation156_spill] sm:$0xff] }
 0x3a4   :  { %14325 = vst [vmem:[#allocation46_spill] sm:$0xff] %v10524_v34  ;;  %v10534_v43 = vpack.c.bf16 %v14330_v4, %v14330_v4  ;;  %v14333_v1 = vmax.f32 %v14332_v28, 0.0  ;;  %v14338_v34 = vld [vmem:[#allocation155_spill] sm:$0xff]  ;;  %v14342_v48 = vmax.f32 %v14341_v39, 0.0 }
 0x3a5   :  { %v14313_v21 = vld [vmem:[#allocation136_spill] sm:$0xff]  ;;  %v10544_v37 = vpack.c.bf16 %v14336_v62, %v14336_v62  ;;  %v14339_v23 = vmax.f32 %v14338_v34, 0.0 }
 0x3a6   :  { %14331 = vst [vmem:[#allocation49_spill] sm:$0xff] %v10534_v43  ;;  %v10539_v25 = vpack.c.bf16 %v14333_v1, %v14333_v1  ;;  %v10554_v4 = vpack.c.bf16 %v14342_v48, %v14342_v48  ;;  %v14344_v43 = vld [vmem:[#allocation157_spill] sm:$0xff] }
 0x3a7   :  { %v14318_v24 = vld [vmem:[#allocation141_spill] sm:$0xff]  ;;  %14337 = vst [vmem:[#allocation50_spill] sm:$0xff] %v10544_v37  ;;  %v10549_v9 = vpack.c.bf16 %v14339_v23, %v14339_v23  ;;  %v14345_v28 = vmax.f32 %v14344_v43, 0.0  ;;  %v14350_v37 = vld [vmem:[#allocation159_spill] sm:$0xff] }
 0x3a8   :  { %14334 = vst [vmem:[#allocation48_spill] sm:$0xff] %v10539_v25  ;;  %14343 = vst [vmem:[#allocation53_spill] sm:$0xff] %v10554_v4  ;;  %v14347_v25 = vld [vmem:[#allocation158_spill] sm:$0xff]  ;;  %v14351_v34 = vmax.f32 %v14350_v37, 0.0  ;;  %v14356_v4 = vld [vmem:[#allocation161_spill] sm:$0xff] }
 0x3a9   :  { %v14322_v14 = vld [vmem:[#allocation178_spill] sm:$0xff]  ;;  %14340 = vst [vmem:[#allocation51_spill] sm:$0xff] %v10549_v9  ;;  %v10559_v1 = vpack.c.bf16 %v14345_v28, %v14345_v28  ;;  %v14348_v60 = vmax.f32 %v14347_v25, 0.0  ;;  %v14353_v9 = vld [vmem:[#allocation160_spill] sm:$0xff]  ;;  %v14357_v43 = vmax.f32 %v14356_v4, 0.0 }
 0x3aa   :  { %v10569_v23 = vpack.c.bf16 %v14351_v34, %v14351_v34  ;;  %v14354_v39 = vmax.f32 %v14353_v9, 0.0 }
 0x3ab   :  { %14346 = vst [vmem:[#allocation52_spill] sm:$0xff] %v10559_v1  ;;  %v10564_v62 = vpack.c.bf16 %v14348_v60, %v14348_v60  ;;  %v10579_v28 = vpack.c.bf16 %v14357_v43, %v14357_v43  ;;  %v14359_v1 = vld [vmem:[#allocation162_spill] sm:$0xff] }
 0x3ac   :  { %14352 = vst [vmem:[#allocation55_spill] sm:$0xff] %v10569_v23  ;;  %v10574_v48 = vpack.c.bf16 %v14354_v39, %v14354_v39  ;;  %v14360_v25 = vmax.f32 %v14359_v1, 0.0  ;;  %v14365_v23 = vld [vmem:[#allocation79_spill] sm:$0xff] }
 0x3ad   :  { %14349 = vst [vmem:[#allocation54_spill] sm:$0xff] %v10564_v62  ;;  %14358 = vst [vmem:[#allocation70_spill] sm:$0xff] %v10579_v28  ;;  %v14362_v62 = vld [vmem:[#allocation163_spill] sm:$0xff]  ;;  %v14366_v9 = vmax.f32 %v14365_v23, 0.0  ;;  %v14371_v28 = vld [vmem:[#allocation84_spill] sm:$0xff] }
 0x3ae   :  { %14355 = vst [vmem:[#allocation57_spill] sm:$0xff] %v10574_v48  ;;  %v10584_v60 = vpack.c.bf16 %v14360_v25, %v14360_v25  ;;  %v14363_v37 = vmax.f32 %v14362_v62, 0.0  ;;  %v14368_v48 = vld [vmem:[#allocation87_spill] sm:$0xff]  ;;  %v14372_v1 = vmax.f32 %v14371_v28, 0.0 }
 0x3af   :  { %v10594_v39 = vpack.c.bf16 %v14366_v9, %v14366_v9  ;;  %v14369_v4 = vmax.f32 %v14368_v48, 0.0 }
 0x3b0   :  { %14361 = vst [vmem:[#allocation74_spill] sm:$0xff] %v10584_v60  ;;  %v10589_v34 = vpack.c.bf16 %v14363_v37, %v14363_v37  ;;  %v10604_v25 = vpack.c.bf16 %v14372_v1, %v14372_v1  ;;  %v14374_v60 = vld [vmem:[#allocation86_spill] sm:$0xff] }
 0x3b1   :  { %14367 = vst [vmem:[#allocation80_spill] sm:$0xff] %v10594_v39  ;;  %v10599_v43 = vpack.c.bf16 %v14369_v4, %v14369_v4  ;;  %v14375_v62 = vmax.f32 %v14374_v60, 0.0  ;;  %v14380_v39 = vld [vmem:[#allocation92_spill] sm:$0xff] }
 0x3b2   :  { %14364 = vst [vmem:[#allocation78_spill] sm:$0xff] %v10589_v34  ;;  %14373 = vst [vmem:[#allocation88_spill] sm:$0xff] %v10604_v25  ;;  %v14377_v34 = vld [vmem:[#allocation95_spill] sm:$0xff]  ;;  %v14381_v48 = vmax.f32 %v14380_v39, 0.0  ;;  %v14386_v25 = vld [vmem:[#allocation100_spill] sm:$0xff] }
 0x3b3   :  { %14370 = vst [vmem:[#allocation83_spill] sm:$0xff] %v10599_v43  ;;  %v10609_v37 = vpack.c.bf16 %v14375_v62, %v14375_v62  ;;  %v14378_v23 = vmax.f32 %v14377_v34, 0.0  ;;  %v14383_v43 = vld [vmem:[#allocation94_spill] sm:$0xff]  ;;  %v14387_v60 = vmax.f32 %v14386_v25, 0.0 }
 0x3b4   :  { %v10619_v4 = vpack.c.bf16 %v14381_v48, %v14381_v48  ;;  %v14384_v28 = vmax.f32 %v14383_v43, 0.0 }
 0x3b5   :  { %14376 = vst [vmem:[#allocation90_spill] sm:$0xff] %v10609_v37  ;;  %v10614_v9 = vpack.c.bf16 %v14378_v23, %v14378_v23  ;;  %v10629_v62 = vpack.c.bf16 %v14387_v60, %v14387_v60  ;;  %v14389_v37 = vld [vmem:[#allocation102_spill] sm:$0xff] }
 0x3b6   :  { %14382 = vst [vmem:[#allocation96_spill] sm:$0xff] %v10619_v4  ;;  %v10624_v1 = vpack.c.bf16 %v14384_v28, %v14384_v28  ;;  %v14390_v34 = vmax.f32 %v14389_v37, 0.0  ;;  %v14395_v4 = vld [vmem:[#allocation169_spill] sm:$0xff] }
 0x3b7   :  { %14379 = vst [vmem:[#allocation91_spill] sm:$0xff] %v10614_v9  ;;  %14388 = vst [vmem:[#allocation97_spill] sm:$0xff] %v10629_v62  ;;  %v14392_v9 = vld [vmem:[#allocation110_spill] sm:$0xff]  ;;  %v14396_v43 = vmax.f32 %v14395_v4, 0.0  ;;  %v14401_v62 = vld [vmem:[#allocation171_spill] sm:$0xff] }
 0x3b8   :  { %14385 = vst [vmem:[#allocation98_spill] sm:$0xff] %v10624_v1  ;;  %v10634_v23 = vpack.c.bf16 %v14390_v34, %v14390_v34  ;;  %v14393_v39 = vmax.f32 %v14392_v9, 0.0  ;;  %v14398_v1 = vld [vmem:[#allocation170_spill] sm:$0xff]  ;;  %v14402_v37 = vmax.f32 %v14401_v62, 0.0 }
 0x3b9   :  { %v10644_v28 = vpack.c.bf16 %v14396_v43, %v14396_v43  ;;  %v14399_v25 = vmax.f32 %v14398_v1, 0.0 }
 0x3ba   :  { %14391 = vst [vmem:[#allocation99_spill] sm:$0xff] %v10634_v23  ;;  %v10639_v48 = vpack.c.bf16 %v14393_v39, %v14393_v39  ;;  %v10654_v34 = vpack.c.bf16 %v14402_v37, %v14402_v37  ;;  %v14404_v23 = vld [vmem:[#allocation172_spill] sm:$0xff] }
 0x3bb   :  { %14397 = vst [vmem:[#allocation136_spill] sm:$0xff] %v10644_v28  ;;  %v10649_v60 = vpack.c.bf16 %v14399_v25, %v14399_v25  ;;  %v14405_v9 = vmax.f32 %v14404_v23, 0.0  ;;  %v14410_v28 = vld [vmem:[#allocation174_spill] sm:$0xff] }
 0x3bc   :  { %14394 = vst [vmem:[#allocation104_spill] sm:$0xff] %v10639_v48  ;;  %14403 = vst [vmem:[#allocation139_spill] sm:$0xff] %v10654_v34  ;;  %v14407_v48 = vld [vmem:[#allocation173_spill] sm:$0xff]  ;;  %v14411_v1 = vmax.f32 %v14410_v28, 0.0  ;;  %v14416_v34 = vld [vmem:[#allocation2_spill] sm:$0xff] }
 0x3bd   :  { %14400 = vst [vmem:[#allocation137_spill] sm:$0xff] %v10649_v60  ;;  %v10659_v39 = vpack.c.bf16 %v14405_v9, %v14405_v9  ;;  %v14408_v4 = vmax.f32 %v14407_v48, 0.0  ;;  %v14413_v60 = vld [vmem:[#allocation175_spill] sm:$0xff]  ;;  %v14417_v23 = vmax.f32 %v14416_v34, 0.0 }
 0x3be   :  { %v10669_v25 = vpack.c.bf16 %v14411_v1, %v14411_v1  ;;  %v14414_v62 = vmax.f32 %v14413_v60, 0.0 }
 0x3bf   :  { %14406 = vst [vmem:[#allocation140_spill] sm:$0xff] %v10659_v39  ;;  %v10664_v43 = vpack.c.bf16 %v14408_v4, %v14408_v4  ;;  %v10679_v9 = vpack.c.bf16 %v14417_v23, %v14417_v23  ;;  %v14419_v39 = vld [vmem:[#allocation4_spill] sm:$0xff] }
 0x3c0   :  { %14412 = vst [vmem:[#allocation142_spill] sm:$0xff] %v10669_v25  ;;  %v10674_v37 = vpack.c.bf16 %v14414_v62, %v14414_v62  ;;  %v14420_v48 = vmax.f32 %v14419_v39, 0.0  ;;  %v14425_v25 = vld [vmem:[#allocation3_spill] sm:$0xff] }
 0x3c1   :  { %14409 = vst [vmem:[#allocation141_spill] sm:$0xff] %v10664_v43  ;;  %14418 = vst [vmem:[#allocation178_spill] sm:$0xff] %v10679_v9  ;;  %v14422_v43 = vld [vmem:[#allocation6_spill] sm:$0xff]  ;;  %v14426_v60 = vmax.f32 %v14425_v25, 0.0  ;;  %v14431_v9 = vld [vmem:[#allocation7_spill] sm:$0xff] }
 0x3c2   :  { %14415 = vst [vmem:[#allocation177_spill] sm:$0xff] %v10674_v37  ;;  %v10684_v4 = vpack.c.bf16 %v14420_v48, %v14420_v48  ;;  %v14423_v28 = vmax.f32 %v14422_v43, 0.0  ;;  %v14428_v37 = vld [vmem:[#allocation5_spill] sm:$0xff]  ;;  %v14432_v39 = vmax.f32 %v14431_v9, 0.0 }
 0x3c3   :  { %v10694_v62 = vpack.c.bf16 %v14426_v60, %v14426_v60  ;;  %v14429_v34 = vmax.f32 %v14428_v37, 0.0 }
 0x3c4   :  { %14421 = vst [vmem:[#allocation143_spill] sm:$0xff] %v10684_v4  ;;  %v10689_v1 = vpack.c.bf16 %v14423_v28, %v14423_v28  ;;  %v10704_v48 = vpack.c.bf16 %v14432_v39, %v14432_v39  ;;  %v14434_v4 = vld [vmem:[#allocation10_spill] sm:$0xff] }
 0x3c5   :  { %14427 = vst [vmem:[#allocation152_spill] sm:$0xff] %v10694_v62  ;;  %v10699_v23 = vpack.c.bf16 %v14429_v34, %v14429_v34  ;;  %v14435_v43 = vmax.f32 %v14434_v4, 0.0  ;;  %v14440_v62 = vld [vmem:[#allocation146_spill] sm:$0xff] }
 0x3c6   :  { %14424 = vst [vmem:[#allocation144_spill] sm:$0xff] %v10689_v1  ;;  %14433 = vst [vmem:[#allocation154_spill] sm:$0xff] %v10704_v48  ;;  %v14437_v1 = vld [vmem:[#allocation145_spill] sm:$0xff]  ;;  %v14441_v37 = vmax.f32 %v14440_v62, 0.0  ;;  %v14446_v48 = vld [vmem:[#allocation148_spill] sm:$0xff] }
 0x3c7   :  { %14430 = vst [vmem:[#allocation153_spill] sm:$0xff] %v10699_v23  ;;  %v10709_v28 = vpack.c.bf16 %v14435_v43, %v14435_v43  ;;  %v14438_v25 = vmax.f32 %v14437_v1, 0.0  ;;  %v14443_v23 = vld [vmem:[#allocation147_spill] sm:$0xff]  ;;  %v14447_v4 = vmax.f32 %v14446_v48, 0.0 }
 0x3c8   :  { %v10719_v34 = vpack.c.bf16 %v14441_v37, %v14441_v37  ;;  %v14444_v9 = vmax.f32 %v14443_v23, 0.0 }
 0x3c9   :  { %14436 = vst [vmem:[#allocation155_spill] sm:$0xff] %v10709_v28  ;;  %v10714_v60 = vpack.c.bf16 %v14438_v25, %v14438_v25  ;;  %v10729_v43 = vpack.c.bf16 %v14447_v4, %v14447_v4  ;;  %v14449_v28 = vld [vmem:[#allocation149_spill] sm:$0xff] }
 0x3ca   :  { %14442 = vst [vmem:[#allocation157_spill] sm:$0xff] %v10719_v34  ;;  %v10724_v39 = vpack.c.bf16 %v14444_v9, %v14444_v9  ;;  %v14450_v1 = vmax.f32 %v14449_v28, 0.0  ;;  %v14455_v34 = vld [vmem:[#allocation151_spill] sm:$0xff] }
 0x3cb   :  { %14439 = vst [vmem:[#allocation156_spill] sm:$0xff] %v10714_v60  ;;  %14448 = vst [vmem:[#allocation159_spill] sm:$0xff] %v10729_v43  ;;  %v14452_v60 = vld [vmem:[#allocation150_spill] sm:$0xff]  ;;  %v14456_v23 = vmax.f32 %v14455_v34, 0.0  ;;  %v14461_v43 = vld [vmem:[#allocation93_spill] sm:$0xff] }
 0x3cc   :  { %14445 = vst [vmem:[#allocation158_spill] sm:$0xff] %v10724_v39  ;;  %v10734_v25 = vpack.c.bf16 %v14450_v1, %v14450_v1  ;;  %v14453_v62 = vmax.f32 %v14452_v60, 0.0  ;;  %v14458_v39 = vld [vmem:[#allocation85_spill] sm:$0xff]  ;;  %v14462_v28 = vmax.f32 %v14461_v43, 0.0 }
 0x3cd   :  { %v10744_v9 = vpack.c.bf16 %v14456_v23, %v14456_v23  ;;  %v14459_v48 = vmax.f32 %v14458_v39, 0.0 }
 0x3ce   :  { %14451 = vst [vmem:[#allocation160_spill] sm:$0xff] %v10734_v25  ;;  %v10739_v37 = vpack.c.bf16 %v14453_v62, %v14453_v62  ;;  %v10754_v1 = vpack.c.bf16 %v14462_v28, %v14462_v28  ;;  %v14464_v25 = vld [vmem:[#allocation101_spill] sm:$0xff] }
 0x3cf   :  { %14457 = vst [vmem:[#allocation162_spill] sm:$0xff] %v10744_v9  ;;  %v10749_v4 = vpack.c.bf16 %v14459_v48, %v14459_v48  ;;  %v14465_v60 = vmax.f32 %v14464_v25, 0.0  ;;  %v14470_v9 = vld [vmem:[#allocation109_spill] sm:$0xff] }
 0x3d0   :  { %14454 = vst [vmem:[#allocation161_spill] sm:$0xff] %v10739_v37  ;;  %14463 = vst [vmem:[#allocation79_spill] sm:$0xff] %v10754_v1  ;;  %v14467_v37 = vld [vmem:[#allocation103_spill] sm:$0xff]  ;;  %v14471_v39 = vmax.f32 %v14470_v9, 0.0  ;;  %v14476_v1 = vld [vmem:[#allocation108_spill] sm:$0xff] }
 0x3d1   :  { %14460 = vst [vmem:[#allocation163_spill] sm:$0xff] %v10749_v4  ;;  %v10759_v62 = vpack.c.bf16 %v14465_v60, %v14465_v60  ;;  %v14468_v34 = vmax.f32 %v14467_v37, 0.0  ;;  %v14473_v4 = vld [vmem:[#allocation164_spill] sm:$0xff]  ;;  %v14477_v25 = vmax.f32 %v14476_v1, 0.0 }
 0x3d2   :  { %v10769_v48 = vpack.c.bf16 %v14471_v39, %v14471_v39  ;;  %v14474_v43 = vmax.f32 %v14473_v4, 0.0 }
 0x3d3   :  { %14466 = vst [vmem:[#allocation87_spill] sm:$0xff] %v10759_v62  ;;  %v10764_v23 = vpack.c.bf16 %v14468_v34, %v14468_v34  ;;  %v10779_v60 = vpack.c.bf16 %v14477_v25, %v14477_v25  ;;  %v14479_v62 = vld [vmem:[#allocation116_spill] sm:$0xff] }
 0x3d4   :  { %14472 = vst [vmem:[#allocation86_spill] sm:$0xff] %v10769_v48  ;;  %v10774_v28 = vpack.c.bf16 %v14474_v43, %v14474_v43  ;;  %v14480_v37 = vmax.f32 %v14479_v62, 0.0  ;;  %v14485_v48 = vld [vmem:[#allocation117_spill] sm:$0xff] }
 0x3d5   :  { %14469 = vst [vmem:[#allocation84_spill] sm:$0xff] %v10764_v23  ;;  %14478 = vst [vmem:[#allocation92_spill] sm:$0xff] %v10779_v60  ;;  %v14482_v23 = vld [vmem:[#allocation115_spill] sm:$0xff]  ;;  %v14486_v4 = vmax.f32 %v14485_v48, 0.0  ;;  %v14491_v60 = vld [vmem:[#allocation124_spill] sm:$0xff] }
 0x3d6   :  { %14475 = vst [vmem:[#allocation95_spill] sm:$0xff] %v10774_v28  ;;  %v10784_v34 = vpack.c.bf16 %v14480_v37, %v14480_v37  ;;  %v14483_v9 = vmax.f32 %v14482_v23, 0.0  ;;  %v14488_v28 = vld [vmem:[#allocation123_spill] sm:$0xff]  ;;  %v14492_v62 = vmax.f32 %v14491_v60, 0.0 }
 0x3d7   :  { %v10794_v43 = vpack.c.bf16 %v14486_v4, %v14486_v4  ;;  %v14489_v1 = vmax.f32 %v14488_v28, 0.0 }
 0x3d8   :  { %14481 = vst [vmem:[#allocation94_spill] sm:$0xff] %v10784_v34  ;;  %v10789_v39 = vpack.c.bf16 %v14483_v9, %v14483_v9  ;;  %v10804_v37 = vpack.c.bf16 %v14492_v62, %v14492_v62  ;;  %v14494_v34 = vld [vmem:[#allocation129_spill] sm:$0xff] }
 0x3d9   :  { %14487 = vst [vmem:[#allocation102_spill] sm:$0xff] %v10794_v43  ;;  %v10799_v25 = vpack.c.bf16 %v14489_v1, %v14489_v1  ;;  %v14495_v23 = vmax.f32 %v14494_v34, 0.0  ;;  %v14500_v43 = vld [vmem:[#allocation166_spill] sm:$0xff] }
 0x3da   :  { %14484 = vst [vmem:[#allocation100_spill] sm:$0xff] %v10789_v39  ;;  %14493 = vst [vmem:[#allocation169_spill] sm:$0xff] %v10804_v37  ;;  %v14497_v39 = vld [vmem:[#allocation165_spill] sm:$0xff]  ;;  %v14501_v28 = vmax.f32 %v14500_v43, 0.0  ;;  %v14506_v37 = vld [vmem:[#allocation168_spill] sm:$0xff] }
 0x3db   :  { %14490 = vst [vmem:[#allocation110_spill] sm:$0xff] %v10799_v25  ;;  %v10809_v9 = vpack.c.bf16 %v14495_v23, %v14495_v23  ;;  %v14498_v48 = vmax.f32 %v14497_v39, 0.0  ;;  %v14503_v25 = vld [vmem:[#allocation167_spill] sm:$0xff]  ;;  %v14507_v34 = vmax.f32 %v14506_v37, 0.0 }
 0x3dc   :  { %v10819_v1 = vpack.c.bf16 %v14501_v28, %v14501_v28  ;;  %v14504_v60 = vmax.f32 %v14503_v25, 0.0 }
 0x3dd   :  { %14496 = vst [vmem:[#allocation170_spill] sm:$0xff] %v10809_v9  ;;  %v10814_v4 = vpack.c.bf16 %v14498_v48, %v14498_v48  ;;  %v10829_v23 = vpack.c.bf16 %v14507_v34, %v14507_v34  ;;  %v14509_v9 = vld [vmem:[#allocation9_spill] sm:$0xff] }
 0x3de   :  { %14502 = vst [vmem:[#allocation172_spill] sm:$0xff] %v10819_v1  ;;  %v10824_v62 = vpack.c.bf16 %v14504_v60, %v14504_v60  ;;  %v14510_v39 = vmax.f32 %v14509_v9, 0.0  ;;  %v14515_v1 = vld [vmem:[#allocation11_spill] sm:$0xff] }
 0x3df   :  { %14499 = vst [vmem:[#allocation171_spill] sm:$0xff] %v10814_v4  ;;  %14508 = vst [vmem:[#allocation174_spill] sm:$0xff] %v10829_v23  ;;  %v14512_v4 = vld [vmem:[#allocation8_spill] sm:$0xff]  ;;  %v14516_v25 = vmax.f32 %v14515_v1, 0.0 }
 0x3e0   :  { %14505 = vst [vmem:[#allocation173_spill] sm:$0xff] %v10824_v62  ;;  %v10834_v48 = vpack.c.bf16 %v14510_v39, %v14510_v39  ;;  %v14513_v43 = vmax.f32 %v14512_v4, 0.0  ;;  %v14518_v62 = vld [vmem:[#allocation13_spill] sm:$0xff]  ;;  %v14521_v23 = vld [vmem:[#allocation12_spill] sm:$0xff] }
 0x3e1   :  { %v10844_v60 = vpack.c.bf16 %v14516_v25, %v14516_v25  ;;  %v14519_v37 = vmax.f32 %v14518_v62, 0.0  ;;  %v14522_v9 = vmax.f32 %v14521_v23, 0.0 }
 0x3e2   :  { %14511 = vst [vmem:[#allocation175_spill] sm:$0xff] %v10834_v48  ;;  %v10839_v28 = vpack.c.bf16 %v14513_v43, %v14513_v43  ;;  %v14524_v48 = vld [vmem:[#allocation14_spill] sm:$0xff] }
 0x3e3   :  { %14517 = vst [vmem:[#allocation4_spill] sm:$0xff] %v10844_v60  ;;  %v10849_v34 = vpack.c.bf16 %v14519_v37, %v14519_v37  ;;  %v10854_v39 = vpack.c.bf16 %v14522_v9, %v14522_v9  ;;  %v14525_v4 = vmax.f32 %v14524_v48, 0.0  ;;  %v14530_v60 = vld [vmem:[#allocation17_spill] sm:$0xff] }
 0x3e4   :  { %14514 = vst [vmem:[#allocation2_spill] sm:$0xff] %v10839_v28  ;;  %v14527_v28 = vld [vmem:[#allocation15_spill] sm:$0xff]  ;;  %v14531_v62 = vmax.f32 %v14530_v60, 0.0 }
 0x3e5   :  { %14520 = vst [vmem:[#allocation6_spill] sm:$0xff] %v10849_v34  ;;  %14523 = vst [vmem:[#allocation3_spill] sm:$0xff] %v10854_v39  ;;  %v10859_v43 = vpack.c.bf16 %v14525_v4, %v14525_v4  ;;  %v14528_v1 = vmax.f32 %v14527_v28, 0.0  ;;  %v14533_v34 = vld [vmem:[#allocation16_spill] sm:$0xff]  ;;  %v14536_v39 = vld [vmem:[#allocation18_spill] sm:$0xff] }
 0x3e6   :  { %v10869_v37 = vpack.c.bf16 %v14531_v62, %v14531_v62  ;;  %v14534_v23 = vmax.f32 %v14533_v34, 0.0  ;;  %v14537_v48 = vmax.f32 %v14536_v39, 0.0 }
 0x3e7   :  { %14526 = vst [vmem:[#allocation5_spill] sm:$0xff] %v10859_v43  ;;  %v10864_v25 = vpack.c.bf16 %v14528_v1, %v14528_v1  ;;  %v14539_v43 = vld [vmem:[#allocation19_spill] sm:$0xff] }
 0x3e8   :  { %14532 = vst [vmem:[#allocation10_spill] sm:$0xff] %v10869_v37  ;;  %v10874_v9 = vpack.c.bf16 %v14534_v23, %v14534_v23  ;;  %v10879_v4 = vpack.c.bf16 %v14537_v48, %v14537_v48  ;;  %v14540_v28 = vmax.f32 %v14539_v43, 0.0  ;;  %v14545_v37 = vld [vmem:[#allocation20_spill] sm:$0xff] }
 0x3e9   :  { %14529 = vst [vmem:[#allocation7_spill] sm:$0xff] %v10864_v25  ;;  %v14542_v25 = vld [vmem:[#allocation21_spill] sm:$0xff]  ;;  %v14546_v34 = vmax.f32 %v14545_v37, 0.0 }
 0x3ea   :  { %14535 = vst [vmem:[#allocation145_spill] sm:$0xff] %v10874_v9  ;;  %14538 = vst [vmem:[#allocation146_spill] sm:$0xff] %v10879_v4  ;;  %v10884_v1 = vpack.c.bf16 %v14540_v28, %v14540_v28  ;;  %v14543_v60 = vmax.f32 %v14542_v25, 0.0  ;;  %v14548_v9 = vld [vmem:[#allocation22_spill] sm:$0xff]  ;;  %v14551_v4 = vld [vmem:[#allocation23_spill] sm:$0xff] }
 0x3eb   :  { %v10894_v23 = vpack.c.bf16 %v14546_v34, %v14546_v34  ;;  %v14549_v39 = vmax.f32 %v14548_v9, 0.0  ;;  %v14552_v43 = vmax.f32 %v14551_v4, 0.0 }
 0x3ec   :  { %14541 = vst [vmem:[#allocation147_spill] sm:$0xff] %v10884_v1  ;;  %v10889_v62 = vpack.c.bf16 %v14543_v60, %v14543_v60  ;;  %v14554_v1 = vld [vmem:[#allocation25_spill] sm:$0xff] }
 0x3ed   :  { %14547 = vst [vmem:[#allocation149_spill] sm:$0xff] %v10894_v23  ;;  %v10899_v48 = vpack.c.bf16 %v14549_v39, %v14549_v39  ;;  %v10904_v28 = vpack.c.bf16 %v14552_v43, %v14552_v43  ;;  %v14555_v25 = vmax.f32 %v14554_v1, 0.0  ;;  %v14560_v23 = vld [vmem:[#allocation26_spill] sm:$0xff] }
 0x3ee   :  { %14544 = vst [vmem:[#allocation148_spill] sm:$0xff] %v10889_v62  ;;  %v14557_v62 = vld [vmem:[#allocation24_spill] sm:$0xff]  ;;  %v14561_v9 = vmax.f32 %v14560_v23, 0.0 }
 0x3ef   :  { %14550 = vst [vmem:[#allocation150_spill] sm:$0xff] %v10899_v48  ;;  %14553 = vst [vmem:[#allocation151_spill] sm:$0xff] %v10904_v28  ;;  %v10909_v60 = vpack.c.bf16 %v14555_v25, %v14555_v25  ;;  %v14558_v37 = vmax.f32 %v14557_v62, 0.0  ;;  %v14563_v48 = vld [vmem:[#allocation27_spill] sm:$0xff]  ;;  %v14566_v28 = vld [vmem:[#allocation29_spill] sm:$0xff] }
 0x3f0   :  { %v10919_v39 = vpack.c.bf16 %v14561_v9, %v14561_v9  ;;  %v14564_v4 = vmax.f32 %v14563_v48, 0.0  ;;  %v14567_v1 = vmax.f32 %v14566_v28, 0.0 }
 0x3f1   :  { %14556 = vst [vmem:[#allocation85_spill] sm:$0xff] %v10909_v60  ;;  %v10914_v34 = vpack.c.bf16 %v14558_v37, %v14558_v37  ;;  %v14569_v60 = vld [vmem:[#allocation28_spill] sm:$0xff] }
 0x3f2   :  { %14562 = vst [vmem:[#allocation101_spill] sm:$0xff] %v10919_v39  ;;  %v10924_v43 = vpack.c.bf16 %v14564_v4, %v14564_v4  ;;  %v10929_v25 = vpack.c.bf16 %v14567_v1, %v14567_v1  ;;  %v14570_v62 = vmax.f32 %v14569_v60, 0.0  ;;  %v14575_v39 = vld [vmem:[#allocation31_spill] sm:$0xff] }
 0x3f3   :  { %14559 = vst [vmem:[#allocation93_spill] sm:$0xff] %v10914_v34  ;;  %v14572_v34 = vld [vmem:[#allocation30_spill] sm:$0xff]  ;;  %v14576_v48 = vmax.f32 %v14575_v39, 0.0 }
 0x3f4   :  { %14565 = vst [vmem:[#allocation103_spill] sm:$0xff] %v10924_v43  ;;  %14568 = vst [vmem:[#allocation109_spill] sm:$0xff] %v10929_v25  ;;  %v10934_v37 = vpack.c.bf16 %v14570_v62, %v14570_v62  ;;  %v14573_v23 = vmax.f32 %v14572_v34, 0.0  ;;  %v14578_v43 = vld [vmem:[#allocation33_spill] sm:$0xff]  ;;  %v14581_v25 = vld [vmem:[#allocation32_spill] sm:$0xff] }
 0x3f5   :  { %v10944_v4 = vpack.c.bf16 %v14576_v48, %v14576_v48  ;;  %v14579_v28 = vmax.f32 %v14578_v43, 0.0  ;;  %v14582_v60 = vmax.f32 %v14581_v25, 0.0 }
 0x3f6   :  { %14571 = vst [vmem:[#allocation164_spill] sm:$0xff] %v10934_v37  ;;  %v10939_v9 = vpack.c.bf16 %v14573_v23, %v14573_v23  ;;  %v14584_v37 = vld [vmem:[#allocation34_spill] sm:$0xff] }
 0x3f7   :  { %14577 = vst [vmem:[#allocation116_spill] sm:$0xff] %v10944_v4  ;;  %v10949_v1 = vpack.c.bf16 %v14579_v28, %v14579_v28  ;;  %v10954_v62 = vpack.c.bf16 %v14582_v60, %v14582_v60  ;;  %v14585_v34 = vmax.f32 %v14584_v37, 0.0  ;;  %v14590_v4 = vld [vmem:[#allocation37_spill] sm:$0xff] }
 0x3f8   :  { %14574 = vst [vmem:[#allocation108_spill] sm:$0xff] %v10939_v9  ;;  %v14587_v9 = vld [vmem:[#allocation35_spill] sm:$0xff]  ;;  %v14591_v43 = vmax.f32 %v14590_v4, 0.0 }
 0x3f9   :  { %14580 = vst [vmem:[#allocation115_spill] sm:$0xff] %v10949_v1  ;;  %14583 = vst [vmem:[#allocation117_spill] sm:$0xff] %v10954_v62  ;;  %v10959_v23 = vpack.c.bf16 %v14585_v34, %v14585_v34  ;;  %v14588_v39 = vmax.f32 %v14587_v9, 0.0  ;;  %v14593_v1 = vld [vmem:[#allocation36_spill] sm:$0xff]  ;;  %v14596_v62 = vld [vmem:[#allocation38_spill] sm:$0xff] }
 0x3fa   :  { %v10969_v28 = vpack.c.bf16 %v14591_v43, %v14591_v43  ;;  %v14594_v25 = vmax.f32 %v14593_v1, 0.0  ;;  %v14597_v37 = vmax.f32 %v14596_v62, 0.0 }
 0x3fb   :  { %14586 = vst [vmem:[#allocation123_spill] sm:$0xff] %v10959_v23  ;;  %v10964_v48 = vpack.c.bf16 %v14588_v39, %v14588_v39  ;;  %v14599_v23 = vld [vmem:[#allocation39_spill] sm:$0xff] }
 0x3fc   :  { %14592 = vst [vmem:[#allocation129_spill] sm:$0xff] %v10969_v28  ;;  %v10974_v60 = vpack.c.bf16 %v14594_v25, %v14594_v25  ;;  %v10979_v34 = vpack.c.bf16 %v14597_v37, %v14597_v37  ;;  %v14600_v9 = vmax.f32 %v14599_v23, 0.0  ;;  %v14605_v28 = vld [vmem:[#allocation40_spill] sm:$0xff] }
 0x3fd   :  { %14589 = vst [vmem:[#allocation124_spill] sm:$0xff] %v10964_v48  ;;  %v14602_v48 = vld [vmem:[#allocation41_spill] sm:$0xff]  ;;  %v14606_v1 = vmax.f32 %v14605_v28, 0.0 }
 0x3fe   :  { %14595 = vst [vmem:[#allocation165_spill] sm:$0xff] %v10974_v60  ;;  %14598 = vst [vmem:[#allocation166_spill] sm:$0xff] %v10979_v34  ;;  %v10984_v39 = vpack.c.bf16 %v14600_v9, %v14600_v9  ;;  %v14603_v4 = vmax.f32 %v14602_v48, 0.0  ;;  %v14607_v60 = vld [vmem:[#allocation42_spill] sm:$0xff]  ;;  %v14609_v34 = vld [vmem:[#allocation43_spill] sm:$0xff] }
 0x3ff   :  { %v10994_v25 = vpack.c.bf16 %v14606_v1, %v14606_v1  ;;  %v14608_v62 = vmax.f32 %v14607_v60, 0.0  ;;  %v14610_v23 = vmax.f32 %v14609_v34, 0.0  ;;  %v14615_v60 = vmax.f32 %v14269_v19, 0.0 }
 0x400   :  { %14601 = vst [vmem:[#allocation167_spill] sm:$0xff] %v10984_v39  ;;  %v10989_v43 = vpack.c.bf16 %v14603_v4, %v14603_v4  ;;  %v14611_v39 = vld [vmem:[#allocation45_spill] sm:$0xff]  ;;  %v14616_v34 = vmax.f32 %v14270_v50, 0.0  ;;  %v14619_v19 = vmax.f32 %v14273_v27, 0.0  ;;  %v14620_v50 = vmax.f32 %v14274_v35, 0.0 }
 0x401   :  { %v10999_v37 = vpack.c.bf16 %v14608_v62, %v14608_v62  ;;  %v11004_v9 = vpack.c.bf16 %v14610_v23, %v14610_v23  ;;  %v14612_v48 = vmax.f32 %v14611_v39, 0.0  ;;  %v11019_v62 = vpack.c.bf16 %v14615_v60, %v14615_v60  ;;  %4534 = vst.msk [vmem:[%s12484_s3 + $0x178] sm:$0xf] %vm4439_vm4, %v10994_v25 }
 0x402   :  { %14604 = vst [vmem:[#allocation168_spill] sm:$0xff] %v10989_v43  ;;  %v14613_v43 = vld [vmem:[#allocation44_spill] sm:$0xff]  ;;  %v11024_v23 = vpack.c.bf16 %v14616_v34, %v14616_v34  ;;  %v14617_v39 = vmax.f32 %v14271_v33, 0.0  ;;  %v11039_v60 = vpack.c.bf16 %v14619_v19, %v14619_v19  ;;  %v11044_v34 = vpack.c.bf16 %v14620_v50, %v14620_v50 }
 0x403   :  { %v11009_v4 = vpack.c.bf16 %v14612_v48, %v14612_v48  ;;  %v14614_v28 = vmax.f32 %v14613_v43, 0.0  ;;  %v14618_v43 = vmax.f32 %v14272_v59, 0.0  ;;  %v14621_v33 = vmax.f32 %v14275_v54, 0.0  ;;  %4535 = vst.msk [vmem:[%s12484_s3 + $0x17c] sm:$0xf] %vm4439_vm4, %v10999_v37 }
 0x404   :  { %v11029_v48 = vpack.c.bf16 %v14617_v39, %v14617_v39  ;;  %v14623_v59 = vmax.f32 %v14276_v15, 0.0  ;;  %v14625_v27 = vmax.f32 %v14277_v0, 0.0  ;;  %v14627_v35 = vmax.f32 %v14278_v22, 0.0  ;;  %4536 = vst.msk [vmem:[%s12484_s3 + $0x180] sm:$0xf] %vm4439_vm4, %v11004_v9 }
 0x405   :  { %v11014_v1 = vpack.c.bf16 %v14614_v28, %v14614_v28  ;;  %v11034_v28 = vpack.c.bf16 %v14618_v43, %v14618_v43  ;;  %v11049_v39 = vpack.c.bf16 %v14621_v33, %v14621_v33  ;;  %v14629_v54 = vmax.f32 %v14279_v8, 0.0  ;;  %4537 = vst.msk [vmem:[%s12484_s3 + $0x184] sm:$0xf] %vm4439_vm4, %v11009_v4  ;;  %4539 = vst.msk [vmem:[%s12484_s3 + $0x18c] sm:$0xf] %vm4439_vm4, %v11019_v62 }
 0x406   :  { %v11054_v43 = vpack.c.bf16 %v14623_v59, %v14623_v59  ;;  %v11059_v19 = vpack.c.bf16 %v14625_v27, %v14625_v27  ;;  %v11064_v50 = vpack.c.bf16 %v14627_v35, %v14627_v35  ;;  %4540 = vst.msk [vmem:[%s12484_s3 + $0x190] sm:$0xf] %vm4439_vm4, %v11024_v23  ;;  %4541 = vst.msk [vmem:[%s12484_s3 + $0x194] sm:$0xf] %vm4439_vm4, %v11029_v48 }
 0x407   :  { %14622 = vst [vmem:[#allocation9_spill] sm:$0xff] %v11049_v39  ;;  %v11069_v33 = vpack.c.bf16 %v14629_v54, %v14629_v54  ;;  %v14631_v39 = vld [vmem:[#allocation56_spill] sm:$0xff]  ;;  %4538 = vst.msk [vmem:[%s12484_s3 + $0x188] sm:$0xf] %vm4439_vm4, %v11014_v1 }
 0x408   :  { %14624 = vst [vmem:[#allocation8_spill] sm:$0xff] %v11054_v43  ;;  %14626 = vst [vmem:[#allocation11_spill] sm:$0xff] %v11059_v19  ;;  %v14632_v15 = vmax.f32 %v14631_v39, 0.0  ;;  %v14634_v43 = vld [vmem:[#allocation58_spill] sm:$0xff]  ;;  %v14637_v19 = vld [vmem:[#allocation59_spill] sm:$0xff] }
 0x409   :  { %14628 = vst [vmem:[#allocation13_spill] sm:$0xff] %v11064_v50  ;;  %14630 = vst [vmem:[#allocation12_spill] sm:$0xff] %v11069_v33  ;;  %v14635_v0 = vmax.f32 %v14634_v43, 0.0  ;;  %v14638_v22 = vmax.f32 %v14637_v19, 0.0  ;;  %v14640_v50 = vld [vmem:[#allocation61_spill] sm:$0xff]  ;;  %v14643_v33 = vld [vmem:[#allocation60_spill] sm:$0xff] }
 0x40a   :  { %v11074_v59 = vpack.c.bf16 %v14632_v15, %v14632_v15  ;;  %v14641_v8 = vmax.f32 %v14640_v50, 0.0  ;;  %v14644_v39 = vmax.f32 %v14643_v33, 0.0  ;;  %4542 = vst.msk [vmem:[%s12484_s3 + $0x198] sm:$0xf] %vm4439_vm4, %v11034_v28  ;;  %4543 = vst.msk [vmem:[%s12484_s3 + $0x19c] sm:$0xf] %vm4439_vm4, %v11039_v60 }
 0x40b   :  { %v11079_v27 = vpack.c.bf16 %v14635_v0, %v14635_v0  ;;  %v11084_v35 = vpack.c.bf16 %v14638_v22, %v14638_v22  ;;  %4544 = vst.msk [vmem:[%s12484_s3 + $0x1a0] sm:$0xf] %vm4439_vm4, %v11044_v34 }
 0x40c   :  { %14633 = vst [vmem:[#allocation14_spill] sm:$0xff] %v11074_v59  ;;  %v11089_v54 = vpack.c.bf16 %v14641_v8, %v14641_v8  ;;  %v11094_v15 = vpack.c.bf16 %v14644_v39, %v14644_v39  ;;  %v14646_v59 = vld [vmem:[#allocation62_spill] sm:$0xff] }
 0x40d   :  { %14636 = vst [vmem:[#allocation15_spill] sm:$0xff] %v11079_v27  ;;  %14639 = vst [vmem:[#allocation17_spill] sm:$0xff] %v11084_v35  ;;  %v14647_v43 = vmax.f32 %v14646_v59, 0.0  ;;  %v14649_v27 = vld [vmem:[#allocation63_spill] sm:$0xff]  ;;  %v14652_v35 = vld [vmem:[#allocation65_spill] sm:$0xff] }
 0x40e   :  { %14642 = vst [vmem:[#allocation16_spill] sm:$0xff] %v11089_v54  ;;  %14645 = vst [vmem:[#allocation18_spill] sm:$0xff] %v11094_v15  ;;  %v14650_v19 = vmax.f32 %v14649_v27, 0.0  ;;  %v14653_v50 = vmax.f32 %v14652_v35, 0.0  ;;  %v14655_v54 = vld [vmem:[#allocation64_spill] sm:$0xff]  ;;  %v14657_v15 = vld [vmem:[#allocation66_spill] sm:$0xff] }
 0x40f   :  { %v11099_v0 = vpack.c.bf16 %v14647_v43, %v14647_v43  ;;  %v14656_v33 = vmax.f32 %v14655_v54, 0.0  ;;  %v14658_v59 = vmax.f32 %v14657_v15, 0.0  ;;  %v14668_v15 = vmax.f32 %v14282_v58, 0.0  ;;  %v14898_v25 = vld [vmem:[#allocation9_spill] sm:$0xff]  ;;  %v14899_v37 = vld [vmem:[#allocation8_spill] sm:$0xff]  ;;  %v14900_v9 = vld [vmem:[#allocation11_spill] sm:$0xff] }
 0x410   :  { %v11104_v22 = vpack.c.bf16 %v14650_v19, %v14650_v19  ;;  %v11109_v8 = vpack.c.bf16 %v14653_v50, %v14653_v50  ;;  %v14678_v58 = vmax.f32 %v14286_v40, 0.0  ;;  %v14687_v40 = vmax.f32 %v14290_v13, 0.0  ;;  %4545 = vst.msk [vmem:[%s12484_s3 + $0x1a4] sm:$0xf] %vm4439_vm4, %v14898_v25  ;;  %4546 = vst.msk [vmem:[%s12484_s3 + $0x1a8] sm:$0xf] %vm4439_vm4, %v14899_v37 }
 0x411   :  { %14648 = vst [vmem:[#allocation19_spill] sm:$0xff] %v11099_v0  ;;  %v11114_v39 = vpack.c.bf16 %v14656_v33, %v14656_v33  ;;  %v11119_v43 = vpack.c.bf16 %v14658_v59, %v14658_v59  ;;  %v14660_v0 = vld [vmem:[#allocation67_spill] sm:$0xff]  ;;  %v11139_v59 = vpack.c.bf16 %v14668_v15, %v14668_v15  ;;  %v14694_v13 = vmax.f32 %v14293_v36, 0.0  ;;  %4547 = vst.msk [vmem:[%s12484_s3 + $0x1ac] sm:$0xf] %vm4439_vm4, %v14900_v9  ;;  %v14901_v4 = vld [vmem:[#allocation13_spill] sm:$0xff] }
 0x412   :  { %14651 = vst [vmem:[#allocation21_spill] sm:$0xff] %v11104_v22  ;;  %14654 = vst [vmem:[#allocation20_spill] sm:$0xff] %v11109_v8  ;;  %v14661_v27 = vmax.f32 %v14660_v0, 0.0  ;;  %v14663_v22 = vld [vmem:[#allocation69_spill] sm:$0xff]  ;;  %v14666_v8 = vld [vmem:[#allocation68_spill] sm:$0xff]  ;;  %v11159_v15 = vpack.c.bf16 %v14678_v58, %v14678_v58  ;;  %v11179_v58 = vpack.c.bf16 %v14687_v40, %v14687_v40  ;;  %v14699_v36 = vmax.f32 %v14296_v10, 0.0 }
 0x413   :  { %14659 = vst [vmem:[#allocation22_spill] sm:$0xff] %v11119_v43  ;;  %v14664_v35 = vmax.f32 %v14663_v22, 0.0  ;;  %v14667_v54 = vmax.f32 %v14666_v8, 0.0  ;;  %14669 = vst [vmem:[#allocation24_spill] sm:$0xff] %v11139_v59  ;;  %v14670_v43 = vld [vmem:[#allocation71_spill] sm:$0xff]  ;;  %v11199_v40 = vpack.c.bf16 %v14694_v13, %v14694_v13  ;;  %v14703_v10 = vmax.f32 %v10115_v46, 0.0 }
 0x414   :  { %v11124_v19 = vpack.c.bf16 %v14661_v27, %v14661_v27  ;;  %v14671_v0 = vmax.f32 %v14670_v43, 0.0  ;;  %v14679_v59 = vld [vmem:[#allocation75_spill] sm:$0xff]  ;;  %v11219_v13 = vpack.c.bf16 %v14699_v36, %v14699_v36  ;;  %v14707_v46 = vmax.f32 %v10131_v38, 0.0  ;;  %4548 = vst.msk [vmem:[%s12484_s3 + $0x1b0] sm:$0xf] %vm4439_vm4, %v14901_v4  ;;  %v14902_v1 = vld [vmem:[#allocation12_spill] sm:$0xff] }
 0x415   :  { %v11129_v50 = vpack.c.bf16 %v14664_v35, %v14664_v35  ;;  %v11134_v33 = vpack.c.bf16 %v14667_v54, %v14667_v54  ;;  %v14680_v43 = vmax.f32 %v14679_v59, 0.0  ;;  %v14688_v59 = vmax.f32 %v14291_v51, 0.0  ;;  %4549 = vst.msk [vmem:[%s12484_s3 + $0x1b4] sm:$0xf] %vm4439_vm4, %v14902_v1  ;;  %v14903_v62 = vld [vmem:[#allocation14_spill] sm:$0xff]  ;;  %v14904_v23 = vld [vmem:[#allocation15_spill] sm:$0xff] }
 0x416   :  { %14662 = vst [vmem:[#allocation23_spill] sm:$0xff] %v11124_v19  ;;  %v11144_v27 = vpack.c.bf16 %v14671_v0, %v14671_v0  ;;  %v14673_v19 = vld [vmem:[#allocation73_spill] sm:$0xff]  ;;  %v14695_v51 = vmax.f32 %v14294_v61, 0.0  ;;  %v14700_v61 = vmax.f32 %v14297_v17, 0.0  ;;  %v11239_v36 = vpack.c.bf16 %v14703_v10, %v14703_v10  ;;  %4550 = vst.msk [vmem:[%s12484_s3 + $0x1b8] sm:$0xf] %vm4439_vm4, %v14903_v62 }
 0x417   :  { %14665 = vst [vmem:[#allocation25_spill] sm:$0xff] %v11129_v50  ;;  %v14674_v22 = vmax.f32 %v14673_v19, 0.0  ;;  %v14676_v50 = vld [vmem:[#allocation72_spill] sm:$0xff]  ;;  %v11164_v0 = vpack.c.bf16 %v14680_v43, %v14680_v43  ;;  %v11184_v43 = vpack.c.bf16 %v14688_v59, %v14688_v59  ;;  %v14704_v17 = vmax.f32 %v14299_v2, 0.0  ;;  %4551 = vst.msk [vmem:[%s12484_s3 + $0x1bc] sm:$0xf] %vm4439_vm4, %v14904_v23 }
 0x418   :  { %14672 = vst [vmem:[#allocation26_spill] sm:$0xff] %v11144_v27  ;;  %v14677_v8 = vmax.f32 %v14676_v50, 0.0  ;;  %v14682_v27 = vld [vmem:[#allocation77_spill] sm:$0xff]  ;;  %v11204_v59 = vpack.c.bf16 %v14695_v51, %v14695_v51  ;;  %v11224_v51 = vpack.c.bf16 %v14700_v61, %v14700_v61  ;;  %v11259_v10 = vpack.c.bf16 %v14707_v46, %v14707_v46  ;;  %v14906_v28 = vld [vmem:[#allocation16_spill] sm:$0xff]  ;;  %v14907_v60 = vld [vmem:[#allocation18_spill] sm:$0xff] }
 0x419   :  { %v11149_v35 = vpack.c.bf16 %v14674_v22, %v14674_v22  ;;  %14681 = vst [vmem:[#allocation29_spill] sm:$0xff] %v11164_v0  ;;  %v14683_v19 = vmax.f32 %v14682_v27, 0.0  ;;  %v14689_v0 = vld [vmem:[#allocation82_spill] sm:$0xff]  ;;  %v11244_v61 = vpack.c.bf16 %v14704_v17, %v14704_v17  ;;  %v14708_v2 = vmax.f32 %v10135_v29, 0.0  ;;  %v14905_v48 = vld [vmem:[#allocation17_spill] sm:$0xff]  ;;  %v14908_v34 = vld [vmem:[#allocation19_spill] sm:$0xff] }
 0x41a   :  { %v11154_v54 = vpack.c.bf16 %v14677_v8, %v14677_v8  ;;  %v14690_v27 = vmax.f32 %v14689_v0, 0.0  ;;  %v14696_v0 = vmax.f32 %v14295_v45, 0.0  ;;  %v14701_v45 = vmax.f32 %v14298_v52, 0.0  ;;  %4552 = vst.msk [vmem:[%s12484_s3 + $0x1c0] sm:$0xf] %vm4439_vm4, %v14905_v48 }
 0x41b   :  { %14675 = vst [vmem:[#allocation27_spill] sm:$0xff] %v11149_v35  ;;  %v11169_v22 = vpack.c.bf16 %v14683_v19, %v14683_v19  ;;  %v14685_v35 = vld [vmem:[#allocation76_spill] sm:$0xff]  ;;  %v14705_v52 = vmax.f32 %v14300_v32, 0.0  ;;  %v11264_v17 = vpack.c.bf16 %v14708_v2, %v14708_v2  ;;  %v14709_v32 = vmax.f32 %v14301_v5, 0.0  ;;  %4553 = vst.msk [vmem:[%s12484_s3 + $0x1c4] sm:$0xf] %vm4439_vm4, %v14906_v28 }
 0x41c   :  { %v14686_v50 = vmax.f32 %v14685_v35, 0.0  ;;  %v11189_v19 = vpack.c.bf16 %v14690_v27, %v14690_v27  ;;  %v11209_v27 = vpack.c.bf16 %v14696_v0, %v14696_v0  ;;  %v11229_v0 = vpack.c.bf16 %v14701_v45, %v14701_v45  ;;  %4554 = vst.msk [vmem:[%s12484_s3 + $0x1c8] sm:$0xf] %vm4439_vm4, %v14907_v60  ;;  %4555 = vst.msk [vmem:[%s12484_s3 + $0x1cc] sm:$0xf] %vm4439_vm4, %v14908_v34 }
 0x41d   :  { %14684 = vst [vmem:[#allocation28_spill] sm:$0xff] %v11169_v22  ;;  %v14692_v22 = vld [vmem:[#allocation81_spill] sm:$0xff]  ;;  %v11249_v45 = vpack.c.bf16 %v14705_v52, %v14705_v52  ;;  %v11269_v52 = vpack.c.bf16 %v14709_v32, %v14709_v32  ;;  %v14711_v38 = vmax.f32 %v10147_v30, 0.0  ;;  %v14712_v29 = vmax.f32 %v10151_v12, 0.0  ;;  %4558 = vst.msk [vmem:[%s12484_s3 + $0x1d8] sm:$0xf] %vm4439_vm4, %v11114_v39 }
 0x41e   :  { %v11174_v8 = vpack.c.bf16 %v14686_v50, %v14686_v50  ;;  %14691 = vst [vmem:[#allocation30_spill] sm:$0xff] %v11189_v19  ;;  %v14693_v35 = vmax.f32 %v14692_v22, 0.0  ;;  %v14697_v19 = vld [vmem:[#allocation89_spill] sm:$0xff]  ;;  %v14713_v5 = vmax.f32 %v10155_v26, 0.0  ;;  %v14715_v30 = vmax.f32 %v10163_v47, 0.0  ;;  %v14914_v39 = vld [vmem:[#allocation24_spill] sm:$0xff] }
 0x41f   :  { %v14698_v22 = vmax.f32 %v14697_v19, 0.0  ;;  %v14702_v19 = vmax.f32 %v10111_v20, 0.0  ;;  %v14706_v20 = vmax.f32 %v10127_v57, 0.0  ;;  %v14710_v57 = vmax.f32 %v10143_v6, 0.0  ;;  %4562 = vst.msk [vmem:[%s12484_s3 + $0x1e8] sm:$0xf] %vm4439_vm4, %v11134_v33 }
 0x420   :  { %v11194_v50 = vpack.c.bf16 %v14693_v35, %v14693_v35  ;;  %v11279_v46 = vpack.c.bf16 %v14711_v38, %v14711_v38  ;;  %v11284_v2 = vpack.c.bf16 %v14712_v29, %v14712_v29  ;;  %v11289_v32 = vpack.c.bf16 %v14713_v5, %v14713_v5  ;;  %4563 = vst.msk [vmem:[%s12484_s3 + $0x1ec] sm:$0xf] %vm4439_vm4, %v14914_v39  ;;  %v14917_v33 = vld [vmem:[#allocation29_spill] sm:$0xff] }
 0x421   :  { %v11214_v35 = vpack.c.bf16 %v14698_v22, %v14698_v22  ;;  %v11234_v22 = vpack.c.bf16 %v14702_v19, %v14702_v19  ;;  %v11254_v19 = vpack.c.bf16 %v14706_v20, %v14706_v20  ;;  %v11274_v20 = vpack.c.bf16 %v14710_v57, %v14710_v57  ;;  %4566 = vst.msk [vmem:[%s12484_s3 + $0x1f8] sm:$0xf] %vm4439_vm4, %v11154_v54 }
 0x422   :  { %v14714_v6 = vmax.f32 %v10159_v7, 0.0  ;;  %v11299_v38 = vpack.c.bf16 %v14715_v30, %v14715_v30  ;;  %v14716_v12 = vmax.f32 %v10167_v16, 0.0  ;;  %v14717_v26 = vmax.f32 %v10171_v18, 0.0  ;;  %4567 = vst.msk [vmem:[%s12484_s3 + $0x1fc] sm:$0xf] %vm4439_vm4, %v11159_v15 }
 0x423   :  { %v14718_v7 = vmax.f32 %v10175_v44, 0.0  ;;  %v14719_v47 = vmax.f32 %v10179_v56, 0.0  ;;  %v14721_v16 = vmax.f32 %v10183_v53, 0.0  ;;  %v14723_v18 = vmax.f32 %v10187_v41, 0.0  ;;  %4568 = vst.msk [vmem:[%s12484_s3 + $0x200] sm:$0xf] %vm4439_vm4, %v14917_v33 }
 0x424   :  { %v11294_v57 = vpack.c.bf16 %v14714_v6, %v14714_v6  ;;  %v11304_v29 = vpack.c.bf16 %v14716_v12, %v14716_v12  ;;  %v11309_v5 = vpack.c.bf16 %v14717_v26, %v14717_v26  ;;  %v14725_v44 = vmax.f32 %v10191_v63, 0.0  ;;  %4570 = vst.msk [vmem:[%s12484_s3 + $0x208] sm:$0xf] %vm4439_vm4, %v11174_v8  ;;  %4571 = vst.msk [vmem:[%s12484_s3 + $0x20c] sm:$0xf] %vm4439_vm4, %v11179_v58 }
 0x425   :  { %v11314_v6 = vpack.c.bf16 %v14718_v7, %v14718_v7  ;;  %v11319_v30 = vpack.c.bf16 %v14719_v47, %v14719_v47  ;;  %v11324_v12 = vpack.c.bf16 %v14721_v16, %v14721_v16  ;;  %v11329_v26 = vpack.c.bf16 %v14723_v18, %v14723_v18  ;;  %4572 = vst.msk [vmem:[%s12484_s3 + $0x210] sm:$0xf] %vm4439_vm4, %v11184_v43  ;;  %v14919_v54 = vld [vmem:[#allocation30_spill] sm:$0xff] }
 0x426   :  { %v11334_v7 = vpack.c.bf16 %v14725_v44, %v14725_v44  ;;  %v14727_v56 = vmax.f32 %v10195_v42, 0.0  ;;  %4573 = vst.msk [vmem:[%s12484_s3 + $0x214] sm:$0xf] %vm4439_vm4, %v14919_v54  ;;  %4574 = vst.msk [vmem:[%s12484_s3 + $0x218] sm:$0xf] %vm4439_vm4, %v11194_v50 }
 0x427   :  { %14720 = vst [vmem:[#allocation31_spill] sm:$0xff] %v11319_v30  ;;  %14722 = vst [vmem:[#allocation33_spill] sm:$0xff] %v11324_v12  ;;  %v14729_v30 = vld [vmem:[#allocation106_spill] sm:$0xff]  ;;  %v14732_v12 = vld [vmem:[#allocation105_spill] sm:$0xff] }
 0x428   :  { %14724 = vst [vmem:[#allocation32_spill] sm:$0xff] %v11329_v26  ;;  %14726 = vst [vmem:[#allocation34_spill] sm:$0xff] %v11334_v7  ;;  %v11339_v47 = vpack.c.bf16 %v14727_v56, %v14727_v56  ;;  %v14730_v53 = vmax.f32 %v14729_v30, 0.0  ;;  %v14733_v41 = vmax.f32 %v14732_v12, 0.0  ;;  %v14735_v26 = vld [vmem:[#allocation107_spill] sm:$0xff] }
 0x429   :  { %v14736_v63 = vmax.f32 %v14735_v26, 0.0  ;;  %v14738_v7 = vld [vmem:[#allocation111_spill] sm:$0xff]  ;;  %4575 = vst.msk [vmem:[%s12484_s3 + $0x21c] sm:$0xf] %vm4439_vm4, %v11199_v40  ;;  %4576 = vst.msk [vmem:[%s12484_s3 + $0x220] sm:$0xf] %vm4439_vm4, %v11204_v59 }
 0x42a   :  { %14728 = vst [vmem:[#allocation35_spill] sm:$0xff] %v11339_v47  ;;  %v11344_v16 = vpack.c.bf16 %v14730_v53, %v14730_v53  ;;  %v11349_v18 = vpack.c.bf16 %v14733_v41, %v14733_v41  ;;  %v14739_v42 = vmax.f32 %v14738_v7, 0.0  ;;  %v14741_v47 = vld [vmem:[#allocation113_spill] sm:$0xff]  ;;  %4577 = vst.msk [vmem:[%s12484_s3 + $0x224] sm:$0xf] %vm4439_vm4, %v11209_v27 }
 0x42b   :  { %v11354_v44 = vpack.c.bf16 %v14736_v63, %v14736_v63  ;;  %v14742_v30 = vmax.f32 %v14741_v47, 0.0  ;;  %4578 = vst.msk [vmem:[%s12484_s3 + $0x228] sm:$0xf] %vm4439_vm4, %v11214_v35  ;;  %4579 = vst.msk [vmem:[%s12484_s3 + $0x22c] sm:$0xf] %vm4439_vm4, %v11219_v13 }
 0x42c   :  { %14731 = vst [vmem:[#allocation37_spill] sm:$0xff] %v11344_v16  ;;  %14734 = vst [vmem:[#allocation36_spill] sm:$0xff] %v11349_v18  ;;  %v11359_v56 = vpack.c.bf16 %v14739_v42, %v14739_v42  ;;  %v14744_v16 = vld [vmem:[#allocation112_spill] sm:$0xff]  ;;  %v14747_v18 = vld [vmem:[#allocation114_spill] sm:$0xff] }
 0x42d   :  { %14737 = vst [vmem:[#allocation38_spill] sm:$0xff] %v11354_v44  ;;  %v11364_v53 = vpack.c.bf16 %v14742_v30, %v14742_v30  ;;  %v14745_v12 = vmax.f32 %v14744_v16, 0.0  ;;  %v14748_v26 = vmax.f32 %v14747_v18, 0.0  ;;  %v14750_v44 = vld [vmem:[#allocation118_spill] sm:$0xff]  ;;  %4580 = vst.msk [vmem:[%s12484_s3 + $0x230] sm:$0xf] %vm4439_vm4, %v11224_v51 }
 0x42e   :  { %14740 = vst [vmem:[#allocation39_spill] sm:$0xff] %v11359_v56  ;;  %v14751_v7 = vmax.f32 %v14750_v44, 0.0  ;;  %v14753_v56 = vld [vmem:[#allocation121_spill] sm:$0xff]  ;;  %4581 = vst.msk [vmem:[%s12484_s3 + $0x234] sm:$0xf] %vm4439_vm4, %v11229_v0  ;;  %v14920_v15 = vld [vmem:[#allocation31_spill] sm:$0xff] }
 0x42f   :  { %14743 = vst [vmem:[#allocation41_spill] sm:$0xff] %v11364_v53  ;;  %v11369_v41 = vpack.c.bf16 %v14745_v12, %v14745_v12  ;;  %v11374_v63 = vpack.c.bf16 %v14748_v26, %v14748_v26  ;;  %v14754_v47 = vmax.f32 %v14753_v56, 0.0  ;;  %v14756_v53 = vld [vmem:[#allocation119_spill] sm:$0xff]  ;;  %4582 = vst.msk [vmem:[%s12484_s3 + $0x238] sm:$0xf] %vm4439_vm4, %v11234_v22  ;;  %v14921_v8 = vld [vmem:[#allocation33_spill] sm:$0xff] }
 0x430   :  { %v11379_v42 = vpack.c.bf16 %v14751_v7, %v14751_v7  ;;  %v14757_v16 = vmax.f32 %v14756_v53, 0.0  ;;  %4583 = vst.msk [vmem:[%s12484_s3 + $0x23c] sm:$0xf] %vm4439_vm4, %v11239_v36  ;;  %4584 = vst.msk [vmem:[%s12484_s3 + $0x240] sm:$0xf] %vm4439_vm4, %v11244_v61  ;;  %v14922_v58 = vld [vmem:[#allocation32_spill] sm:$0xff] }
 0x431   :  { %14746 = vst [vmem:[#allocation40_spill] sm:$0xff] %v11369_v41  ;;  %14749 = vst [vmem:[#allocation42_spill] sm:$0xff] %v11374_v63  ;;  %v11384_v30 = vpack.c.bf16 %v14754_v47, %v14754_v47  ;;  %v14759_v41 = vld [vmem:[#allocation122_spill] sm:$0xff]  ;;  %v14762_v63 = vld [vmem:[#allocation120_spill] sm:$0xff] }
 0x432   :  { %14752 = vst [vmem:[#allocation43_spill] sm:$0xff] %v11379_v42  ;;  %v11389_v12 = vpack.c.bf16 %v14757_v16, %v14757_v16  ;;  %v14760_v18 = vmax.f32 %v14759_v41, 0.0  ;;  %v14763_v44 = vmax.f32 %v14762_v63, 0.0  ;;  %v14765_v42 = vld [vmem:[#allocation125_spill] sm:$0xff]  ;;  %4585 = vst.msk [vmem:[%s12484_s3 + $0x244] sm:$0xf] %vm4439_vm4, %v11249_v45 }
 0x433   :  { %14755 = vst [vmem:[#allocation45_spill] sm:$0xff] %v11384_v30  ;;  %v14766_v56 = vmax.f32 %v14765_v42, 0.0  ;;  %v14768_v30 = vld [vmem:[#allocation126_spill] sm:$0xff]  ;;  %4586 = vst.msk [vmem:[%s12484_s3 + $0x248] sm:$0xf] %vm4439_vm4, %v11254_v19  ;;  %v14924_v50 = vld [vmem:[#allocation35_spill] sm:$0xff] }
 0x434   :  { %14758 = vst [vmem:[#allocation44_spill] sm:$0xff] %v11389_v12  ;;  %v11394_v26 = vpack.c.bf16 %v14760_v18, %v14760_v18  ;;  %v11399_v7 = vpack.c.bf16 %v14763_v44, %v14763_v44  ;;  %v14769_v53 = vmax.f32 %v14768_v30, 0.0  ;;  %v14771_v12 = vld [vmem:[#allocation127_spill] sm:$0xff]  ;;  %4587 = vst.msk [vmem:[%s12484_s3 + $0x24c] sm:$0xf] %vm4439_vm4, %v11259_v10  ;;  %v14923_v43 = vld [vmem:[#allocation34_spill] sm:$0xff] }
 0x435   :  { %v11404_v47 = vpack.c.bf16 %v14766_v56, %v14766_v56  ;;  %v14772_v41 = vmax.f32 %v14771_v12, 0.0  ;;  %4588 = vst.msk [vmem:[%s12484_s3 + $0x250] sm:$0xf] %vm4439_vm4, %v11264_v17  ;;  %4589 = vst.msk [vmem:[%s12484_s3 + $0x254] sm:$0xf] %vm4439_vm4, %v11269_v52  ;;  %v14925_v40 = vld [vmem:[#allocation37_spill] sm:$0xff] }
 0x436   :  { %14761 = vst [vmem:[#allocation56_spill] sm:$0xff] %v11394_v26  ;;  %14764 = vst [vmem:[#allocation58_spill] sm:$0xff] %v11399_v7  ;;  %v11409_v16 = vpack.c.bf16 %v14769_v53, %v14769_v53  ;;  %v14774_v26 = vld [vmem:[#allocation128_spill] sm:$0xff]  ;;  %v14777_v7 = vld [vmem:[#allocation130_spill] sm:$0xff] }
 0x437   :  { %14767 = vst [vmem:[#allocation59_spill] sm:$0xff] %v11404_v47  ;;  %v11414_v18 = vpack.c.bf16 %v14772_v41, %v14772_v41  ;;  %v14775_v63 = vmax.f32 %v14774_v26, 0.0  ;;  %v14778_v42 = vmax.f32 %v14777_v7, 0.0  ;;  %v14780_v47 = vld [vmem:[#allocation131_spill] sm:$0xff]  ;;  %4590 = vst.msk [vmem:[%s12484_s3 + $0x258] sm:$0xf] %vm4439_vm4, %v11274_v20 }
 0x438   :  { %14770 = vst [vmem:[#allocation61_spill] sm:$0xff] %v11409_v16  ;;  %v14781_v30 = vmax.f32 %v14780_v47, 0.0  ;;  %v14782_v16 = vld [vmem:[#allocation132_spill] sm:$0xff]  ;;  %4591 = vst.msk [vmem:[%s12484_s3 + $0x25c] sm:$0xf] %vm4439_vm4, %v11279_v46  ;;  %v14927_v27 = vld [vmem:[#allocation38_spill] sm:$0xff] }
 0x439   :  { %14773 = vst [vmem:[#allocation60_spill] sm:$0xff] %v11414_v18  ;;  %v11419_v44 = vpack.c.bf16 %v14775_v63, %v14775_v63  ;;  %v11424_v56 = vpack.c.bf16 %v14778_v42, %v14778_v42  ;;  %v14783_v12 = vmax.f32 %v14782_v16, 0.0  ;;  %v14784_v18 = vld [vmem:[#allocation133_spill] sm:$0xff]  ;;  %v14791_v16 = vmax.f32 %v14313_v21, 0.0  ;;  %4592 = vst.msk [vmem:[%s12484_s3 + $0x260] sm:$0xf] %vm4439_vm4, %v11284_v2 }
 0x43a   :  { %v11429_v53 = vpack.c.bf16 %v14781_v30, %v14781_v30  ;;  %v14785_v26 = vmax.f32 %v14784_v18, 0.0  ;;  %v14792_v18 = vmax.f32 %v14314_v55, 0.0  ;;  %v14797_v21 = vmax.f32 %v14317_v49, 0.0  ;;  %4593 = vst.msk [vmem:[%s12484_s3 + $0x264] sm:$0xf] %vm4439_vm4, %v11289_v32  ;;  %v14926_v59 = vld [vmem:[#allocation36_spill] sm:$0xff] }
 0x43b   :  { %14776 = vst [vmem:[#allocation62_spill] sm:$0xff] %v11419_v44  ;;  %14779 = vst [vmem:[#allocation63_spill] sm:$0xff] %v11424_v56  ;;  %v11434_v41 = vpack.c.bf16 %v14783_v12, %v14783_v12  ;;  %v14787_v44 = vld [vmem:[#allocation134_spill] sm:$0xff]  ;;  %v14789_v56 = vld [vmem:[#allocation135_spill] sm:$0xff]  ;;  %v11454_v12 = vpack.c.bf16 %v14791_v16, %v14791_v16  ;;  %v14798_v55 = vmax.f32 %v14318_v24, 0.0  ;;  %v14802_v49 = vmax.f32 %v14321_v11, 0.0 }
 0x43c   :  { %v11439_v63 = vpack.c.bf16 %v14785_v26, %v14785_v26  ;;  %v14788_v7 = vmax.f32 %v14787_v44, 0.0  ;;  %v14790_v47 = vmax.f32 %v14789_v56, 0.0  ;;  %v11459_v26 = vpack.c.bf16 %v14792_v18, %v14792_v18  ;;  %v14806_v11 = vld [vmem:[#allocation49_spill] sm:$0xff]  ;;  %4594 = vst.msk [vmem:[%s12484_s3 + $0x268] sm:$0xf] %vm4439_vm4, %v11294_v57  ;;  %v14928_v35 = vld [vmem:[#allocation39_spill] sm:$0xff] }
 0x43d   :  { %v14796_v56 = vmax.f32 %v14316_v3, 0.0  ;;  %v11474_v16 = vpack.c.bf16 %v14797_v21, %v14797_v21  ;;  %v11479_v18 = vpack.c.bf16 %v14798_v55, %v14798_v55  ;;  %v11494_v21 = vpack.c.bf16 %v14802_v49, %v14802_v49  ;;  %4442 = vst.msk [vmem:[%s12484_s3 + $0x8] sm:$0xf] %vm4439_vm4, %v14806_v11  ;;  %v14810_v49 = vld [vmem:[#allocation53_spill] sm:$0xff]  ;;  %4595 = vst.msk [vmem:[%s12484_s3 + $0x26c] sm:$0xf] %vm4439_vm4, %v11299_v38 }
 0x43e   :  { %14786 = vst [vmem:[#allocation65_spill] sm:$0xff] %v11439_v63  ;;  %v11444_v42 = vpack.c.bf16 %v14788_v7, %v14788_v7  ;;  %v11449_v30 = vpack.c.bf16 %v14790_v47, %v14790_v47  ;;  %v14793_v63 = vld [vmem:[#allocation138_spill] sm:$0xff]  ;;  %v14803_v24 = vmax.f32 %v14322_v14, 0.0  ;;  %v14807_v14 = vld [vmem:[#allocation48_spill] sm:$0xff]  ;;  %4446 = vst.msk [vmem:[%s12484_s3 + $0x18] sm:$0xf] %vm4439_vm4, %v14810_v49 }
 0x43f   :  { %v14794_v44 = vmax.f32 %v14793_v63, 0.0  ;;  %v11469_v47 = vpack.c.bf16 %v14796_v56, %v14796_v56  ;;  %v14799_v63 = vmax.f32 %v14319_v31, 0.0  ;;  %v14804_v31 = vld [vmem:[#allocation46_spill] sm:$0xff]  ;;  %4443 = vst.msk [vmem:[%s12484_s3 + $0xc] sm:$0xf] %vm4439_vm4, %v14807_v14  ;;  %v14814_v11 = vld [vmem:[#allocation57_spill] sm:$0xff] }
 0x440   :  { %v11499_v55 = vpack.c.bf16 %v14803_v24, %v14803_v24  ;;  %4440 = vst.msk [vmem:[%s12484_s3] sm:$0xf] %vm4439_vm4, %v14804_v31  ;;  %v14811_v24 = vld [vmem:[#allocation52_spill] sm:$0xff]  ;;  %v14812_v31 = vld [vmem:[#allocation54_spill] sm:$0xff]  ;;  %4450 = vst.msk [vmem:[%s12484_s3 + $0x28] sm:$0xf] %vm4439_vm4, %v14814_v11 }
 0x441   :  { %v11464_v7 = vpack.c.bf16 %v14794_v44, %v14794_v44  ;;  %v11484_v44 = vpack.c.bf16 %v14799_v63, %v14799_v63  ;;  %v14808_v63 = vld [vmem:[#allocation50_spill] sm:$0xff]  ;;  %4447 = vst.msk [vmem:[%s12484_s3 + $0x1c] sm:$0xf] %vm4439_vm4, %v14811_v24  ;;  %4448 = vst.msk [vmem:[%s12484_s3 + $0x20] sm:$0xf] %vm4439_vm4, %v14812_v31  ;;  %v14818_v49 = vld [vmem:[#allocation80_spill] sm:$0xff] }
 0x442   :  { %4444 = vst.msk [vmem:[%s12484_s3 + $0x10] sm:$0xf] %vm4439_vm4, %v14808_v63  ;;  %v14815_v14 = vld [vmem:[#allocation70_spill] sm:$0xff]  ;;  %4454 = vst.msk [vmem:[%s12484_s3 + $0x38] sm:$0xf] %vm4439_vm4, %v14818_v49  ;;  %v14819_v24 = vld [vmem:[#allocation83_spill] sm:$0xff] }
 0x443   :  { %14795 = vst [vmem:[#allocation64_spill] sm:$0xff] %v11464_v7  ;;  %v14800_v7 = vld [vmem:[#allocation176_spill] sm:$0xff]  ;;  %4451 = vst.msk [vmem:[%s12484_s3 + $0x2c] sm:$0xf] %vm4439_vm4, %v14815_v14  ;;  %v14816_v63 = vld [vmem:[#allocation74_spill] sm:$0xff] }
 0x444   :  { %v14801_v3 = vmax.f32 %v14800_v7, 0.0  ;;  %v14805_v7 = vld [vmem:[#allocation47_spill] sm:$0xff]  ;;  %4452 = vst.msk [vmem:[%s12484_s3 + $0x30] sm:$0xf] %vm4439_vm4, %v14816_v63  ;;  %4455 = vst.msk [vmem:[%s12484_s3 + $0x3c] sm:$0xf] %vm4439_vm4, %v14819_v24 }
 0x445   :  { %4441 = vst.msk [vmem:[%s12484_s3 + $0x4] sm:$0xf] %vm4439_vm4, %v14805_v7  ;;  %v14813_v7 = vld [vmem:[#allocation55_spill] sm:$0xff]  ;;  %v14820_v31 = vld [vmem:[#allocation88_spill] sm:$0xff]  ;;  %v14824_v63 = vld [vmem:[#allocation98_spill] sm:$0xff] }
 0x446   :  { %v11489_v56 = vpack.c.bf16 %v14801_v3, %v14801_v3  ;;  %v14809_v3 = vld [vmem:[#allocation51_spill] sm:$0xff]  ;;  %4449 = vst.msk [vmem:[%s12484_s3 + $0x24] sm:$0xf] %vm4439_vm4, %v14813_v7  ;;  %4456 = vst.msk [vmem:[%s12484_s3 + $0x40] sm:$0xf] %vm4439_vm4, %v14820_v31  ;;  %v14821_v7 = vld [vmem:[#allocation90_spill] sm:$0xff] }
 0x447   :  { %4445 = vst.msk [vmem:[%s12484_s3 + $0x14] sm:$0xf] %vm4439_vm4, %v14809_v3  ;;  %v14817_v3 = vld [vmem:[#allocation78_spill] sm:$0xff]  ;;  %4457 = vst.msk [vmem:[%s12484_s3 + $0x44] sm:$0xf] %vm4439_vm4, %v14821_v7  ;;  %v14822_v11 = vld [vmem:[#allocation91_spill] sm:$0xff] }
 0x448   :  { %4453 = vst.msk [vmem:[%s12484_s3 + $0x34] sm:$0xf] %vm4439_vm4, %v14817_v3  ;;  %4458 = vst.msk [vmem:[%s12484_s3 + $0x48] sm:$0xf] %vm4439_vm4, %v14822_v11  ;;  %v14823_v14 = vld [vmem:[#allocation96_spill] sm:$0xff]  ;;  %v14825_v3 = vld [vmem:[#allocation97_spill] sm:$0xff] }
 0x449   :  { %4459 = vst.msk [vmem:[%s12484_s3 + $0x4c] sm:$0xf] %vm4439_vm4, %v14823_v14  ;;  %4460 = vst.msk [vmem:[%s12484_s3 + $0x50] sm:$0xf] %vm4439_vm4, %v14824_v63  ;;  %v14826_v49 = vld [vmem:[#allocation99_spill] sm:$0xff]  ;;  %v14827_v24 = vld [vmem:[#allocation104_spill] sm:$0xff] }
 0x44a   :  { %4461 = vst.msk [vmem:[%s12484_s3 + $0x54] sm:$0xf] %vm4439_vm4, %v14825_v3  ;;  %4462 = vst.msk [vmem:[%s12484_s3 + $0x58] sm:$0xf] %vm4439_vm4, %v14826_v49  ;;  %v14828_v31 = vld [vmem:[#allocation136_spill] sm:$0xff]  ;;  %v14829_v7 = vld [vmem:[#allocation137_spill] sm:$0xff] }
 0x44b   :  { %4463 = vst.msk [vmem:[%s12484_s3 + $0x5c] sm:$0xf] %vm4439_vm4, %v14827_v24  ;;  %4464 = vst.msk [vmem:[%s12484_s3 + $0x60] sm:$0xf] %vm4439_vm4, %v14828_v31  ;;  %v14830_v11 = vld [vmem:[#allocation139_spill] sm:$0xff]  ;;  %v14831_v14 = vld [vmem:[#allocation140_spill] sm:$0xff] }
 0x44c   :  { %4465 = vst.msk [vmem:[%s12484_s3 + $0x64] sm:$0xf] %vm4439_vm4, %v14829_v7  ;;  %4466 = vst.msk [vmem:[%s12484_s3 + $0x68] sm:$0xf] %vm4439_vm4, %v14830_v11  ;;  %v14832_v63 = vld [vmem:[#allocation141_spill] sm:$0xff]  ;;  %v14833_v3 = vld [vmem:[#allocation142_spill] sm:$0xff] }
 0x44d   :  { %4467 = vst.msk [vmem:[%s12484_s3 + $0x6c] sm:$0xf] %vm4439_vm4, %v14831_v14  ;;  %4468 = vst.msk [vmem:[%s12484_s3 + $0x70] sm:$0xf] %vm4439_vm4, %v14832_v63  ;;  %v14834_v49 = vld [vmem:[#allocation177_spill] sm:$0xff]  ;;  %v14835_v24 = vld [vmem:[#allocation178_spill] sm:$0xff] }
 0x44e   :  { %4469 = vst.msk [vmem:[%s12484_s3 + $0x74] sm:$0xf] %vm4439_vm4, %v14833_v3  ;;  %4470 = vst.msk [vmem:[%s12484_s3 + $0x78] sm:$0xf] %vm4439_vm4, %v14834_v49  ;;  %v14836_v31 = vld [vmem:[#allocation143_spill] sm:$0xff]  ;;  %v14837_v7 = vld [vmem:[#allocation144_spill] sm:$0xff] }
 0x44f   :  { %4471 = vst.msk [vmem:[%s12484_s3 + $0x7c] sm:$0xf] %vm4439_vm4, %v14835_v24  ;;  %4472 = vst.msk [vmem:[%s12484_s3 + $0x80] sm:$0xf] %vm4439_vm4, %v14836_v31  ;;  %v14838_v11 = vld [vmem:[#allocation152_spill] sm:$0xff]  ;;  %v14839_v14 = vld [vmem:[#allocation153_spill] sm:$0xff] }
 0x450   :  { %4473 = vst.msk [vmem:[%s12484_s3 + $0x84] sm:$0xf] %vm4439_vm4, %v14837_v7  ;;  %4474 = vst.msk [vmem:[%s12484_s3 + $0x88] sm:$0xf] %vm4439_vm4, %v14838_v11  ;;  %v14840_v63 = vld [vmem:[#allocation154_spill] sm:$0xff]  ;;  %v14841_v3 = vld [vmem:[#allocation155_spill] sm:$0xff] }
 0x451   :  { %4475 = vst.msk [vmem:[%s12484_s3 + $0x8c] sm:$0xf] %vm4439_vm4, %v14839_v14  ;;  %4476 = vst.msk [vmem:[%s12484_s3 + $0x90] sm:$0xf] %vm4439_vm4, %v14840_v63  ;;  %v14842_v49 = vld [vmem:[#allocation156_spill] sm:$0xff]  ;;  %v14843_v24 = vld [vmem:[#allocation157_spill] sm:$0xff] }
 0x452   :  { %4477 = vst.msk [vmem:[%s12484_s3 + $0x94] sm:$0xf] %vm4439_vm4, %v14841_v3  ;;  %4478 = vst.msk [vmem:[%s12484_s3 + $0x98] sm:$0xf] %vm4439_vm4, %v14842_v49  ;;  %v14844_v31 = vld [vmem:[#allocation158_spill] sm:$0xff]  ;;  %v14845_v7 = vld [vmem:[#allocation159_spill] sm:$0xff] }
 0x453   :  { %4479 = vst.msk [vmem:[%s12484_s3 + $0x9c] sm:$0xf] %vm4439_vm4, %v14843_v24  ;;  %4480 = vst.msk [vmem:[%s12484_s3 + $0xa0] sm:$0xf] %vm4439_vm4, %v14844_v31  ;;  %v14846_v11 = vld [vmem:[#allocation160_spill] sm:$0xff]  ;;  %v14847_v14 = vld [vmem:[#allocation161_spill] sm:$0xff] }
 0x454   :  { %4481 = vst.msk [vmem:[%s12484_s3 + $0xa4] sm:$0xf] %vm4439_vm4, %v14845_v7  ;;  %4482 = vst.msk [vmem:[%s12484_s3 + $0xa8] sm:$0xf] %vm4439_vm4, %v14846_v11  ;;  %v14848_v63 = vld [vmem:[#allocation162_spill] sm:$0xff]  ;;  %v14849_v3 = vld [vmem:[#allocation163_spill] sm:$0xff] }
 0x455   :  { %4483 = vst.msk [vmem:[%s12484_s3 + $0xac] sm:$0xf] %vm4439_vm4, %v14847_v14  ;;  %4484 = vst.msk [vmem:[%s12484_s3 + $0xb0] sm:$0xf] %vm4439_vm4, %v14848_v63  ;;  %v14850_v49 = vld [vmem:[#allocation79_spill] sm:$0xff]  ;;  %v14852_v31 = vld [vmem:[#allocation84_spill] sm:$0xff] }
 0x456   :  { %4485 = vst.msk [vmem:[%s12484_s3 + $0xb4] sm:$0xf] %vm4439_vm4, %v14849_v3  ;;  %4486 = vst.msk [vmem:[%s12484_s3 + $0xb8] sm:$0xf] %vm4439_vm4, %v14850_v49  ;;  %v14851_v24 = vld [vmem:[#allocation87_spill] sm:$0xff]  ;;  %v14853_v7 = vld [vmem:[#allocation86_spill] sm:$0xff] }
 0x457   :  { %4487 = vst.msk [vmem:[%s12484_s3 + $0xbc] sm:$0xf] %vm4439_vm4, %v14851_v24  ;;  %4488 = vst.msk [vmem:[%s12484_s3 + $0xc0] sm:$0xf] %vm4439_vm4, %v14852_v31  ;;  %v14854_v11 = vld [vmem:[#allocation95_spill] sm:$0xff]  ;;  %v14855_v14 = vld [vmem:[#allocation92_spill] sm:$0xff] }
 0x458   :  { %4489 = vst.msk [vmem:[%s12484_s3 + $0xc4] sm:$0xf] %vm4439_vm4, %v14853_v7  ;;  %4490 = vst.msk [vmem:[%s12484_s3 + $0xc8] sm:$0xf] %vm4439_vm4, %v14854_v11  ;;  %v14856_v63 = vld [vmem:[#allocation94_spill] sm:$0xff]  ;;  %v14857_v3 = vld [vmem:[#allocation100_spill] sm:$0xff] }
 0x459   :  { %4491 = vst.msk [vmem:[%s12484_s3 + $0xcc] sm:$0xf] %vm4439_vm4, %v14855_v14  ;;  %4492 = vst.msk [vmem:[%s12484_s3 + $0xd0] sm:$0xf] %vm4439_vm4, %v14856_v63  ;;  %v14858_v49 = vld [vmem:[#allocation102_spill] sm:$0xff]  ;;  %v14860_v31 = vld [vmem:[#allocation169_spill] sm:$0xff] }
 0x45a   :  { %4493 = vst.msk [vmem:[%s12484_s3 + $0xd4] sm:$0xf] %vm4439_vm4, %v14857_v3  ;;  %4494 = vst.msk [vmem:[%s12484_s3 + $0xd8] sm:$0xf] %vm4439_vm4, %v14858_v49  ;;  %v14859_v24 = vld [vmem:[#allocation110_spill] sm:$0xff]  ;;  %v14862_v11 = vld [vmem:[#allocation171_spill] sm:$0xff] }
 0x45b   :  { %4495 = vst.msk [vmem:[%s12484_s3 + $0xdc] sm:$0xf] %vm4439_vm4, %v14859_v24  ;;  %4496 = vst.msk [vmem:[%s12484_s3 + $0xe0] sm:$0xf] %vm4439_vm4, %v14860_v31  ;;  %v14861_v7 = vld [vmem:[#allocation170_spill] sm:$0xff]  ;;  %v14863_v14 = vld [vmem:[#allocation172_spill] sm:$0xff] }
 0x45c   :  { %4497 = vst.msk [vmem:[%s12484_s3 + $0xe4] sm:$0xf] %vm4439_vm4, %v14861_v7  ;;  %4498 = vst.msk [vmem:[%s12484_s3 + $0xe8] sm:$0xf] %vm4439_vm4, %v14862_v11  ;;  %v14864_v63 = vld [vmem:[#allocation173_spill] sm:$0xff]  ;;  %v14865_v3 = vld [vmem:[#allocation174_spill] sm:$0xff] }
 0x45d   :  { %4499 = vst.msk [vmem:[%s12484_s3 + $0xec] sm:$0xf] %vm4439_vm4, %v14863_v14  ;;  %4500 = vst.msk [vmem:[%s12484_s3 + $0xf0] sm:$0xf] %vm4439_vm4, %v14864_v63  ;;  %v14866_v49 = vld [vmem:[#allocation175_spill] sm:$0xff]  ;;  %v14867_v24 = vld [vmem:[#allocation2_spill] sm:$0xff] }
 0x45e   :  { %4501 = vst.msk [vmem:[%s12484_s3 + $0xf4] sm:$0xf] %vm4439_vm4, %v14865_v3  ;;  %4502 = vst.msk [vmem:[%s12484_s3 + $0xf8] sm:$0xf] %vm4439_vm4, %v14866_v49  ;;  %v14868_v31 = vld [vmem:[#allocation4_spill] sm:$0xff]  ;;  %v14869_v7 = vld [vmem:[#allocation6_spill] sm:$0xff] }
 0x45f   :  { %4503 = vst.msk [vmem:[%s12484_s3 + $0xfc] sm:$0xf] %vm4439_vm4, %v14867_v24  ;;  %4504 = vst.msk [vmem:[%s12484_s3 + $0x100] sm:$0xf] %vm4439_vm4, %v14868_v31  ;;  %v14870_v11 = vld [vmem:[#allocation3_spill] sm:$0xff]  ;;  %v14871_v14 = vld [vmem:[#allocation5_spill] sm:$0xff] }
 0x460   :  { %4505 = vst.msk [vmem:[%s12484_s3 + $0x104] sm:$0xf] %vm4439_vm4, %v14869_v7  ;;  %4506 = vst.msk [vmem:[%s12484_s3 + $0x108] sm:$0xf] %vm4439_vm4, %v14870_v11  ;;  %v14872_v63 = vld [vmem:[#allocation7_spill] sm:$0xff]  ;;  %v14873_v3 = vld [vmem:[#allocation10_spill] sm:$0xff] }
 0x461   :  { %4507 = vst.msk [vmem:[%s12484_s3 + $0x10c] sm:$0xf] %vm4439_vm4, %v14871_v14  ;;  %4508 = vst.msk [vmem:[%s12484_s3 + $0x110] sm:$0xf] %vm4439_vm4, %v14872_v63  ;;  %v14874_v49 = vld [vmem:[#allocation145_spill] sm:$0xff]  ;;  %v14875_v24 = vld [vmem:[#allocation146_spill] sm:$0xff] }
 0x462   :  { %4509 = vst.msk [vmem:[%s12484_s3 + $0x114] sm:$0xf] %vm4439_vm4, %v14873_v3  ;;  %4510 = vst.msk [vmem:[%s12484_s3 + $0x118] sm:$0xf] %vm4439_vm4, %v14874_v49  ;;  %v14876_v31 = vld [vmem:[#allocation147_spill] sm:$0xff]  ;;  %v14877_v7 = vld [vmem:[#allocation148_spill] sm:$0xff] }
 0x463   :  { %4511 = vst.msk [vmem:[%s12484_s3 + $0x11c] sm:$0xf] %vm4439_vm4, %v14875_v24  ;;  %4512 = vst.msk [vmem:[%s12484_s3 + $0x120] sm:$0xf] %vm4439_vm4, %v14876_v31  ;;  %v14878_v11 = vld [vmem:[#allocation149_spill] sm:$0xff]  ;;  %v14879_v14 = vld [vmem:[#allocation150_spill] sm:$0xff] }
 0x464   :  { %4513 = vst.msk [vmem:[%s12484_s3 + $0x124] sm:$0xf] %vm4439_vm4, %v14877_v7  ;;  %4514 = vst.msk [vmem:[%s12484_s3 + $0x128] sm:$0xf] %vm4439_vm4, %v14878_v11  ;;  %v14880_v63 = vld [vmem:[#allocation151_spill] sm:$0xff]  ;;  %v14881_v3 = vld [vmem:[#allocation85_spill] sm:$0xff] }
 0x465   :  { %4515 = vst.msk [vmem:[%s12484_s3 + $0x12c] sm:$0xf] %vm4439_vm4, %v14879_v14  ;;  %4516 = vst.msk [vmem:[%s12484_s3 + $0x130] sm:$0xf] %vm4439_vm4, %v14880_v63  ;;  %v14882_v49 = vld [vmem:[#allocation93_spill] sm:$0xff]  ;;  %v14884_v31 = vld [vmem:[#allocation103_spill] sm:$0xff] }
 0x466   :  { %4517 = vst.msk [vmem:[%s12484_s3 + $0x134] sm:$0xf] %vm4439_vm4, %v14881_v3  ;;  %4518 = vst.msk [vmem:[%s12484_s3 + $0x138] sm:$0xf] %vm4439_vm4, %v14882_v49  ;;  %v14883_v24 = vld [vmem:[#allocation101_spill] sm:$0xff]  ;;  %v14886_v11 = vld [vmem:[#allocation164_spill] sm:$0xff] }
 0x467   :  { %4519 = vst.msk [vmem:[%s12484_s3 + $0x13c] sm:$0xf] %vm4439_vm4, %v14883_v24  ;;  %4520 = vst.msk [vmem:[%s12484_s3 + $0x140] sm:$0xf] %vm4439_vm4, %v14884_v31  ;;  %v14885_v7 = vld [vmem:[#allocation109_spill] sm:$0xff]  ;;  %v14887_v14 = vld [vmem:[#allocation108_spill] sm:$0xff] }
 0x468   :  { %4521 = vst.msk [vmem:[%s12484_s3 + $0x144] sm:$0xf] %vm4439_vm4, %v14885_v7  ;;  %4522 = vst.msk [vmem:[%s12484_s3 + $0x148] sm:$0xf] %vm4439_vm4, %v14886_v11  ;;  %v14888_v63 = vld [vmem:[#allocation116_spill] sm:$0xff]  ;;  %v14889_v3 = vld [vmem:[#allocation115_spill] sm:$0xff] }
 0x469   :  { %4523 = vst.msk [vmem:[%s12484_s3 + $0x14c] sm:$0xf] %vm4439_vm4, %v14887_v14  ;;  %4524 = vst.msk [vmem:[%s12484_s3 + $0x150] sm:$0xf] %vm4439_vm4, %v14888_v63  ;;  %v14890_v49 = vld [vmem:[#allocation117_spill] sm:$0xff]  ;;  %v14891_v24 = vld [vmem:[#allocation123_spill] sm:$0xff] }
 0x46a   :  { %4525 = vst.msk [vmem:[%s12484_s3 + $0x154] sm:$0xf] %vm4439_vm4, %v14889_v3  ;;  %4526 = vst.msk [vmem:[%s12484_s3 + $0x158] sm:$0xf] %vm4439_vm4, %v14890_v49  ;;  %v14892_v31 = vld [vmem:[#allocation124_spill] sm:$0xff]  ;;  %v14893_v7 = vld [vmem:[#allocation129_spill] sm:$0xff] }
 0x46b   :  { %4527 = vst.msk [vmem:[%s12484_s3 + $0x15c] sm:$0xf] %vm4439_vm4, %v14891_v24  ;;  %4528 = vst.msk [vmem:[%s12484_s3 + $0x160] sm:$0xf] %vm4439_vm4, %v14892_v31  ;;  %v14894_v11 = vld [vmem:[#allocation165_spill] sm:$0xff]  ;;  %v14895_v14 = vld [vmem:[#allocation166_spill] sm:$0xff] }
 0x46c   :  { %4529 = vst.msk [vmem:[%s12484_s3 + $0x164] sm:$0xf] %vm4439_vm4, %v14893_v7  ;;  %4530 = vst.msk [vmem:[%s12484_s3 + $0x168] sm:$0xf] %vm4439_vm4, %v14894_v11  ;;  %v14896_v63 = vld [vmem:[#allocation167_spill] sm:$0xff]  ;;  %v14897_v3 = vld [vmem:[#allocation168_spill] sm:$0xff] }
 0x46d   :  { %4531 = vst.msk [vmem:[%s12484_s3 + $0x16c] sm:$0xf] %vm4439_vm4, %v14895_v14  ;;  %4532 = vst.msk [vmem:[%s12484_s3 + $0x170] sm:$0xf] %vm4439_vm4, %v14896_v63  ;;  %v14909_v49 = vld [vmem:[#allocation21_spill] sm:$0xff]  ;;  %v14910_v24 = vld [vmem:[#allocation20_spill] sm:$0xff] }
 0x46e   :  { %4533 = vst.msk [vmem:[%s12484_s3 + $0x174] sm:$0xf] %vm4439_vm4, %v14897_v3  ;;  %4556 = vst.msk [vmem:[%s12484_s3 + $0x1d0] sm:$0xf] %vm4439_vm4, %v14909_v49  ;;  %v14911_v31 = vld [vmem:[#allocation22_spill] sm:$0xff]  ;;  %v14912_v7 = vld [vmem:[#allocation23_spill] sm:$0xff] }
 0x46f   :  { %4557 = vst.msk [vmem:[%s12484_s3 + $0x1d4] sm:$0xf] %vm4439_vm4, %v14910_v24  ;;  %4559 = vst.msk [vmem:[%s12484_s3 + $0x1dc] sm:$0xf] %vm4439_vm4, %v14911_v31  ;;  %v14913_v11 = vld [vmem:[#allocation25_spill] sm:$0xff]  ;;  %v14915_v14 = vld [vmem:[#allocation26_spill] sm:$0xff] }
 0x470   :  { %4560 = vst.msk [vmem:[%s12484_s3 + $0x1e0] sm:$0xf] %vm4439_vm4, %v14912_v7  ;;  %4561 = vst.msk [vmem:[%s12484_s3 + $0x1e4] sm:$0xf] %vm4439_vm4, %v14913_v11  ;;  %v14916_v63 = vld [vmem:[#allocation27_spill] sm:$0xff]  ;;  %v14918_v3 = vld [vmem:[#allocation28_spill] sm:$0xff] }
 0x471   :  { %4564 = vst.msk [vmem:[%s12484_s3 + $0x1f0] sm:$0xf] %vm4439_vm4, %v14915_v14  ;;  %4565 = vst.msk [vmem:[%s12484_s3 + $0x1f4] sm:$0xf] %vm4439_vm4, %v14916_v63  ;;  %v14929_v13 = vld [vmem:[#allocation41_spill] sm:$0xff]  ;;  %v14930_v51 = vld [vmem:[#allocation40_spill] sm:$0xff] }
 0x472   :  { %4569 = vst.msk [vmem:[%s12484_s3 + $0x204] sm:$0xf] %vm4439_vm4, %v14918_v3  ;;  %4596 = vst.msk [vmem:[%s12484_s3 + $0x270] sm:$0xf] %vm4439_vm4, %v11304_v29  ;;  %v14931_v0 = vld [vmem:[#allocation42_spill] sm:$0xff]  ;;  %v14932_v22 = vld [vmem:[#allocation43_spill] sm:$0xff] }
 0x473   :  { %4597 = vst.msk [vmem:[%s12484_s3 + $0x274] sm:$0xf] %vm4439_vm4, %v11309_v5  ;;  %4598 = vst.msk [vmem:[%s12484_s3 + $0x278] sm:$0xf] %vm4439_vm4, %v11314_v6  ;;  %v14933_v36 = vld [vmem:[#allocation45_spill] sm:$0xff]  ;;  %v14934_v61 = vld [vmem:[#allocation44_spill] sm:$0xff] }
 0x474   :  { %4599 = vst.msk [vmem:[%s12484_s3 + $0x27c] sm:$0xf] %vm4439_vm4, %v14920_v15  ;;  %4600 = vst.msk [vmem:[%s12484_s3 + $0x280] sm:$0xf] %vm4439_vm4, %v14921_v8  ;;  %v14935_v45 = vld [vmem:[#allocation56_spill] sm:$0xff]  ;;  %v14936_v19 = vld [vmem:[#allocation58_spill] sm:$0xff] }
 0x475   :  { %4601 = vst.msk [vmem:[%s12484_s3 + $0x284] sm:$0xf] %vm4439_vm4, %v14922_v58  ;;  %4602 = vst.msk [vmem:[%s12484_s3 + $0x288] sm:$0xf] %vm4439_vm4, %v14923_v43  ;;  %v14937_v10 = vld [vmem:[#allocation59_spill] sm:$0xff]  ;;  %v14938_v17 = vld [vmem:[#allocation61_spill] sm:$0xff] }
 0x476   :  { %4603 = vst.msk [vmem:[%s12484_s3 + $0x28c] sm:$0xf] %vm4439_vm4, %v14924_v50  ;;  %4604 = vst.msk [vmem:[%s12484_s3 + $0x290] sm:$0xf] %vm4439_vm4, %v14925_v40  ;;  %v14939_v52 = vld [vmem:[#allocation60_spill] sm:$0xff]  ;;  %v14940_v20 = vld [vmem:[#allocation62_spill] sm:$0xff] }
 0x477   :  { %4605 = vst.msk [vmem:[%s12484_s3 + $0x294] sm:$0xf] %vm4439_vm4, %v14926_v59  ;;  %4606 = vst.msk [vmem:[%s12484_s3 + $0x298] sm:$0xf] %vm4439_vm4, %v14927_v27  ;;  %v14941_v46 = vld [vmem:[#allocation63_spill] sm:$0xff]  ;;  %v14942_v2 = vld [vmem:[#allocation65_spill] sm:$0xff] }
 0x478   :  { %4607 = vst.msk [vmem:[%s12484_s3 + $0x29c] sm:$0xf] %vm4439_vm4, %v14928_v35  ;;  %4608 = vst.msk [vmem:[%s12484_s3 + $0x2a0] sm:$0xf] %vm4439_vm4, %v14929_v13  ;;  %v14943_v32 = vld [vmem:[#allocation64_spill] sm:$0xff] }
 0x479   :  { %4609 = vst.msk [vmem:[%s12484_s3 + $0x2a4] sm:$0xf] %vm4439_vm4, %v14930_v51  ;;  %4610 = vst.msk [vmem:[%s12484_s3 + $0x2a8] sm:$0xf] %vm4439_vm4, %v14931_v0 }
 0x47a   :  { %4611 = vst.msk [vmem:[%s12484_s3 + $0x2ac] sm:$0xf] %vm4439_vm4, %v14932_v22  ;;  %4612 = vst.msk [vmem:[%s12484_s3 + $0x2b0] sm:$0xf] %vm4439_vm4, %v14933_v36 }
 0x47b   :  { %4613 = vst.msk [vmem:[%s12484_s3 + $0x2b4] sm:$0xf] %vm4439_vm4, %v14934_v61  ;;  %4614 = vst.msk [vmem:[%s12484_s3 + $0x2b8] sm:$0xf] %vm4439_vm4, %v14935_v45 }
 0x47c   :  { %4615 = vst.msk [vmem:[%s12484_s3 + $0x2bc] sm:$0xf] %vm4439_vm4, %v14936_v19  ;;  %4616 = vst.msk [vmem:[%s12484_s3 + $0x2c0] sm:$0xf] %vm4439_vm4, %v14937_v10 }
 0x47d   :  { %4617 = vst.msk [vmem:[%s12484_s3 + $0x2c4] sm:$0xf] %vm4439_vm4, %v14938_v17  ;;  %4618 = vst.msk [vmem:[%s12484_s3 + $0x2c8] sm:$0xf] %vm4439_vm4, %v14939_v52 }
 0x47e   :  { %4619 = vst.msk [vmem:[%s12484_s3 + $0x2cc] sm:$0xf] %vm4439_vm4, %v14940_v20  ;;  %4620 = vst.msk [vmem:[%s12484_s3 + $0x2d0] sm:$0xf] %vm4439_vm4, %v14941_v46 }
 0x47f   :  { %4621 = vst.msk [vmem:[%s12484_s3 + $0x2d4] sm:$0xf] %vm4439_vm4, %v11429_v53  ;;  %4622 = vst.msk [vmem:[%s12484_s3 + $0x2d8] sm:$0xf] %vm4439_vm4, %v11434_v41 }
 0x480   :  { %4623 = vst.msk [vmem:[%s12484_s3 + $0x2dc] sm:$0xf] %vm4439_vm4, %v14942_v2  ;;  %4624 = vst.msk [vmem:[%s12484_s3 + $0x2e0] sm:$0xf] %vm4439_vm4, %v11444_v42 }
 0x481   :  { %4625 = vst.msk [vmem:[%s12484_s3 + $0x2e4] sm:$0xf] %vm4439_vm4, %v11449_v30  ;;  %4626 = vst.msk [vmem:[%s12484_s3 + $0x2e8] sm:$0xf] %vm4439_vm4, %v11454_v12 }
 0x482   :  { %4627 = vst.msk [vmem:[%s12484_s3 + $0x2ec] sm:$0xf] %vm4439_vm4, %v11459_v26  ;;  %4628 = vst.msk [vmem:[%s12484_s3 + $0x2f0] sm:$0xf] %vm4439_vm4, %v14943_v32 }
 0x483   :  { %4629 = vst.msk [vmem:[%s12484_s3 + $0x2f4] sm:$0xf] %vm4439_vm4, %v11469_v47  ;;  %4630 = vst.msk [vmem:[%s12484_s3 + $0x2f8] sm:$0xf] %vm4439_vm4, %v11474_v16 }
 0x484   :  { %4631 = vst.msk [vmem:[%s12484_s3 + $0x2fc] sm:$0xf] %vm4439_vm4, %v11479_v18  ;;  %4632 = vst.msk [vmem:[%s12484_s3 + $0x300] sm:$0xf] %vm4439_vm4, %v11484_v44 }
 0x485   :  { %4633 = vst.msk [vmem:[%s12484_s3 + $0x304] sm:$0xf] %vm4439_vm4, %v11489_v56  ;;  %4634 = vst.msk [vmem:[%s12484_s3 + $0x308] sm:$0xf] %vm4439_vm4, %v11494_v21 }
 0x486   :  { %4635 = vst.msk [vmem:[%s12484_s3 + $0x30c] sm:$0xf] %vm4439_vm4, %v11499_v55 }

// kernel: net_forward.4
= control target key start
LH: loop header
LB: loop body
LE: loop exit
PB: predicated region body
PF: predicated region fallthrough
CT: control target
= control target key end

     0   :  { %v968_v0 = vmov 0   ;;  %vm235_vm0 = vcmask 179200   ;;  %vm275_vm1 = vcmask 1042432   ;;  %v60_v39 = vlaneseq  ;;  %s1521_s1 = inlined_call_operand.vmem [shape: bf16[150,16], index: 1, kind: input, shape index: {}]   ;;  %s1522_s0 = inlined_call_operand.vmem [shape: bf16[200,150], index: 0, kind: input, shape index: {}]   ;;  %s1523_s2 = inlined_call_operand.vmem [shape: f32[3,16], index: 2, kind: input, shape index: {}]   ;;  %s1524_s3 = inlined_call_operand.vmem [shape: bf16[200,16], index: 3, kind: output, shape index: {}]  }
   0x1   :  { %279 = vmatprep.subr.bf16.mxu0 %v968_v0  ;;  %v918_v1 = vld [vmem:[%s1521_s1] sm:$0xff]   ;;  %897 = vmatprep.subr.bf16.mxu1 %v968_v0  ;;  %v919_v2 = vld [vmem:[%s1521_s1 + $0x8] sm:$0xff]   ;;  %v920_v3 = vld [vmem:[%s1521_s1 + $0x10] sm:$0xff]   ;;  %vm415_vm2 = vcmask 130048   ;;  %vm768_vm3 = vcmask 125952  }
   0x2   :  { %280 = vmatpush1.bf16.msra.mxu0 %v918_v1  ;;  %907 = vmatpush1.bf16.msra.mxu1 %v918_v1  ;;  %v921_v4 = vld [vmem:[%s1521_s1 + $0x18] sm:$0xff]   ;;  %v930_v5 = vld [vmem:[%s1522_s0 + $0x4] ss:$8 sps:$4 sm:$0xff]   ;;  %v924_v9 = vld [vmem:[%s1521_s1 + $0x30] sm:$0xff]   ;;  %v1107_v40 = vshrl.u32 %v60_v39, 7 }
   0x3   :  { %281 = vmatprep.subr.bf16.mxu0 %v968_v0  ;;  %898 = vmatprep.subr.bf16.mxu1 %v968_v0  ;;  %v922_v6 = vld [vmem:[%s1521_s1 + $0x20] sm:$0xff]   ;;  %v942_v7 = vld [vmem:[%s1522_s0 + $0x74] ss:$8 sps:$4 sm:$0xff]   ;;  %v923_v8 = vld [vmem:[%s1521_s1 + $0x28] sm:$0xff]  }
   0x4   :  { %834 = vmatprep.mubr.msk.bf16.mxu0 %vm235_vm0, %v930_v5  ;;  %841 = vmatprep.mubr.msk.bf16.mxu1 %vm235_vm0, %v942_v7  ;;  %v925_v10 = vld [vmem:[%s1521_s1 + $0x38] sm:$0xff]   ;;  %v926_v11 = vld [vmem:[%s1521_s1 + $0x40] sm:$0xff]   ;;  %v927_v12 = vld [vmem:[%s1521_s1 + $0x48] ss:$0 sps:$4 sm:$0x77]   ;;  %v62_v43 = vsub.s32 0, %v1107_v40 }
   0x5   :  { %v277_v13 = vsel %vm275_vm1, %v927_v12, 0  ;;  %v928_v14 = vld [vmem:[%s1522_s0] ss:$8 sps:$4 sm:$0xff]   ;;  %v940_v15 = vld [vmem:[%s1522_s0 + $0x70] ss:$8 sps:$4 sm:$0xff]  }
   0x6   :  { %282 = vmatpush1.bf16.msra.mxu0 %v919_v2  ;;  %908 = vmatpush1.bf16.msra.mxu1 %v919_v2  ;;  %v931_v16 = vld [vmem:[%s1522_s0 + $0x14] ss:$8 sps:$4 sm:$0xff]   ;;  %v946_v17 = vld [vmem:[%s1522_s0 + $0x84] ss:$8 sps:$4 sm:$0xff]   ;;  %v933_v18 = vld [vmem:[%s1522_s0 + $0x10] ss:$8 sps:$4 sm:$0xff]  }
   0x7   :  { %283 = vmatprep.subr.bf16.mxu0 %v968_v0  ;;  %899 = vmatprep.subr.bf16.mxu1 %v968_v0  ;;  %v948_v19 = vld [vmem:[%s1522_s0 + $0x80] ss:$8 sps:$4 sm:$0xff]   ;;  %v934_v20 = vld [vmem:[%s1522_s0 + $0x24] ss:$8 sps:$4 sm:$0xff]   ;;  %v952_v21 = vld [vmem:[%s1522_s0 + $0x94] ss:$8 sps:$4 sm:$0xff]  }
   0x8   :  { %v936_v22 = vld [vmem:[%s1522_s0 + $0x20] ss:$8 sps:$4 sm:$0xff]   ;;  %v954_v23 = vld [vmem:[%s1522_s0 + $0x90] ss:$8 sps:$4 sm:$0xff]   ;;  %v937_v24 = vld [vmem:[%s1522_s0 + $0x34] ss:$8 sps:$4 sm:$0xff]  }
   0x9   :  { %v958_v25 = vld [vmem:[%s1522_s0 + $0xa4] ss:$8 sps:$4 sm:$0xff]   ;;  %v939_v26 = vld [vmem:[%s1522_s0 + $0x30] ss:$8 sps:$4 sm:$0xff]   ;;  %v960_v27 = vld [vmem:[%s1522_s0 + $0xa0] ss:$8 sps:$4 sm:$0xff]  }
   0xa   :  { %284 = vmatpush1.bf16.msra.mxu0 %v920_v3  ;;  %909 = vmatpush1.bf16.msra.mxu1 %v920_v3  ;;  %v943_v28 = vld [vmem:[%s1522_s0 + $0x44] ss:$8 sps:$4 sm:$0xff]   ;;  %v961_v29 = vld [vmem:[%s1522_s0 + $0xb4] ss:$8 sps:$4 sm:$0xff]   ;;  %v945_v31 = vld [vmem:[%s1522_s0 + $0x40] ss:$8 sps:$4 sm:$0xff]  }
   0xb   :  { %285 = vmatprep.subr.bf16.mxu0 %v968_v0  ;;  %900 = vmatprep.subr.bf16.mxu1 %v968_v0  ;;  %v40_v30 = vld [vmem:[%s1522_s0 + $0xc0] sm:$0xff]  ;;  %v963_v32 = vld [vmem:[%s1522_s0 + $0xb0] ss:$8 sps:$4 sm:$0xff]   ;;  %v949_v33 = vld [vmem:[%s1522_s0 + $0x54] ss:$8 sps:$4 sm:$0xff]  }
   0xc   :  { %v823_v34 = vcombine.high %v40_v30, %v40_v30  ;;  %v951_v35 = vld [vmem:[%s1522_s0 + $0x50] ss:$8 sps:$4 sm:$0xff]   ;;  %v822_v36 = vcombine.low %v40_v30, %v40_v30  ;;  %v955_v37 = vld [vmem:[%s1522_s0 + $0x64] ss:$8 sps:$4 sm:$0xff]   ;;  %v957_v38 = vld [vmem:[%s1522_s0 + $0x60] ss:$8 sps:$4 sm:$0xff]  }
   0xd   :  { %v1115_v46 = vld [vmem:[%s1523_s2] sm:$0x7] }
   0xe   :  { %286 = vmatpush1.bf16.msra.mxu0 %v921_v4  ;;  %910 = vmatpush1.bf16.msra.mxu1 %v921_v4  ;;  %v1120_v51 = vrot.slane %v1115_v46, %v62_v43 }
   0xf   :  { %287 = vmatprep.subr.bf16.mxu0 %v968_v0  ;;  %901 = vmatprep.subr.bf16.mxu1 %v968_v0 }
  0x12   :  { %288 = vmatpush1.bf16.msra.mxu0 %v922_v6  ;;  %911 = vmatpush1.bf16.msra.mxu1 %v922_v6 }
  0x13   :  { %289 = vmatprep.subr.bf16.mxu0 %v968_v0  ;;  %902 = vmatprep.subr.bf16.mxu1 %v968_v0 }
  0x16   :  { %290 = vmatpush1.bf16.msra.mxu0 %v923_v8  ;;  %912 = vmatpush1.bf16.msra.mxu1 %v923_v8 }
  0x17   :  { %291 = vmatprep.subr.bf16.mxu0 %v968_v0  ;;  %903 = vmatprep.subr.bf16.mxu1 %v968_v0 }
  0x1a   :  { %292 = vmatpush1.bf16.msra.mxu0 %v924_v9  ;;  %913 = vmatpush1.bf16.msra.mxu1 %v924_v9 }
  0x1b   :  { %293 = vmatprep.subr.bf16.mxu0 %v968_v0  ;;  %904 = vmatprep.subr.bf16.mxu1 %v968_v0 }
  0x1e   :  { %294 = vmatpush1.bf16.msra.mxu0 %v925_v10  ;;  %914 = vmatpush1.bf16.msra.mxu1 %v925_v10 }
  0x1f   :  { %295 = vmatprep.subr.bf16.mxu0 %v968_v0  ;;  %905 = vmatprep.subr.bf16.mxu1 %v968_v0 }
  0x22   :  { %296 = vmatpush1.bf16.msra.mxu0 %v926_v11  ;;  %915 = vmatpush1.bf16.msra.mxu1 %v926_v11 }
  0x23   :  { %297 = vmatprep.subr.bf16.mxu0 %v968_v0  ;;  %906 = vmatprep.subr.bf16.mxu1 %v968_v0 }
  0x26   :  { %298 = vmatpush1.bf16.msra.mxu0 %v277_v13  ;;  %916 = vmatpush1.bf16.msra.mxu1 %v277_v13 }
  0x29   :  { %312 = vmatmul.mubr.bf16.vlgmr.msra.gmra.mrb[0].mxu0 %v928_v14  ;;  %368 = vmatmul.mubr.bf16.vlgmr.msra.gmra.mrb[0].mxu1 %v940_v15 }
  0x2a   :  { %835 = vmatprep.mubr.msk.bf16.mxu0 %vm235_vm0, %v931_v16  ;;  %842 = vmatprep.mubr.msk.bf16.mxu1 %vm235_vm0, %v946_v17 }
  0x31   :  { %320 = vmatmul.mubr.bf16.gmra.mrb[4].mxu0 %v933_v18  ;;  %376 = vmatmul.mubr.bf16.gmra.mrb[4].mxu1 %v948_v19 }
  0x32   :  { %836 = vmatprep.mubr.msk.bf16.mxu0 %vm235_vm0, %v934_v20  ;;  %843 = vmatprep.mubr.msk.bf16.mxu1 %vm235_vm0, %v952_v21 }
  0x39   :  { %328 = vmatmul.mubr.bf16.gmra.mrb[8].mxu0 %v936_v22  ;;  %384 = vmatmul.mubr.bf16.gmra.mrb[8].mxu1 %v954_v23 }
  0x3a   :  { %837 = vmatprep.mubr.msk.bf16.mxu0 %vm235_vm0, %v937_v24  ;;  %844 = vmatprep.mubr.msk.bf16.mxu1 %vm235_vm0, %v958_v25 }
  0x41   :  { %336 = vmatmul.mubr.bf16.gmra.mrb[12].mxu0 %v939_v26  ;;  %392 = vmatmul.mubr.bf16.gmra.mrb[12].mxu1 %v960_v27 }
  0x42   :  { %838 = vmatprep.mubr.msk.bf16.mxu0 %vm235_vm0, %v943_v28  ;;  %845 = vmatprep.mubr.msk.bf16.mxu1 %vm235_vm0, %v961_v29 }
  0x49   :  { %344 = vmatmul.mubr.bf16.gmra.mrb[16].mxu0 %v945_v31  ;;  %400 = vmatmul.mubr.bf16.gmra.mrb[16].mxu1 %v963_v32 }
  0x4a   :  { %839 = vmatprep.mubr.msk.bf16.mxu0 %vm235_vm0, %v949_v33  ;;  %846 = vmatprep.mubr.msk.bf16.mxu1 %vm235_vm0, %v823_v34 }
  0x51   :  { %352 = vmatmul.mubr.bf16.gmra.mrb[20].mxu0 %v951_v35  ;;  %408 = vmatmul.mubr.bf16.gmra.mrb[20].mxu1 %v822_v36 }
  0x52   :  { %840 = vmatprep.mubr.msk.bf16.mxu0 %vm235_vm0, %v955_v37 }
  0x59   :  { %360 = vmatmul.mubr.bf16.gmra.mrb[24].mxu0 %v957_v38 }
  0xfc   :  { %v313_v41 = vpop.f32.mrb[0].mxu0  ;;  %v1109_v42 = vpop.f32.mrb[0].mxu1 }
  0xfd   :  { %v315_v44 = vpop.f32.mrb[1].mxu0  ;;  %v371_v45 = vpop.f32.mrb[1].mxu1  ;;  %v1128_v55 = vadd.f32 %v313_v41, %v1120_v51 }
  0xfe   :  { %v316_v47 = vpop.f32.mrb[2].mxu0  ;;  %v1117_v48 = vpop.f32.mrb[2].mxu1 }
  0xff   :  { %v318_v49 = vpop.f32.mrb[3].mxu0  ;;  %v374_v50 = vpop.f32.mrb[3].mxu1  ;;  %v1123_v52 = vadd.f32 %v316_v47, %v1120_v51  ;;  %v473_v0 = vmul.f32 %v1128_v55, %v1128_v55  ;;  %v416_v4 = vsel %vm415_vm2, %v1128_v55, 0.0 }
 0x101   :  { %v474_v61 = vmul.f32 %v1123_v52, %v1123_v52  ;;  %v417_v1 = vsel %vm415_vm2, %v1123_v52, 0.0  ;;  %v498_v10 = vsel %vm415_vm2, %v473_v0, 0.0 }
 0x102   :  { %v418_v7 = vadd.f32 %v417_v1, %v416_v4 }
 0x103   :  { %v499_v5 = vsel %vm415_vm2, %v474_v61, 0.0 }
 0x104   :  { %v321_v53 = vpop.f32.mrb[4].mxu0  ;;  %v1125_v54 = vpop.f32.mrb[4].mxu1  ;;  %v500_v16 = vadd.f32 %v499_v5, %v498_v10 }
 0x105   :  { %v1131_v56 = vadd.f32 %v321_v53, %v1120_v51  ;;  %v323_v57 = vpop.f32.mrb[5].mxu0  ;;  %v379_v58 = vpop.f32.mrb[5].mxu1 }
 0x106   :  { %v324_v59 = vpop.f32.mrb[6].mxu0  ;;  %v1133_v60 = vpop.f32.mrb[6].mxu1 }
 0x107   :  { %v326_v62 = vpop.f32.mrb[7].mxu0  ;;  %v382_v63 = vpop.f32.mrb[7].mxu1  ;;  %v475_v2 = vmul.f32 %v1131_v56, %v1131_v56  ;;  %v1144_v3 = vadd.f32 %v324_v59, %v1120_v51  ;;  %v419_v6 = vsel %vm415_vm2, %v1131_v56, 0.0 }
 0x108   :  { %v420_v17 = vadd.f32 %v419_v6, %v418_v7 }
 0x109   :  { %v501_v11 = vsel %vm415_vm2, %v475_v2, 0.0  ;;  %v476_v12 = vmul.f32 %v1144_v3, %v1144_v3  ;;  %v421_v20 = vsel %vm415_vm2, %v1144_v3, 0.0 }
 0x10a   :  { %v502_v25 = vadd.f32 %v501_v11, %v500_v16  ;;  %v422_v28 = vadd.f32 %v421_v20, %v420_v17 }
 0x10b   :  { %v503_v26 = vsel %vm415_vm2, %v476_v12, 0.0 }
 0x10c   :  { %v329_v8 = vpop.f32.mrb[8].mxu0  ;;  %v1151_v9 = vpop.f32.mrb[8].mxu1  ;;  %v504_v31 = vadd.f32 %v503_v26, %v502_v25 }
 0x10d   :  { %v1158_v13 = vadd.f32 %v329_v8, %v1120_v51  ;;  %v331_v14 = vpop.f32.mrb[9].mxu0  ;;  %v387_v15 = vpop.f32.mrb[9].mxu1 }
 0x10e   :  { %v332_v18 = vpop.f32.mrb[10].mxu0  ;;  %v1160_v19 = vpop.f32.mrb[10].mxu1 }
 0x10f   :  { %v477_v21 = vmul.f32 %v1158_v13, %v1158_v13  ;;  %v1167_v22 = vadd.f32 %v332_v18, %v1120_v51  ;;  %v334_v23 = vpop.f32.mrb[11].mxu0  ;;  %v390_v24 = vpop.f32.mrb[11].mxu1  ;;  %v423_v27 = vsel %vm415_vm2, %v1158_v13, 0.0 }
 0x110   :  { %v424_v32 = vadd.f32 %v423_v27, %v422_v28 }
 0x111   :  { %v505_v29 = vsel %vm415_vm2, %v477_v21, 0.0  ;;  %v478_v30 = vmul.f32 %v1167_v22, %v1167_v22  ;;  %v425_v35 = vsel %vm415_vm2, %v1167_v22, 0.0 }
 0x112   :  { %v506_v39 = vadd.f32 %v505_v29, %v504_v31  ;;  %v426_v57 = vadd.f32 %v425_v35, %v424_v32 }
 0x113   :  { %v507_v44 = vsel %vm415_vm2, %v478_v30, 0.0 }
 0x114   :  { %v337_v33 = vpop.f32.mrb[12].mxu0  ;;  %v1175_v34 = vpop.f32.mrb[12].mxu1  ;;  %v508_v61 = vadd.f32 %v507_v44, %v506_v39 }
 0x115   :  { %v1180_v36 = vadd.f32 %v337_v33, %v1120_v51  ;;  %v339_v37 = vpop.f32.mrb[13].mxu0  ;;  %v395_v38 = vpop.f32.mrb[13].mxu1 }
 0x116   :  { %v340_v41 = vpop.f32.mrb[14].mxu0  ;;  %v1182_v43 = vpop.f32.mrb[14].mxu1 }
 0x117   :  { %v427_v45 = vsel %vm415_vm2, %v1180_v36, 0.0  ;;  %v479_v47 = vmul.f32 %v1180_v36, %v1180_v36  ;;  %v1190_v49 = vadd.f32 %v340_v41, %v1120_v51  ;;  %v342_v50 = vpop.f32.mrb[15].mxu0  ;;  %v398_v53 = vpop.f32.mrb[15].mxu1 }
 0x118   :  { %v428_v62 = vadd.f32 %v427_v45, %v426_v57 }
 0x119   :  { %v509_v58 = vsel %vm415_vm2, %v479_v47, 0.0  ;;  %v480_v59 = vmul.f32 %v1190_v49, %v1190_v49  ;;  %v429_v63 = vsel %vm415_vm2, %v1190_v49, 0.0 }
 0x11a   :  { %v510_v0 = vadd.f32 %v509_v58, %v508_v61  ;;  %v430_v8 = vadd.f32 %v429_v63, %v428_v62  ;;  %v1238_v62 = vadd.f32 %v1109_v42, %v1120_v51 }
 0x11b   :  { %v511_v4 = vsel %vm415_vm2, %v480_v59, 0.0 }
 0x11c   :  { %v345_v1 = vpop.f32.mrb[16].mxu0  ;;  %v1197_v2 = vpop.f32.mrb[16].mxu1  ;;  %v512_v18 = vadd.f32 %v511_v4, %v510_v0 }
 0x11d   :  { %v1201_v5 = vadd.f32 %v345_v1, %v1120_v51  ;;  %v347_v6 = vpop.f32.mrb[17].mxu0  ;;  %v403_v7 = vpop.f32.mrb[17].mxu1 }
 0x11e   :  { %v348_v10 = vpop.f32.mrb[18].mxu0  ;;  %v1203_v11 = vpop.f32.mrb[18].mxu1  ;;  %v1245_v7 = vadd.f32 %v1117_v48, %v1120_v51 }
 0x11f   :  { %v431_v12 = vsel %vm415_vm2, %v1201_v5, 0.0  ;;  %v481_v14 = vmul.f32 %v1201_v5, %v1201_v5  ;;  %v1210_v15 = vadd.f32 %v348_v10, %v1120_v51  ;;  %v350_v16 = vpop.f32.mrb[19].mxu0  ;;  %v406_v17 = vpop.f32.mrb[19].mxu1 }
 0x120   :  { %v432_v20 = vadd.f32 %v431_v12, %v430_v8  ;;  %v1258_v17 = vadd.f32 %v1125_v54, %v1120_v51  ;;  %v1271_v54 = vadd.f32 %v1133_v60, %v1120_v51  ;;  %v1285_v60 = vadd.f32 %v1160_v19, %v1120_v51 }
 0x121   :  { %v513_v21 = vsel %vm415_vm2, %v481_v14, 0.0  ;;  %v433_v23 = vsel %vm415_vm2, %v1210_v15, 0.0  ;;  %v482_v24 = vmul.f32 %v1210_v15, %v1210_v15  ;;  %v487_v14 = vmul.f32 %v1238_v62, %v1238_v62 }
 0x122   :  { %v514_v25 = vadd.f32 %v513_v21, %v512_v18  ;;  %v434_v26 = vadd.f32 %v433_v23, %v432_v20 }
 0x123   :  { %v515_v27 = vsel %vm415_vm2, %v482_v24, 0.0  ;;  %v443_v24 = vsel %vm415_vm2, %v1238_v62, 0.0 }
 0x124   :  { %v516_v28 = vadd.f32 %v515_v27, %v514_v25  ;;  %v353_v29 = vpop.f32.mrb[20].mxu0  ;;  %v1218_v30 = vpop.f32.mrb[20].mxu1  ;;  %v488_v25 = vmul.f32 %v1245_v7, %v1245_v7 }
 0x125   :  { %v1221_v31 = vadd.f32 %v353_v29, %v1120_v51  ;;  %v355_v32 = vpop.f32.mrb[21].mxu0  ;;  %v411_v33 = vpop.f32.mrb[21].mxu1  ;;  %v525_v29 = vsel %vm415_vm2, %v487_v14, 0.0  ;;  %v1317_v14 = vadd.f32 %v1197_v2, %v1120_v51 }
 0x126   :  { %v356_v35 = vpop.f32.mrb[22].mxu0  ;;  %v412_v37 = vpop.f32.mrb[22].mxu1  ;;  %v445_v32 = vsel %vm415_vm2, %v1245_v7, 0.0  ;;  %v489_v33 = vmul.f32 %v1258_v17, %v1258_v17 }
 0x127   :  { %v435_v38 = vsel %vm415_vm2, %v1221_v31, 0.0  ;;  %v483_v39 = vmul.f32 %v1221_v31, %v1221_v31  ;;  %v1228_v41 = vadd.f32 %v356_v35, %v1120_v51  ;;  %v358_v44 = vpop.f32.mrb[23].mxu0  ;;  %v413_v45 = vpop.f32.mrb[23].mxu1  ;;  %v1281_v35 = vadd.f32 %v1151_v9, %v1120_v51 }
 0x128   :  { %v436_v47 = vadd.f32 %v435_v38, %v434_v26  ;;  %v447_v44 = vsel %vm415_vm2, %v1258_v17, 0.0  ;;  %v490_v45 = vmul.f32 %v1271_v54, %v1271_v54  ;;  %v449_v9 = vsel %vm415_vm2, %v1271_v54, 0.0 }
 0x129   :  { %v517_v50 = vsel %vm415_vm2, %v483_v39, 0.0  ;;  %v437_v53 = vsel %vm415_vm2, %v1228_v41, 0.0  ;;  %v484_v57 = vmul.f32 %v1228_v41, %v1228_v41  ;;  %v527_v39 = vsel %vm415_vm2, %v488_v25, 0.0 }
 0x12a   :  { %v518_v58 = vadd.f32 %v517_v50, %v516_v28  ;;  %v438_v59 = vadd.f32 %v437_v53, %v436_v47  ;;  %v529_v53 = vsel %vm415_vm2, %v489_v33, 0.0  ;;  %v491_v19 = vmul.f32 %v1281_v35, %v1281_v35 }
 0x12b   :  { %v519_v61 = vsel %vm415_vm2, %v484_v57, 0.0  ;;  %v1299_v57 = vadd.f32 %v1175_v34, %v1120_v51  ;;  %v453_v34 = vsel %vm415_vm2, %v1285_v60, 0.0 }
 0x12c   :  { %v520_v63 = vadd.f32 %v519_v61, %v518_v58  ;;  %v361_v0 = vpop.f32.mrb[24].mxu0  ;;  %v492_v58 = vmul.f32 %v1285_v60, %v1285_v60 }
 0x12d   :  { %v1241_v1 = vadd.f32 %v361_v0, %v1120_v51  ;;  %v363_v4 = vpop.f32.mrb[25].mxu0  ;;  %v451_v0 = vsel %vm415_vm2, %v1281_v35, 0.0 }
 0x12e   :  { %v364_v6 = vpop.f32.mrb[26].mxu0  ;;  %v1308_v4 = vadd.f32 %v1182_v43, %v1120_v51  ;;  %v455_v43 = vsel %vm415_vm2, %v1299_v57, 0.0 }
 0x12f   :  { %v439_v8 = vsel %vm415_vm2, %v1241_v1, 0.0  ;;  %v485_v10 = vmul.f32 %v1241_v1, %v1241_v1  ;;  %v1252_v42 = vadd.f32 %v364_v6, %v1120_v51  ;;  %v366_v12 = vpop.f32.mrb[27].mxu0 }
 0x130   :  { %v440_v16 = vadd.f32 %v439_v8, %v438_v59  ;;  %v493_v12 = vmul.f32 %v1299_v57, %v1299_v57 }
 0x131   :  { %v521_v48 = vsel %vm415_vm2, %v485_v10, 0.0  ;;  %v441_v18 = vsel %vm415_vm2, %v1252_v42, 0.0  ;;  %v486_v20 = vmul.f32 %v1252_v42, %v1252_v42  ;;  %v533_v10 = vsel %vm415_vm2, %v491_v19, 0.0 }
 0x132   :  { %v522_v21 = vadd.f32 %v521_v48, %v520_v63  ;;  %v442_v23 = vadd.f32 %v441_v18, %v440_v16  ;;  %v531_v63 = vsel %vm415_vm2, %v490_v45, 0.0  ;;  %v535_v16 = vsel %vm415_vm2, %v492_v58, 0.0 }
 0x133   :  { %v523_v26 = vsel %vm415_vm2, %v486_v20, 0.0  ;;  %v494_v20 = vmul.f32 %v1308_v4, %v1308_v4  ;;  %v537_v25 = vsel %vm415_vm2, %v493_v12, 0.0 }
 0x134   :  { %v444_v27 = vadd.f32 %v443_v24, %v442_v23  ;;  %v524_v28 = vadd.f32 %v523_v26, %v522_v21  ;;  %v1326_v21 = vadd.f32 %v1203_v11, %v1120_v51  ;;  %v1330_v23 = vadd.f32 %v1218_v30, %v1120_v51 }
 0x135   :  { %v457_v26 = vsel %vm415_vm2, %v1308_v4, 0.0  ;;  %v459_v11 = vsel %vm415_vm2, %v1317_v14, 0.0 }
 0x136   :  { %v446_v37 = vadd.f32 %v445_v32, %v444_v27  ;;  %v526_v38 = vadd.f32 %v525_v29, %v524_v28  ;;  %v495_v27 = vmul.f32 %v1317_v14, %v1317_v14  ;;  %v539_v32 = vsel %vm415_vm2, %v494_v20, 0.0 }
 0x137   :  { %v496_v51 = vmul.f32 %v1326_v21, %v1326_v21  ;;  %v497_v30 = vmul.f32 %v1330_v23, %v1330_v23 }
 0x138   :  { %v448_v47 = vadd.f32 %v447_v44, %v446_v37  ;;  %v528_v50 = vadd.f32 %v527_v39, %v526_v38  ;;  %v541_v38 = vsel %vm415_vm2, %v495_v27, 0.0  ;;  %v461_v39 = vsel %vm415_vm2, %v1326_v21, 0.0 }
 0x139   :  { %v463_v44 = vsel %vm415_vm2, %v1330_v23, 0.0 }
 0x13a   :  { %v530_v59 = vadd.f32 %v529_v53, %v528_v50  ;;  %v450_v61 = vadd.f32 %v449_v9, %v448_v47  ;;  %v543_v50 = vsel %vm415_vm2, %v496_v51, 0.0  ;;  %v545_v53 = vsel %vm415_vm2, %v497_v30, 0.0 }
 0x13c   :  { %v452_v6 = vadd.f32 %v451_v0, %v450_v61  ;;  %v532_v8 = vadd.f32 %v531_v63, %v530_v59 }
 0x13e   :  { %v454_v48 = vadd.f32 %v453_v34, %v452_v6  ;;  %v534_v18 = vadd.f32 %v533_v10, %v532_v8 }
 0x140   :  { %v456_v2 = vadd.f32 %v455_v43, %v454_v48  ;;  %v536_v24 = vadd.f32 %v535_v16, %v534_v18 }
 0x142   :  { %v538_v28 = vadd.f32 %v537_v25, %v536_v24  ;;  %v458_v29 = vadd.f32 %v457_v26, %v456_v2 }
 0x144   :  { %v540_v33 = vadd.f32 %v539_v32, %v538_v28  ;;  %v460_v37 = vadd.f32 %v459_v11, %v458_v29 }
 0x146   :  { %v542_v45 = vadd.f32 %v541_v38, %v540_v33  ;;  %v462_v47 = vadd.f32 %v461_v39, %v460_v37 }
 0x148   :  { %v544_v9 = vadd.f32 %v543_v50, %v542_v45  ;;  %v464_v19 = vadd.f32 %v463_v44, %v462_v47 }
 0x14a   :  { %v465_v58 = vrot.slane %v464_v19, 4  ;;  %v546_v59 = vadd.f32 %v545_v53, %v544_v9 }
 0x14c   :  { %v466_v61 = vadd.f32 %v465_v58, %v464_v19  ;;  %v547_v63 = vrot.slane %v546_v59, 4 }
 0x14e   :  { %v467_v0 = vrot.slane %v466_v61, 2  ;;  %v548_v6 = vadd.f32 %v547_v63, %v546_v59 }
 0x150   :  { %v468_v8 = vadd.f32 %v467_v0, %v466_v61  ;;  %v549_v10 = vrot.slane %v548_v6, 2 }
 0x152   :  { %v469_v34 = vrot.slane %v468_v8, 1  ;;  %v550_v12 = vadd.f32 %v549_v10, %v548_v6 }
 0x154   :  { %v470_v16 = vadd.f32 %v469_v34, %v468_v8  ;;  %v551_v48 = vrot.slane %v550_v12, 1 }
 0x156   :  { %v1351_v18 = vmul.f32 0.005, %v470_v16  ;;  %v552_v43 = vadd.f32 %v551_v48, %v550_v12 }
 0x158   :  { %v553_v20 = vmul.f32 0.005, %v552_v43  ;;  %v554_v2 = vmul.f32 %v1351_v18, %v1351_v18  ;;  %v566_v25 = vsub.f32 %v1201_v5, %v1351_v18  ;;  %v567_v26 = vsub.f32 %v1210_v15, %v1351_v18 }
 0x159   :  { %v568_v27 = vsub.f32 %v1221_v31, %v1351_v18  ;;  %v569_v28 = vsub.f32 %v1228_v41, %v1351_v18  ;;  %v570_v29 = vsub.f32 %v1241_v1, %v1351_v18  ;;  %v571_v11 = vsub.f32 %v1252_v42, %v1351_v18 }
 0x15a   :  { %v555_v24 = vsub.f32 %v553_v20, %v554_v2  ;;  %v572_v51 = vsub.f32 %v1238_v62, %v1351_v18  ;;  %v573_v5 = vsub.f32 %v1245_v7, %v1351_v18  ;;  %v574_v15 = vsub.f32 %v1258_v17, %v1351_v18 }
 0x15b   :  { %v575_v31 = vsub.f32 %v1271_v54, %v1351_v18  ;;  %v576_v41 = vsub.f32 %v1281_v35, %v1351_v18  ;;  %v577_v1 = vsub.f32 %v1285_v60, %v1351_v18  ;;  %v578_v42 = vsub.f32 %v1299_v57, %v1351_v18 }
 0x15c   :  { %v556_v32 = vadd.f32 1e-05, %v555_v24  ;;  %v579_v62 = vsub.f32 %v1308_v4, %v1351_v18  ;;  %v580_v7 = vsub.f32 %v1317_v14, %v1351_v18  ;;  %v581_v17 = vsub.f32 %v1326_v21, %v1351_v18 }
 0x15d   :  { %v582_v54 = vsub.f32 %v1330_v23, %v1351_v18  ;;  %v615_v35 = vsub.s32 2, %v1107_v40  ;;  %v586_v60 = vsub.s32 1, %v1107_v40  ;;  %v558_v4 = vsub.f32 %v1128_v55, %v1351_v18 }
 0x15e   :  { %966 = vrsqrt.f32 %v556_v32  ;;  %v559_v14 = vsub.f32 %v1123_v52, %v1351_v18  ;;  %v560_v21 = vsub.f32 %v1131_v56, %v1351_v18  ;;  %v561_v23 = vsub.f32 %v1144_v3, %v1351_v18 }
 0x15f   :  { %v616_v57 = vrot.slane %v1115_v46, %v615_v35  ;;  %v562_v40 = vsub.f32 %v1158_v13, %v1351_v18  ;;  %v563_v38 = vsub.f32 %v1167_v22, %v1351_v18  ;;  %v565_v55 = vsub.f32 %v1190_v49, %v1351_v18 }
 0x168   :  { %v967_v30 = vpop.eup %966 }
 0x169   :  { %v583_v33 = vmul.f32 %v967_v30, %v1115_v46  ;;  %v564_v46 = vsub.f32 %v1180_v36, %v1351_v18 }
 0x16b   :  { %v587_v37 = vrot.slane %v583_v33, %v586_v60 }
 0x16d   :  { %v588_v52 = vmul.f32 %v587_v37, %v558_v4  ;;  %v589_v39 = vmul.f32 %v587_v37, %v559_v14  ;;  %v590_v44 = vmul.f32 %v587_v37, %v560_v21  ;;  %v591_v56 = vmul.f32 %v587_v37, %v561_v23 }
 0x16e   :  { %v592_v45 = vmul.f32 %v587_v37, %v562_v40  ;;  %v593_v47 = vmul.f32 %v587_v37, %v563_v38  ;;  %v594_v3 = vmul.f32 %v587_v37, %v564_v46  ;;  %v595_v50 = vmul.f32 %v587_v37, %v565_v55 }
 0x16f   :  { %v596_v53 = vmul.f32 %v587_v37, %v566_v25  ;;  %v597_v9 = vmul.f32 %v587_v37, %v567_v26  ;;  %v598_v13 = vmul.f32 %v587_v37, %v568_v27  ;;  %v599_v19 = vmul.f32 %v587_v37, %v569_v28 }
 0x170   :  { %v600_v58 = vmul.f32 %v587_v37, %v570_v29  ;;  %v601_v22 = vmul.f32 %v587_v37, %v571_v11  ;;  %v602_v59 = vmul.f32 %v587_v37, %v572_v51  ;;  %v603_v61 = vmul.f32 %v587_v37, %v573_v5 }
 0x171   :  { %v604_v36 = vmul.f32 %v587_v37, %v574_v15  ;;  %v605_v63 = vmul.f32 %v587_v37, %v575_v31  ;;  %v606_v0 = vmul.f32 %v587_v37, %v576_v41  ;;  %v607_v49 = vmul.f32 %v587_v37, %v577_v1 }
 0x172   :  { %v608_v6 = vmul.f32 %v587_v37, %v578_v42  ;;  %v609_v8 = vmul.f32 %v587_v37, %v579_v62  ;;  %v610_v10 = vmul.f32 %v587_v37, %v580_v7  ;;  %v611_v34 = vmul.f32 %v587_v37, %v581_v17 }
 0x173   :  { %v612_v12 = vmul.f32 %v587_v37, %v582_v54  ;;  %v617_v16 = vadd.f32 %v616_v57, %v588_v52  ;;  %v618_v48 = vadd.f32 %v616_v57, %v589_v39  ;;  %v619_v18 = vadd.f32 %v616_v57, %v590_v44 }
 0x174   :  { %v620_v43 = vadd.f32 %v616_v57, %v591_v56  ;;  %v621_v20 = vadd.f32 %v616_v57, %v592_v45  ;;  %v622_v2 = vadd.f32 %v616_v57, %v593_v47  ;;  %v623_v24 = vadd.f32 %v616_v57, %v594_v3 }
 0x175   :  { %v624_v25 = vadd.f32 %v616_v57, %v595_v50  ;;  %v625_v26 = vadd.f32 %v616_v57, %v596_v53  ;;  %v626_v27 = vadd.f32 %v616_v57, %v597_v9  ;;  %v627_v28 = vadd.f32 %v616_v57, %v598_v13 }
 0x176   :  { %v628_v29 = vadd.f32 %v616_v57, %v599_v19  ;;  %v629_v32 = vadd.f32 %v616_v57, %v600_v58  ;;  %v630_v11 = vadd.f32 %v616_v57, %v601_v22  ;;  %v631_v51 = vadd.f32 %v616_v57, %v602_v59 }
 0x177   :  { %v632_v5 = vadd.f32 %v616_v57, %v603_v61  ;;  %v633_v15 = vadd.f32 %v616_v57, %v604_v36  ;;  %v634_v31 = vadd.f32 %v616_v57, %v605_v63  ;;  %v635_v41 = vadd.f32 %v616_v57, %v606_v0 }
 0x178   :  { %v636_v1 = vadd.f32 %v616_v57, %v607_v49  ;;  %v637_v42 = vadd.f32 %v616_v57, %v608_v6  ;;  %v1409_v62 = vadd.f32 %v616_v57, %v609_v8  ;;  %v1411_v7 = vadd.f32 %v616_v57, %v610_v10 }
 0x179   :  { %v1413_v17 = vadd.f32 %v616_v57, %v611_v34  ;;  %v1415_v54 = vadd.f32 %v616_v57, %v612_v12  ;;  %v642_v35 = vmax.f32 %v617_v16, 0.0  ;;  %v643_v60 = vmax.f32 %v618_v48, 0.0 }
 0x17a   :  { %v644_v30 = vmax.f32 %v619_v18, 0.0  ;;  %v645_v33 = vmax.f32 %v620_v43, 0.0  ;;  %v646_v4 = vmax.f32 %v621_v20, 0.0  ;;  %v647_v14 = vmax.f32 %v622_v2, 0.0 }
 0x17b   :  { %v648_v21 = vmax.f32 %v623_v24, 0.0  ;;  %v649_v23 = vmax.f32 %v624_v25, 0.0  ;;  %v650_v37 = vmax.f32 %v625_v26, 0.0  ;;  %v651_v40 = vmax.f32 %v626_v27, 0.0 }
 0x17c   :  { %v652_v38 = vmax.f32 %v627_v28, 0.0  ;;  %v653_v46 = vmax.f32 %v628_v29, 0.0  ;;  %v654_v55 = vmax.f32 %v629_v32, 0.0  ;;  %v655_v52 = vmax.f32 %v630_v11, 0.0 }
 0x17d   :  { %v656_v39 = vmax.f32 %v631_v51, 0.0  ;;  %v657_v44 = vmax.f32 %v632_v5, 0.0  ;;  %v658_v56 = vmax.f32 %v633_v15, 0.0  ;;  %v659_v45 = vmax.f32 %v634_v31, 0.0 }
 0x17e   :  { %v660_v57 = vmax.f32 %v635_v41, 0.0  ;;  %v661_v47 = vmax.f32 %v636_v1, 0.0  ;;  %v662_v3 = vmax.f32 %v637_v42, 0.0  ;;  %v663_v50 = vmax.f32 %v1409_v62, 0.0 }
 0x17f   :  { %v664_v53 = vmax.f32 %v1411_v7, 0.0  ;;  %v665_v9 = vmax.f32 %v1413_v17, 0.0  ;;  %v666_v13 = vmax.f32 %v1415_v54, 0.0  ;;  %v872_v19 = vpack.c.bf16 %v642_v35, %v642_v35 }
 0x180   :  { %v873_v58 = vpack.c.bf16 %v643_v60, %v643_v60  ;;  %v874_v22 = vpack.c.bf16 %v644_v30, %v644_v30  ;;  %v875_v59 = vpack.c.bf16 %v645_v33, %v645_v33  ;;  %v876_v61 = vpack.c.bf16 %v646_v4, %v646_v4 }
 0x181   :  { %v877_v36 = vpack.c.bf16 %v647_v14, %v647_v14  ;;  %v878_v63 = vpack.c.bf16 %v648_v21, %v648_v21  ;;  %v879_v0 = vpack.c.bf16 %v649_v23, %v649_v23  ;;  %v880_v49 = vpack.c.bf16 %v650_v37, %v650_v37  ;;  %769 = vst.msk [vmem:[%s1524_s3] sm:$0xf] %vm768_vm3, %v872_v19 }
 0x182   :  { %v881_v6 = vpack.c.bf16 %v651_v40, %v651_v40  ;;  %v882_v8 = vpack.c.bf16 %v652_v38, %v652_v38  ;;  %v883_v10 = vpack.c.bf16 %v653_v46, %v653_v46  ;;  %v884_v34 = vpack.c.bf16 %v654_v55, %v654_v55  ;;  %770 = vst.msk [vmem:[%s1524_s3 + $0x4] sm:$0xf] %vm768_vm3, %v873_v58 }
 0x183   :  { %771 = vst.msk [vmem:[%s1524_s3 + $0x8] sm:$0xf] %vm768_vm3, %v874_v22  ;;  %772 = vst.msk [vmem:[%s1524_s3 + $0xc] sm:$0xf] %vm768_vm3, %v875_v59  ;;  %v885_v12 = vpack.c.bf16 %v655_v52, %v655_v52  ;;  %v886_v16 = vpack.c.bf16 %v656_v39, %v656_v39  ;;  %v887_v48 = vpack.c.bf16 %v657_v44, %v657_v44 }
 0x184   :  { %773 = vst.msk [vmem:[%s1524_s3 + $0x10] sm:$0xf] %vm768_vm3, %v876_v61  ;;  %v888_v18 = vpack.c.bf16 %v658_v56, %v658_v56  ;;  %774 = vst.msk [vmem:[%s1524_s3 + $0x14] sm:$0xf] %vm768_vm3, %v877_v36  ;;  %v889_v43 = vpack.c.bf16 %v659_v45, %v659_v45  ;;  %v890_v20 = vpack.c.bf16 %v660_v57, %v660_v57 }
 0x185   :  { %775 = vst.msk [vmem:[%s1524_s3 + $0x18] sm:$0xf] %vm768_vm3, %v878_v63  ;;  %776 = vst.msk [vmem:[%s1524_s3 + $0x1c] sm:$0xf] %vm768_vm3, %v879_v0  ;;  %v891_v2 = vpack.c.bf16 %v661_v47, %v661_v47  ;;  %v892_v24 = vpack.c.bf16 %v662_v3, %v662_v3  ;;  %v893_v25 = vpack.c.bf16 %v663_v50, %v663_v50 }
 0x186   :  { %777 = vst.msk [vmem:[%s1524_s3 + $0x20] sm:$0xf] %vm768_vm3, %v880_v49  ;;  %778 = vst.msk [vmem:[%s1524_s3 + $0x24] sm:$0xf] %vm768_vm3, %v881_v6  ;;  %v894_v26 = vpack.c.bf16 %v664_v53, %v664_v53  ;;  %v895_v27 = vpack.c.bf16 %v665_v9, %v665_v9  ;;  %v896_v28 = vpack.c.bf16 %v666_v13, %v666_v13 }
 0x187   :  { %779 = vst.msk [vmem:[%s1524_s3 + $0x28] sm:$0xf] %vm768_vm3, %v882_v8  ;;  %780 = vst.msk [vmem:[%s1524_s3 + $0x2c] sm:$0xf] %vm768_vm3, %v883_v10 }
 0x188   :  { %781 = vst.msk [vmem:[%s1524_s3 + $0x30] sm:$0xf] %vm768_vm3, %v884_v34  ;;  %782 = vst.msk [vmem:[%s1524_s3 + $0x34] sm:$0xf] %vm768_vm3, %v885_v12 }
 0x189   :  { %783 = vst.msk [vmem:[%s1524_s3 + $0x38] sm:$0xf] %vm768_vm3, %v886_v16  ;;  %784 = vst.msk [vmem:[%s1524_s3 + $0x3c] sm:$0xf] %vm768_vm3, %v887_v48 }
 0x18a   :  { %785 = vst.msk [vmem:[%s1524_s3 + $0x40] sm:$0xf] %vm768_vm3, %v888_v18  ;;  %786 = vst.msk [vmem:[%s1524_s3 + $0x44] sm:$0xf] %vm768_vm3, %v889_v43 }
 0x18b   :  { %787 = vst.msk [vmem:[%s1524_s3 + $0x48] sm:$0xf] %vm768_vm3, %v890_v20  ;;  %788 = vst.msk [vmem:[%s1524_s3 + $0x4c] sm:$0xf] %vm768_vm3, %v891_v2 }
 0x18c   :  { %789 = vst.msk [vmem:[%s1524_s3 + $0x50] sm:$0xf] %vm768_vm3, %v892_v24  ;;  %790 = vst.msk [vmem:[%s1524_s3 + $0x54] sm:$0xf] %vm768_vm3, %v893_v25 }
 0x18d   :  { %791 = vst.msk [vmem:[%s1524_s3 + $0x58] sm:$0xf] %vm768_vm3, %v894_v26  ;;  %792 = vst.msk [vmem:[%s1524_s3 + $0x5c] sm:$0xf] %vm768_vm3, %v895_v27 }
 0x18e   :  { %793 = vst.msk [vmem:[%s1524_s3 + $0x60] sm:$0xf] %vm768_vm3, %v896_v28 }

// kernel: net_forward.5
= control target key start
LH: loop header
LB: loop body
LE: loop exit
PB: predicated region body
PF: predicated region fallthrough
CT: control target
= control target key end

     0   :  { %v837_v1 = vmov 0   ;;  %v80_v21 = vlaneseq  ;;  %v838_v27 = vmov 1966171168   ;;  %vm262_vm0 = vcmask 130048   ;;  %s1067_s0 = inlined_call_operand.vmem [shape: bf16[2,400], index: 0, kind: input, shape index: {}]   ;;  %s1068_s1 = inlined_call_operand.vmem [shape: bf16[400,120], index: 1, kind: input, shape index: {}]   ;;  %s1069_s2 = inlined_call_operand.vmem [shape: f32[3,120], index: 2, kind: input, shape index: {}]   ;;  %s1070_s3 = inlined_call_operand.vmem [shape: bf16[120,84], index: 3, kind: input, shape index: {}]   ;;  %s1071_s4 = inlined_call_operand.vmem [shape: f32[3,84], index: 4, kind: input, shape index: {}]   ;;  %s1072_s5 = inlined_call_operand.vmem [shape: bf16[84,10], index: 5, kind: input, shape index: {}]   ;;  %s1073_s6 = inlined_call_operand.vmem [shape: f32[1,10], index: 6, kind: input, shape index: {}]   ;;  %s1074_s7 = inlined_call_operand.hbm [shape: f32[2,10], index: 7, kind: output, shape index: {}]  }
   0x1   :  { %v770_v0 = vld [vmem:[%s1068_s1 + $0x40] sm:$0xff]   ;;  %306 = vmatprep.subr.bf16.mxu1 %v837_v1  ;;  %v773_v4 = vld [vmem:[%s1068_s1 + $0x48] sm:$0xff]   ;;  %v776_v7 = vld [vmem:[%s1068_s1 + $0x50] sm:$0xff]   ;;  %v94_v28 = vunpack.c.l.s4 %v838_v27 }
   0x2   :  { %v771_v2 = vld [vmem:[%s1068_s1 + $0x80] sm:$0xff]   ;;  %691 = vmatprep.subr.bf16.mxu0 %v770_v0  ;;  %v774_v5 = vld [vmem:[%s1068_s1 + $0x88] sm:$0xff]   ;;  %v777_v8 = vld [vmem:[%s1068_s1 + $0x90] sm:$0xff]   ;;  %v961_v26 = vshrl.u32 %v80_v21, 7 }
   0x3   :  { %v772_v3 = vld [vmem:[%s1068_s1] sm:$0xff]   ;;  %307 = vmatpush1.bf16.msra.mxu1 %v771_v2  ;;  %v775_v6 = vld [vmem:[%s1068_s1 + $0x8] sm:$0xff]   ;;  %v778_v9 = vld [vmem:[%s1068_s1 + $0x10] sm:$0xff]   ;;  %v95_v31 = vunpack.c.0.s8 %v94_v28 }
   0x4   :  { %692 = vmatpush3.bf16.msra.mxu0 %v772_v3  ;;  %308 = vmatprep.subr.bf16.mxu1 %v837_v1  ;;  %v779_v10 = vld [vmem:[%s1068_s1 + $0x58] sm:$0xff]   ;;  %v782_v13 = vld [vmem:[%s1068_s1 + $0x60] sm:$0xff]   ;;  %v785_v16 = vld [vmem:[%s1068_s1 + $0x68] sm:$0xff]  }
   0x5   :  { %693 = vmatprep.subr.bf16.mxu0 %v773_v4  ;;  %v780_v11 = vld [vmem:[%s1068_s1 + $0x98] sm:$0xff]   ;;  %v783_v14 = vld [vmem:[%s1068_s1 + $0xa0] sm:$0xff]   ;;  %v786_v17 = vld [vmem:[%s1068_s1 + $0xa8] sm:$0xff]   ;;  %v98_v32 = vsub.s32 %v95_v31, %v961_v26 }
   0x6   :  { %v781_v12 = vld [vmem:[%s1068_s1 + $0x18] sm:$0xff]   ;;  %v784_v15 = vld [vmem:[%s1068_s1 + $0x20] sm:$0xff]   ;;  %v787_v18 = vld [vmem:[%s1068_s1 + $0x28] sm:$0xff]  }
   0x7   :  { %309 = vmatpush1.bf16.msra.mxu1 %v774_v5  ;;  %v788_v19 = vld [vmem:[%s1068_s1 + $0x70] sm:$0xff]   ;;  %v791_v23 = vld [vmem:[%s1068_s1 + $0x78] sm:$0xff]   ;;  %v647_v24 = vld.sshfl [vmem:[%s1067_s0] sm:$0x33 pattern:$0x75316420] }
   0x8   :  { %694 = vmatpush3.bf16.msra.mxu0 %v775_v6  ;;  %310 = vmatprep.subr.bf16.mxu1 %v837_v1  ;;  %v789_v20 = vld [vmem:[%s1068_s1 + $0xb0] sm:$0xff]   ;;  %v792_v25 = vld [vmem:[%s1068_s1 + $0xb8] sm:$0xff]   ;;  %v92_v30 = vcombine.high %v647_v24, %v647_v24  ;;  %v794_v33 = vld [vmem:[%s1068_s1 + $0xc0] sm:$0xff]   ;;  %v99_v35 = vrot.slane %v647_v24, %v98_v32 }
   0x9   :  { %695 = vmatprep.subr.bf16.mxu0 %v776_v7  ;;  %v790_v22 = vld [vmem:[%s1068_s1 + $0x30] sm:$0xff]   ;;  %v793_v29 = vld [vmem:[%s1068_s1 + $0x38] sm:$0xff]  }
   0xa   :  { %v106_v34 = vrot.slane %v92_v30, %v98_v32  ;;  %v107_v37 = vcombine.high %v99_v35, %v99_v35 }
   0xb   :  { %311 = vmatpush1.bf16.msra.mxu1 %v777_v8 }
   0xc   :  { %696 = vmatpush3.bf16.msra.mxu0 %v778_v9  ;;  %312 = vmatprep.subr.bf16.mxu1 %v837_v1  ;;  %v108_v36 = vcombine.high %v106_v34, %v106_v34 }
   0xd   :  { %697 = vmatprep.subr.bf16.mxu0 %v779_v10  ;;  %298 = vmatprep.mubr.bf16.mxu0 %v106_v34 }
   0xf   :  { %313 = vmatpush1.bf16.msra.mxu1 %v780_v11 }
  0x10   :  { %698 = vmatpush3.bf16.msra.mxu0 %v781_v12  ;;  %314 = vmatprep.subr.bf16.mxu1 %v837_v1 }
  0x11   :  { %699 = vmatprep.subr.bf16.mxu0 %v782_v13 }
  0x13   :  { %315 = vmatpush1.bf16.msra.mxu1 %v783_v14 }
  0x14   :  { %700 = vmatpush3.bf16.msra.mxu0 %v784_v15  ;;  %316 = vmatprep.subr.bf16.mxu1 %v837_v1 }
  0x15   :  { %701 = vmatprep.subr.bf16.mxu0 %v785_v16 }
  0x17   :  { %317 = vmatpush1.bf16.msra.mxu1 %v786_v17 }
  0x18   :  { %702 = vmatpush3.bf16.msra.mxu0 %v787_v18  ;;  %318 = vmatprep.subr.bf16.mxu1 %v837_v1 }
  0x19   :  { %703 = vmatprep.subr.bf16.mxu0 %v788_v19 }
  0x1b   :  { %319 = vmatpush1.bf16.msra.mxu1 %v789_v20 }
  0x1c   :  { %704 = vmatpush3.bf16.msra.mxu0 %v790_v22  ;;  %320 = vmatprep.subr.bf16.mxu1 %v837_v1 }
  0x1d   :  { %705 = vmatprep.subr.bf16.mxu0 %v791_v23 }
  0x1f   :  { %321 = vmatpush1.bf16.msra.mxu1 %v792_v25 }
  0x20   :  { %706 = vmatpush3.bf16.msra.mxu0 %v793_v29  ;;  %322 = vmatprep.subr.bf16.mxu1 %v837_v1 }
  0x21   :  { %12 = vsyncpa [#allocation3], 0  ;;  %673 = vmatprep.mubr.msk.bf16.mxu1 %vm262_vm0, %v108_v36  ;;  %v795_v38 = vld [vmem:[%s1070_s3] sm:$0xff]   ;;  %v839_v39 = vmov 0.0   ;;  %v796_v40 = vld [vmem:[%s1070_s3 + $0x8] sm:$0xff]   ;;  %vm452_vm1 = vcmask 1043456  }
  0x22   :  { %729 = vmatprep.subr.bf16.mxu0 %v839_v39  ;;  %v797_v41 = vld [vmem:[%s1070_s3 + $0x10] sm:$0xff]   ;;  %v798_v42 = vld [vmem:[%s1070_s3 + $0x18] sm:$0xff]   ;;  %v799_v43 = vld [vmem:[%s1070_s3 + $0x20] sm:$0xff]   ;;  %vm840_vm2 = vmmov 0   ;;  %v82_v48 = vsub.s32 0, %v961_v26  ;;  %vm346_vm3 = vcmask 975872  }
  0x23   :  { %299 = vmatmul.mubr.bf16.vlgmr.msra.gmra.mrb[0].mxu0 %v99_v35  ;;  %323 = vmatpush1.bf16.msra.mxu1 %v794_v33  ;;  %v800_v44 = vld [vmem:[%s1070_s3 + $0x28] sm:$0xff]   ;;  %v801_v45 = vld [vmem:[%s1070_s3 + $0x30] sm:$0xff]   ;;  %v802_v46 = vld [vmem:[%s1070_s3 + $0x38] ss:$0 sps:$4 sm:$0xff]   ;;  %v373_v18 = vsub.s32 1, %v961_v26  ;;  %v378_v19 = vsub.s32 2, %v961_v26 }
  0x24   :  { %749 = vmatprep.subr.bf16.mxu1 %v839_v39  ;;  %730 = vmatpush3.bf16.msra.mxu0 %v795_v38  ;;  %v454_v47 = vsel %vm452_vm1, %v802_v46, 0  ;;  %v28_v49 = vld [vmem:[%s1069_s2] sm:$0x7]  ;;  %vm448_vm4 = vcmask 982016   ;;  %v804_v31 = vld [vmem:[%s1072_s5 + $0x8] sm:$0xff]   ;;  %v805_v32 = vld [vmem:[%s1072_s5 + $0x10] sm:$0xff]  }
  0x25   :  { %731 = vmatprep.subr.bf16.mxu0 %v839_v39  ;;  %745 = vmatprep.mubr.msk.bf16.mxu0 %vm840_vm2, %v839_v39  ;;  %v83_v51 = vrot.slane %v28_v49, %v82_v48  ;;  %v379_v24 = vrot.slane %v28_v49, %v378_v19  ;;  %v803_v30 = vld [vmem:[%s1072_s5] sm:$0xff]   ;;  %v806_v33 = vld [vmem:[%s1072_s5 + $0x18] sm:$0xff]   ;;  %v808_v35 = vld [vmem:[%s1072_s5 + $0x28] ss:$0 sps:$4 sm:$0x33]   ;;  %vm587_vm5 = vcmask 1041408  }
  0x26   :  { %339 = vmatmul.mubr.bf16.vlgmr.msra.gmra.mrb[0].mxu1 %v107_v37  ;;  %v807_v34 = vld [vmem:[%s1072_s5 + $0x20] sm:$0xff]   ;;  %v589_v36 = vsel %vm587_vm5, %v808_v35, 0  ;;  %vm496_vm6 = vcmask 680960   ;;  %vm583_vm7 = vcmask 687104   ;;  %s841_s10 = smov [#allocation2]   ;;  %vm631_vm8 = vcmask 74752  }
  0x27   :  { %761 = vmatprep.mubr.msk.bf16.mxu1 %vm840_vm2, %v839_v39  ;;  %750 = vmatpush3.bf16.msra.mxu1 %v803_v30  ;;  %v382_v37 = vld [vmem:[%s1071_s4] sm:$0x7]  ;;  %s639_s11 = sshll.u32 %s841_s10, 4  ;;  %s640_s11 = int_to_ptr.vmem [resolvable:$true] %s639_s11 }
  0x28   :  { %732 = vmatpush3.bf16.msra.mxu0 %v796_v40  ;;  %751 = vmatprep.subr.bf16.mxu1 %v839_v39  ;;  %v402_v38 = vrot.slane %v382_v37, %v82_v48  ;;  %s813_s12 = scalar_lea.vmem %s640_s11, 32  ;;  %p818_p1 = scmp.lt.s32.totalorder %s640_s11, %s640_s11 }
  0x29   :  { %733 = vmatprep.subr.bf16.mxu0 %v839_v39  ;;  %p814_p0 = scmp.ne.s32.totalorder %s640_s11, %s813_s12  ;;  %p819_p2 = scmp.lt.s32.totalorder %s813_s12, %s813_s12 }
  0x2b   :  { %752 = vmatpush3.bf16.msra.mxu1 %v804_v31  ;;  %p820_p3 = por %p819_p2, %p818_p1 }
  0x2c   :  { %734 = vmatpush3.bf16.msra.mxu0 %v797_v41  ;;  %753 = vmatprep.subr.bf16.mxu1 %v839_v39 }
  0x2d   :  { %735 = vmatprep.subr.bf16.mxu0 %v839_v39  ;;  %p821_p4 = pnand %p820_p3, %p814_p0 }
  0x2f   :  { %754 = vmatpush3.bf16.msra.mxu1 %v805_v32 }
  0x30   :  { %736 = vmatpush3.bf16.msra.mxu0 %v798_v42  ;;  %755 = vmatprep.subr.bf16.mxu1 %v839_v39 }
  0x31   :  { %737 = vmatprep.subr.bf16.mxu0 %v839_v39 }
  0x33   :  { %756 = vmatpush3.bf16.msra.mxu1 %v806_v33 }
  0x34   :  { %738 = vmatpush3.bf16.msra.mxu0 %v799_v43  ;;  %757 = vmatprep.subr.bf16.mxu1 %v839_v39 }
  0x35   :  { %739 = vmatprep.subr.bf16.mxu0 %v839_v39 }
  0x37   :  { %758 = vmatpush3.bf16.msra.mxu1 %v807_v34 }
  0x38   :  { %740 = vmatpush3.bf16.msra.mxu0 %v800_v44  ;;  %759 = vmatprep.subr.bf16.mxu1 %v839_v39 }
  0x39   :  { %741 = vmatprep.subr.bf16.mxu0 %v839_v39 }
  0x3b   :  { %760 = vmatpush3.bf16.msra.mxu1 %v589_v36 }
  0x3c   :  { %742 = vmatpush3.bf16.msra.mxu0 %v801_v45 }
  0x3d   :  { %743 = vmatprep.subr.bf16.mxu0 %v839_v39 }
  0x40   :  { %744 = vmatpush3.bf16.msra.mxu0 %v454_v47 }
  0xf6   :  { %v707_v50 = vpop.f32.mrb[0].mxu0 }
  0xf7   :  { %v708_v52 = vpop.f32.mrb[1].mxu0 }
  0xf8   :  { %v709_v53 = vadd.f32 %v708_v52, %v707_v50  ;;  %v710_v54 = vpop.f32.mrb[2].mxu0 }
  0xf9   :  { %v711_v55 = vpop.f32.mrb[3].mxu0  ;;  %v340_v56 = vpop.f32.mrb[0].mxu1 }
  0xfa   :  { %v301_v57 = vadd.f32 %v709_v53, %v83_v51  ;;  %v342_v58 = vpop.f32.mrb[1].mxu1 }
  0xfb   :  { %v343_v59 = vpop.f32.mrb[2].mxu1 }
  0xfc   :  { %v341_v60 = vadd.f32 %v340_v56, %v301_v57  ;;  %v344_v61 = vpop.f32.mrb[3].mxu1 }
  0xfe   :  { %v347_v62 = vsel %vm346_vm3, %v341_v60, 0.0  ;;  %v356_v63 = vmul.f32 %v341_v60, %v341_v60 }
  0xff   :  { %v348_v0 = vrot.slane %v347_v62, 4 }
 0x100   :  { %v357_v1 = vsel %vm346_vm3, %v356_v63, 0.0 }
 0x101   :  { %v349_v2 = vadd.f32 %v348_v0, %v347_v62  ;;  %v358_v3 = vrot.slane %v357_v1, 4 }
 0x103   :  { %v350_v4 = vrot.slane %v349_v2, 2  ;;  %v359_v5 = vadd.f32 %v358_v3, %v357_v1 }
 0x105   :  { %v351_v6 = vadd.f32 %v350_v4, %v349_v2  ;;  %v360_v7 = vrot.slane %v359_v5, 2  ;;  %v528_v4 = vrot.slane %v382_v37, %v378_v19 }
 0x107   :  { %v352_v8 = vrot.slane %v351_v6, 1  ;;  %v361_v9 = vadd.f32 %v360_v7, %v359_v5 }
 0x109   :  { %v353_v10 = vadd.f32 %v352_v8, %v351_v6  ;;  %v362_v11 = vrot.slane %v361_v9, 1 }
 0x10b   :  { %v355_v12 = vmul.f32 0.5, %v353_v10  ;;  %v363_v13 = vadd.f32 %v362_v11, %v361_v9  ;;  %v683_v9 = vld [vmem:[%s1073_s6] ss:$0 sm:$0xff] }
 0x10d   :  { %v364_v14 = vmul.f32 0.5, %v363_v13  ;;  %v365_v15 = vmul.f32 %v355_v12, %v355_v12  ;;  %v369_v22 = vsub.f32 %v341_v60, %v355_v12 }
 0x10f   :  { %v366_v16 = vsub.f32 %v364_v14, %v365_v15 }
 0x111   :  { %v367_v17 = vadd.f32 1e-05, %v366_v16 }
 0x113   :  { %809 = vrsqrt.f32 %v367_v17 }
 0x11d   :  { %v810_v20 = vpop.eup %809 }
 0x11e   :  { %v370_v21 = vmul.f32 %v810_v20, %v28_v49 }
 0x120   :  { %v374_v23 = vrot.slane %v370_v21, %v373_v18 }
 0x122   :  { %v375_v25 = vmul.f32 %v374_v23, %v369_v22 }
 0x124   :  { %v380_v27 = vadd.f32 %v379_v24, %v375_v25 }
 0x126   :  { %v381_v28 = vmax.f32 %v380_v27, 0.0 }
 0x128   :  { %v383_v29 = vpack.c.bf16 %v381_v28, %v381_v28 }
 0x12a   :  { %746 = vmatmul.mubr.msk.bf16.vlgmr.msra.gmra.mrb[4].mxu0 %vm448_vm4, %v383_v29 }
 0x1fd   :  { %v490_v40 = vpop.f32.mrb[4].mxu0 }
 0x1fe   :  { %v491_v41 = vadd.f32 %v490_v40, %v402_v38  ;;  %v747_v42 = vpop.f32.mrb[5].mxu0 }
 0x1ff   :  { %v493_v43 = vpop.f32.mrb[6].mxu0 }
 0x200   :  { %v497_v39 = vsel %vm496_vm6, %v491_v41, 0.0  ;;  %v505_v44 = vmul.f32 %v491_v41, %v491_v41  ;;  %v748_v45 = vpop.f32.mrb[7].mxu0 }
 0x201   :  { %v498_v46 = vrot.slane %v497_v39, 4 }
 0x202   :  { %v506_v47 = vsel %vm496_vm6, %v505_v44, 0.0 }
 0x203   :  { %v499_v49 = vadd.f32 %v498_v46, %v497_v39  ;;  %v507_v50 = vrot.slane %v506_v47, 4 }
 0x205   :  { %v500_v51 = vrot.slane %v499_v49, 2  ;;  %v508_v52 = vadd.f32 %v507_v50, %v506_v47 }
 0x207   :  { %v501_v53 = vadd.f32 %v500_v51, %v499_v49  ;;  %v509_v54 = vrot.slane %v508_v52, 2 }
 0x209   :  { %v502_v55 = vrot.slane %v501_v53, 1  ;;  %v510_v56 = vadd.f32 %v509_v54, %v508_v52 }
 0x20b   :  { %v503_v57 = vadd.f32 %v502_v55, %v501_v53  ;;  %v511_v48 = vrot.slane %v510_v56, 1 }
 0x20d   :  { %v504_v58 = vmul.f32 0.5, %v503_v57  ;;  %v512_v59 = vadd.f32 %v511_v48, %v510_v56 }
 0x20f   :  { %v513_v60 = vmul.f32 0.5, %v512_v59  ;;  %v514_v61 = vmul.f32 %v504_v58, %v504_v58  ;;  %v518_v2 = vsub.f32 %v491_v41, %v504_v58 }
 0x211   :  { %v515_v62 = vsub.f32 %v513_v60, %v514_v61 }
 0x213   :  { %v516_v63 = vadd.f32 1e-05, %v515_v62 }
 0x215   :  { %811 = vrsqrt.f32 %v516_v63 }
 0x21f   :  { %v812_v0 = vpop.eup %811 }
 0x220   :  { %v519_v1 = vmul.f32 %v812_v0, %v382_v37 }
 0x222   :  { %v523_v3 = vrot.slane %v519_v1, %v373_v18 }
 0x224   :  { %v524_v5 = vmul.f32 %v523_v3, %v518_v2 }
 0x226   :  { %v529_v6 = vadd.f32 %v528_v4, %v524_v5 }
 0x228   :  { %v530_v7 = vmax.f32 %v529_v6, 0.0 }
 0x22a   :  { %v531_v8 = vpack.c.bf16 %v530_v7, %v530_v7 }
 0x22c   :  { %762 = vmatmul.mubr.msk.bf16.vlgmr.msra.gmra.mrb[4].mxu1 %vm583_vm7, %v531_v8 }
 0x2ff   :  { %v625_v10 = vpop.f32.mrb[4].mxu1 }
 0x300   :  { %v626_v11 = vadd.f32 %v683_v9, %v625_v10  ;;  %v763_v12 = vpop.f32.mrb[5].mxu1 }
 0x301   :  { %v628_v13 = vpop.f32.mrb[6].mxu1 }
 0x302   :  { %v764_v26 = vpop.f32.mrb[7].mxu1  ;;  %632 = vst.msk [vmem:[#allocation2] sm:$0x3] %vm631_vm8, %v626_v11 }
 0x303   :  { %824 = shalt.err (!%p821_p4)
}
 0x304   :  { %s825_s6 = scalar_lea.hbm %s1074_s7, 32 }
 0x305   :  { %p826_p5 = scmp.ne.s32.totalorder %s1074_s7, %s825_s6  ;;  %p829_p6 = scmp.lt.u32.totalorder %s825_s6, %s1074_s7 }
 0x307   :  { %p831_p7 = pnand %p829_p6, %p826_p5 }
 0x309   :  { %834 = shalt.err (!%p831_p7)
}
 0x30a   :  { %642 = dma.vmem_to_hbm [thread:$0]  %s640_s11, 32, %s1074_s7, [#allocation3]  }
 0x30b   :  { %835 = dma.done.wait [#allocation3], 32  }
 0x30c   :  { %836 = vsyncadd [#allocation3], 4294967264 }
 0x30d   :  { %646 = vsyncpa [#allocation3], 1 }

</bundles_post_ra>
